<compile_context>
chip_gen: v6e
topology: v6e:2x2x1
jax: 0.10.0
libtpu: 0.0.40
codegen_flags: <defaults>
</compile_context>

<pallas_src>
import functools
from math import pi, sqrt

import jax
import jax.numpy as jnp
from jax.experimental import pallas as pl
from jax.experimental.pallas import tpu as pltpu

LANE = 128


def _round_up(x, m):
    return (x + m - 1) // m * m


def _pad_axis(x, target, axis):
    pad = target - x.shape[axis]
    if pad == 0:
        return x
    cfg = [(0, 0)] * x.ndim
    cfg[axis] = (0, pad)
    return jnp.pad(x, cfg)


# ----------------------------------------------------------------------------
# Pallas kernel 1: tiled bf16 matmul (+ optional bias) with fp32 accumulation
# ----------------------------------------------------------------------------
def _matmul_kernel(a_ref, b_ref, o_ref, acc_ref):
    k = pl.program_id(2)

    @pl.when(k == 0)
    def _():
        acc_ref[...] = jnp.zeros_like(acc_ref)

    acc_ref[...] += jnp.dot(a_ref[...], b_ref[...],
                            preferred_element_type=jnp.float32)

    @pl.when(k == pl.num_programs(2) - 1)
    def _():
        o_ref[...] = acc_ref[...].astype(o_ref.dtype)


def _matmul_bias_kernel(a_ref, b_ref, bias_ref, o_ref, acc_ref):
    k = pl.program_id(2)

    @pl.when(k == 0)
    def _():
        acc_ref[...] = jnp.zeros_like(acc_ref)

    acc_ref[...] += jnp.dot(a_ref[...], b_ref[...],
                            preferred_element_type=jnp.float32)

    @pl.when(k == pl.num_programs(2) - 1)
    def _():
        o_ref[...] = (acc_ref[...] + bias_ref[...]).astype(o_ref.dtype)


def matmul(a, b, bias=None, out_dtype=jnp.bfloat16):
    """a: (M, K) float; b: (Kp, Np) bf16, pre-padded to 128 multiples (Kp >= K);
    bias: None or (1, Np) fp32.  Returns (M, Np) in out_dtype."""
    M, K = a.shape
    Kp, Np = b.shape
    assert K <= Kp and Kp % LANE == 0 and Np % LANE == 0

    # Static tile selection: big M tiles for the large-M layers, lane-multiple N/K.
    tm = 512 if M >= 1024 else min(256, _round_up(M, 8))
    tk = 256 if Kp % 256 == 0 else LANE
    m_tiles = _round_up(M, tm) // tm
    tn = 256 if (Np % 256 == 0 and m_tiles > 1) else LANE

    a_p = _pad_axis(_pad_axis(a.astype(jnp.bfloat16), Kp, 1), _round_up(M, tm), 0)
    Mp = a_p.shape[0]

    in_specs = [
        pl.BlockSpec((tm, tk), lambda i, j, k: (i, k)),
        pl.BlockSpec((tk, tn), lambda i, j, k: (k, j)),
    ]
    operands = [a_p, b]
    kernel = _matmul_kernel
    if bias is not None:
        in_specs.append(pl.BlockSpec((1, tn), lambda i, j, k: (0, j)))
        operands.append(bias)
        kernel = _matmul_bias_kernel

    out = pl.pallas_call(
        kernel,
        out_shape=jax.ShapeDtypeStruct((Mp, Np), out_dtype),
        grid_spec=pltpu.PrefetchScalarGridSpec(
            num_scalar_prefetch=0,
            grid=(Mp // tm, Np // tn, Kp // tk),
            in_specs=in_specs,
            out_specs=pl.BlockSpec((tm, tn), lambda i, j, k: (i, j)),
            scratch_shapes=[pltpu.VMEM((tm, tn), jnp.float32)],
        ),
        compiler_params=pltpu.CompilerParams(
            dimension_semantics=("parallel", "parallel", "arbitrary")),
    )(*operands)
    if Mp != M:
        out = out[:M]
    return out


# ----------------------------------------------------------------------------
# Pallas kernel 2: BatchNorm (batch stats, single pass) + optional ReLU
# ----------------------------------------------------------------------------
def _bn_relu_kernel(x_ref, gamma_ref, o_ref, *, eps, relu, inv_m):
    # bf16 storage, fp32 internal math (v5e VPU has no bf16 ALU).
    x = x_ref[...].astype(jnp.float32)
    mean = jnp.sum(x, axis=0, keepdims=True) * inv_m
    ex2 = jnp.sum(x * x, axis=0, keepdims=True) * inv_m
    var = ex2 - mean * mean                       # biased var (PyTorch BN, train mode)
    y = (x - mean) * jax.lax.rsqrt(var + eps) * gamma_ref[...]   # beta == 0
    if relu:
        y = jnp.maximum(y, 0.0)
    o_ref[...] = y.astype(o_ref.dtype)


def batchnorm_relu(x2d, gamma, relu, eps=1e-5):
    """x2d: (M, Cp) bf16 slab over (N*H*W, C_padded); gamma: (1, Cp) fp32."""
    M, Cp = x2d.shape
    assert Cp % LANE == 0
    kernel = functools.partial(_bn_relu_kernel, eps=eps, relu=relu,
                               inv_m=1.0 / float(M))
    return pl.pallas_call(
        kernel,
        out_shape=jax.ShapeDtypeStruct((M, Cp), jnp.bfloat16),
        grid_spec=pltpu.PrefetchScalarGridSpec(
            num_scalar_prefetch=0,
            grid=(Cp // LANE,),
            in_specs=[pl.BlockSpec((M, LANE), lambda j: (0, j)),
                      pl.BlockSpec((1, LANE), lambda j: (0, j))],
            out_specs=pl.BlockSpec((M, LANE), lambda j: (0, j)),
        ),
        compiler_params=pltpu.CompilerParams(dimension_semantics=("parallel",)),
    )(x2d, gamma)


# ----------------------------------------------------------------------------
# Glue: im2col patch extraction (NHWC), static config, parameter prep, forward
# ----------------------------------------------------------------------------
def im2col(x, k, stride, padding):
    """x: (N, H, W, C) -> (N*Ho*Wo, k*k*C) bf16 patches, element order (kh, kw, c)."""
    N, H, W, C = x.shape
    if padding:
        x = jnp.pad(x, ((0, 0), (padding, padding), (padding, padding), (0, 0)))
    Ho = (H + 2 * padding - k) // stride + 1
    Wo = (W + 2 * padding - k) // stride + 1
    pieces = []
    for di in range(k):
        for dj in range(k):
            pieces.append(x[:, di:di + stride * Ho:stride,
                            dj:dj + stride * Wo:stride, :])
    p = jnp.stack(pieces, axis=3)                  # (N, Ho, Wo, k*k, C)
    return p.reshape(N * Ho * Wo, k * k * C), Ho, Wo


# (cin, cout, kernel, stride, padding, bn_sign(True->gamma=1), relu_after) — STATIC.
_CONV_CFG = (
    (3,   32, 3, 1, 1, True,  True),
    (32,  64, 3, 1, 1, True,  True),
    (64,  64, 3, 2, 1, True,  True),
    (64, 128, 3, 1, 1, True,  True),
    (128, 128, 3, 2, 1, True,  True),
    (128, 128, 3, 1, 1, True,  True),
    (128, 256, 8, 1, 0, False, False),
)
_B_OUT = 10  # `b` from the (unspecified) argparse arg; CIFAR-10 classes


def init_params(key):
    """Weights are stored pre-transposed to (k*k*cin_padded, cout_padded), pre-padded
    to 128-lane multiples and pre-cast to bf16, so no per-forward prep ops remain."""
    params = {"conv_w": [], "bn_gamma": []}
    cin_act = 3  # channel count of the activation entering this layer (padded from L2 on)
    for (cin, cout, k, stride, padding, sign, relu) in _CONV_CFG:
        key, kw = jax.random.split(key)
        w = jax.random.normal(kw, (cout, cin, k, k), jnp.float32) * 0.05  # torch layout
        cout_p = _round_up(cout, LANE)
        w_t = jnp.transpose(w, (2, 3, 1, 0))                      # (kh, kw, cin, cout)
        w_full = jnp.zeros((k, k, cin_act, cout_p), jnp.float32)
        w_full = w_full.at[:, :, :cin, :cout].set(w_t)            # zero rows/cols = padding
        w2 = w_full.reshape(k * k * cin_act, cout_p)
        w2 = _pad_axis(w2, _round_up(k * k * cin_act, LANE), 0).astype(jnp.bfloat16)
        params["conv_w"].append(w2)
        gamma_val = 1.0 if sign else sqrt(2.0 / pi)
        params["bn_gamma"].append(jnp.full((1, cout_p), gamma_val, jnp.float32))
        cin_act = cout_p
    # NOTE: conv biases are omitted on purpose — each conv is followed by BatchNorm
    # with batch statistics, whose mean subtraction cancels a per-channel bias exactly.
    key, kw, kb = jax.random.split(key, 3)
    fc_w = jax.random.normal(kw, (_B_OUT, 256), jnp.float32) * 0.05
    fc_b = jax.random.normal(kb, (_B_OUT,), jnp.float32) * 0.01
    nb_p = _round_up(_B_OUT, LANE)
    params["fc_w"] = _pad_axis(fc_w.T, nb_p, 1).astype(jnp.bfloat16)   # (256, 128) bf16
    params["fc_b"] = _pad_axis(fc_b.reshape(1, _B_OUT), nb_p, 1)       # (1, 128) fp32
    return params


def blcd_forward(x_nchw, params):
    x = jnp.transpose(x_nchw, (0, 2, 3, 1)).astype(jnp.bfloat16)   # NCHW -> NHWC
    N = x.shape[0]
    for cfg, w2, gamma in zip(_CONV_CFG, params["conv_w"], params["bn_gamma"]):
        _, _, k, stride, padding, _, relu = cfg
        patches, Ho, Wo = im2col(x, k, stride, padding)
        y = matmul(patches, w2, bias=None, out_dtype=jnp.bfloat16)  # conv GEMM (Pallas)
        y = batchnorm_relu(y, gamma, relu)                          # BN(+ReLU) (Pallas)
        x = y.reshape(N, Ho, Wo, w2.shape[1])                       # channels kept padded
    # x is (N, 1, 1, 256); torch.squeeze -> (N, 256)
    # TODO(synk): torch.squeeze would also drop the batch dim if N == 1; assume N > 1.
    feat = x.reshape(N, 256)
    out = matmul(feat, params["fc_w"], bias=params["fc_b"], out_dtype=jnp.float32)
    return out[:, :_B_OUT]


if __name__ == "__main__":
    key = jax.random.PRNGKey(0)
    key, kx = jax.random.split(key)
    # CIFAR-10 sized input (the trailing 8x8 conv requires 32x32 spatial input).
    x = jax.random.normal(kx, (2, 3, 32, 32), jnp.float32)   # NCHW like PyTorch
    params = init_params(key)

    fwd = jax.jit(blcd_forward)
    out = fwd(x, params)
    jax.block_until_ready(out)
    assert out.shape == (2, _B_OUT), out.shape
    print("KERNEL_OK")
</pallas_src>

<mosaic_0001>
module attributes {stable_mosaic.version = 11 : i64} {
  func.func @_matmul_kernel(%arg0: i32, %arg1: i32, %arg2: i32, %arg3: memref<512x128xbf16, #tpu.memory_space<vmem>>, %arg4: memref<128x128xbf16, #tpu.memory_space<vmem>>, %arg5: memref<512x128xbf16, #tpu.memory_space<vmem>>, %arg6: memref<512x128xf32, #tpu.memory_space<vmem>>) attributes {dimension_semantics = [#tpu.dimension_semantics<parallel>, #tpu.dimension_semantics<parallel>, #tpu.dimension_semantics<arbitrary>], iteration_bounds = array<i64: 4, 1, 1>, scalar_prefetch = 0 : i64, scratch_operands = 1 : i64, tpu.core_type = #tpu.core_type<tc>, window_params = [{transform_indices = @transform_0, window_bounds = array<i64: 512, 128>}, {transform_indices = @transform_1, window_bounds = array<i64: 128, 128>}, {transform_indices = @transform_2, window_bounds = array<i64: 512, 128>}]} {
    %c0_i32 = arith.constant 0 : i32
    %0 = arith.cmpi eq, %arg2, %c0_i32 : i32
    %1 = arith.extui %0 : i1 to i32
    %c0_i32_0 = arith.constant 0 : i32
    %2 = arith.cmpi ne, %1, %c0_i32_0 : i32
    scf.if %2 {
      %cst_10 = arith.constant 0.000000e+00 : f32
      %12 = vector.broadcast %cst_10 : f32 to vector<512x128xf32>
      %c0_11 = arith.constant 0 : index
      %c0_12 = arith.constant 0 : index
      %13 = vector.load %arg6[%c0_11, %c0_12] : memref<512x128xf32, #tpu.memory_space<vmem>>, vector<512x128xf32>
      tpu.vector_store %arg6[%c0_11, %c0_12], %12 {strides = array<i32>} : memref<512x128xf32, #tpu.memory_space<vmem>>, vector<512x128xf32>,
    } else {
    }
    %c0 = arith.constant 0 : index
    %c0_1 = arith.constant 0 : index
    %3 = vector.load %arg6[%c0, %c0_1] : memref<512x128xf32, #tpu.memory_space<vmem>>, vector<512x128xf32>
    %c0_2 = arith.constant 0 : index
    %c0_3 = arith.constant 0 : index
    %4 = vector.load %arg3[%c0_2, %c0_3] : memref<512x128xbf16, #tpu.memory_space<vmem>>, vector<512x128xbf16>
    %c0_4 = arith.constant 0 : index
    %c0_5 = arith.constant 0 : index
    %5 = vector.load %arg4[%c0_4, %c0_5] : memref<128x128xbf16, #tpu.memory_space<vmem>>, vector<128x128xbf16>
    %cst = arith.constant dense<0.000000e+00> : vector<512x128xf32>
    %6 = tpu.matmul %4, %5, %cst {dimension_numbers = #tpu.dot_dimension_numbers<[1], [0], [0], [1], [0, 0, 1, 1], [], []>} : vector<512x128xbf16>, vector<128x128xbf16>, vector<512x128xf32> -> vector<512x128xf32>
    %7 = arith.addf %3, %6 : vector<512x128xf32>
    %c0_6 = arith.constant 0 : index
    %c0_7 = arith.constant 0 : index
    %8 = vector.load %arg6[%c0_6, %c0_7] : memref<512x128xf32, #tpu.memory_space<vmem>>, vector<512x128xf32>
    tpu.vector_store %arg6[%c0_6, %c0_7], %7 {strides = array<i32>} : memref<512x128xf32, #tpu.memory_space<vmem>>, vector<512x128xf32>,
    %c0_i32_8 = arith.constant 0 : i32
    %9 = arith.cmpi eq, %arg2, %c0_i32_8 : i32
    %10 = arith.extui %9 : i1 to i32
    %c0_i32_9 = arith.constant 0 : i32
    %11 = arith.cmpi ne, %10, %c0_i32_9 : i32
    scf.if %11 {
      %c0_10 = arith.constant 0 : index
      %c0_11 = arith.constant 0 : index
      %12 = vector.load %arg6[%c0_10, %c0_11] : memref<512x128xf32, #tpu.memory_space<vmem>>, vector<512x128xf32>
      %13 = arith.truncf %12 : vector<512x128xf32> to vector<512x128xbf16>
      %c0_12 = arith.constant 0 : index
      %c0_13 = arith.constant 0 : index
      %14 = vector.load %arg5[%c0_12, %c0_13] : memref<512x128xbf16, #tpu.memory_space<vmem>>, vector<512x128xbf16>
      tpu.vector_store %arg5[%c0_12, %c0_13], %13 {strides = array<i32>} : memref<512x128xbf16, #tpu.memory_space<vmem>>, vector<512x128xbf16>,
    } else {
    }
    return
  }
  func.func @transform_0(%arg0: i32, %arg1: i32, %arg2: i32) -> (i32, i32) {
    %c0_i32 = arith.constant 0 : i32
    return %arg0, %arg2 : i32, i32
  }
  func.func @transform_1(%arg0: i32, %arg1: i32, %arg2: i32) -> (i32, i32) {
    %c0_i32 = arith.constant 0 : i32
    return %arg2, %arg1 : i32, i32
  }
  func.func @transform_2(%arg0: i32, %arg1: i32, %arg2: i32) -> (i32, i32) {
    %c0_i32 = arith.constant 0 : i32
    return %arg0, %arg1 : i32, i32
  }
}

module attributes {stable_mosaic.version = 11 : i64} {
  func.func @_bn_relu_kernel(%arg0: i32, %arg1: memref<2048x128xbf16, #tpu.memory_space<vmem>>, %arg2: memref<1x128xf32, #tpu.memory_space<vmem>>, %arg3: memref<2048x128xbf16, #tpu.memory_space<vmem>>) attributes {dimension_semantics = [#tpu.dimension_semantics<parallel>], iteration_bounds = array<i64: 1>, scalar_prefetch = 0 : i64, scratch_operands = 0 : i64, tpu.core_type = #tpu.core_type<tc>, window_params = [{transform_indices = @transform_0, window_bounds = array<i64: 2048, 128>}, {transform_indices = @transform_1, window_bounds = array<i64: 1, 128>}, {transform_indices = @transform_2, window_bounds = array<i64: 2048, 128>}]} {
    %c0 = arith.constant 0 : index
    %c0_0 = arith.constant 0 : index
    %0 = vector.load %arg1[%c0, %c0_0] : memref<2048x128xbf16, #tpu.memory_space<vmem>>, vector<2048x128xbf16>
    %1 = arith.extf %0 : vector<2048x128xbf16> to vector<2048x128xf32>
    %cst = arith.constant dense<0.000000e+00> : vector<128xf32>
    %2 = vector.multi_reduction <add>, %1, %cst [0] : vector<2048x128xf32> to vector<128xf32>
    %3 = vector.shape_cast %2 : vector<128xf32> to vector<1x128xf32>
    %cst_1 = arith.constant 4.8828125E-4 : f32
    %4 = vector.broadcast %cst_1 : f32 to vector<1x128xf32>
    %5 = arith.mulf %3, %4 : vector<1x128xf32>
    %6 = arith.mulf %1, %1 : vector<2048x128xf32>
    %cst_2 = arith.constant dense<0.000000e+00> : vector<128xf32>
    %7 = vector.multi_reduction <add>, %6, %cst_2 [0] : vector<2048x128xf32> to vector<128xf32>
    %8 = vector.shape_cast %7 : vector<128xf32> to vector<1x128xf32>
    %cst_3 = arith.constant 4.8828125E-4 : f32
    %9 = vector.broadcast %cst_3 : f32 to vector<1x128xf32>
    %10 = arith.mulf %8, %9 : vector<1x128xf32>
    %11 = arith.mulf %5, %5 : vector<1x128xf32>
    %12 = arith.subf %10, %11 : vector<1x128xf32>
    %13 = vector.broadcast %5 : vector<1x128xf32> to vector<2048x128xf32>
    %14 = arith.subf %1, %13 : vector<2048x128xf32>
    %cst_4 = arith.constant 9.99999974E-6 : f32
    %15 = vector.broadcast %cst_4 : f32 to vector<1x128xf32>
    %16 = arith.addf %12, %15 : vector<1x128xf32>
    %17 = math.rsqrt %16 : vector<1x128xf32>
    %18 = vector.broadcast %17 : vector<1x128xf32> to vector<2048x128xf32>
    %19 = arith.mulf %14, %18 : vector<2048x128xf32>
    %c0_5 = arith.constant 0 : index
    %c0_6 = arith.constant 0 : index
    %20 = vector.load %arg2[%c0_5, %c0_6] : memref<1x128xf32, #tpu.memory_space<vmem>>, vector<1x128xf32>
    %21 = vector.broadcast %20 : vector<1x128xf32> to vector<2048x128xf32>
    %22 = arith.mulf %19, %21 : vector<2048x128xf32>
    %cst_7 = arith.constant 0.000000e+00 : f32
    %23 = vector.broadcast %cst_7 : f32 to vector<2048x128xf32>
    %24 = arith.maximumf %22, %23 : vector<2048x128xf32>
    %25 = arith.truncf %24 : vector<2048x128xf32> to vector<2048x128xbf16>
    %c0_8 = arith.constant 0 : index
    %c0_9 = arith.constant 0 : index
    %26 = vector.load %arg3[%c0_8, %c0_9] : memref<2048x128xbf16, #tpu.memory_space<vmem>>, vector<2048x128xbf16>
    tpu.vector_store %arg3[%c0_8, %c0_9], %25 {strides = array<i32>} : memref<2048x128xbf16, #tpu.memory_space<vmem>>, vector<2048x128xbf16>,
    return
  }
  func.func @transform_0(%arg0: i32) -> (i32, i32) {
    %c0_i32 = arith.constant 0 : i32
    %c0_i32_0 = arith.constant 0 : i32
    return %c0_i32, %arg0 : i32, i32
  }
  func.func @transform_1(%arg0: i32) -> (i32, i32) {
    %c0_i32 = arith.constant 0 : i32
    %c0_i32_0 = arith.constant 0 : i32
    return %c0_i32, %arg0 : i32, i32
  }
  func.func @transform_2(%arg0: i32) -> (i32, i32) {
    %c0_i32 = arith.constant 0 : i32
    %c0_i32_0 = arith.constant 0 : i32
    return %c0_i32, %arg0 : i32, i32
  }
}

module attributes {stable_mosaic.version = 11 : i64} {
  func.func @_matmul_kernel(%arg0: i32, %arg1: i32, %arg2: i32, %arg3: memref<512x128xbf16, #tpu.memory_space<vmem>>, %arg4: memref<128x128xbf16, #tpu.memory_space<vmem>>, %arg5: memref<512x128xbf16, #tpu.memory_space<vmem>>, %arg6: memref<512x128xf32, #tpu.memory_space<vmem>>) attributes {dimension_semantics = [#tpu.dimension_semantics<parallel>, #tpu.dimension_semantics<parallel>, #tpu.dimension_semantics<arbitrary>], iteration_bounds = array<i64: 4, 1, 9>, scalar_prefetch = 0 : i64, scratch_operands = 1 : i64, tpu.core_type = #tpu.core_type<tc>, window_params = [{transform_indices = @transform_0, window_bounds = array<i64: 512, 128>}, {transform_indices = @transform_1, window_bounds = array<i64: 128, 128>}, {transform_indices = @transform_2, window_bounds = array<i64: 512, 128>}]} {
    %c0_i32 = arith.constant 0 : i32
    %0 = arith.cmpi eq, %arg2, %c0_i32 : i32
    %1 = arith.extui %0 : i1 to i32
    %c0_i32_0 = arith.constant 0 : i32
    %2 = arith.cmpi ne, %1, %c0_i32_0 : i32
    scf.if %2 {
      %cst_9 = arith.constant 0.000000e+00 : f32
      %12 = vector.broadcast %cst_9 : f32 to vector<512x128xf32>
      %c0_10 = arith.constant 0 : index
      %c0_11 = arith.constant 0 : index
      %13 = vector.load %arg6[%c0_10, %c0_11] : memref<512x128xf32, #tpu.memory_space<vmem>>, vector<512x128xf32>
      tpu.vector_store %arg6[%c0_10, %c0_11], %12 {strides = array<i32>} : memref<512x128xf32, #tpu.memory_space<vmem>>, vector<512x128xf32>,
    } else {
    }
    %c0 = arith.constant 0 : index
    %c0_1 = arith.constant 0 : index
    %3 = vector.load %arg6[%c0, %c0_1] : memref<512x128xf32, #tpu.memory_space<vmem>>, vector<512x128xf32>
    %c0_2 = arith.constant 0 : index
    %c0_3 = arith.constant 0 : index
    %4 = vector.load %arg3[%c0_2, %c0_3] : memref<512x128xbf16, #tpu.memory_space<vmem>>, vector<512x128xbf16>
    %c0_4 = arith.constant 0 : index
    %c0_5 = arith.constant 0 : index
    %5 = vector.load %arg4[%c0_4, %c0_5] : memref<128x128xbf16, #tpu.memory_space<vmem>>, vector<128x128xbf16>
    %cst = arith.constant dense<0.000000e+00> : vector<512x128xf32>
    %6 = tpu.matmul %4, %5, %cst {dimension_numbers = #tpu.dot_dimension_numbers<[1], [0], [0], [1], [0, 0, 1, 1], [], []>} : vector<512x128xbf16>, vector<128x128xbf16>, vector<512x128xf32> -> vector<512x128xf32>
    %7 = arith.addf %3, %6 : vector<512x128xf32>
    %c0_6 = arith.constant 0 : index
    %c0_7 = arith.constant 0 : index
    %8 = vector.load %arg6[%c0_6, %c0_7] : memref<512x128xf32, #tpu.memory_space<vmem>>, vector<512x128xf32>
    tpu.vector_store %arg6[%c0_6, %c0_7], %7 {strides = array<i32>} : memref<512x128xf32, #tpu.memory_space<vmem>>, vector<512x128xf32>,
    %c8_i32 = arith.constant 8 : i32
    %9 = arith.cmpi eq, %arg2, %c8_i32 : i32
    %10 = arith.extui %9 : i1 to i32
    %c0_i32_8 = arith.constant 0 : i32
    %11 = arith.cmpi ne, %10, %c0_i32_8 : i32
    scf.if %11 {
      %c0_9 = arith.constant 0 : index
      %c0_10 = arith.constant 0 : index
      %12 = vector.load %arg6[%c0_9, %c0_10] : memref<512x128xf32, #tpu.memory_space<vmem>>, vector<512x128xf32>
      %13 = arith.truncf %12 : vector<512x128xf32> to vector<512x128xbf16>
      %c0_11 = arith.constant 0 : index
      %c0_12 = arith.constant 0 : index
      %14 = vector.load %arg5[%c0_11, %c0_12] : memref<512x128xbf16, #tpu.memory_space<vmem>>, vector<512x128xbf16>
      tpu.vector_store %arg5[%c0_11, %c0_12], %13 {strides = array<i32>} : memref<512x128xbf16, #tpu.memory_space<vmem>>, vector<512x128xbf16>,
    } else {
    }
    return
  }
  func.func @transform_0(%arg0: i32, %arg1: i32, %arg2: i32) -> (i32, i32) {
    %c0_i32 = arith.constant 0 : i32
    return %arg0, %arg2 : i32, i32
  }
  func.func @transform_1(%arg0: i32, %arg1: i32, %arg2: i32) -> (i32, i32) {
    %c0_i32 = arith.constant 0 : i32
    return %arg2, %arg1 : i32, i32
  }
  func.func @transform_2(%arg0: i32, %arg1: i32, %arg2: i32) -> (i32, i32) {
    %c0_i32 = arith.constant 0 : i32
    return %arg0, %arg1 : i32, i32
  }
}

module attributes {stable_mosaic.version = 11 : i64} {
  func.func @_matmul_kernel(%arg0: i32, %arg1: i32, %arg2: i32, %arg3: memref<256x128xbf16, #tpu.memory_space<vmem>>, %arg4: memref<128x128xbf16, #tpu.memory_space<vmem>>, %arg5: memref<256x128xbf16, #tpu.memory_space<vmem>>, %arg6: memref<256x128xf32, #tpu.memory_space<vmem>>) attributes {dimension_semantics = [#tpu.dimension_semantics<parallel>, #tpu.dimension_semantics<parallel>, #tpu.dimension_semantics<arbitrary>], iteration_bounds = array<i64: 2, 1, 9>, scalar_prefetch = 0 : i64, scratch_operands = 1 : i64, tpu.core_type = #tpu.core_type<tc>, window_params = [{transform_indices = @transform_0, window_bounds = array<i64: 256, 128>}, {transform_indices = @transform_1, window_bounds = array<i64: 128, 128>}, {transform_indices = @transform_2, window_bounds = array<i64: 256, 128>}]} {
    %c0_i32 = arith.constant 0 : i32
    %0 = arith.cmpi eq, %arg2, %c0_i32 : i32
    %1 = arith.extui %0 : i1 to i32
    %c0_i32_0 = arith.constant 0 : i32
    %2 = arith.cmpi ne, %1, %c0_i32_0 : i32
    scf.if %2 {
      %cst_9 = arith.constant 0.000000e+00 : f32
      %12 = vector.broadcast %cst_9 : f32 to vector<256x128xf32>
      %c0_10 = arith.constant 0 : index
      %c0_11 = arith.constant 0 : index
      %13 = vector.load %arg6[%c0_10, %c0_11] : memref<256x128xf32, #tpu.memory_space<vmem>>, vector<256x128xf32>
      tpu.vector_store %arg6[%c0_10, %c0_11], %12 {strides = array<i32>} : memref<256x128xf32, #tpu.memory_space<vmem>>, vector<256x128xf32>,
    } else {
    }
    %c0 = arith.constant 0 : index
    %c0_1 = arith.constant 0 : index
    %3 = vector.load %arg6[%c0, %c0_1] : memref<256x128xf32, #tpu.memory_space<vmem>>, vector<256x128xf32>
    %c0_2 = arith.constant 0 : index
    %c0_3 = arith.constant 0 : index
    %4 = vector.load %arg3[%c0_2, %c0_3] : memref<256x128xbf16, #tpu.memory_space<vmem>>, vector<256x128xbf16>
    %c0_4 = arith.constant 0 : index
    %c0_5 = arith.constant 0 : index
    %5 = vector.load %arg4[%c0_4, %c0_5] : memref<128x128xbf16, #tpu.memory_space<vmem>>, vector<128x128xbf16>
    %cst = arith.constant dense<0.000000e+00> : vector<256x128xf32>
    %6 = tpu.matmul %4, %5, %cst {dimension_numbers = #tpu.dot_dimension_numbers<[1], [0], [0], [1], [0, 0, 1, 1], [], []>} : vector<256x128xbf16>, vector<128x128xbf16>, vector<256x128xf32> -> vector<256x128xf32>
    %7 = arith.addf %3, %6 : vector<256x128xf32>
    %c0_6 = arith.constant 0 : index
    %c0_7 = arith.constant 0 : index
    %8 = vector.load %arg6[%c0_6, %c0_7] : memref<256x128xf32, #tpu.memory_space<vmem>>, vector<256x128xf32>
    tpu.vector_store %arg6[%c0_6, %c0_7], %7 {strides = array<i32>} : memref<256x128xf32, #tpu.memory_space<vmem>>, vector<256x128xf32>,
    %c8_i32 = arith.constant 8 : i32
    %9 = arith.cmpi eq, %arg2, %c8_i32 : i32
    %10 = arith.extui %9 : i1 to i32
    %c0_i32_8 = arith.constant 0 : i32
    %11 = arith.cmpi ne, %10, %c0_i32_8 : i32
    scf.if %11 {
      %c0_9 = arith.constant 0 : index
      %c0_10 = arith.constant 0 : index
      %12 = vector.load %arg6[%c0_9, %c0_10] : memref<256x128xf32, #tpu.memory_space<vmem>>, vector<256x128xf32>
      %13 = arith.truncf %12 : vector<256x128xf32> to vector<256x128xbf16>
      %c0_11 = arith.constant 0 : index
      %c0_12 = arith.constant 0 : index
      %14 = vector.load %arg5[%c0_11, %c0_12] : memref<256x128xbf16, #tpu.memory_space<vmem>>, vector<256x128xbf16>
      tpu.vector_store %arg5[%c0_11, %c0_12], %13 {strides = array<i32>} : memref<256x128xbf16, #tpu.memory_space<vmem>>, vector<256x128xbf16>,
    } else {
    }
    return
  }
  func.func @transform_0(%arg0: i32, %arg1: i32, %arg2: i32) -> (i32, i32) {
    %c0_i32 = arith.constant 0 : i32
    return %arg0, %arg2 : i32, i32
  }
  func.func @transform_1(%arg0: i32, %arg1: i32, %arg2: i32) -> (i32, i32) {
    %c0_i32 = arith.constant 0 : i32
    return %arg2, %arg1 : i32, i32
  }
  func.func @transform_2(%arg0: i32, %arg1: i32, %arg2: i32) -> (i32, i32) {
    %c0_i32 = arith.constant 0 : i32
    return %arg0, %arg1 : i32, i32
  }
}

module attributes {stable_mosaic.version = 11 : i64} {
  func.func @_bn_relu_kernel(%arg0: i32, %arg1: memref<512x128xbf16, #tpu.memory_space<vmem>>, %arg2: memref<1x128xf32, #tpu.memory_space<vmem>>, %arg3: memref<512x128xbf16, #tpu.memory_space<vmem>>) attributes {dimension_semantics = [#tpu.dimension_semantics<parallel>], iteration_bounds = array<i64: 1>, scalar_prefetch = 0 : i64, scratch_operands = 0 : i64, tpu.core_type = #tpu.core_type<tc>, window_params = [{transform_indices = @transform_0, window_bounds = array<i64: 512, 128>}, {transform_indices = @transform_1, window_bounds = array<i64: 1, 128>}, {transform_indices = @transform_2, window_bounds = array<i64: 512, 128>}]} {
    %c0 = arith.constant 0 : index
    %c0_0 = arith.constant 0 : index
    %0 = vector.load %arg1[%c0, %c0_0] : memref<512x128xbf16, #tpu.memory_space<vmem>>, vector<512x128xbf16>
    %1 = arith.extf %0 : vector<512x128xbf16> to vector<512x128xf32>
    %cst = arith.constant dense<0.000000e+00> : vector<128xf32>
    %2 = vector.multi_reduction <add>, %1, %cst [0] : vector<512x128xf32> to vector<128xf32>
    %3 = vector.shape_cast %2 : vector<128xf32> to vector<1x128xf32>
    %cst_1 = arith.constant 0.001953125 : f32
    %4 = vector.broadcast %cst_1 : f32 to vector<1x128xf32>
    %5 = arith.mulf %3, %4 : vector<1x128xf32>
    %6 = arith.mulf %1, %1 : vector<512x128xf32>
    %cst_2 = arith.constant dense<0.000000e+00> : vector<128xf32>
    %7 = vector.multi_reduction <add>, %6, %cst_2 [0] : vector<512x128xf32> to vector<128xf32>
    %8 = vector.shape_cast %7 : vector<128xf32> to vector<1x128xf32>
    %cst_3 = arith.constant 0.001953125 : f32
    %9 = vector.broadcast %cst_3 : f32 to vector<1x128xf32>
    %10 = arith.mulf %8, %9 : vector<1x128xf32>
    %11 = arith.mulf %5, %5 : vector<1x128xf32>
    %12 = arith.subf %10, %11 : vector<1x128xf32>
    %13 = vector.broadcast %5 : vector<1x128xf32> to vector<512x128xf32>
    %14 = arith.subf %1, %13 : vector<512x128xf32>
    %cst_4 = arith.constant 9.99999974E-6 : f32
    %15 = vector.broadcast %cst_4 : f32 to vector<1x128xf32>
    %16 = arith.addf %12, %15 : vector<1x128xf32>
    %17 = math.rsqrt %16 : vector<1x128xf32>
    %18 = vector.broadcast %17 : vector<1x128xf32> to vector<512x128xf32>
    %19 = arith.mulf %14, %18 : vector<512x128xf32>
    %c0_5 = arith.constant 0 : index
    %c0_6 = arith.constant 0 : index
    %20 = vector.load %arg2[%c0_5, %c0_6] : memref<1x128xf32, #tpu.memory_space<vmem>>, vector<1x128xf32>
    %21 = vector.broadcast %20 : vector<1x128xf32> to vector<512x128xf32>
    %22 = arith.mulf %19, %21 : vector<512x128xf32>
    %cst_7 = arith.constant 0.000000e+00 : f32
    %23 = vector.broadcast %cst_7 : f32 to vector<512x128xf32>
    %24 = arith.maximumf %22, %23 : vector<512x128xf32>
    %25 = arith.truncf %24 : vector<512x128xf32> to vector<512x128xbf16>
    %c0_8 = arith.constant 0 : index
    %c0_9 = arith.constant 0 : index
    %26 = vector.load %arg3[%c0_8, %c0_9] : memref<512x128xbf16, #tpu.memory_space<vmem>>, vector<512x128xbf16>
    tpu.vector_store %arg3[%c0_8, %c0_9], %25 {strides = array<i32>} : memref<512x128xbf16, #tpu.memory_space<vmem>>, vector<512x128xbf16>,
    return
  }
  func.func @transform_0(%arg0: i32) -> (i32, i32) {
    %c0_i32 = arith.constant 0 : i32
    %c0_i32_0 = arith.constant 0 : i32
    return %c0_i32, %arg0 : i32, i32
  }
  func.func @transform_1(%arg0: i32) -> (i32, i32) {
    %c0_i32 = arith.constant 0 : i32
    %c0_i32_0 = arith.constant 0 : i32
    return %c0_i32, %arg0 : i32, i32
  }
  func.func @transform_2(%arg0: i32) -> (i32, i32) {
    %c0_i32 = arith.constant 0 : i32
    %c0_i32_0 = arith.constant 0 : i32
    return %c0_i32, %arg0 : i32, i32
  }
}

module attributes {stable_mosaic.version = 11 : i64} {
  func.func @_matmul_kernel(%arg0: i32, %arg1: i32, %arg2: i32, %arg3: memref<128x128xbf16, #tpu.memory_space<vmem>>, %arg4: memref<128x128xbf16, #tpu.memory_space<vmem>>, %arg5: memref<128x128xbf16, #tpu.memory_space<vmem>>, %arg6: memref<128x128xf32, #tpu.memory_space<vmem>>) attributes {dimension_semantics = [#tpu.dimension_semantics<parallel>, #tpu.dimension_semantics<parallel>, #tpu.dimension_semantics<arbitrary>], iteration_bounds = array<i64: 1, 1, 9>, scalar_prefetch = 0 : i64, scratch_operands = 1 : i64, tpu.core_type = #tpu.core_type<tc>, window_params = [{transform_indices = @transform_0, window_bounds = array<i64: 128, 128>}, {transform_indices = @transform_1, window_bounds = array<i64: 128, 128>}, {transform_indices = @transform_2, window_bounds = array<i64: 128, 128>}]} {
    %c0_i32 = arith.constant 0 : i32
    %0 = arith.cmpi eq, %arg2, %c0_i32 : i32
    %1 = arith.extui %0 : i1 to i32
    %c0_i32_0 = arith.constant 0 : i32
    %2 = arith.cmpi ne, %1, %c0_i32_0 : i32
    scf.if %2 {
      %cst_9 = arith.constant 0.000000e+00 : f32
      %12 = vector.broadcast %cst_9 : f32 to vector<128x128xf32>
      %c0_10 = arith.constant 0 : index
      %c0_11 = arith.constant 0 : index
      %13 = vector.load %arg6[%c0_10, %c0_11] : memref<128x128xf32, #tpu.memory_space<vmem>>, vector<128x128xf32>
      tpu.vector_store %arg6[%c0_10, %c0_11], %12 {strides = array<i32>} : memref<128x128xf32, #tpu.memory_space<vmem>>, vector<128x128xf32>,
    } else {
    }
    %c0 = arith.constant 0 : index
    %c0_1 = arith.constant 0 : index
    %3 = vector.load %arg6[%c0, %c0_1] : memref<128x128xf32, #tpu.memory_space<vmem>>, vector<128x128xf32>
    %c0_2 = arith.constant 0 : index
    %c0_3 = arith.constant 0 : index
    %4 = vector.load %arg3[%c0_2, %c0_3] : memref<128x128xbf16, #tpu.memory_space<vmem>>, vector<128x128xbf16>
    %c0_4 = arith.constant 0 : index
    %c0_5 = arith.constant 0 : index
    %5 = vector.load %arg4[%c0_4, %c0_5] : memref<128x128xbf16, #tpu.memory_space<vmem>>, vector<128x128xbf16>
    %cst = arith.constant dense<0.000000e+00> : vector<128x128xf32>
    %6 = tpu.matmul %4, %5, %cst {dimension_numbers = #tpu.dot_dimension_numbers<[1], [0], [0], [1], [0, 0, 1, 1], [], []>} : vector<128x128xbf16>, vector<128x128xbf16>, vector<128x128xf32> -> vector<128x128xf32>
    %7 = arith.addf %3, %6 : vector<128x128xf32>
    %c0_6 = arith.constant 0 : index
    %c0_7 = arith.constant 0 : index
    %8 = vector.load %arg6[%c0_6, %c0_7] : memref<128x128xf32, #tpu.memory_space<vmem>>, vector<128x128xf32>
    tpu.vector_store %arg6[%c0_6, %c0_7], %7 {strides = array<i32>} : memref<128x128xf32, #tpu.memory_space<vmem>>, vector<128x128xf32>,
    %c8_i32 = arith.constant 8 : i32
    %9 = arith.cmpi eq, %arg2, %c8_i32 : i32
    %10 = arith.extui %9 : i1 to i32
    %c0_i32_8 = arith.constant 0 : i32
    %11 = arith.cmpi ne, %10, %c0_i32_8 : i32
    scf.if %11 {
      %c0_9 = arith.constant 0 : index
      %c0_10 = arith.constant 0 : index
      %12 = vector.load %arg6[%c0_9, %c0_10] : memref<128x128xf32, #tpu.memory_space<vmem>>, vector<128x128xf32>
      %13 = arith.truncf %12 : vector<128x128xf32> to vector<128x128xbf16>
      %c0_11 = arith.constant 0 : index
      %c0_12 = arith.constant 0 : index
      %14 = vector.load %arg5[%c0_11, %c0_12] : memref<128x128xbf16, #tpu.memory_space<vmem>>, vector<128x128xbf16>
      tpu.vector_store %arg5[%c0_11, %c0_12], %13 {strides = array<i32>} : memref<128x128xbf16, #tpu.memory_space<vmem>>, vector<128x128xbf16>,
    } else {
    }
    return
  }
  func.func @transform_0(%arg0: i32, %arg1: i32, %arg2: i32) -> (i32, i32) {
    %c0_i32 = arith.constant 0 : i32
    return %arg0, %arg2 : i32, i32
  }
  func.func @transform_1(%arg0: i32, %arg1: i32, %arg2: i32) -> (i32, i32) {
    %c0_i32 = arith.constant 0 : i32
    return %arg2, %arg1 : i32, i32
  }
  func.func @transform_2(%arg0: i32, %arg1: i32, %arg2: i32) -> (i32, i32) {
    %c0_i32 = arith.constant 0 : i32
    return %arg0, %arg1 : i32, i32
  }
}

module attributes {stable_mosaic.version = 11 : i64} {
  func.func @_bn_relu_kernel(%arg0: i32, %arg1: memref<128x128xbf16, #tpu.memory_space<vmem>>, %arg2: memref<1x128xf32, #tpu.memory_space<vmem>>, %arg3: memref<128x128xbf16, #tpu.memory_space<vmem>>) attributes {dimension_semantics = [#tpu.dimension_semantics<parallel>], iteration_bounds = array<i64: 1>, scalar_prefetch = 0 : i64, scratch_operands = 0 : i64, tpu.core_type = #tpu.core_type<tc>, window_params = [{transform_indices = @transform_0, window_bounds = array<i64: 128, 128>}, {transform_indices = @transform_1, window_bounds = array<i64: 1, 128>}, {transform_indices = @transform_2, window_bounds = array<i64: 128, 128>}]} {
    %c0 = arith.constant 0 : index
    %c0_0 = arith.constant 0 : index
    %0 = vector.load %arg1[%c0, %c0_0] : memref<128x128xbf16, #tpu.memory_space<vmem>>, vector<128x128xbf16>
    %1 = arith.extf %0 : vector<128x128xbf16> to vector<128x128xf32>
    %cst = arith.constant dense<0.000000e+00> : vector<128xf32>
    %2 = vector.multi_reduction <add>, %1, %cst [0] : vector<128x128xf32> to vector<128xf32>
    %3 = vector.shape_cast %2 : vector<128xf32> to vector<1x128xf32>
    %cst_1 = arith.constant 7.812500e-03 : f32
    %4 = vector.broadcast %cst_1 : f32 to vector<1x128xf32>
    %5 = arith.mulf %3, %4 : vector<1x128xf32>
    %6 = arith.mulf %1, %1 : vector<128x128xf32>
    %cst_2 = arith.constant dense<0.000000e+00> : vector<128xf32>
    %7 = vector.multi_reduction <add>, %6, %cst_2 [0] : vector<128x128xf32> to vector<128xf32>
    %8 = vector.shape_cast %7 : vector<128xf32> to vector<1x128xf32>
    %cst_3 = arith.constant 7.812500e-03 : f32
    %9 = vector.broadcast %cst_3 : f32 to vector<1x128xf32>
    %10 = arith.mulf %8, %9 : vector<1x128xf32>
    %11 = arith.mulf %5, %5 : vector<1x128xf32>
    %12 = arith.subf %10, %11 : vector<1x128xf32>
    %13 = vector.broadcast %5 : vector<1x128xf32> to vector<128x128xf32>
    %14 = arith.subf %1, %13 : vector<128x128xf32>
    %cst_4 = arith.constant 9.99999974E-6 : f32
    %15 = vector.broadcast %cst_4 : f32 to vector<1x128xf32>
    %16 = arith.addf %12, %15 : vector<1x128xf32>
    %17 = math.rsqrt %16 : vector<1x128xf32>
    %18 = vector.broadcast %17 : vector<1x128xf32> to vector<128x128xf32>
    %19 = arith.mulf %14, %18 : vector<128x128xf32>
    %c0_5 = arith.constant 0 : index
    %c0_6 = arith.constant 0 : index
    %20 = vector.load %arg2[%c0_5, %c0_6] : memref<1x128xf32, #tpu.memory_space<vmem>>, vector<1x128xf32>
    %21 = vector.broadcast %20 : vector<1x128xf32> to vector<128x128xf32>
    %22 = arith.mulf %19, %21 : vector<128x128xf32>
    %cst_7 = arith.constant 0.000000e+00 : f32
    %23 = vector.broadcast %cst_7 : f32 to vector<128x128xf32>
    %24 = arith.maximumf %22, %23 : vector<128x128xf32>
    %25 = arith.truncf %24 : vector<128x128xf32> to vector<128x128xbf16>
    %c0_8 = arith.constant 0 : index
    %c0_9 = arith.constant 0 : index
    %26 = vector.load %arg3[%c0_8, %c0_9] : memref<128x128xbf16, #tpu.memory_space<vmem>>, vector<128x128xbf16>
    tpu.vector_store %arg3[%c0_8, %c0_9], %25 {strides = array<i32>} : memref<128x128xbf16, #tpu.memory_space<vmem>>, vector<128x128xbf16>,
    return
  }
  func.func @transform_0(%arg0: i32) -> (i32, i32) {
    %c0_i32 = arith.constant 0 : i32
    %c0_i32_0 = arith.constant 0 : i32
    return %c0_i32, %arg0 : i32, i32
  }
  func.func @transform_1(%arg0: i32) -> (i32, i32) {
    %c0_i32 = arith.constant 0 : i32
    %c0_i32_0 = arith.constant 0 : i32
    return %c0_i32, %arg0 : i32, i32
  }
  func.func @transform_2(%arg0: i32) -> (i32, i32) {
    %c0_i32 = arith.constant 0 : i32
    %c0_i32_0 = arith.constant 0 : i32
    return %c0_i32, %arg0 : i32, i32
  }
}

module attributes {stable_mosaic.version = 11 : i64} {
  func.func @_matmul_kernel(%arg0: i32, %arg1: i32, %arg2: i32, %arg3: memref<8x256xbf16, #tpu.memory_space<vmem>>, %arg4: memref<256x128xbf16, #tpu.memory_space<vmem>>, %arg5: memref<8x128xbf16, #tpu.memory_space<vmem>>, %arg6: memref<8x128xf32, #tpu.memory_space<vmem>>) attributes {dimension_semantics = [#tpu.dimension_semantics<parallel>, #tpu.dimension_semantics<parallel>, #tpu.dimension_semantics<arbitrary>], iteration_bounds = array<i64: 1, 2, 32>, scalar_prefetch = 0 : i64, scratch_operands = 1 : i64, tpu.core_type = #tpu.core_type<tc>, window_params = [{transform_indices = @transform_0, window_bounds = array<i64: 8, 256>}, {transform_indices = @transform_1, window_bounds = array<i64: 256, 128>}, {transform_indices = @transform_2, window_bounds = array<i64: 8, 128>}]} {
    %c0_i32 = arith.constant 0 : i32
    %0 = arith.cmpi eq, %arg2, %c0_i32 : i32
    %1 = arith.extui %0 : i1 to i32
    %c0_i32_0 = arith.constant 0 : i32
    %2 = arith.cmpi ne, %1, %c0_i32_0 : i32
    scf.if %2 {
      %cst_9 = arith.constant 0.000000e+00 : f32
      %12 = vector.broadcast %cst_9 : f32 to vector<8x128xf32>
      %c0_10 = arith.constant 0 : index
      %c0_11 = arith.constant 0 : index
      %13 = vector.load %arg6[%c0_10, %c0_11] : memref<8x128xf32, #tpu.memory_space<vmem>>, vector<8x128xf32>
      tpu.vector_store %arg6[%c0_10, %c0_11], %12 {strides = array<i32>} : memref<8x128xf32, #tpu.memory_space<vmem>>, vector<8x128xf32>,
    } else {
    }
    %c0 = arith.constant 0 : index
    %c0_1 = arith.constant 0 : index
    %3 = vector.load %arg6[%c0, %c0_1] : memref<8x128xf32, #tpu.memory_space<vmem>>, vector<8x128xf32>
    %c0_2 = arith.constant 0 : index
    %c0_3 = arith.constant 0 : index
    %4 = vector.load %arg3[%c0_2, %c0_3] : memref<8x256xbf16, #tpu.memory_space<vmem>>, vector<8x256xbf16>
    %c0_4 = arith.constant 0 : index
    %c0_5 = arith.constant 0 : index
    %5 = vector.load %arg4[%c0_4, %c0_5] : memref<256x128xbf16, #tpu.memory_space<vmem>>, vector<256x128xbf16>
    %cst = arith.constant dense<0.000000e+00> : vector<8x128xf32>
    %6 = tpu.matmul %4, %5, %cst {dimension_numbers = #tpu.dot_dimension_numbers<[1], [0], [0], [1], [0, 0, 1, 1], [], []>} : vector<8x256xbf16>, vector<256x128xbf16>, vector<8x128xf32> -> vector<8x128xf32>
    %7 = arith.addf %3, %6 : vector<8x128xf32>
    %c0_6 = arith.constant 0 : index
    %c0_7 = arith.constant 0 : index
    %8 = vector.load %arg6[%c0_6, %c0_7] : memref<8x128xf32, #tpu.memory_space<vmem>>, vector<8x128xf32>
    tpu.vector_store %arg6[%c0_6, %c0_7], %7 {strides = array<i32>} : memref<8x128xf32, #tpu.memory_space<vmem>>, vector<8x128xf32>,
    %c31_i32 = arith.constant 31 : i32
    %9 = arith.cmpi eq, %arg2, %c31_i32 : i32
    %10 = arith.extui %9 : i1 to i32
    %c0_i32_8 = arith.constant 0 : i32
    %11 = arith.cmpi ne, %10, %c0_i32_8 : i32
    scf.if %11 {
      %c0_9 = arith.constant 0 : index
      %c0_10 = arith.constant 0 : index
      %12 = vector.load %arg6[%c0_9, %c0_10] : memref<8x128xf32, #tpu.memory_space<vmem>>, vector<8x128xf32>
      %13 = arith.truncf %12 : vector<8x128xf32> to vector<8x128xbf16>
      %c0_11 = arith.constant 0 : index
      %c0_12 = arith.constant 0 : index
      %14 = vector.load %arg5[%c0_11, %c0_12] : memref<8x128xbf16, #tpu.memory_space<vmem>>, vector<8x128xbf16>
      tpu.vector_store %arg5[%c0_11, %c0_12], %13 {strides = array<i32>} : memref<8x128xbf16, #tpu.memory_space<vmem>>, vector<8x128xbf16>,
    } else {
    }
    return
  }
  func.func @transform_0(%arg0: i32, %arg1: i32, %arg2: i32) -> (i32, i32) {
    %c0_i32 = arith.constant 0 : i32
    return %arg0, %arg2 : i32, i32
  }
  func.func @transform_1(%arg0: i32, %arg1: i32, %arg2: i32) -> (i32, i32) {
    %c0_i32 = arith.constant 0 : i32
    return %arg2, %arg1 : i32, i32
  }
  func.func @transform_2(%arg0: i32, %arg1: i32, %arg2: i32) -> (i32, i32) {
    %c0_i32 = arith.constant 0 : i32
    return %arg0, %arg1 : i32, i32
  }
}

module attributes {stable_mosaic.version = 11 : i64} {
  func.func @_bn_relu_kernel(%arg0: i32, %arg1: memref<2x128xbf16, #tpu.memory_space<vmem>>, %arg2: memref<1x128xf32, #tpu.memory_space<vmem>>, %arg3: memref<2x128xbf16, #tpu.memory_space<vmem>>) attributes {dimension_semantics = [#tpu.dimension_semantics<parallel>], iteration_bounds = array<i64: 2>, scalar_prefetch = 0 : i64, scratch_operands = 0 : i64, tpu.core_type = #tpu.core_type<tc>, window_params = [{transform_indices = @transform_0, window_bounds = array<i64: 2, 128>}, {transform_indices = @transform_1, window_bounds = array<i64: 1, 128>}, {transform_indices = @transform_2, window_bounds = array<i64: 2, 128>}]} {
    %c0 = arith.constant 0 : index
    %c0_0 = arith.constant 0 : index
    %0 = vector.load %arg1[%c0, %c0_0] : memref<2x128xbf16, #tpu.memory_space<vmem>>, vector<2x128xbf16>
    %1 = arith.extf %0 : vector<2x128xbf16> to vector<2x128xf32>
    %cst = arith.constant dense<0.000000e+00> : vector<128xf32>
    %2 = vector.multi_reduction <add>, %1, %cst [0] : vector<2x128xf32> to vector<128xf32>
    %3 = vector.shape_cast %2 : vector<128xf32> to vector<1x128xf32>
    %cst_1 = arith.constant 5.000000e-01 : f32
    %4 = vector.broadcast %cst_1 : f32 to vector<1x128xf32>
    %5 = arith.mulf %3, %4 : vector<1x128xf32>
    %6 = arith.mulf %1, %1 : vector<2x128xf32>
    %cst_2 = arith.constant dense<0.000000e+00> : vector<128xf32>
    %7 = vector.multi_reduction <add>, %6, %cst_2 [0] : vector<2x128xf32> to vector<128xf32>
    %8 = vector.shape_cast %7 : vector<128xf32> to vector<1x128xf32>
    %cst_3 = arith.constant 5.000000e-01 : f32
    %9 = vector.broadcast %cst_3 : f32 to vector<1x128xf32>
    %10 = arith.mulf %8, %9 : vector<1x128xf32>
    %11 = arith.mulf %5, %5 : vector<1x128xf32>
    %12 = arith.subf %10, %11 : vector<1x128xf32>
    %13 = vector.broadcast %5 : vector<1x128xf32> to vector<2x128xf32>
    %14 = arith.subf %1, %13 : vector<2x128xf32>
    %cst_4 = arith.constant 9.99999974E-6 : f32
    %15 = vector.broadcast %cst_4 : f32 to vector<1x128xf32>
    %16 = arith.addf %12, %15 : vector<1x128xf32>
    %17 = math.rsqrt %16 : vector<1x128xf32>
    %18 = vector.broadcast %17 : vector<1x128xf32> to vector<2x128xf32>
    %19 = arith.mulf %14, %18 : vector<2x128xf32>
    %c0_5 = arith.constant 0 : index
    %c0_6 = arith.constant 0 : index
    %20 = vector.load %arg2[%c0_5, %c0_6] : memref<1x128xf32, #tpu.memory_space<vmem>>, vector<1x128xf32>
    %21 = vector.broadcast %20 : vector<1x128xf32> to vector<2x128xf32>
    %22 = arith.mulf %19, %21 : vector<2x128xf32>
    %23 = arith.truncf %22 : vector<2x128xf32> to vector<2x128xbf16>
    %c0_7 = arith.constant 0 : index
    %c0_8 = arith.constant 0 : index
    %24 = vector.load %arg3[%c0_7, %c0_8] : memref<2x128xbf16, #tpu.memory_space<vmem>>, vector<2x128xbf16>
    tpu.vector_store %arg3[%c0_7, %c0_8], %23 {strides = array<i32>} : memref<2x128xbf16, #tpu.memory_space<vmem>>, vector<2x128xbf16>,
    return
  }
  func.func @transform_0(%arg0: i32) -> (i32, i32) {
    %c0_i32 = arith.constant 0 : i32
    %c0_i32_0 = arith.constant 0 : i32
    return %c0_i32, %arg0 : i32, i32
  }
  func.func @transform_1(%arg0: i32) -> (i32, i32) {
    %c0_i32 = arith.constant 0 : i32
    %c0_i32_0 = arith.constant 0 : i32
    return %c0_i32, %arg0 : i32, i32
  }
  func.func @transform_2(%arg0: i32) -> (i32, i32) {
    %c0_i32 = arith.constant 0 : i32
    %c0_i32_0 = arith.constant 0 : i32
    return %c0_i32, %arg0 : i32, i32
  }
}

module attributes {stable_mosaic.version = 11 : i64} {
  func.func @_matmul_bias_kernel(%arg0: i32, %arg1: i32, %arg2: i32, %arg3: memref<8x256xbf16, #tpu.memory_space<vmem>>, %arg4: memref<256x128xbf16, #tpu.memory_space<vmem>>, %arg5: memref<1x128xf32, #tpu.memory_space<vmem>>, %arg6: memref<8x128xf32, #tpu.memory_space<vmem>>, %arg7: memref<8x128xf32, #tpu.memory_space<vmem>>) attributes {dimension_semantics = [#tpu.dimension_semantics<parallel>, #tpu.dimension_semantics<parallel>, #tpu.dimension_semantics<arbitrary>], iteration_bounds = array<i64: 1, 1, 1>, scalar_prefetch = 0 : i64, scratch_operands = 1 : i64, tpu.core_type = #tpu.core_type<tc>, window_params = [{transform_indices = @transform_0, window_bounds = array<i64: 8, 256>}, {transform_indices = @transform_1, window_bounds = array<i64: 256, 128>}, {transform_indices = @transform_2, window_bounds = array<i64: 1, 128>}, {transform_indices = @transform_3, window_bounds = array<i64: 8, 128>}]} {
    %c0_i32 = arith.constant 0 : i32
    %0 = arith.cmpi eq, %arg2, %c0_i32 : i32
    %1 = arith.extui %0 : i1 to i32
    %c0_i32_0 = arith.constant 0 : i32
    %2 = arith.cmpi ne, %1, %c0_i32_0 : i32
    scf.if %2 {
      %cst_10 = arith.constant 0.000000e+00 : f32
      %12 = vector.broadcast %cst_10 : f32 to vector<8x128xf32>
      %c0_11 = arith.constant 0 : index
      %c0_12 = arith.constant 0 : index
      %13 = vector.load %arg7[%c0_11, %c0_12] : memref<8x128xf32, #tpu.memory_space<vmem>>, vector<8x128xf32>
      tpu.vector_store %arg7[%c0_11, %c0_12], %12 {strides = array<i32>} : memref<8x128xf32, #tpu.memory_space<vmem>>, vector<8x128xf32>,
    } else {
    }
    %c0 = arith.constant 0 : index
    %c0_1 = arith.constant 0 : index
    %3 = vector.load %arg7[%c0, %c0_1] : memref<8x128xf32, #tpu.memory_space<vmem>>, vector<8x128xf32>
    %c0_2 = arith.constant 0 : index
    %c0_3 = arith.constant 0 : index
    %4 = vector.load %arg3[%c0_2, %c0_3] : memref<8x256xbf16, #tpu.memory_space<vmem>>, vector<8x256xbf16>
    %c0_4 = arith.constant 0 : index
    %c0_5 = arith.constant 0 : index
    %5 = vector.load %arg4[%c0_4, %c0_5] : memref<256x128xbf16, #tpu.memory_space<vmem>>, vector<256x128xbf16>
    %cst = arith.constant dense<0.000000e+00> : vector<8x128xf32>
    %6 = tpu.matmul %4, %5, %cst {dimension_numbers = #tpu.dot_dimension_numbers<[1], [0], [0], [1], [0, 0, 1, 1], [], []>} : vector<8x256xbf16>, vector<256x128xbf16>, vector<8x128xf32> -> vector<8x128xf32>
    %7 = arith.addf %3, %6 : vector<8x128xf32>
    %c0_6 = arith.constant 0 : index
    %c0_7 = arith.constant 0 : index
    %8 = vector.load %arg7[%c0_6, %c0_7] : memref<8x128xf32, #tpu.memory_space<vmem>>, vector<8x128xf32>
    tpu.vector_store %arg7[%c0_6, %c0_7], %7 {strides = array<i32>} : memref<8x128xf32, #tpu.memory_space<vmem>>, vector<8x128xf32>,
    %c0_i32_8 = arith.constant 0 : i32
    %9 = arith.cmpi eq, %arg2, %c0_i32_8 : i32
    %10 = arith.extui %9 : i1 to i32
    %c0_i32_9 = arith.constant 0 : i32
    %11 = arith.cmpi ne, %10, %c0_i32_9 : i32
    scf.if %11 {
      %c0_10 = arith.constant 0 : index
      %c0_11 = arith.constant 0 : index
      %12 = vector.load %arg7[%c0_10, %c0_11] : memref<8x128xf32, #tpu.memory_space<vmem>>, vector<8x128xf32>
      %c0_12 = arith.constant 0 : index
      %c0_13 = arith.constant 0 : index
      %13 = vector.load %arg5[%c0_12, %c0_13] : memref<1x128xf32, #tpu.memory_space<vmem>>, vector<1x128xf32>
      %14 = vector.broadcast %13 : vector<1x128xf32> to vector<8x128xf32>
      %15 = arith.addf %12, %14 : vector<8x128xf32>
      %c0_14 = arith.constant 0 : index
      %c0_15 = arith.constant 0 : index
      %16 = vector.load %arg6[%c0_14, %c0_15] : memref<8x128xf32, #tpu.memory_space<vmem>>, vector<8x128xf32>
      tpu.vector_store %arg6[%c0_14, %c0_15], %15 {strides = array<i32>} : memref<8x128xf32, #tpu.memory_space<vmem>>, vector<8x128xf32>,
    } else {
    }
    return
  }
  func.func @transform_0(%arg0: i32, %arg1: i32, %arg2: i32) -> (i32, i32) {
    %c0_i32 = arith.constant 0 : i32
    return %arg0, %arg2 : i32, i32
  }
  func.func @transform_1(%arg0: i32, %arg1: i32, %arg2: i32) -> (i32, i32) {
    %c0_i32 = arith.constant 0 : i32
    return %arg2, %arg1 : i32, i32
  }
  func.func @transform_2(%arg0: i32, %arg1: i32, %arg2: i32) -> (i32, i32) {
    %c0_i32 = arith.constant 0 : i32
    %c0_i32_0 = arith.constant 0 : i32
    return %c0_i32, %arg1 : i32, i32
  }
  func.func @transform_3(%arg0: i32, %arg1: i32, %arg2: i32) -> (i32, i32) {
    %c0_i32 = arith.constant 0 : i32
    return %arg0, %arg1 : i32, i32
  }
}

</mosaic_0001>

<bundles_post_ra>
// kernel: blcd_forward.15
= control target key start
LH: loop header
LB: loop body
LE: loop exit
PB: predicated region body
PF: predicated region fallthrough
CT: control target
= control target key end

     0   :  { %s2184_s9 = smov 0   ;;  %s2186_s10 = smov 0   ;;  %s2316_s0 = inlined_call_operand.vmem [shape: bf16[2048,128], index: 0, kind: input, shape index: {}]   ;;  %s2317_s1 = inlined_call_operand.vmem [shape: bf16[128,128], index: 1, kind: input, shape index: {}]   ;;  %s2318_s2 = inlined_call_operand.vmem [shape: bf16[2048,128], index: 2, kind: output, shape index: {}]  }
   0x1   :  { %s2188_s11 = smov 0  }
   0x2 LB: > { %s31_s12 = sadd.s32 1, %s2163_s10  ;;  %p1579_p0 = scmp.ge.s32.totalorder %s2167_s11, 1  ;;  %s2167_s11 = sphi %s2188_s11, %s12_s11   ;;  %s2163_s10 = sphi %s2186_s10, %s2320_s10   ;;  %s2159_s9 = sphi %s2184_s9, %s2319_s9  }
   0x3   : > { %p33_p1 = scmp.ge.s32.totalorder %s31_s12, 4  ;;  %p155_p2 = scmp.lt.s32.totalorder %s2167_s11, 5 }
   0x5   : > { %s2322_s12 = smov (%p33_p1, %s31_s12), 0  ;;  %p156_p3 = pnand %p1579_p0, %p155_p2 }
   0x6   : > { %s1580_s15 = sshll.u32 (!%p156_p3), %s2159_s9, 6 }
   0x7   : > { %159 = sbr.rel (%p156_p3) target bundleno = 303 (0x12f), region = 28  ;;  %p192_p4 = scmp.lt.s32.totalorder (!%p156_p3), %s1580_s15, 255 }
   0xc   : > { %v2105_v0 = vld [vmem:[%s2317_s1 + $0x38] sm:$0xff]   ;;  %v2106_v1 = vld [vmem:[%s2317_s1 + $0x30] sm:$0xff]   ;;  %s2324_s15 = smov (!%p192_p4, %s1580_s15), 255  ;;  %v2107_v2 = vld [vmem:[%s2317_s1 + $0x28] sm:$0xff]  }
   0xd   : > { %1985 = vmatprep.subr.bf16.mxu0 %v2105_v0  ;;  %2065 = vmatprep.subr.bf16.mxu1 %v2105_v0  ;;  %s1581_s20 = sshll.u32 %s2324_s15, 2  ;;  %v2108_v3 = vld [vmem:[%s2317_s1 + $0x20] sm:$0xff]   ;;  %v2109_v6 = vld [vmem:[%s2317_s1 + $0x18] sm:$0xff]   ;;  %v2110_v7 = vld [vmem:[%s2317_s1 + $0x10] sm:$0xff]  }
   0xe   : > { %1986 = vmatpush3.bf16.msra.mxu0 %v2105_v0  ;;  %2073 = vmatpush3.bf16.msra.mxu1 %v2105_v0  ;;  %s2219_s23 = scalar_lea.vmem %s2316_s0, %s1581_s20  ;;  %v2111_v8 = vld [vmem:[%s2317_s1 + $0x8] sm:$0xff]   ;;  %v2112_v9 = vld [vmem:[%s2317_s1] sm:$0xff]   ;;  %s2273_s8 = scalar_lea.vmem %s2318_s2, %s1581_s20 }
   0xf   : > { %1987 = vmatprep.subr.bf16.mxu0 %v2106_v1  ;;  %2066 = vmatprep.subr.bf16.mxu1 %v2106_v1  ;;  %v2113_v4 = vld [vmem:[%s2219_s23] sm:$0xff]   ;;  %v2115_v10 = vld [vmem:[%s2219_s23 + $0x8] sm:$0xff]   ;;  %v2117_v12 = vld [vmem:[%s2219_s23 + $0x10] sm:$0xff]  }
  0x10   : > { %v2114_v5 = vld [vmem:[%s2219_s23 + $0x80] sm:$0xff]   ;;  %2001 = vmatprep.mubr.bf16.mxu0 %v2113_v4  ;;  %v2116_v11 = vld [vmem:[%s2219_s23 + $0x88] sm:$0xff]   ;;  %v2118_v13 = vld [vmem:[%s2219_s23 + $0x90] sm:$0xff]  }
  0x11   : > { %2033 = vmatprep.mubr.bf16.mxu1 %v2114_v5  ;;  %v2119_v14 = vld [vmem:[%s2219_s23 + $0x18] sm:$0xff]   ;;  %v2121_v16 = vld [vmem:[%s2219_s23 + $0x20] sm:$0xff]   ;;  %v2123_v18 = vld [vmem:[%s2219_s23 + $0x28] sm:$0xff]  }
  0x12   : > { %1988 = vmatpush3.bf16.msra.mxu0 %v2106_v1  ;;  %2074 = vmatpush3.bf16.msra.mxu1 %v2106_v1  ;;  %v2120_v15 = vld [vmem:[%s2219_s23 + $0x98] sm:$0xff]   ;;  %v2122_v17 = vld [vmem:[%s2219_s23 + $0xa0] sm:$0xff]   ;;  %v2124_v19 = vld [vmem:[%s2219_s23 + $0xa8] sm:$0xff]  }
  0x13   : > { %1989 = vmatprep.subr.bf16.mxu0 %v2107_v2  ;;  %2067 = vmatprep.subr.bf16.mxu1 %v2107_v2  ;;  %v2125_v20 = vld [vmem:[%s2219_s23 + $0x30] sm:$0xff]   ;;  %v2127_v22 = vld [vmem:[%s2219_s23 + $0x38] sm:$0xff]   ;;  %v2129_v24 = vld [vmem:[%s2219_s23 + $0x40] sm:$0xff]  }
  0x14   : > { %v2126_v21 = vld [vmem:[%s2219_s23 + $0xb0] sm:$0xff]   ;;  %v2128_v23 = vld [vmem:[%s2219_s23 + $0xb8] sm:$0xff]   ;;  %v2130_v25 = vld [vmem:[%s2219_s23 + $0xc0] sm:$0xff]  }
  0x15   : > { %v2131_v26 = vld [vmem:[%s2219_s23 + $0x48] sm:$0xff]   ;;  %v2133_v28 = vld [vmem:[%s2219_s23 + $0x50] sm:$0xff]   ;;  %v2135_v30 = vld [vmem:[%s2219_s23 + $0x58] sm:$0xff]  }
  0x16   : > { %1990 = vmatpush3.bf16.msra.mxu0 %v2107_v2  ;;  %2075 = vmatpush3.bf16.msra.mxu1 %v2107_v2  ;;  %v2132_v27 = vld [vmem:[%s2219_s23 + $0xc8] sm:$0xff]   ;;  %v2134_v29 = vld [vmem:[%s2219_s23 + $0xd0] sm:$0xff]   ;;  %v2136_v31 = vld [vmem:[%s2219_s23 + $0xd8] sm:$0xff]  }
  0x17   : > { %1991 = vmatprep.subr.bf16.mxu0 %v2108_v3  ;;  %2068 = vmatprep.subr.bf16.mxu1 %v2108_v3  ;;  %v2137_v32 = vld [vmem:[%s2219_s23 + $0x60] sm:$0xff]   ;;  %v2139_v34 = vld [vmem:[%s2219_s23 + $0x68] sm:$0xff]   ;;  %v2141_v36 = vld [vmem:[%s2219_s23 + $0x70] sm:$0xff]  }
  0x18   : > { %v2138_v33 = vld [vmem:[%s2219_s23 + $0xe0] sm:$0xff]   ;;  %v2140_v35 = vld [vmem:[%s2219_s23 + $0xe8] sm:$0xff]   ;;  %v2142_v37 = vld [vmem:[%s2219_s23 + $0xf0] sm:$0xff]  }
  0x19   : > { %v2143_v38 = vld [vmem:[%s2219_s23 + $0x78] sm:$0xff]  }
  0x1a   : > { %1992 = vmatpush3.bf16.msra.mxu0 %v2108_v3  ;;  %2076 = vmatpush3.bf16.msra.mxu1 %v2108_v3  ;;  %v2144_v39 = vld [vmem:[%s2219_s23 + $0xf8] sm:$0xff]  }
  0x1b   : > { %1993 = vmatprep.subr.bf16.mxu0 %v2109_v6  ;;  %2069 = vmatprep.subr.bf16.mxu1 %v2109_v6 }
  0x1e   : > { %1994 = vmatpush3.bf16.msra.mxu0 %v2109_v6  ;;  %2077 = vmatpush3.bf16.msra.mxu1 %v2109_v6 }
  0x1f   : > { %1995 = vmatprep.subr.bf16.mxu0 %v2110_v7  ;;  %2070 = vmatprep.subr.bf16.mxu1 %v2110_v7 }
  0x22   : > { %1996 = vmatpush3.bf16.msra.mxu0 %v2110_v7  ;;  %2078 = vmatpush3.bf16.msra.mxu1 %v2110_v7 }
  0x23   : > { %1997 = vmatprep.subr.bf16.mxu0 %v2111_v8  ;;  %2071 = vmatprep.subr.bf16.mxu1 %v2111_v8 }
  0x26   : > { %1998 = vmatpush3.bf16.msra.mxu0 %v2111_v8  ;;  %2079 = vmatpush3.bf16.msra.mxu1 %v2111_v8 }
  0x27   : > { %1999 = vmatprep.subr.bf16.mxu0 %v2112_v9  ;;  %2072 = vmatprep.subr.bf16.mxu1 %v2112_v9 }
  0x2a   : > { %2000 = vmatpush3.bf16.msra.mxu0 %v2112_v9  ;;  %2080 = vmatpush3.bf16.msra.mxu1 %v2112_v9 }
  0x2d   : > { %2002 = vmatmul.mubr.bf16.vlgmr.msra.gmra.mxu0 %v2115_v10  ;;  %2034 = vmatmul.mubr.bf16.vlgmr.msra.gmra.mxu1 %v2116_v11 }
  0x2e   : > { %2005 = vmatprep.mubr.bf16.mxu0 %v2117_v12  ;;  %2037 = vmatprep.mubr.bf16.mxu1 %v2118_v13 }
  0x35   : > { %2006 = vmatmul.mubr.bf16.gmra.mxu0 %v2119_v14  ;;  %2038 = vmatmul.mubr.bf16.gmra.mxu1 %v2120_v15 }
  0x36   : > { %2009 = vmatprep.mubr.bf16.mxu0 %v2121_v16  ;;  %2041 = vmatprep.mubr.bf16.mxu1 %v2122_v17 }
  0x3d   : > { %2010 = vmatmul.mubr.bf16.gmra.mxu0 %v2123_v18  ;;  %2042 = vmatmul.mubr.bf16.gmra.mxu1 %v2124_v19 }
  0x3e   : > { %2013 = vmatprep.mubr.bf16.mxu0 %v2125_v20  ;;  %2045 = vmatprep.mubr.bf16.mxu1 %v2126_v21 }
  0x45   : > { %2014 = vmatmul.mubr.bf16.gmra.mxu0 %v2127_v22  ;;  %2046 = vmatmul.mubr.bf16.gmra.mxu1 %v2128_v23 }
  0x46   : > { %2017 = vmatprep.mubr.bf16.mxu0 %v2129_v24  ;;  %2049 = vmatprep.mubr.bf16.mxu1 %v2130_v25 }
  0x4d   : > { %2018 = vmatmul.mubr.bf16.gmra.mxu0 %v2131_v26  ;;  %2050 = vmatmul.mubr.bf16.gmra.mxu1 %v2132_v27 }
  0x4e   : > { %2021 = vmatprep.mubr.bf16.mxu0 %v2133_v28  ;;  %2053 = vmatprep.mubr.bf16.mxu1 %v2134_v29 }
  0x55   : > { %2022 = vmatmul.mubr.bf16.gmra.mxu0 %v2135_v30  ;;  %2054 = vmatmul.mubr.bf16.gmra.mxu1 %v2136_v31 }
  0x56   : > { %2025 = vmatprep.mubr.bf16.mxu0 %v2137_v32  ;;  %2057 = vmatprep.mubr.bf16.mxu1 %v2138_v33 }
  0x5d   : > { %2026 = vmatmul.mubr.bf16.gmra.mxu0 %v2139_v34  ;;  %2058 = vmatmul.mubr.bf16.gmra.mxu1 %v2140_v35 }
  0x5e   : > { %2029 = vmatprep.mubr.bf16.mxu0 %v2141_v36  ;;  %2061 = vmatprep.mubr.bf16.mxu1 %v2142_v37 }
  0x65   : > { %2030 = vmatmul.mubr.bf16.gmra.mxu0 %v2143_v38  ;;  %2062 = vmatmul.mubr.bf16.gmra.mxu1 %v2144_v39 }
  0xed   : > { %v2003_v40 = vpop.f32.mrf.mxu0  ;;  %v2035_v41 = vpop.f32.mrf.mxu1 }
  0xef   : > { %v705_v42 = vpop.f32.mrf.mxu0  ;;  %v833_v43 = vpop.f32.mrf.mxu1 }
  0xf1   : > { %v2004_v44 = vpop.f32.mrf.mxu0  ;;  %v2036_v45 = vpop.f32.mrf.mxu1 }
  0xf2   : > { %v1762_v46 = vpack.c.bf16 %v2004_v44, %v2003_v40  ;;  %v1842_v47 = vpack.c.bf16 %v2036_v45, %v2035_v41 }
  0xf3   : > { %v708_v48 = vpop.f32.mrf.mxu0  ;;  %v836_v49 = vpop.f32.mrf.mxu1 }
  0xf4   : > { %1914 = vst [vmem:[%s2273_s8 + $0x8] sm:$0xff] %v1762_v46   ;;  %1930 = vst [vmem:[%s2273_s8 + $0x88] sm:$0xff] %v1842_v47   ;;  %v1757_v50 = vpack.c.bf16 %v708_v48, %v705_v42  ;;  %v1837_v51 = vpack.c.bf16 %v836_v49, %v833_v43 }
  0xf5   : > { %v2007_v52 = vpop.f32.mrf.mxu0  ;;  %v2039_v53 = vpop.f32.mrf.mxu1 }
  0xf6   : > { %1758 = vst [vmem:[%s2273_s8] sm:$0xff] %v1757_v50   ;;  %1929 = vst [vmem:[%s2273_s8 + $0x80] sm:$0xff] %v1837_v51  }
  0xf7   : > { %v721_v54 = vpop.f32.mrf.mxu0  ;;  %v849_v55 = vpop.f32.mrf.mxu1 }
  0xf9   : > { %v2008_v56 = vpop.f32.mrf.mxu0  ;;  %v2040_v57 = vpop.f32.mrf.mxu1 }
  0xfa   : > { %v1772_v58 = vpack.c.bf16 %v2008_v56, %v2007_v52  ;;  %v1852_v59 = vpack.c.bf16 %v2040_v57, %v2039_v53 }
  0xfb   : > { %v724_v60 = vpop.f32.mrf.mxu0  ;;  %v852_v61 = vpop.f32.mrf.mxu1 }
  0xfc   : > { %1916 = vst [vmem:[%s2273_s8 + $0x18] sm:$0xff] %v1772_v58   ;;  %1932 = vst [vmem:[%s2273_s8 + $0x98] sm:$0xff] %v1852_v59   ;;  %v1767_v62 = vpack.c.bf16 %v724_v60, %v721_v54  ;;  %v1847_v63 = vpack.c.bf16 %v852_v61, %v849_v55 }
  0xfd   : > { %v2011_v0 = vpop.f32.mrf.mxu0  ;;  %v2043_v1 = vpop.f32.mrf.mxu1 }
  0xfe   : > { %1915 = vst [vmem:[%s2273_s8 + $0x10] sm:$0xff] %v1767_v62   ;;  %1931 = vst [vmem:[%s2273_s8 + $0x90] sm:$0xff] %v1847_v63  }
  0xff   : > { %v737_v2 = vpop.f32.mrf.mxu0  ;;  %v865_v3 = vpop.f32.mrf.mxu1 }
 0x101   : > { %v2012_v4 = vpop.f32.mrf.mxu0  ;;  %v2044_v5 = vpop.f32.mrf.mxu1 }
 0x102   : > { %v1782_v6 = vpack.c.bf16 %v2012_v4, %v2011_v0  ;;  %v1862_v7 = vpack.c.bf16 %v2044_v5, %v2043_v1 }
 0x103   : > { %v740_v8 = vpop.f32.mrf.mxu0  ;;  %v868_v9 = vpop.f32.mrf.mxu1 }
 0x104   : > { %1918 = vst [vmem:[%s2273_s8 + $0x28] sm:$0xff] %v1782_v6   ;;  %1934 = vst [vmem:[%s2273_s8 + $0xa8] sm:$0xff] %v1862_v7   ;;  %v1777_v10 = vpack.c.bf16 %v740_v8, %v737_v2  ;;  %v1857_v11 = vpack.c.bf16 %v868_v9, %v865_v3 }
 0x105   : > { %v2015_v12 = vpop.f32.mrf.mxu0  ;;  %v2047_v13 = vpop.f32.mrf.mxu1 }
 0x106   : > { %1917 = vst [vmem:[%s2273_s8 + $0x20] sm:$0xff] %v1777_v10   ;;  %1933 = vst [vmem:[%s2273_s8 + $0xa0] sm:$0xff] %v1857_v11  }
 0x107   : > { %v753_v14 = vpop.f32.mrf.mxu0  ;;  %v881_v15 = vpop.f32.mrf.mxu1 }
 0x109   : > { %v2016_v16 = vpop.f32.mrf.mxu0  ;;  %v2048_v17 = vpop.f32.mrf.mxu1 }
 0x10a   : > { %v1792_v18 = vpack.c.bf16 %v2016_v16, %v2015_v12  ;;  %v1872_v19 = vpack.c.bf16 %v2048_v17, %v2047_v13 }
 0x10b   : > { %v756_v20 = vpop.f32.mrf.mxu0  ;;  %v884_v21 = vpop.f32.mrf.mxu1 }
 0x10c   : > { %1920 = vst [vmem:[%s2273_s8 + $0x38] sm:$0xff] %v1792_v18   ;;  %1936 = vst [vmem:[%s2273_s8 + $0xb8] sm:$0xff] %v1872_v19   ;;  %v1787_v22 = vpack.c.bf16 %v756_v20, %v753_v14  ;;  %v1867_v23 = vpack.c.bf16 %v884_v21, %v881_v15 }
 0x10d   : > { %v2019_v24 = vpop.f32.mrf.mxu0  ;;  %v2051_v25 = vpop.f32.mrf.mxu1 }
 0x10e   : > { %1919 = vst [vmem:[%s2273_s8 + $0x30] sm:$0xff] %v1787_v22   ;;  %1935 = vst [vmem:[%s2273_s8 + $0xb0] sm:$0xff] %v1867_v23  }
 0x10f   : > { %v769_v26 = vpop.f32.mrf.mxu0  ;;  %v897_v27 = vpop.f32.mrf.mxu1 }
 0x111   : > { %v2020_v28 = vpop.f32.mrf.mxu0  ;;  %v2052_v29 = vpop.f32.mrf.mxu1 }
 0x112   : > { %v1802_v30 = vpack.c.bf16 %v2020_v28, %v2019_v24  ;;  %v1882_v31 = vpack.c.bf16 %v2052_v29, %v2051_v25 }
 0x113   : > { %v772_v32 = vpop.f32.mrf.mxu0  ;;  %v900_v33 = vpop.f32.mrf.mxu1 }
 0x114   : > { %1922 = vst [vmem:[%s2273_s8 + $0x48] sm:$0xff] %v1802_v30   ;;  %1938 = vst [vmem:[%s2273_s8 + $0xc8] sm:$0xff] %v1882_v31   ;;  %v1797_v34 = vpack.c.bf16 %v772_v32, %v769_v26  ;;  %v1877_v35 = vpack.c.bf16 %v900_v33, %v897_v27 }
 0x115   : > { %v2023_v36 = vpop.f32.mrf.mxu0  ;;  %v2055_v37 = vpop.f32.mrf.mxu1 }
 0x116   : > { %1921 = vst [vmem:[%s2273_s8 + $0x40] sm:$0xff] %v1797_v34   ;;  %1937 = vst [vmem:[%s2273_s8 + $0xc0] sm:$0xff] %v1877_v35  }
 0x117   : > { %v785_v38 = vpop.f32.mrf.mxu0  ;;  %v913_v39 = vpop.f32.mrf.mxu1 }
 0x119   : > { %v2024_v40 = vpop.f32.mrf.mxu0  ;;  %v2056_v41 = vpop.f32.mrf.mxu1 }
 0x11a   : > { %v1812_v42 = vpack.c.bf16 %v2024_v40, %v2023_v36  ;;  %v1892_v43 = vpack.c.bf16 %v2056_v41, %v2055_v37 }
 0x11b   : > { %v788_v44 = vpop.f32.mrf.mxu0  ;;  %v916_v45 = vpop.f32.mrf.mxu1 }
 0x11c   : > { %1924 = vst [vmem:[%s2273_s8 + $0x58] sm:$0xff] %v1812_v42   ;;  %1940 = vst [vmem:[%s2273_s8 + $0xd8] sm:$0xff] %v1892_v43   ;;  %v1807_v46 = vpack.c.bf16 %v788_v44, %v785_v38  ;;  %v1887_v47 = vpack.c.bf16 %v916_v45, %v913_v39 }
 0x11d   : > { %v2027_v48 = vpop.f32.mrf.mxu0  ;;  %v2059_v49 = vpop.f32.mrf.mxu1 }
 0x11e   : > { %1923 = vst [vmem:[%s2273_s8 + $0x50] sm:$0xff] %v1807_v46   ;;  %1939 = vst [vmem:[%s2273_s8 + $0xd0] sm:$0xff] %v1887_v47  }
 0x11f   : > { %v801_v50 = vpop.f32.mrf.mxu0  ;;  %v929_v51 = vpop.f32.mrf.mxu1 }
 0x121   : > { %v2028_v52 = vpop.f32.mrf.mxu0  ;;  %v2060_v53 = vpop.f32.mrf.mxu1 }
 0x122   : > { %v1822_v54 = vpack.c.bf16 %v2028_v52, %v2027_v48  ;;  %v1902_v55 = vpack.c.bf16 %v2060_v53, %v2059_v49 }
 0x123   : > { %v804_v56 = vpop.f32.mrf.mxu0  ;;  %v932_v57 = vpop.f32.mrf.mxu1 }
 0x124   : > { %1926 = vst [vmem:[%s2273_s8 + $0x68] sm:$0xff] %v1822_v54   ;;  %1942 = vst [vmem:[%s2273_s8 + $0xe8] sm:$0xff] %v1902_v55   ;;  %v1817_v58 = vpack.c.bf16 %v804_v56, %v801_v50  ;;  %v1897_v59 = vpack.c.bf16 %v932_v57, %v929_v51 }
 0x125   : > { %v2031_v60 = vpop.f32.mrf.mxu0  ;;  %v2063_v61 = vpop.f32.mrf.mxu1 }
 0x126   : > { %1925 = vst [vmem:[%s2273_s8 + $0x60] sm:$0xff] %v1817_v58   ;;  %1941 = vst [vmem:[%s2273_s8 + $0xe0] sm:$0xff] %v1897_v59  }
 0x127   : > { %v817_v62 = vpop.f32.mrf.mxu0  ;;  %v945_v63 = vpop.f32.mrf.mxu1 }
 0x129   : > { %v2032_v0 = vpop.f32.mrf.mxu0  ;;  %v2064_v1 = vpop.f32.mrf.mxu1 }
 0x12a   : > { %v1832_v2 = vpack.c.bf16 %v2032_v0, %v2031_v60  ;;  %v1912_v3 = vpack.c.bf16 %v2064_v1, %v2063_v61 }
 0x12b   : > { %v820_v4 = vpop.f32.mrf.mxu0  ;;  %v948_v5 = vpop.f32.mrf.mxu1 }
 0x12c   : > { %1928 = vst [vmem:[%s2273_s8 + $0x78] sm:$0xff] %v1832_v2   ;;  %1944 = vst [vmem:[%s2273_s8 + $0xf8] sm:$0xff] %v1912_v3   ;;  %v1827_v6 = vpack.c.bf16 %v820_v4, %v817_v62  ;;  %v1907_v7 = vpack.c.bf16 %v948_v5, %v945_v63 }
 0x12e   : > { %1927 = vst [vmem:[%s2273_s8 + $0x70] sm:$0xff] %v1827_v6   ;;  %1943 = vst [vmem:[%s2273_s8 + $0xf0] sm:$0xff] %v1907_v7  }
 0x12f PF: > { %s12_s11 = sadd.s32 1, %s2167_s11   ;;  %s2319_s9 = smov %s2163_s10 }
 0x130   : > { %p9_p5 = scmp.ge.s32.totalorder %s12_s11, 6   ;;  %s2320_s10 = smov %s2322_s12 }
 0x132   :  { %11 = sbr.rel (!%p9_p5) target bundleno = 2 (0x2), region = 69 }

// kernel: blcd_forward.16
= control target key start
LH: loop header
LB: loop body
LE: loop exit
PB: predicated region body
PF: predicated region fallthrough
CT: control target
= control target key end

     0   :  { %s9082_s0 = inlined_call_operand.vmem [shape: bf16[2048,128], index: 0, kind: input, shape index: {}]   ;;  %s9083_s1 = inlined_call_operand.vmem [shape: f32[1,128], index: 1, kind: input, shape index: {}]   ;;  %s9084_s2 = inlined_call_operand.vmem [shape: bf16[2048,128], index: 2, kind: output, shape index: {}]  }
   0x1   :  { %v4136_v0 = vld [vmem:[%s9082_s0] sm:$0xff]   ;;  %v5287_v1 = vld [vmem:[%s9082_s0 + $0x8] sm:$0xff]   ;;  %v5288_v5 = vld [vmem:[%s9082_s0 + $0x10] sm:$0xff]  }
   0x2   :  { %v5566_v2 = vunpack.c.l.bf16 %v4136_v0  ;;  %v5568_v3 = vunpack.c.h.bf16 %v4136_v0  ;;  %v5570_v4 = vunpack.c.l.bf16 %v5287_v1  ;;  %v5575_v6 = vunpack.c.h.bf16 %v5287_v1  ;;  %v5289_v10 = vld [vmem:[%s9082_s0 + $0x18] sm:$0xff]   ;;  %v5290_v15 = vld [vmem:[%s9082_s0 + $0x20] sm:$0xff]   ;;  %v5291_v20 = vld [vmem:[%s9082_s0 + $0x28] sm:$0xff]  }
   0x3   :  { %v5579_v8 = vunpack.c.l.bf16 %v5288_v5  ;;  %v5585_v11 = vunpack.c.h.bf16 %v5288_v5  ;;  %v5588_v13 = vunpack.c.l.bf16 %v5289_v10  ;;  %v5594_v16 = vunpack.c.h.bf16 %v5289_v10  ;;  %v5292_v25 = vld [vmem:[%s9082_s0 + $0x30] sm:$0xff]   ;;  %v5293_v32 = vld [vmem:[%s9082_s0 + $0x38] sm:$0xff]   ;;  %v5294_v40 = vld [vmem:[%s9082_s0 + $0x40] sm:$0xff]  }
   0x4   :  { %v523_v7 = vadd.f32 %v5568_v3, %v5566_v2  ;;  %v5597_v18 = vunpack.c.l.bf16 %v5290_v15  ;;  %v5603_v21 = vunpack.c.h.bf16 %v5290_v15  ;;  %v5606_v23 = vunpack.c.l.bf16 %v5291_v20  ;;  %v5295_v49 = vld [vmem:[%s9082_s0 + $0x48] sm:$0xff]   ;;  %v5296_v58 = vld [vmem:[%s9082_s0 + $0x50] sm:$0xff]  }
   0x5   :  { %v5612_v26 = vunpack.c.h.bf16 %v5291_v20  ;;  %v785_v28 = vmul.f32 %v5566_v2, %v5566_v2  ;;  %v786_v29 = vmul.f32 %v5568_v3, %v5568_v3  ;;  %v5619_v30 = vunpack.c.l.bf16 %v5292_v25 }
   0x6   :  { %v524_v9 = vadd.f32 %v5570_v4, %v523_v7  ;;  %v787_v33 = vmul.f32 %v5570_v4, %v5570_v4  ;;  %v5627_v34 = vunpack.c.h.bf16 %v5292_v25  ;;  %v788_v36 = vmul.f32 %v5575_v6, %v5575_v6  ;;  %v5297_v7 = vld [vmem:[%s9082_s0 + $0x58] sm:$0xff]  }
   0x7   :  { %v1041_v37 = vadd.f32 %v786_v29, %v785_v28  ;;  %v5632_v38 = vunpack.c.l.bf16 %v5293_v32  ;;  %v789_v41 = vmul.f32 %v5579_v8, %v5579_v8  ;;  %v5640_v43 = vunpack.c.h.bf16 %v5293_v32 }
   0x8   :  { %v525_v12 = vadd.f32 %v5575_v6, %v524_v9  ;;  %v790_v45 = vmul.f32 %v5585_v11, %v5585_v11  ;;  %v5645_v47 = vunpack.c.l.bf16 %v5294_v40  ;;  %v791_v50 = vmul.f32 %v5588_v13, %v5588_v13 }
   0x9   :  { %v1042_v42 = vadd.f32 %v1041_v37, %v787_v33  ;;  %v5653_v52 = vunpack.c.h.bf16 %v5294_v40  ;;  %v792_v54 = vmul.f32 %v5594_v16, %v5594_v16  ;;  %v5658_v56 = vunpack.c.l.bf16 %v5295_v49 }
   0xa   :  { %v526_v14 = vadd.f32 %v5579_v8, %v525_v12  ;;  %v793_v59 = vmul.f32 %v5597_v18, %v5597_v18  ;;  %v5666_v61 = vunpack.c.h.bf16 %v5295_v49  ;;  %v794_v63 = vmul.f32 %v5603_v21, %v5603_v21 }
   0xb   :  { %v1043_v46 = vadd.f32 %v1042_v42, %v788_v36  ;;  %v5671_v1 = vunpack.c.l.bf16 %v5296_v58  ;;  %v795_v9 = vmul.f32 %v5606_v23, %v5606_v23  ;;  %v5679_v12 = vunpack.c.h.bf16 %v5296_v58  ;;  %v5301_v58 = vld [vmem:[%s9082_s0 + $0x78] sm:$0xff]  }
   0xc   :  { %v527_v17 = vadd.f32 %v5585_v11, %v526_v14  ;;  %v796_v15 = vmul.f32 %v5612_v26, %v5612_v26  ;;  %v798_v29 = vmul.f32 %v5627_v34, %v5627_v34  ;;  %v799_v36 = vmul.f32 %v5632_v38, %v5632_v38 }
   0xd   :  { %v1044_v51 = vadd.f32 %v1043_v46, %v789_v41  ;;  %v800_v41 = vmul.f32 %v5640_v43, %v5640_v43  ;;  %v5300_v46 = vld [vmem:[%s9082_s0 + $0x70] sm:$0xff]  }
   0xe   :  { %v528_v19 = vadd.f32 %v5588_v13, %v527_v17 }
   0xf   :  { %v1045_v55 = vadd.f32 %v1044_v51, %v790_v45 }
  0x10   :  { %v529_v22 = vadd.f32 %v5594_v16, %v528_v19  ;;  %v5684_v19 = vunpack.c.l.bf16 %v5297_v7 }
  0x11   :  { %v1046_v60 = vadd.f32 %v1045_v55, %v791_v50  ;;  %v5723_v55 = vunpack.c.l.bf16 %v5300_v46 }
  0x12   :  { %v530_v24 = vadd.f32 %v5597_v18, %v529_v22  ;;  %v5298_v22 = vld [vmem:[%s9082_s0 + $0x60] sm:$0xff]  }
  0x13   :  { %v1047_v0 = vadd.f32 %v1046_v60, %v792_v54  ;;  %v5697_v32 = vunpack.c.l.bf16 %v5298_v22 }
  0x14   :  { %v531_v27 = vadd.f32 %v5603_v21, %v530_v24  ;;  %v797_v24 = vmul.f32 %v5619_v30, %v5619_v30 }
  0x15   :  { %v1048_v10 = vadd.f32 %v1047_v0, %v793_v59  ;;  %v803_v59 = vmul.f32 %v5658_v56, %v5658_v56  ;;  %v804_v0 = vmul.f32 %v5666_v61, %v5666_v61 }
  0x16   :  { %v532_v31 = vadd.f32 %v5606_v23, %v531_v27  ;;  %v5692_v27 = vunpack.c.h.bf16 %v5297_v7  ;;  %v5736_v7 = vunpack.c.l.bf16 %v5301_v58 }
  0x17   :  { %v1049_v17 = vadd.f32 %v1048_v10, %v794_v63  ;;  %v5302_v10 = vld [vmem:[%s9082_s0 + $0x80] sm:$0xff]  }
  0x18   :  { %v533_v35 = vadd.f32 %v5612_v26, %v532_v31 }
  0x19   :  { %v1050_v25 = vadd.f32 %v1049_v17, %v795_v9  ;;  %v5744_v17 = vunpack.c.h.bf16 %v5301_v58 }
  0x1a   :  { %v534_v39 = vadd.f32 %v5619_v30, %v533_v35  ;;  %v5299_v35 = vld [vmem:[%s9082_s0 + $0x68] sm:$0xff]  }
  0x1b   :  { %v1051_v31 = vadd.f32 %v1050_v25, %v796_v15  ;;  %v5718_v50 = vunpack.c.h.bf16 %v5299_v35  ;;  %v5749_v25 = vunpack.c.l.bf16 %v5302_v10 }
  0x1c   :  { %v535_v44 = vadd.f32 %v5627_v34, %v534_v39  ;;  %v5705_v39 = vunpack.c.h.bf16 %v5298_v22  ;;  %v806_v22 = vmul.f32 %v5679_v12, %v5679_v12 }
  0x1d   :  { %v1052_v37 = vadd.f32 %v1051_v31, %v797_v24  ;;  %v807_v31 = vmul.f32 %v5684_v19, %v5684_v19 }
  0x1e   :  { %v536_v48 = vadd.f32 %v5632_v38, %v535_v44  ;;  %v5710_v44 = vunpack.c.l.bf16 %v5299_v35  ;;  %v5757_v35 = vunpack.c.h.bf16 %v5302_v10 }
  0x1f   :  { %v1053_v42 = vadd.f32 %v1052_v37, %v798_v29  ;;  %v5303_v29 = vld [vmem:[%s9082_s0 + $0x88] sm:$0xff]   ;;  %v808_v37 = vmul.f32 %v5692_v27, %v5692_v27 }
  0x20   :  { %v537_v53 = vadd.f32 %v5640_v43, %v536_v48  ;;  %v801_v48 = vmul.f32 %v5645_v47, %v5645_v47 }
  0x21   :  { %v1054_v49 = vadd.f32 %v1053_v42, %v799_v36 }
  0x22   :  { %v538_v57 = vadd.f32 %v5645_v47, %v537_v53  ;;  %v802_v53 = vmul.f32 %v5653_v52, %v5653_v52 }
  0x23   :  { %v1055_v54 = vadd.f32 %v1054_v49, %v800_v41  ;;  %v5762_v41 = vunpack.c.l.bf16 %v5303_v29  ;;  %v5770_v49 = vunpack.c.h.bf16 %v5303_v29 }
  0x24   :  { %v539_v62 = vadd.f32 %v5653_v52, %v538_v57 }
  0x25   :  { %v1056_v60 = vadd.f32 %v1055_v54, %v801_v48 }
  0x26   :  { %v540_v5 = vadd.f32 %v5658_v56, %v539_v62  ;;  %v5731_v62 = vunpack.c.h.bf16 %v5300_v46  ;;  %v809_v46 = vmul.f32 %v5697_v32, %v5697_v32 }
  0x28   :  { %v541_v14 = vadd.f32 %v5666_v61, %v540_v5  ;;  %v1057_v5 = vadd.f32 %v1056_v60, %v802_v53  ;;  %v810_v53 = vmul.f32 %v5705_v39, %v5705_v39  ;;  %v811_v60 = vmul.f32 %v5710_v44, %v5710_v44 }
  0x2a   :  { %v542_v20 = vadd.f32 %v5671_v1, %v541_v14  ;;  %v805_v14 = vmul.f32 %v5671_v1, %v5671_v1  ;;  %v1058_v15 = vadd.f32 %v1057_v5, %v803_v59  ;;  %v5305_v59 = vld [vmem:[%s9082_s0 + $0x98] sm:$0xff]  }
  0x2c   :  { %v543_v28 = vadd.f32 %v5679_v12, %v542_v20  ;;  %v1059_v24 = vadd.f32 %v1058_v15, %v804_v0 }
  0x2e   :  { %v544_v33 = vadd.f32 %v5684_v19, %v543_v28 }
  0x30   :  { %v545_v40 = vadd.f32 %v5692_v27, %v544_v33  ;;  %v1060_v33 = vadd.f32 %v1059_v24, %v805_v14  ;;  %v5788_v14 = vunpack.c.l.bf16 %v5305_v59 }
  0x32   :  { %v546_v45 = vadd.f32 %v5697_v32, %v545_v40  ;;  %v1061_v40 = vadd.f32 %v1060_v33, %v806_v22  ;;  %9413 = vst [vmem:[#allocation4_spill] sm:$0xff] %v5788_v14  ;;  %v813_v22 = vmul.f32 %v5723_v55, %v5723_v55 }
  0x34   :  { %v547_v51 = vadd.f32 %v5705_v39, %v546_v45  ;;  %v5304_v45 = vld [vmem:[%s9082_s0 + $0x90] sm:$0xff]   ;;  %v1062_v48 = vadd.f32 %v1061_v40, %v807_v31  ;;  %v814_v31 = vmul.f32 %v5731_v62, %v5731_v62  ;;  %v5307_v40 = vld [vmem:[%s9082_s0 + $0xa8] sm:$0xff]  }
  0x35   :  { %v5783_v0 = vunpack.c.h.bf16 %v5304_v45 }
  0x36   :  { %v548_v57 = vadd.f32 %v5710_v44, %v547_v51  ;;  %v1063_v54 = vadd.f32 %v1062_v48, %v808_v37 }
  0x37   :  { %9412 = vst [vmem:[#allocation3_spill] sm:$0xff] %v5783_v0 }
  0x38   :  { %v549_v63 = vadd.f32 %v5718_v50, %v548_v57  ;;  %v5775_v57 = vunpack.c.l.bf16 %v5304_v45 }
  0x3a   :  { %v550_v9 = vadd.f32 %v5723_v55, %v549_v63  ;;  %9411 = vst [vmem:[#allocation2_spill] sm:$0xff] %v5775_v57  ;;  %v1064_v63 = vadd.f32 %v1063_v54, %v809_v46  ;;  %v5814_v54 = vunpack.c.l.bf16 %v5307_v40 }
  0x3c   :  { %v551_v20 = vadd.f32 %v5731_v62, %v550_v9  ;;  %v812_v9 = vmul.f32 %v5718_v50, %v5718_v50  ;;  %v1065_v10 = vadd.f32 %v1064_v63, %v810_v53  ;;  %9417 = vst [vmem:[#allocation8_spill] sm:$0xff] %v5814_v54 }
  0x3e   :  { %v552_v28 = vadd.f32 %v5736_v7, %v551_v20  ;;  %v5306_v20 = vld [vmem:[%s9082_s0 + $0xa0] sm:$0xff]   ;;  %v1066_v24 = vadd.f32 %v1065_v10, %v811_v60  ;;  %v817_v60 = vmul.f32 %v5749_v25, %v5749_v25  ;;  %v818_v10 = vmul.f32 %v5757_v35, %v5757_v35 }
  0x3f   :  { %v5809_v46 = vunpack.c.h.bf16 %v5306_v20 }
  0x40   :  { %v553_v36 = vadd.f32 %v5744_v17, %v552_v28  ;;  %v5796_v28 = vunpack.c.h.bf16 %v5305_v59  ;;  %v1067_v33 = vadd.f32 %v1066_v24, %v812_v9  ;;  %v5308_v59 = vld [vmem:[%s9082_s0 + $0xb0] sm:$0xff]   ;;  %v5309_v24 = vld [vmem:[%s9082_s0 + $0xb8] sm:$0xff]  }
  0x41   :  { %9416 = vst [vmem:[#allocation7_spill] sm:$0xff] %v5809_v46 }
  0x42   :  { %v554_v42 = vadd.f32 %v5749_v25, %v553_v36  ;;  %9414 = vst [vmem:[#allocation5_spill] sm:$0xff] %v5796_v28  ;;  %v5801_v36 = vunpack.c.l.bf16 %v5306_v20  ;;  %v1068_v45 = vadd.f32 %v1067_v33, %v813_v22  ;;  %v5827_v20 = vunpack.c.l.bf16 %v5308_v59 }
  0x43   :  { %v5835_v33 = vunpack.c.h.bf16 %v5308_v59  ;;  %v5848_v59 = vunpack.c.h.bf16 %v5309_v24 }
  0x44   :  { %v555_v51 = vadd.f32 %v5757_v35, %v554_v42  ;;  %9415 = vst [vmem:[#allocation6_spill] sm:$0xff] %v5801_v36  ;;  %v815_v42 = vmul.f32 %v5736_v7, %v5736_v7  ;;  %v1069_v53 = vadd.f32 %v1068_v45, %v814_v31  ;;  %9419 = vst [vmem:[#allocation10_spill] sm:$0xff] %v5827_v20  ;;  %v5840_v45 = vunpack.c.l.bf16 %v5309_v24 }
  0x45   :  { %9420 = vst [vmem:[#allocation11_spill] sm:$0xff] %v5835_v33  ;;  %9422 = vst [vmem:[#allocation13_spill] sm:$0xff] %v5848_v59 }
  0x46   :  { %v556_v58 = vadd.f32 %v5762_v41, %v555_v51  ;;  %v816_v51 = vmul.f32 %v5744_v17, %v5744_v17  ;;  %v1070_v63 = vadd.f32 %v1069_v53, %v815_v42  ;;  %9421 = vst [vmem:[#allocation12_spill] sm:$0xff] %v5840_v45  ;;  %v821_v53 = vmul.f32 %v5775_v57, %v5775_v57 }
  0x48   :  { %v557_v5 = vadd.f32 %v5770_v49, %v556_v58 }
  0x4a   :  { %v558_v15 = vadd.f32 %v5775_v57, %v557_v5  ;;  %v5822_v5 = vunpack.c.h.bf16 %v5307_v40  ;;  %v820_v40 = vmul.f32 %v5770_v49, %v5770_v49 }
  0x4c   :  { %v559_v29 = vadd.f32 %v5783_v0, %v558_v15  ;;  %9418 = vst [vmem:[#allocation9_spill] sm:$0xff] %v5822_v5  ;;  %v1071_v15 = vadd.f32 %v1070_v63, %v816_v51  ;;  %v5310_v51 = vld [vmem:[%s9082_s0 + $0xc0] sm:$0xff]   ;;  %v822_v63 = vmul.f32 %v5783_v0, %v5783_v0 }
  0x4d   :  { %v5861_v24 = vunpack.c.h.bf16 %v5310_v51 }
  0x4e   :  { %v560_v37 = vadd.f32 %v5788_v14, %v559_v29  ;;  %v819_v29 = vmul.f32 %v5762_v41, %v5762_v41  ;;  %v1072_v31 = vadd.f32 %v1071_v15, %v817_v60 }
  0x4f   :  { %9424 = vst [vmem:[#allocation15_spill] sm:$0xff] %v5861_v24 }
  0x50   :  { %v561_v48 = vadd.f32 %v5796_v28, %v560_v37  ;;  %v1073_v42 = vadd.f32 %v1072_v31, %v818_v10  ;;  %v5853_v10 = vunpack.c.l.bf16 %v5310_v51  ;;  %v823_v31 = vmul.f32 %v5788_v14, %v5788_v14 }
  0x51   :  { %v825_v14 = vmul.f32 %v5801_v36, %v5801_v36 }
  0x52   :  { %v562_v58 = vadd.f32 %v5801_v36, %v561_v48  ;;  %9423 = vst [vmem:[#allocation14_spill] sm:$0xff] %v5853_v10  ;;  %v827_v36 = vmul.f32 %v5814_v54, %v5814_v54 }
  0x54   :  { %v563_v9 = vadd.f32 %v5809_v46, %v562_v58  ;;  %v1074_v58 = vadd.f32 %v1073_v42, %v819_v29  ;;  %v824_v42 = vmul.f32 %v5796_v28, %v5796_v28  ;;  %v5313_v28 = vld [vmem:[%s9082_s0 + $0xd8] sm:$0xff]  }
  0x56   :  { %v564_v22 = vadd.f32 %v5814_v54, %v563_v9  ;;  %v1075_v9 = vadd.f32 %v1074_v58, %v820_v40  ;;  %v829_v54 = vmul.f32 %v5827_v20, %v5827_v20 }
  0x58   :  { %v565_v37 = vadd.f32 %v5822_v5, %v564_v22  ;;  %v5311_v22 = vld [vmem:[%s9082_s0 + $0xc8] sm:$0xff]   ;;  %v1076_v29 = vadd.f32 %v1075_v9, %v821_v53 }
  0x59   :  { %v5874_v51 = vunpack.c.h.bf16 %v5311_v22 }
  0x5a   :  { %v566_v48 = vadd.f32 %v5827_v20, %v565_v37  ;;  %v1077_v40 = vadd.f32 %v1076_v29, %v822_v63  ;;  %v831_v20 = vmul.f32 %v5840_v45, %v5840_v45 }
  0x5b   :  { %9426 = vst [vmem:[#allocation17_spill] sm:$0xff] %v5874_v51 }
  0x5c   :  { %v567_v60 = vadd.f32 %v5835_v33, %v566_v48  ;;  %v5866_v48 = vunpack.c.l.bf16 %v5311_v22  ;;  %v1078_v53 = vadd.f32 %v1077_v40, %v823_v31 }
  0x5e   :  { %v568_v15 = vadd.f32 %v5840_v45, %v567_v60  ;;  %9425 = vst [vmem:[#allocation16_spill] sm:$0xff] %v5866_v48  ;;  %v5312_v60 = vld [vmem:[%s9082_s0 + $0xd0] sm:$0xff]   ;;  %v1079_v63 = vadd.f32 %v1078_v53, %v824_v42  ;;  %v5892_v53 = vunpack.c.l.bf16 %v5313_v28  ;;  %v833_v45 = vmul.f32 %v5853_v10, %v5853_v10 }
  0x5f   :  { %v5879_v29 = vunpack.c.l.bf16 %v5312_v60  ;;  %v5887_v22 = vunpack.c.h.bf16 %v5312_v60  ;;  %v5900_v60 = vunpack.c.h.bf16 %v5313_v28 }
  0x60   :  { %v569_v37 = vadd.f32 %v5848_v59, %v568_v15  ;;  %v826_v15 = vmul.f32 %v5809_v46, %v5809_v46  ;;  %v1080_v31 = vadd.f32 %v1079_v63, %v825_v14  ;;  %9429 = vst [vmem:[#allocation20_spill] sm:$0xff] %v5892_v53  ;;  %v5314_v46 = vld [vmem:[%s9082_s0 + $0xe0] sm:$0xff]  }
  0x61   :  { %9427 = vst [vmem:[#allocation18_spill] sm:$0xff] %v5879_v29  ;;  %9428 = vst [vmem:[#allocation19_spill] sm:$0xff] %v5887_v22  ;;  %v5913_v28 = vunpack.c.h.bf16 %v5314_v46 }
  0x62   :  { %v570_v58 = vadd.f32 %v5853_v10, %v569_v37  ;;  %v1081_v42 = vadd.f32 %v1080_v31, %v826_v15  ;;  %9430 = vst [vmem:[#allocation21_spill] sm:$0xff] %v5900_v60  ;;  %v5905_v31 = vunpack.c.l.bf16 %v5314_v46  ;;  %v835_v10 = vmul.f32 %v5866_v48, %v5866_v48 }
  0x63   :  { %9432 = vst [vmem:[#allocation23_spill] sm:$0xff] %v5913_v28 }
  0x64   :  { %v571_v9 = vadd.f32 %v5861_v24, %v570_v58  ;;  %v828_v58 = vmul.f32 %v5822_v5, %v5822_v5  ;;  %v1082_v14 = vadd.f32 %v1081_v42, %v827_v36  ;;  %9431 = vst [vmem:[#allocation22_spill] sm:$0xff] %v5905_v31  ;;  %v5315_v5 = vld [vmem:[%s9082_s0 + $0xe8] sm:$0xff]  }
  0x65   :  { %v5926_v46 = vunpack.c.h.bf16 %v5315_v5 }
  0x66   :  { %v572_v37 = vadd.f32 %v5866_v48, %v571_v9  ;;  %v1083_v15 = vadd.f32 %v1082_v14, %v828_v58  ;;  %v5918_v14 = vunpack.c.l.bf16 %v5315_v5  ;;  %v837_v48 = vmul.f32 %v5879_v29, %v5879_v29 }
  0x67   :  { %9434 = vst [vmem:[#allocation25_spill] sm:$0xff] %v5926_v46 }
  0x68   :  { %v573_v40 = vadd.f32 %v5874_v51, %v572_v37  ;;  %v830_v37 = vmul.f32 %v5835_v33, %v5835_v33  ;;  %v1084_v36 = vadd.f32 %v1083_v15, %v829_v54  ;;  %9433 = vst [vmem:[#allocation24_spill] sm:$0xff] %v5918_v14  ;;  %v5316_v33 = vld [vmem:[%s9082_s0 + $0xf0] sm:$0xff]  }
  0x69   :  { %v5939_v5 = vunpack.c.h.bf16 %v5316_v33 }
  0x6a   :  { %v574_v9 = vadd.f32 %v5879_v29, %v573_v40  ;;  %v1085_v58 = vadd.f32 %v1084_v36, %v830_v37  ;;  %v5931_v36 = vunpack.c.l.bf16 %v5316_v33  ;;  %v839_v29 = vmul.f32 %v5892_v53, %v5892_v53 }
  0x6b   :  { %9436 = vst [vmem:[#allocation27_spill] sm:$0xff] %v5939_v5 }
  0x6c   :  { %v575_v63 = vadd.f32 %v5887_v22, %v574_v9  ;;  %v832_v9 = vmul.f32 %v5848_v59, %v5848_v59  ;;  %v1086_v54 = vadd.f32 %v1085_v58, %v831_v20  ;;  %9435 = vst [vmem:[#allocation26_spill] sm:$0xff] %v5931_v36  ;;  %v5317_v59 = vld [vmem:[%s9082_s0 + $0xf8] sm:$0xff]  }
  0x6d   :  { %v5952_v33 = vunpack.c.h.bf16 %v5317_v59 }
  0x6e   :  { %v576_v40 = vadd.f32 %v5892_v53, %v575_v63  ;;  %v1087_v37 = vadd.f32 %v1086_v54, %v832_v9  ;;  %v5944_v54 = vunpack.c.l.bf16 %v5317_v59  ;;  %v841_v53 = vmul.f32 %v5905_v31, %v5905_v31 }
  0x6f   :  { %9438 = vst [vmem:[#allocation29_spill] sm:$0xff] %v5952_v33 }
  0x70   :  { %v577_v42 = vadd.f32 %v5900_v60, %v576_v40  ;;  %v834_v40 = vmul.f32 %v5861_v24, %v5861_v24  ;;  %v1088_v20 = vadd.f32 %v1087_v37, %v833_v45  ;;  %9437 = vst [vmem:[#allocation28_spill] sm:$0xff] %v5944_v54  ;;  %v5318_v24 = vld [vmem:[%s9082_s0 + $0x100] sm:$0xff]  }
  0x71   :  { %v5965_v59 = vunpack.c.h.bf16 %v5318_v24 }
  0x72   :  { %v578_v63 = vadd.f32 %v5905_v31, %v577_v42  ;;  %v1089_v9 = vadd.f32 %v1088_v20, %v834_v40  ;;  %v5957_v20 = vunpack.c.l.bf16 %v5318_v24  ;;  %v843_v31 = vmul.f32 %v5918_v14, %v5918_v14 }
  0x73   :  { %9440 = vst [vmem:[#allocation31_spill] sm:$0xff] %v5965_v59 }
  0x74   :  { %v579_v15 = vadd.f32 %v5913_v28, %v578_v63  ;;  %v836_v63 = vmul.f32 %v5874_v51, %v5874_v51  ;;  %v1090_v45 = vadd.f32 %v1089_v9, %v835_v10  ;;  %9439 = vst [vmem:[#allocation30_spill] sm:$0xff] %v5957_v20  ;;  %v5319_v51 = vld [vmem:[%s9082_s0 + $0x108] sm:$0xff]  }
  0x75   :  { %v5978_v24 = vunpack.c.h.bf16 %v5319_v51 }
  0x76   :  { %v580_v42 = vadd.f32 %v5918_v14, %v579_v15  ;;  %v1091_v40 = vadd.f32 %v1090_v45, %v836_v63  ;;  %v5970_v45 = vunpack.c.l.bf16 %v5319_v51  ;;  %v845_v14 = vmul.f32 %v5931_v36, %v5931_v36 }
  0x77   :  { %9442 = vst [vmem:[#allocation33_spill] sm:$0xff] %v5978_v24 }
  0x78   :  { %v581_v58 = vadd.f32 %v5926_v46, %v580_v42  ;;  %v838_v42 = vmul.f32 %v5887_v22, %v5887_v22  ;;  %v1092_v10 = vadd.f32 %v1091_v40, %v837_v48  ;;  %9441 = vst [vmem:[#allocation32_spill] sm:$0xff] %v5970_v45  ;;  %v5320_v22 = vld [vmem:[%s9082_s0 + $0x110] sm:$0xff]  }
  0x79   :  { %v5991_v51 = vunpack.c.h.bf16 %v5320_v22 }
  0x7a   :  { %v582_v15 = vadd.f32 %v5931_v36, %v581_v58  ;;  %v1093_v63 = vadd.f32 %v1092_v10, %v838_v42  ;;  %v5983_v10 = vunpack.c.l.bf16 %v5320_v22  ;;  %v847_v36 = vmul.f32 %v5944_v54, %v5944_v54 }
  0x7b   :  { %9444 = vst [vmem:[#allocation35_spill] sm:$0xff] %v5991_v51 }
  0x7c   :  { %v583_v37 = vadd.f32 %v5939_v5, %v582_v15  ;;  %v840_v15 = vmul.f32 %v5900_v60, %v5900_v60  ;;  %v1094_v48 = vadd.f32 %v1093_v63, %v839_v29  ;;  %9443 = vst [vmem:[#allocation34_spill] sm:$0xff] %v5983_v10  ;;  %v5321_v60 = vld [vmem:[%s9082_s0 + $0x118] sm:$0xff]  }
  0x7d   :  { %v6004_v22 = vunpack.c.h.bf16 %v5321_v60 }
  0x7e   :  { %v584_v58 = vadd.f32 %v5944_v54, %v583_v37  ;;  %v1095_v42 = vadd.f32 %v1094_v48, %v840_v15  ;;  %v5996_v48 = vunpack.c.l.bf16 %v5321_v60  ;;  %v849_v54 = vmul.f32 %v5957_v20, %v5957_v20 }
  0x7f   :  { %9446 = vst [vmem:[#allocation37_spill] sm:$0xff] %v6004_v22 }
  0x80   :  { %v585_v9 = vadd.f32 %v5952_v33, %v584_v58  ;;  %v842_v58 = vmul.f32 %v5913_v28, %v5913_v28  ;;  %v1096_v29 = vadd.f32 %v1095_v42, %v841_v53  ;;  %9445 = vst [vmem:[#allocation36_spill] sm:$0xff] %v5996_v48  ;;  %v5322_v28 = vld [vmem:[%s9082_s0 + $0x120] sm:$0xff]  }
  0x81   :  { %v6017_v60 = vunpack.c.h.bf16 %v5322_v28 }
  0x82   :  { %v586_v37 = vadd.f32 %v5957_v20, %v585_v9  ;;  %v1097_v15 = vadd.f32 %v1096_v29, %v842_v58  ;;  %v6009_v29 = vunpack.c.l.bf16 %v5322_v28  ;;  %v851_v20 = vmul.f32 %v5970_v45, %v5970_v45 }
  0x83   :  { %9448 = vst [vmem:[#allocation39_spill] sm:$0xff] %v6017_v60 }
  0x84   :  { %v587_v40 = vadd.f32 %v5965_v59, %v586_v37  ;;  %v844_v37 = vmul.f32 %v5926_v46, %v5926_v46  ;;  %v1098_v53 = vadd.f32 %v1097_v15, %v843_v31  ;;  %9447 = vst [vmem:[#allocation38_spill] sm:$0xff] %v6009_v29  ;;  %v5323_v46 = vld [vmem:[%s9082_s0 + $0x128] sm:$0xff]  }
  0x85   :  { %v6030_v28 = vunpack.c.h.bf16 %v5323_v46 }
  0x86   :  { %v588_v9 = vadd.f32 %v5970_v45, %v587_v40  ;;  %v1099_v58 = vadd.f32 %v1098_v53, %v844_v37  ;;  %v6022_v53 = vunpack.c.l.bf16 %v5323_v46  ;;  %v853_v45 = vmul.f32 %v5983_v10, %v5983_v10 }
  0x87   :  { %9450 = vst [vmem:[#allocation41_spill] sm:$0xff] %v6030_v28 }
  0x88   :  { %v589_v63 = vadd.f32 %v5978_v24, %v588_v9  ;;  %v846_v9 = vmul.f32 %v5939_v5, %v5939_v5  ;;  %v1100_v31 = vadd.f32 %v1099_v58, %v845_v14  ;;  %9449 = vst [vmem:[#allocation40_spill] sm:$0xff] %v6022_v53  ;;  %v5324_v5 = vld [vmem:[%s9082_s0 + $0x130] sm:$0xff]  }
  0x89   :  { %v6043_v46 = vunpack.c.h.bf16 %v5324_v5 }
  0x8a   :  { %v590_v40 = vadd.f32 %v5983_v10, %v589_v63  ;;  %v1101_v37 = vadd.f32 %v1100_v31, %v846_v9  ;;  %v6035_v31 = vunpack.c.l.bf16 %v5324_v5  ;;  %v855_v10 = vmul.f32 %v5996_v48, %v5996_v48 }
  0x8b   :  { %9452 = vst [vmem:[#allocation43_spill] sm:$0xff] %v6043_v46 }
  0x8c   :  { %v591_v42 = vadd.f32 %v5991_v51, %v590_v40  ;;  %v848_v40 = vmul.f32 %v5952_v33, %v5952_v33  ;;  %v1102_v14 = vadd.f32 %v1101_v37, %v847_v36  ;;  %9451 = vst [vmem:[#allocation42_spill] sm:$0xff] %v6035_v31  ;;  %v5325_v33 = vld [vmem:[%s9082_s0 + $0x138] sm:$0xff]  }
  0x8d   :  { %v6056_v5 = vunpack.c.h.bf16 %v5325_v33 }
  0x8e   :  { %v592_v63 = vadd.f32 %v5996_v48, %v591_v42  ;;  %v1103_v9 = vadd.f32 %v1102_v14, %v848_v40  ;;  %v6048_v14 = vunpack.c.l.bf16 %v5325_v33  ;;  %v857_v48 = vmul.f32 %v6009_v29, %v6009_v29 }
  0x8f   :  { %9454 = vst [vmem:[#allocation45_spill] sm:$0xff] %v6056_v5 }
  0x90   :  { %v593_v15 = vadd.f32 %v6004_v22, %v592_v63  ;;  %v850_v63 = vmul.f32 %v5965_v59, %v5965_v59  ;;  %v1104_v36 = vadd.f32 %v1103_v9, %v849_v54  ;;  %9453 = vst [vmem:[#allocation44_spill] sm:$0xff] %v6048_v14  ;;  %v5326_v59 = vld [vmem:[%s9082_s0 + $0x140] sm:$0xff]  }
  0x91   :  { %v6069_v33 = vunpack.c.h.bf16 %v5326_v59 }
  0x92   :  { %v594_v42 = vadd.f32 %v6009_v29, %v593_v15  ;;  %v1105_v40 = vadd.f32 %v1104_v36, %v850_v63  ;;  %v6061_v36 = vunpack.c.l.bf16 %v5326_v59  ;;  %v859_v29 = vmul.f32 %v6022_v53, %v6022_v53 }
  0x93   :  { %9456 = vst [vmem:[#allocation47_spill] sm:$0xff] %v6069_v33 }
  0x94   :  { %v595_v58 = vadd.f32 %v6017_v60, %v594_v42  ;;  %v852_v42 = vmul.f32 %v5978_v24, %v5978_v24  ;;  %v1106_v54 = vadd.f32 %v1105_v40, %v851_v20  ;;  %9455 = vst [vmem:[#allocation46_spill] sm:$0xff] %v6061_v36  ;;  %v5327_v24 = vld [vmem:[%s9082_s0 + $0x148] sm:$0xff]  }
  0x95   :  { %v6082_v59 = vunpack.c.h.bf16 %v5327_v24 }
  0x96   :  { %v596_v15 = vadd.f32 %v6022_v53, %v595_v58  ;;  %v1107_v63 = vadd.f32 %v1106_v54, %v852_v42  ;;  %v6074_v54 = vunpack.c.l.bf16 %v5327_v24  ;;  %v861_v53 = vmul.f32 %v6035_v31, %v6035_v31 }
  0x97   :  { %9458 = vst [vmem:[#allocation49_spill] sm:$0xff] %v6082_v59 }
  0x98   :  { %v597_v37 = vadd.f32 %v6030_v28, %v596_v15  ;;  %v854_v15 = vmul.f32 %v5991_v51, %v5991_v51  ;;  %v1108_v20 = vadd.f32 %v1107_v63, %v853_v45  ;;  %9457 = vst [vmem:[#allocation48_spill] sm:$0xff] %v6074_v54  ;;  %v5328_v51 = vld [vmem:[%s9082_s0 + $0x150] sm:$0xff]  }
  0x99   :  { %v6095_v24 = vunpack.c.h.bf16 %v5328_v51 }
  0x9a   :  { %v598_v58 = vadd.f32 %v6035_v31, %v597_v37  ;;  %v1109_v42 = vadd.f32 %v1108_v20, %v854_v15  ;;  %v6087_v20 = vunpack.c.l.bf16 %v5328_v51  ;;  %v863_v31 = vmul.f32 %v6048_v14, %v6048_v14 }
  0x9b   :  { %9460 = vst [vmem:[#allocation51_spill] sm:$0xff] %v6095_v24 }
  0x9c   :  { %v599_v9 = vadd.f32 %v6043_v46, %v598_v58  ;;  %v856_v58 = vmul.f32 %v6004_v22, %v6004_v22  ;;  %v1110_v45 = vadd.f32 %v1109_v42, %v855_v10  ;;  %9459 = vst [vmem:[#allocation50_spill] sm:$0xff] %v6087_v20  ;;  %v5329_v22 = vld [vmem:[%s9082_s0 + $0x158] sm:$0xff]  }
  0x9d   :  { %v6108_v51 = vunpack.c.h.bf16 %v5329_v22 }
  0x9e   :  { %v600_v37 = vadd.f32 %v6048_v14, %v599_v9  ;;  %v1111_v15 = vadd.f32 %v1110_v45, %v856_v58  ;;  %v6100_v45 = vunpack.c.l.bf16 %v5329_v22  ;;  %v865_v14 = vmul.f32 %v6061_v36, %v6061_v36 }
  0x9f   :  { %9462 = vst [vmem:[#allocation53_spill] sm:$0xff] %v6108_v51 }
  0xa0   :  { %v601_v40 = vadd.f32 %v6056_v5, %v600_v37  ;;  %v858_v37 = vmul.f32 %v6017_v60, %v6017_v60  ;;  %v1112_v10 = vadd.f32 %v1111_v15, %v857_v48  ;;  %9461 = vst [vmem:[#allocation52_spill] sm:$0xff] %v6100_v45  ;;  %v5330_v60 = vld [vmem:[%s9082_s0 + $0x160] sm:$0xff]  }
  0xa1   :  { %v6121_v22 = vunpack.c.h.bf16 %v5330_v60 }
  0xa2   :  { %v602_v9 = vadd.f32 %v6061_v36, %v601_v40  ;;  %v1113_v58 = vadd.f32 %v1112_v10, %v858_v37  ;;  %v6113_v10 = vunpack.c.l.bf16 %v5330_v60  ;;  %v867_v36 = vmul.f32 %v6074_v54, %v6074_v54 }
  0xa3   :  { %9464 = vst [vmem:[#allocation55_spill] sm:$0xff] %v6121_v22 }
  0xa4   :  { %v603_v63 = vadd.f32 %v6069_v33, %v602_v9  ;;  %v860_v9 = vmul.f32 %v6030_v28, %v6030_v28  ;;  %v1114_v48 = vadd.f32 %v1113_v58, %v859_v29  ;;  %9463 = vst [vmem:[#allocation54_spill] sm:$0xff] %v6113_v10  ;;  %v5331_v28 = vld [vmem:[%s9082_s0 + $0x168] sm:$0xff]  }
  0xa5   :  { %v6134_v60 = vunpack.c.h.bf16 %v5331_v28 }
  0xa6   :  { %v604_v40 = vadd.f32 %v6074_v54, %v603_v63  ;;  %v1115_v37 = vadd.f32 %v1114_v48, %v860_v9  ;;  %v6126_v48 = vunpack.c.l.bf16 %v5331_v28  ;;  %v869_v54 = vmul.f32 %v6087_v20, %v6087_v20 }
  0xa7   :  { %9466 = vst [vmem:[#allocation57_spill] sm:$0xff] %v6134_v60 }
  0xa8   :  { %v605_v42 = vadd.f32 %v6082_v59, %v604_v40  ;;  %v862_v40 = vmul.f32 %v6043_v46, %v6043_v46  ;;  %v1116_v29 = vadd.f32 %v1115_v37, %v861_v53  ;;  %9465 = vst [vmem:[#allocation56_spill] sm:$0xff] %v6126_v48  ;;  %v5332_v46 = vld [vmem:[%s9082_s0 + $0x170] sm:$0xff]  }
  0xa9   :  { %v6147_v28 = vunpack.c.h.bf16 %v5332_v46 }
  0xaa   :  { %v606_v63 = vadd.f32 %v6087_v20, %v605_v42  ;;  %v1117_v9 = vadd.f32 %v1116_v29, %v862_v40  ;;  %v6139_v29 = vunpack.c.l.bf16 %v5332_v46  ;;  %v871_v20 = vmul.f32 %v6100_v45, %v6100_v45 }
  0xab   :  { %9468 = vst [vmem:[#allocation59_spill] sm:$0xff] %v6147_v28 }
  0xac   :  { %v607_v15 = vadd.f32 %v6095_v24, %v606_v63  ;;  %v864_v63 = vmul.f32 %v6056_v5, %v6056_v5  ;;  %v1118_v53 = vadd.f32 %v1117_v9, %v863_v31  ;;  %9467 = vst [vmem:[#allocation58_spill] sm:$0xff] %v6139_v29  ;;  %v5333_v5 = vld [vmem:[%s9082_s0 + $0x178] sm:$0xff]  }
  0xad   :  { %v6160_v46 = vunpack.c.h.bf16 %v5333_v5 }
  0xae   :  { %v608_v42 = vadd.f32 %v6100_v45, %v607_v15  ;;  %v1119_v40 = vadd.f32 %v1118_v53, %v864_v63  ;;  %v6152_v53 = vunpack.c.l.bf16 %v5333_v5  ;;  %v873_v45 = vmul.f32 %v6113_v10, %v6113_v10 }
  0xaf   :  { %9470 = vst [vmem:[#allocation61_spill] sm:$0xff] %v6160_v46 }
  0xb0   :  { %v609_v58 = vadd.f32 %v6108_v51, %v608_v42  ;;  %v866_v42 = vmul.f32 %v6069_v33, %v6069_v33  ;;  %v1120_v31 = vadd.f32 %v1119_v40, %v865_v14  ;;  %9469 = vst [vmem:[#allocation60_spill] sm:$0xff] %v6152_v53  ;;  %v5334_v33 = vld [vmem:[%s9082_s0 + $0x180] sm:$0xff]  }
  0xb1   :  { %v6173_v5 = vunpack.c.h.bf16 %v5334_v33 }
  0xb2   :  { %v610_v15 = vadd.f32 %v6113_v10, %v609_v58  ;;  %v1121_v63 = vadd.f32 %v1120_v31, %v866_v42  ;;  %v6165_v31 = vunpack.c.l.bf16 %v5334_v33  ;;  %v875_v10 = vmul.f32 %v6126_v48, %v6126_v48 }
  0xb3   :  { %9472 = vst [vmem:[#allocation63_spill] sm:$0xff] %v6173_v5 }
  0xb4   :  { %v611_v37 = vadd.f32 %v6121_v22, %v610_v15  ;;  %v868_v15 = vmul.f32 %v6082_v59, %v6082_v59  ;;  %v1122_v14 = vadd.f32 %v1121_v63, %v867_v36  ;;  %9471 = vst [vmem:[#allocation62_spill] sm:$0xff] %v6165_v31  ;;  %v5335_v59 = vld [vmem:[%s9082_s0 + $0x188] sm:$0xff]  }
  0xb5   :  { %v6186_v33 = vunpack.c.h.bf16 %v5335_v59 }
  0xb6   :  { %v612_v58 = vadd.f32 %v6126_v48, %v611_v37  ;;  %v1123_v42 = vadd.f32 %v1122_v14, %v868_v15  ;;  %v6178_v14 = vunpack.c.l.bf16 %v5335_v59  ;;  %v877_v48 = vmul.f32 %v6139_v29, %v6139_v29 }
  0xb7   :  { %9474 = vst [vmem:[#allocation65_spill] sm:$0xff] %v6186_v33 }
  0xb8   :  { %v613_v9 = vadd.f32 %v6134_v60, %v612_v58  ;;  %v870_v58 = vmul.f32 %v6095_v24, %v6095_v24  ;;  %v1124_v36 = vadd.f32 %v1123_v42, %v869_v54  ;;  %9473 = vst [vmem:[#allocation64_spill] sm:$0xff] %v6178_v14  ;;  %v5336_v24 = vld [vmem:[%s9082_s0 + $0x190] sm:$0xff]  }
  0xb9   :  { %v6199_v59 = vunpack.c.h.bf16 %v5336_v24 }
  0xba   :  { %v614_v37 = vadd.f32 %v6139_v29, %v613_v9  ;;  %v1125_v15 = vadd.f32 %v1124_v36, %v870_v58  ;;  %v6191_v36 = vunpack.c.l.bf16 %v5336_v24  ;;  %v879_v29 = vmul.f32 %v6152_v53, %v6152_v53 }
  0xbb   :  { %9476 = vst [vmem:[#allocation67_spill] sm:$0xff] %v6199_v59 }
  0xbc   :  { %v615_v40 = vadd.f32 %v6147_v28, %v614_v37  ;;  %v872_v37 = vmul.f32 %v6108_v51, %v6108_v51  ;;  %v1126_v54 = vadd.f32 %v1125_v15, %v871_v20  ;;  %9475 = vst [vmem:[#allocation66_spill] sm:$0xff] %v6191_v36  ;;  %v5337_v51 = vld [vmem:[%s9082_s0 + $0x198] sm:$0xff]  }
  0xbd   :  { %v6212_v24 = vunpack.c.h.bf16 %v5337_v51 }
  0xbe   :  { %v616_v9 = vadd.f32 %v6152_v53, %v615_v40  ;;  %v1127_v58 = vadd.f32 %v1126_v54, %v872_v37  ;;  %v6204_v54 = vunpack.c.l.bf16 %v5337_v51  ;;  %v881_v53 = vmul.f32 %v6165_v31, %v6165_v31 }
  0xbf   :  { %9478 = vst [vmem:[#allocation69_spill] sm:$0xff] %v6212_v24 }
  0xc0   :  { %v617_v63 = vadd.f32 %v6160_v46, %v616_v9  ;;  %v874_v9 = vmul.f32 %v6121_v22, %v6121_v22  ;;  %v1128_v20 = vadd.f32 %v1127_v58, %v873_v45  ;;  %9477 = vst [vmem:[#allocation68_spill] sm:$0xff] %v6204_v54  ;;  %v5338_v22 = vld [vmem:[%s9082_s0 + $0x1a0] sm:$0xff]  }
  0xc1   :  { %v6225_v51 = vunpack.c.h.bf16 %v5338_v22 }
  0xc2   :  { %v618_v40 = vadd.f32 %v6165_v31, %v617_v63  ;;  %v1129_v37 = vadd.f32 %v1128_v20, %v874_v9  ;;  %v6217_v20 = vunpack.c.l.bf16 %v5338_v22  ;;  %v883_v31 = vmul.f32 %v6178_v14, %v6178_v14 }
  0xc3   :  { %9480 = vst [vmem:[#allocation71_spill] sm:$0xff] %v6225_v51 }
  0xc4   :  { %v619_v42 = vadd.f32 %v6173_v5, %v618_v40  ;;  %v876_v40 = vmul.f32 %v6134_v60, %v6134_v60  ;;  %v1130_v45 = vadd.f32 %v1129_v37, %v875_v10  ;;  %9479 = vst [vmem:[#allocation70_spill] sm:$0xff] %v6217_v20  ;;  %v5339_v60 = vld [vmem:[%s9082_s0 + $0x1a8] sm:$0xff]  }
  0xc5   :  { %v6238_v22 = vunpack.c.h.bf16 %v5339_v60 }
  0xc6   :  { %v620_v63 = vadd.f32 %v6178_v14, %v619_v42  ;;  %v1131_v9 = vadd.f32 %v1130_v45, %v876_v40  ;;  %v6230_v45 = vunpack.c.l.bf16 %v5339_v60  ;;  %v885_v14 = vmul.f32 %v6191_v36, %v6191_v36 }
  0xc7   :  { %9482 = vst [vmem:[#allocation73_spill] sm:$0xff] %v6238_v22 }
  0xc8   :  { %v621_v15 = vadd.f32 %v6186_v33, %v620_v63  ;;  %v878_v63 = vmul.f32 %v6147_v28, %v6147_v28  ;;  %v1132_v10 = vadd.f32 %v1131_v9, %v877_v48  ;;  %9481 = vst [vmem:[#allocation72_spill] sm:$0xff] %v6230_v45  ;;  %v5340_v28 = vld [vmem:[%s9082_s0 + $0x1b0] sm:$0xff]  }
  0xc9   :  { %v6251_v60 = vunpack.c.h.bf16 %v5340_v28 }
  0xca   :  { %v622_v42 = vadd.f32 %v6191_v36, %v621_v15  ;;  %v1133_v40 = vadd.f32 %v1132_v10, %v878_v63  ;;  %v6243_v10 = vunpack.c.l.bf16 %v5340_v28  ;;  %v887_v36 = vmul.f32 %v6204_v54, %v6204_v54 }
  0xcb   :  { %9484 = vst [vmem:[#allocation75_spill] sm:$0xff] %v6251_v60 }
  0xcc   :  { %v623_v58 = vadd.f32 %v6199_v59, %v622_v42  ;;  %v880_v42 = vmul.f32 %v6160_v46, %v6160_v46  ;;  %v1134_v48 = vadd.f32 %v1133_v40, %v879_v29  ;;  %9483 = vst [vmem:[#allocation74_spill] sm:$0xff] %v6243_v10  ;;  %v5341_v46 = vld [vmem:[%s9082_s0 + $0x1b8] sm:$0xff]  }
  0xcd   :  { %v6264_v28 = vunpack.c.h.bf16 %v5341_v46 }
  0xce   :  { %v624_v15 = vadd.f32 %v6204_v54, %v623_v58  ;;  %v1135_v63 = vadd.f32 %v1134_v48, %v880_v42  ;;  %v6256_v48 = vunpack.c.l.bf16 %v5341_v46  ;;  %v889_v54 = vmul.f32 %v6217_v20, %v6217_v20 }
  0xcf   :  { %9486 = vst [vmem:[#allocation77_spill] sm:$0xff] %v6264_v28 }
  0xd0   :  { %v625_v37 = vadd.f32 %v6212_v24, %v624_v15  ;;  %v882_v15 = vmul.f32 %v6173_v5, %v6173_v5  ;;  %v1136_v29 = vadd.f32 %v1135_v63, %v881_v53  ;;  %9485 = vst [vmem:[#allocation76_spill] sm:$0xff] %v6256_v48  ;;  %v5342_v5 = vld [vmem:[%s9082_s0 + $0x1c0] sm:$0xff]  }
  0xd1   :  { %v6277_v46 = vunpack.c.h.bf16 %v5342_v5 }
  0xd2   :  { %v626_v58 = vadd.f32 %v6217_v20, %v625_v37  ;;  %v1137_v42 = vadd.f32 %v1136_v29, %v882_v15  ;;  %v6269_v29 = vunpack.c.l.bf16 %v5342_v5  ;;  %v891_v20 = vmul.f32 %v6230_v45, %v6230_v45 }
  0xd3   :  { %9488 = vst [vmem:[#allocation79_spill] sm:$0xff] %v6277_v46 }
  0xd4   :  { %v627_v9 = vadd.f32 %v6225_v51, %v626_v58  ;;  %v884_v58 = vmul.f32 %v6186_v33, %v6186_v33  ;;  %v1138_v53 = vadd.f32 %v1137_v42, %v883_v31  ;;  %9487 = vst [vmem:[#allocation78_spill] sm:$0xff] %v6269_v29  ;;  %v5343_v33 = vld [vmem:[%s9082_s0 + $0x1c8] sm:$0xff]  }
  0xd5   :  { %v6290_v5 = vunpack.c.h.bf16 %v5343_v33 }
  0xd6   :  { %v628_v37 = vadd.f32 %v6230_v45, %v627_v9  ;;  %v1139_v15 = vadd.f32 %v1138_v53, %v884_v58  ;;  %v6282_v53 = vunpack.c.l.bf16 %v5343_v33  ;;  %v893_v45 = vmul.f32 %v6243_v10, %v6243_v10 }
  0xd7   :  { %9490 = vst [vmem:[#allocation81_spill] sm:$0xff] %v6290_v5 }
  0xd8   :  { %v629_v40 = vadd.f32 %v6238_v22, %v628_v37  ;;  %v886_v37 = vmul.f32 %v6199_v59, %v6199_v59  ;;  %v1140_v31 = vadd.f32 %v1139_v15, %v885_v14  ;;  %9489 = vst [vmem:[#allocation80_spill] sm:$0xff] %v6282_v53  ;;  %v5344_v59 = vld [vmem:[%s9082_s0 + $0x1d0] sm:$0xff]  }
  0xd9   :  { %v6303_v33 = vunpack.c.h.bf16 %v5344_v59 }
  0xda   :  { %v630_v9 = vadd.f32 %v6243_v10, %v629_v40  ;;  %v1141_v58 = vadd.f32 %v1140_v31, %v886_v37  ;;  %v6295_v31 = vunpack.c.l.bf16 %v5344_v59  ;;  %v895_v10 = vmul.f32 %v6256_v48, %v6256_v48 }
  0xdb   :  { %9492 = vst [vmem:[#allocation83_spill] sm:$0xff] %v6303_v33 }
  0xdc   :  { %v631_v63 = vadd.f32 %v6251_v60, %v630_v9  ;;  %v888_v9 = vmul.f32 %v6212_v24, %v6212_v24  ;;  %v1142_v14 = vadd.f32 %v1141_v58, %v887_v36  ;;  %9491 = vst [vmem:[#allocation82_spill] sm:$0xff] %v6295_v31  ;;  %v5345_v24 = vld [vmem:[%s9082_s0 + $0x1d8] sm:$0xff]  }
  0xdd   :  { %v6316_v59 = vunpack.c.h.bf16 %v5345_v24 }
  0xde   :  { %v632_v40 = vadd.f32 %v6256_v48, %v631_v63  ;;  %v1143_v37 = vadd.f32 %v1142_v14, %v888_v9  ;;  %v6308_v14 = vunpack.c.l.bf16 %v5345_v24  ;;  %v897_v48 = vmul.f32 %v6269_v29, %v6269_v29 }
  0xdf   :  { %9494 = vst [vmem:[#allocation85_spill] sm:$0xff] %v6316_v59 }
  0xe0   :  { %v633_v42 = vadd.f32 %v6264_v28, %v632_v40  ;;  %v890_v40 = vmul.f32 %v6225_v51, %v6225_v51  ;;  %v1144_v36 = vadd.f32 %v1143_v37, %v889_v54  ;;  %9493 = vst [vmem:[#allocation84_spill] sm:$0xff] %v6308_v14  ;;  %v5346_v51 = vld [vmem:[%s9082_s0 + $0x1e0] sm:$0xff]  }
  0xe1   :  { %v6329_v24 = vunpack.c.h.bf16 %v5346_v51 }
  0xe2   :  { %v634_v63 = vadd.f32 %v6269_v29, %v633_v42  ;;  %v1145_v9 = vadd.f32 %v1144_v36, %v890_v40  ;;  %v6321_v36 = vunpack.c.l.bf16 %v5346_v51  ;;  %v899_v29 = vmul.f32 %v6282_v53, %v6282_v53 }
  0xe3   :  { %9496 = vst [vmem:[#allocation87_spill] sm:$0xff] %v6329_v24 }
  0xe4   :  { %v635_v15 = vadd.f32 %v6277_v46, %v634_v63  ;;  %v892_v63 = vmul.f32 %v6238_v22, %v6238_v22  ;;  %v1146_v54 = vadd.f32 %v1145_v9, %v891_v20  ;;  %9495 = vst [vmem:[#allocation86_spill] sm:$0xff] %v6321_v36  ;;  %v5347_v22 = vld [vmem:[%s9082_s0 + $0x1e8] sm:$0xff]  }
  0xe5   :  { %v6342_v51 = vunpack.c.h.bf16 %v5347_v22 }
  0xe6   :  { %v636_v42 = vadd.f32 %v6282_v53, %v635_v15  ;;  %v1147_v40 = vadd.f32 %v1146_v54, %v892_v63  ;;  %v6334_v54 = vunpack.c.l.bf16 %v5347_v22  ;;  %v901_v53 = vmul.f32 %v6295_v31, %v6295_v31 }
  0xe7   :  { %9498 = vst [vmem:[#allocation89_spill] sm:$0xff] %v6342_v51 }
  0xe8   :  { %v637_v58 = vadd.f32 %v6290_v5, %v636_v42  ;;  %v894_v42 = vmul.f32 %v6251_v60, %v6251_v60  ;;  %v1148_v20 = vadd.f32 %v1147_v40, %v893_v45  ;;  %9497 = vst [vmem:[#allocation88_spill] sm:$0xff] %v6334_v54  ;;  %v5348_v60 = vld [vmem:[%s9082_s0 + $0x1f0] sm:$0xff]  }
  0xe9   :  { %v6355_v22 = vunpack.c.h.bf16 %v5348_v60 }
  0xea   :  { %v638_v15 = vadd.f32 %v6295_v31, %v637_v58  ;;  %v1149_v63 = vadd.f32 %v1148_v20, %v894_v42  ;;  %v6347_v20 = vunpack.c.l.bf16 %v5348_v60  ;;  %v903_v31 = vmul.f32 %v6308_v14, %v6308_v14 }
  0xeb   :  { %9500 = vst [vmem:[#allocation91_spill] sm:$0xff] %v6355_v22 }
  0xec   :  { %v639_v37 = vadd.f32 %v6303_v33, %v638_v15  ;;  %v896_v15 = vmul.f32 %v6264_v28, %v6264_v28  ;;  %v1150_v45 = vadd.f32 %v1149_v63, %v895_v10  ;;  %9499 = vst [vmem:[#allocation90_spill] sm:$0xff] %v6347_v20  ;;  %v5349_v28 = vld [vmem:[%s9082_s0 + $0x1f8] sm:$0xff]  }
  0xed   :  { %v6368_v60 = vunpack.c.h.bf16 %v5349_v28 }
  0xee   :  { %v640_v58 = vadd.f32 %v6308_v14, %v639_v37  ;;  %v1151_v42 = vadd.f32 %v1150_v45, %v896_v15  ;;  %v6360_v45 = vunpack.c.l.bf16 %v5349_v28  ;;  %v905_v14 = vmul.f32 %v6321_v36, %v6321_v36 }
  0xef   :  { %9502 = vst [vmem:[#allocation93_spill] sm:$0xff] %v6368_v60 }
  0xf0   :  { %v641_v9 = vadd.f32 %v6316_v59, %v640_v58  ;;  %v898_v58 = vmul.f32 %v6277_v46, %v6277_v46  ;;  %v1152_v10 = vadd.f32 %v1151_v42, %v897_v48  ;;  %9501 = vst [vmem:[#allocation92_spill] sm:$0xff] %v6360_v45  ;;  %v5350_v46 = vld [vmem:[%s9082_s0 + $0x200] sm:$0xff]  }
  0xf1   :  { %v6381_v28 = vunpack.c.h.bf16 %v5350_v46 }
  0xf2   :  { %v642_v37 = vadd.f32 %v6321_v36, %v641_v9  ;;  %v1153_v15 = vadd.f32 %v1152_v10, %v898_v58  ;;  %v6373_v10 = vunpack.c.l.bf16 %v5350_v46  ;;  %v907_v36 = vmul.f32 %v6334_v54, %v6334_v54 }
  0xf3   :  { %9504 = vst [vmem:[#allocation95_spill] sm:$0xff] %v6381_v28 }
  0xf4   :  { %v643_v40 = vadd.f32 %v6329_v24, %v642_v37  ;;  %v900_v37 = vmul.f32 %v6290_v5, %v6290_v5  ;;  %v1154_v48 = vadd.f32 %v1153_v15, %v899_v29  ;;  %9503 = vst [vmem:[#allocation94_spill] sm:$0xff] %v6373_v10  ;;  %v5351_v5 = vld [vmem:[%s9082_s0 + $0x208] sm:$0xff]  }
  0xf5   :  { %v6394_v46 = vunpack.c.h.bf16 %v5351_v5 }
  0xf6   :  { %v644_v9 = vadd.f32 %v6334_v54, %v643_v40  ;;  %v1155_v58 = vadd.f32 %v1154_v48, %v900_v37  ;;  %v6386_v48 = vunpack.c.l.bf16 %v5351_v5  ;;  %v909_v54 = vmul.f32 %v6347_v20, %v6347_v20 }
  0xf7   :  { %9506 = vst [vmem:[#allocation97_spill] sm:$0xff] %v6394_v46 }
  0xf8   :  { %v645_v63 = vadd.f32 %v6342_v51, %v644_v9  ;;  %v902_v9 = vmul.f32 %v6303_v33, %v6303_v33  ;;  %v1156_v29 = vadd.f32 %v1155_v58, %v901_v53  ;;  %9505 = vst [vmem:[#allocation96_spill] sm:$0xff] %v6386_v48  ;;  %v5352_v33 = vld [vmem:[%s9082_s0 + $0x210] sm:$0xff]  }
  0xf9   :  { %v6407_v5 = vunpack.c.h.bf16 %v5352_v33 }
  0xfa   :  { %v646_v40 = vadd.f32 %v6347_v20, %v645_v63  ;;  %v1157_v37 = vadd.f32 %v1156_v29, %v902_v9  ;;  %v6399_v29 = vunpack.c.l.bf16 %v5352_v33  ;;  %v911_v20 = vmul.f32 %v6360_v45, %v6360_v45 }
  0xfb   :  { %9508 = vst [vmem:[#allocation99_spill] sm:$0xff] %v6407_v5 }
  0xfc   :  { %v647_v42 = vadd.f32 %v6355_v22, %v646_v40  ;;  %v904_v40 = vmul.f32 %v6316_v59, %v6316_v59  ;;  %v1158_v53 = vadd.f32 %v1157_v37, %v903_v31  ;;  %9507 = vst [vmem:[#allocation98_spill] sm:$0xff] %v6399_v29  ;;  %v5353_v59 = vld [vmem:[%s9082_s0 + $0x218] sm:$0xff]  }
  0xfd   :  { %v6420_v33 = vunpack.c.h.bf16 %v5353_v59 }
  0xfe   :  { %v648_v63 = vadd.f32 %v6360_v45, %v647_v42  ;;  %v1159_v9 = vadd.f32 %v1158_v53, %v904_v40  ;;  %v6412_v53 = vunpack.c.l.bf16 %v5353_v59  ;;  %v913_v45 = vmul.f32 %v6373_v10, %v6373_v10 }
  0xff   :  { %9510 = vst [vmem:[#allocation101_spill] sm:$0xff] %v6420_v33 }
 0x100   :  { %v649_v15 = vadd.f32 %v6368_v60, %v648_v63  ;;  %v906_v63 = vmul.f32 %v6329_v24, %v6329_v24  ;;  %v1160_v31 = vadd.f32 %v1159_v9, %v905_v14  ;;  %9509 = vst [vmem:[#allocation100_spill] sm:$0xff] %v6412_v53  ;;  %v5354_v24 = vld [vmem:[%s9082_s0 + $0x220] sm:$0xff]  }
 0x101   :  { %v6433_v59 = vunpack.c.h.bf16 %v5354_v24 }
 0x102   :  { %v650_v42 = vadd.f32 %v6373_v10, %v649_v15  ;;  %v1161_v40 = vadd.f32 %v1160_v31, %v906_v63  ;;  %v6425_v31 = vunpack.c.l.bf16 %v5354_v24  ;;  %v915_v10 = vmul.f32 %v6386_v48, %v6386_v48 }
 0x103   :  { %9512 = vst [vmem:[#allocation103_spill] sm:$0xff] %v6433_v59 }
 0x104   :  { %v651_v58 = vadd.f32 %v6381_v28, %v650_v42  ;;  %v908_v42 = vmul.f32 %v6342_v51, %v6342_v51  ;;  %v1162_v14 = vadd.f32 %v1161_v40, %v907_v36  ;;  %9511 = vst [vmem:[#allocation102_spill] sm:$0xff] %v6425_v31  ;;  %v5355_v51 = vld [vmem:[%s9082_s0 + $0x228] sm:$0xff]  }
 0x105   :  { %v6446_v24 = vunpack.c.h.bf16 %v5355_v51 }
 0x106   :  { %v652_v15 = vadd.f32 %v6386_v48, %v651_v58  ;;  %v1163_v63 = vadd.f32 %v1162_v14, %v908_v42  ;;  %v6438_v14 = vunpack.c.l.bf16 %v5355_v51  ;;  %v917_v48 = vmul.f32 %v6399_v29, %v6399_v29 }
 0x107   :  { %9514 = vst [vmem:[#allocation105_spill] sm:$0xff] %v6446_v24 }
 0x108   :  { %v653_v37 = vadd.f32 %v6394_v46, %v652_v15  ;;  %v910_v15 = vmul.f32 %v6355_v22, %v6355_v22  ;;  %v1164_v36 = vadd.f32 %v1163_v63, %v909_v54  ;;  %9513 = vst [vmem:[#allocation104_spill] sm:$0xff] %v6438_v14  ;;  %v5356_v22 = vld [vmem:[%s9082_s0 + $0x230] sm:$0xff]  }
 0x109   :  { %v6459_v51 = vunpack.c.h.bf16 %v5356_v22 }
 0x10a   :  { %v654_v58 = vadd.f32 %v6399_v29, %v653_v37  ;;  %v1165_v42 = vadd.f32 %v1164_v36, %v910_v15  ;;  %v6451_v36 = vunpack.c.l.bf16 %v5356_v22  ;;  %v919_v29 = vmul.f32 %v6412_v53, %v6412_v53 }
 0x10b   :  { %9516 = vst [vmem:[#allocation107_spill] sm:$0xff] %v6459_v51 }
 0x10c   :  { %v655_v9 = vadd.f32 %v6407_v5, %v654_v58  ;;  %v912_v58 = vmul.f32 %v6368_v60, %v6368_v60  ;;  %v1166_v54 = vadd.f32 %v1165_v42, %v911_v20  ;;  %9515 = vst [vmem:[#allocation106_spill] sm:$0xff] %v6451_v36  ;;  %v5357_v60 = vld [vmem:[%s9082_s0 + $0x238] sm:$0xff]  }
 0x10d   :  { %v6472_v22 = vunpack.c.h.bf16 %v5357_v60 }
 0x10e   :  { %v656_v37 = vadd.f32 %v6412_v53, %v655_v9  ;;  %v1167_v15 = vadd.f32 %v1166_v54, %v912_v58  ;;  %v6464_v54 = vunpack.c.l.bf16 %v5357_v60  ;;  %v921_v53 = vmul.f32 %v6425_v31, %v6425_v31 }
 0x10f   :  { %9518 = vst [vmem:[#allocation109_spill] sm:$0xff] %v6472_v22 }
 0x110   :  { %v657_v40 = vadd.f32 %v6420_v33, %v656_v37  ;;  %v914_v37 = vmul.f32 %v6381_v28, %v6381_v28  ;;  %v1168_v20 = vadd.f32 %v1167_v15, %v913_v45  ;;  %9517 = vst [vmem:[#allocation108_spill] sm:$0xff] %v6464_v54  ;;  %v5358_v28 = vld [vmem:[%s9082_s0 + $0x240] sm:$0xff]  }
 0x111   :  { %v6485_v60 = vunpack.c.h.bf16 %v5358_v28 }
 0x112   :  { %v658_v9 = vadd.f32 %v6425_v31, %v657_v40  ;;  %v1169_v58 = vadd.f32 %v1168_v20, %v914_v37  ;;  %v6477_v20 = vunpack.c.l.bf16 %v5358_v28  ;;  %v923_v31 = vmul.f32 %v6438_v14, %v6438_v14 }
 0x113   :  { %9520 = vst [vmem:[#allocation111_spill] sm:$0xff] %v6485_v60 }
 0x114   :  { %v659_v63 = vadd.f32 %v6433_v59, %v658_v9  ;;  %v916_v9 = vmul.f32 %v6394_v46, %v6394_v46  ;;  %v1170_v45 = vadd.f32 %v1169_v58, %v915_v10  ;;  %9519 = vst [vmem:[#allocation110_spill] sm:$0xff] %v6477_v20  ;;  %v5359_v46 = vld [vmem:[%s9082_s0 + $0x248] sm:$0xff]  }
 0x115   :  { %v6498_v28 = vunpack.c.h.bf16 %v5359_v46 }
 0x116   :  { %v660_v40 = vadd.f32 %v6438_v14, %v659_v63  ;;  %v1171_v37 = vadd.f32 %v1170_v45, %v916_v9  ;;  %v6490_v45 = vunpack.c.l.bf16 %v5359_v46  ;;  %v925_v14 = vmul.f32 %v6451_v36, %v6451_v36 }
 0x117   :  { %9522 = vst [vmem:[#allocation113_spill] sm:$0xff] %v6498_v28 }
 0x118   :  { %v661_v42 = vadd.f32 %v6446_v24, %v660_v40  ;;  %v918_v40 = vmul.f32 %v6407_v5, %v6407_v5  ;;  %v1172_v10 = vadd.f32 %v1171_v37, %v917_v48  ;;  %9521 = vst [vmem:[#allocation112_spill] sm:$0xff] %v6490_v45  ;;  %v5360_v5 = vld [vmem:[%s9082_s0 + $0x250] sm:$0xff]  }
 0x119   :  { %v6511_v46 = vunpack.c.h.bf16 %v5360_v5 }
 0x11a   :  { %v662_v63 = vadd.f32 %v6451_v36, %v661_v42  ;;  %v1173_v9 = vadd.f32 %v1172_v10, %v918_v40  ;;  %v6503_v10 = vunpack.c.l.bf16 %v5360_v5  ;;  %v927_v36 = vmul.f32 %v6464_v54, %v6464_v54 }
 0x11b   :  { %9524 = vst [vmem:[#allocation115_spill] sm:$0xff] %v6511_v46 }
 0x11c   :  { %v663_v15 = vadd.f32 %v6459_v51, %v662_v63  ;;  %v920_v63 = vmul.f32 %v6420_v33, %v6420_v33  ;;  %v1174_v48 = vadd.f32 %v1173_v9, %v919_v29  ;;  %9523 = vst [vmem:[#allocation114_spill] sm:$0xff] %v6503_v10  ;;  %v5361_v33 = vld [vmem:[%s9082_s0 + $0x258] sm:$0xff]  }
 0x11d   :  { %v6524_v5 = vunpack.c.h.bf16 %v5361_v33 }
 0x11e   :  { %v664_v42 = vadd.f32 %v6464_v54, %v663_v15  ;;  %v1175_v40 = vadd.f32 %v1174_v48, %v920_v63  ;;  %v6516_v48 = vunpack.c.l.bf16 %v5361_v33  ;;  %v929_v54 = vmul.f32 %v6477_v20, %v6477_v20 }
 0x11f   :  { %9526 = vst [vmem:[#allocation117_spill] sm:$0xff] %v6524_v5 }
 0x120   :  { %v665_v58 = vadd.f32 %v6472_v22, %v664_v42  ;;  %v922_v42 = vmul.f32 %v6433_v59, %v6433_v59  ;;  %v1176_v29 = vadd.f32 %v1175_v40, %v921_v53  ;;  %9525 = vst [vmem:[#allocation116_spill] sm:$0xff] %v6516_v48  ;;  %v5362_v59 = vld [vmem:[%s9082_s0 + $0x260] sm:$0xff]  }
 0x121   :  { %v6537_v33 = vunpack.c.h.bf16 %v5362_v59 }
 0x122   :  { %v666_v15 = vadd.f32 %v6477_v20, %v665_v58  ;;  %v1177_v63 = vadd.f32 %v1176_v29, %v922_v42  ;;  %v6529_v29 = vunpack.c.l.bf16 %v5362_v59  ;;  %v931_v20 = vmul.f32 %v6490_v45, %v6490_v45 }
 0x123   :  { %9528 = vst [vmem:[#allocation119_spill] sm:$0xff] %v6537_v33 }
 0x124   :  { %v667_v37 = vadd.f32 %v6485_v60, %v666_v15  ;;  %v924_v15 = vmul.f32 %v6446_v24, %v6446_v24  ;;  %v1178_v53 = vadd.f32 %v1177_v63, %v923_v31  ;;  %9527 = vst [vmem:[#allocation118_spill] sm:$0xff] %v6529_v29  ;;  %v5363_v24 = vld [vmem:[%s9082_s0 + $0x268] sm:$0xff]  }
 0x125   :  { %v6550_v59 = vunpack.c.h.bf16 %v5363_v24 }
 0x126   :  { %v668_v58 = vadd.f32 %v6490_v45, %v667_v37  ;;  %v1179_v42 = vadd.f32 %v1178_v53, %v924_v15  ;;  %v6542_v53 = vunpack.c.l.bf16 %v5363_v24  ;;  %v933_v45 = vmul.f32 %v6503_v10, %v6503_v10 }
 0x127   :  { %9530 = vst [vmem:[#allocation121_spill] sm:$0xff] %v6550_v59 }
 0x128   :  { %v669_v9 = vadd.f32 %v6498_v28, %v668_v58  ;;  %v926_v58 = vmul.f32 %v6459_v51, %v6459_v51  ;;  %v1180_v31 = vadd.f32 %v1179_v42, %v925_v14  ;;  %9529 = vst [vmem:[#allocation120_spill] sm:$0xff] %v6542_v53  ;;  %v5364_v51 = vld [vmem:[%s9082_s0 + $0x270] sm:$0xff]  }
 0x129   :  { %v6563_v24 = vunpack.c.h.bf16 %v5364_v51 }
 0x12a   :  { %v670_v37 = vadd.f32 %v6503_v10, %v669_v9  ;;  %v1181_v15 = vadd.f32 %v1180_v31, %v926_v58  ;;  %v6555_v31 = vunpack.c.l.bf16 %v5364_v51  ;;  %v935_v10 = vmul.f32 %v6516_v48, %v6516_v48 }
 0x12b   :  { %9532 = vst [vmem:[#allocation123_spill] sm:$0xff] %v6563_v24 }
 0x12c   :  { %v671_v40 = vadd.f32 %v6511_v46, %v670_v37  ;;  %v928_v37 = vmul.f32 %v6472_v22, %v6472_v22  ;;  %v1182_v14 = vadd.f32 %v1181_v15, %v927_v36  ;;  %9531 = vst [vmem:[#allocation122_spill] sm:$0xff] %v6555_v31  ;;  %v5365_v22 = vld [vmem:[%s9082_s0 + $0x278] sm:$0xff]  }
 0x12d   :  { %v6576_v51 = vunpack.c.h.bf16 %v5365_v22 }
 0x12e   :  { %v672_v9 = vadd.f32 %v6516_v48, %v671_v40  ;;  %v1183_v58 = vadd.f32 %v1182_v14, %v928_v37  ;;  %v6568_v14 = vunpack.c.l.bf16 %v5365_v22  ;;  %v937_v48 = vmul.f32 %v6529_v29, %v6529_v29 }
 0x12f   :  { %9534 = vst [vmem:[#allocation125_spill] sm:$0xff] %v6576_v51 }
 0x130   :  { %v673_v63 = vadd.f32 %v6524_v5, %v672_v9  ;;  %v930_v9 = vmul.f32 %v6485_v60, %v6485_v60  ;;  %v1184_v36 = vadd.f32 %v1183_v58, %v929_v54  ;;  %9533 = vst [vmem:[#allocation124_spill] sm:$0xff] %v6568_v14  ;;  %v5366_v60 = vld [vmem:[%s9082_s0 + $0x280] sm:$0xff]  }
 0x131   :  { %v6589_v22 = vunpack.c.h.bf16 %v5366_v60 }
 0x132   :  { %v674_v40 = vadd.f32 %v6529_v29, %v673_v63  ;;  %v1185_v37 = vadd.f32 %v1184_v36, %v930_v9  ;;  %v6581_v36 = vunpack.c.l.bf16 %v5366_v60  ;;  %v939_v29 = vmul.f32 %v6542_v53, %v6542_v53 }
 0x133   :  { %9536 = vst [vmem:[#allocation127_spill] sm:$0xff] %v6589_v22 }
 0x134   :  { %v675_v42 = vadd.f32 %v6537_v33, %v674_v40  ;;  %v932_v40 = vmul.f32 %v6498_v28, %v6498_v28  ;;  %v1186_v54 = vadd.f32 %v1185_v37, %v931_v20  ;;  %9535 = vst [vmem:[#allocation126_spill] sm:$0xff] %v6581_v36  ;;  %v5367_v28 = vld [vmem:[%s9082_s0 + $0x288] sm:$0xff]  }
 0x135   :  { %v6602_v60 = vunpack.c.h.bf16 %v5367_v28 }
 0x136   :  { %v676_v63 = vadd.f32 %v6542_v53, %v675_v42  ;;  %v1187_v9 = vadd.f32 %v1186_v54, %v932_v40  ;;  %v6594_v54 = vunpack.c.l.bf16 %v5367_v28  ;;  %v941_v53 = vmul.f32 %v6555_v31, %v6555_v31 }
 0x137   :  { %9538 = vst [vmem:[#allocation129_spill] sm:$0xff] %v6602_v60 }
 0x138   :  { %v677_v15 = vadd.f32 %v6550_v59, %v676_v63  ;;  %v934_v63 = vmul.f32 %v6511_v46, %v6511_v46  ;;  %v1188_v20 = vadd.f32 %v1187_v9, %v933_v45  ;;  %9537 = vst [vmem:[#allocation128_spill] sm:$0xff] %v6594_v54  ;;  %v5368_v46 = vld [vmem:[%s9082_s0 + $0x290] sm:$0xff]  }
 0x139   :  { %v6615_v28 = vunpack.c.h.bf16 %v5368_v46 }
 0x13a   :  { %v678_v42 = vadd.f32 %v6555_v31, %v677_v15  ;;  %v1189_v40 = vadd.f32 %v1188_v20, %v934_v63  ;;  %v6607_v20 = vunpack.c.l.bf16 %v5368_v46  ;;  %v943_v31 = vmul.f32 %v6568_v14, %v6568_v14 }
 0x13b   :  { %9540 = vst [vmem:[#allocation131_spill] sm:$0xff] %v6615_v28 }
 0x13c   :  { %v679_v58 = vadd.f32 %v6563_v24, %v678_v42  ;;  %v936_v42 = vmul.f32 %v6524_v5, %v6524_v5  ;;  %v1190_v45 = vadd.f32 %v1189_v40, %v935_v10  ;;  %9539 = vst [vmem:[#allocation130_spill] sm:$0xff] %v6607_v20  ;;  %v5369_v5 = vld [vmem:[%s9082_s0 + $0x298] sm:$0xff]  }
 0x13d   :  { %v6628_v46 = vunpack.c.h.bf16 %v5369_v5 }
 0x13e   :  { %v680_v15 = vadd.f32 %v6568_v14, %v679_v58  ;;  %v1191_v63 = vadd.f32 %v1190_v45, %v936_v42  ;;  %v6620_v45 = vunpack.c.l.bf16 %v5369_v5  ;;  %v945_v14 = vmul.f32 %v6581_v36, %v6581_v36 }
 0x13f   :  { %9542 = vst [vmem:[#allocation133_spill] sm:$0xff] %v6628_v46 }
 0x140   :  { %v681_v37 = vadd.f32 %v6576_v51, %v680_v15  ;;  %v938_v15 = vmul.f32 %v6537_v33, %v6537_v33  ;;  %v1192_v10 = vadd.f32 %v1191_v63, %v937_v48  ;;  %9541 = vst [vmem:[#allocation132_spill] sm:$0xff] %v6620_v45  ;;  %v5370_v33 = vld [vmem:[%s9082_s0 + $0x2a0] sm:$0xff]  }
 0x141   :  { %v6641_v5 = vunpack.c.h.bf16 %v5370_v33 }
 0x142   :  { %v682_v58 = vadd.f32 %v6581_v36, %v681_v37  ;;  %v1193_v42 = vadd.f32 %v1192_v10, %v938_v15  ;;  %v6633_v10 = vunpack.c.l.bf16 %v5370_v33  ;;  %v947_v36 = vmul.f32 %v6594_v54, %v6594_v54 }
 0x143   :  { %9544 = vst [vmem:[#allocation135_spill] sm:$0xff] %v6641_v5 }
 0x144   :  { %v683_v9 = vadd.f32 %v6589_v22, %v682_v58  ;;  %v940_v58 = vmul.f32 %v6550_v59, %v6550_v59  ;;  %v1194_v48 = vadd.f32 %v1193_v42, %v939_v29  ;;  %9543 = vst [vmem:[#allocation134_spill] sm:$0xff] %v6633_v10  ;;  %v5371_v59 = vld [vmem:[%s9082_s0 + $0x2a8] sm:$0xff]  }
 0x145   :  { %v6654_v33 = vunpack.c.h.bf16 %v5371_v59 }
 0x146   :  { %v684_v37 = vadd.f32 %v6594_v54, %v683_v9  ;;  %v1195_v15 = vadd.f32 %v1194_v48, %v940_v58  ;;  %v6646_v48 = vunpack.c.l.bf16 %v5371_v59  ;;  %v949_v54 = vmul.f32 %v6607_v20, %v6607_v20 }
 0x147   :  { %9546 = vst [vmem:[#allocation137_spill] sm:$0xff] %v6654_v33 }
 0x148   :  { %v685_v40 = vadd.f32 %v6602_v60, %v684_v37  ;;  %v942_v37 = vmul.f32 %v6563_v24, %v6563_v24  ;;  %v1196_v29 = vadd.f32 %v1195_v15, %v941_v53  ;;  %9545 = vst [vmem:[#allocation136_spill] sm:$0xff] %v6646_v48  ;;  %v5372_v24 = vld [vmem:[%s9082_s0 + $0x2b0] sm:$0xff]  }
 0x149   :  { %v6667_v59 = vunpack.c.h.bf16 %v5372_v24 }
 0x14a   :  { %v686_v9 = vadd.f32 %v6607_v20, %v685_v40  ;;  %v1197_v58 = vadd.f32 %v1196_v29, %v942_v37  ;;  %v6659_v29 = vunpack.c.l.bf16 %v5372_v24  ;;  %v951_v20 = vmul.f32 %v6620_v45, %v6620_v45 }
 0x14b   :  { %9548 = vst [vmem:[#allocation139_spill] sm:$0xff] %v6667_v59 }
 0x14c   :  { %v687_v63 = vadd.f32 %v6615_v28, %v686_v9  ;;  %v944_v9 = vmul.f32 %v6576_v51, %v6576_v51  ;;  %v1198_v53 = vadd.f32 %v1197_v58, %v943_v31  ;;  %9547 = vst [vmem:[#allocation138_spill] sm:$0xff] %v6659_v29  ;;  %v5373_v51 = vld [vmem:[%s9082_s0 + $0x2b8] sm:$0xff]  }
 0x14d   :  { %v6680_v24 = vunpack.c.h.bf16 %v5373_v51 }
 0x14e   :  { %v688_v40 = vadd.f32 %v6620_v45, %v687_v63  ;;  %v1199_v37 = vadd.f32 %v1198_v53, %v944_v9  ;;  %v6672_v53 = vunpack.c.l.bf16 %v5373_v51  ;;  %v953_v45 = vmul.f32 %v6633_v10, %v6633_v10 }
 0x14f   :  { %9550 = vst [vmem:[#allocation141_spill] sm:$0xff] %v6680_v24 }
 0x150   :  { %v689_v42 = vadd.f32 %v6628_v46, %v688_v40  ;;  %v946_v40 = vmul.f32 %v6589_v22, %v6589_v22  ;;  %v1200_v31 = vadd.f32 %v1199_v37, %v945_v14  ;;  %9549 = vst [vmem:[#allocation140_spill] sm:$0xff] %v6672_v53  ;;  %v5374_v22 = vld [vmem:[%s9082_s0 + $0x2c0] sm:$0xff]  }
 0x151   :  { %v6693_v51 = vunpack.c.h.bf16 %v5374_v22 }
 0x152   :  { %v690_v63 = vadd.f32 %v6633_v10, %v689_v42  ;;  %v1201_v9 = vadd.f32 %v1200_v31, %v946_v40  ;;  %v6685_v31 = vunpack.c.l.bf16 %v5374_v22  ;;  %v955_v10 = vmul.f32 %v6646_v48, %v6646_v48 }
 0x153   :  { %9552 = vst [vmem:[#allocation143_spill] sm:$0xff] %v6693_v51 }
 0x154   :  { %v691_v15 = vadd.f32 %v6641_v5, %v690_v63  ;;  %v948_v63 = vmul.f32 %v6602_v60, %v6602_v60  ;;  %v1202_v14 = vadd.f32 %v1201_v9, %v947_v36  ;;  %9551 = vst [vmem:[#allocation142_spill] sm:$0xff] %v6685_v31  ;;  %v5375_v60 = vld [vmem:[%s9082_s0 + $0x2c8] sm:$0xff]  }
 0x155   :  { %v6706_v22 = vunpack.c.h.bf16 %v5375_v60 }
 0x156   :  { %v692_v42 = vadd.f32 %v6646_v48, %v691_v15  ;;  %v1203_v40 = vadd.f32 %v1202_v14, %v948_v63  ;;  %v6698_v14 = vunpack.c.l.bf16 %v5375_v60  ;;  %v957_v48 = vmul.f32 %v6659_v29, %v6659_v29 }
 0x157   :  { %9554 = vst [vmem:[#allocation145_spill] sm:$0xff] %v6706_v22 }
 0x158   :  { %v693_v58 = vadd.f32 %v6654_v33, %v692_v42  ;;  %v950_v42 = vmul.f32 %v6615_v28, %v6615_v28  ;;  %v1204_v36 = vadd.f32 %v1203_v40, %v949_v54  ;;  %9553 = vst [vmem:[#allocation144_spill] sm:$0xff] %v6698_v14  ;;  %v5376_v28 = vld [vmem:[%s9082_s0 + $0x2d0] sm:$0xff]  }
 0x159   :  { %v6719_v60 = vunpack.c.h.bf16 %v5376_v28 }
 0x15a   :  { %v694_v15 = vadd.f32 %v6659_v29, %v693_v58  ;;  %v1205_v63 = vadd.f32 %v1204_v36, %v950_v42  ;;  %v6711_v36 = vunpack.c.l.bf16 %v5376_v28  ;;  %v959_v29 = vmul.f32 %v6672_v53, %v6672_v53 }
 0x15b   :  { %9556 = vst [vmem:[#allocation147_spill] sm:$0xff] %v6719_v60 }
 0x15c   :  { %v695_v37 = vadd.f32 %v6667_v59, %v694_v15  ;;  %v952_v15 = vmul.f32 %v6628_v46, %v6628_v46  ;;  %v1206_v54 = vadd.f32 %v1205_v63, %v951_v20  ;;  %9555 = vst [vmem:[#allocation146_spill] sm:$0xff] %v6711_v36  ;;  %v5377_v46 = vld [vmem:[%s9082_s0 + $0x2d8] sm:$0xff]  }
 0x15d   :  { %v6732_v28 = vunpack.c.h.bf16 %v5377_v46 }
 0x15e   :  { %v696_v58 = vadd.f32 %v6672_v53, %v695_v37  ;;  %v1207_v42 = vadd.f32 %v1206_v54, %v952_v15  ;;  %v6724_v54 = vunpack.c.l.bf16 %v5377_v46  ;;  %v961_v53 = vmul.f32 %v6685_v31, %v6685_v31 }
 0x15f   :  { %9558 = vst [vmem:[#allocation149_spill] sm:$0xff] %v6732_v28 }
 0x160   :  { %v697_v9 = vadd.f32 %v6680_v24, %v696_v58  ;;  %v954_v58 = vmul.f32 %v6641_v5, %v6641_v5  ;;  %v1208_v20 = vadd.f32 %v1207_v42, %v953_v45  ;;  %9557 = vst [vmem:[#allocation148_spill] sm:$0xff] %v6724_v54  ;;  %v5378_v5 = vld [vmem:[%s9082_s0 + $0x2e0] sm:$0xff]  }
 0x161   :  { %v6745_v46 = vunpack.c.h.bf16 %v5378_v5 }
 0x162   :  { %v698_v37 = vadd.f32 %v6685_v31, %v697_v9  ;;  %v1209_v15 = vadd.f32 %v1208_v20, %v954_v58  ;;  %v6737_v20 = vunpack.c.l.bf16 %v5378_v5  ;;  %v963_v31 = vmul.f32 %v6698_v14, %v6698_v14 }
 0x163   :  { %9560 = vst [vmem:[#allocation151_spill] sm:$0xff] %v6745_v46 }
 0x164   :  { %v699_v40 = vadd.f32 %v6693_v51, %v698_v37  ;;  %v956_v37 = vmul.f32 %v6654_v33, %v6654_v33  ;;  %v1210_v45 = vadd.f32 %v1209_v15, %v955_v10  ;;  %9559 = vst [vmem:[#allocation150_spill] sm:$0xff] %v6737_v20  ;;  %v5379_v33 = vld [vmem:[%s9082_s0 + $0x2e8] sm:$0xff]  }
 0x165   :  { %v6758_v5 = vunpack.c.h.bf16 %v5379_v33 }
 0x166   :  { %v700_v9 = vadd.f32 %v6698_v14, %v699_v40  ;;  %v1211_v58 = vadd.f32 %v1210_v45, %v956_v37  ;;  %v6750_v45 = vunpack.c.l.bf16 %v5379_v33  ;;  %v965_v14 = vmul.f32 %v6711_v36, %v6711_v36 }
 0x167   :  { %9562 = vst [vmem:[#allocation153_spill] sm:$0xff] %v6758_v5 }
 0x168   :  { %v701_v63 = vadd.f32 %v6706_v22, %v700_v9  ;;  %v958_v9 = vmul.f32 %v6667_v59, %v6667_v59  ;;  %v1212_v10 = vadd.f32 %v1211_v58, %v957_v48  ;;  %9561 = vst [vmem:[#allocation152_spill] sm:$0xff] %v6750_v45  ;;  %v5380_v59 = vld [vmem:[%s9082_s0 + $0x2f0] sm:$0xff]  }
 0x169   :  { %v6771_v33 = vunpack.c.h.bf16 %v5380_v59 }
 0x16a   :  { %v702_v40 = vadd.f32 %v6711_v36, %v701_v63  ;;  %v1213_v37 = vadd.f32 %v1212_v10, %v958_v9  ;;  %v6763_v10 = vunpack.c.l.bf16 %v5380_v59  ;;  %v967_v36 = vmul.f32 %v6724_v54, %v6724_v54 }
 0x16b   :  { %9564 = vst [vmem:[#allocation155_spill] sm:$0xff] %v6771_v33 }
 0x16c   :  { %v703_v42 = vadd.f32 %v6719_v60, %v702_v40  ;;  %v960_v40 = vmul.f32 %v6680_v24, %v6680_v24  ;;  %v1214_v48 = vadd.f32 %v1213_v37, %v959_v29  ;;  %9563 = vst [vmem:[#allocation154_spill] sm:$0xff] %v6763_v10  ;;  %v5381_v24 = vld [vmem:[%s9082_s0 + $0x2f8] sm:$0xff]  }
 0x16d   :  { %v6784_v59 = vunpack.c.h.bf16 %v5381_v24 }
 0x16e   :  { %v704_v63 = vadd.f32 %v6724_v54, %v703_v42  ;;  %v1215_v9 = vadd.f32 %v1214_v48, %v960_v40  ;;  %v6776_v48 = vunpack.c.l.bf16 %v5381_v24  ;;  %v969_v54 = vmul.f32 %v6737_v20, %v6737_v20 }
 0x16f   :  { %9566 = vst [vmem:[#allocation157_spill] sm:$0xff] %v6784_v59 }
 0x170   :  { %v705_v15 = vadd.f32 %v6732_v28, %v704_v63  ;;  %v962_v63 = vmul.f32 %v6693_v51, %v6693_v51  ;;  %v1216_v29 = vadd.f32 %v1215_v9, %v961_v53  ;;  %9565 = vst [vmem:[#allocation156_spill] sm:$0xff] %v6776_v48  ;;  %v5382_v51 = vld [vmem:[%s9082_s0 + $0x300] sm:$0xff]  }
 0x171   :  { %v6797_v24 = vunpack.c.h.bf16 %v5382_v51 }
 0x172   :  { %v706_v42 = vadd.f32 %v6737_v20, %v705_v15  ;;  %v1217_v40 = vadd.f32 %v1216_v29, %v962_v63  ;;  %v6789_v29 = vunpack.c.l.bf16 %v5382_v51  ;;  %v971_v20 = vmul.f32 %v6750_v45, %v6750_v45 }
 0x173   :  { %9568 = vst [vmem:[#allocation159_spill] sm:$0xff] %v6797_v24 }
 0x174   :  { %v707_v58 = vadd.f32 %v6745_v46, %v706_v42  ;;  %v964_v42 = vmul.f32 %v6706_v22, %v6706_v22  ;;  %v1218_v53 = vadd.f32 %v1217_v40, %v963_v31  ;;  %9567 = vst [vmem:[#allocation158_spill] sm:$0xff] %v6789_v29  ;;  %v5383_v22 = vld [vmem:[%s9082_s0 + $0x308] sm:$0xff]  }
 0x175   :  { %v6810_v51 = vunpack.c.h.bf16 %v5383_v22 }
 0x176   :  { %v708_v15 = vadd.f32 %v6750_v45, %v707_v58  ;;  %v1219_v63 = vadd.f32 %v1218_v53, %v964_v42  ;;  %v6802_v53 = vunpack.c.l.bf16 %v5383_v22  ;;  %v973_v45 = vmul.f32 %v6763_v10, %v6763_v10 }
 0x177   :  { %9570 = vst [vmem:[#allocation161_spill] sm:$0xff] %v6810_v51 }
 0x178   :  { %v709_v37 = vadd.f32 %v6758_v5, %v708_v15  ;;  %v966_v15 = vmul.f32 %v6719_v60, %v6719_v60  ;;  %v1220_v31 = vadd.f32 %v1219_v63, %v965_v14  ;;  %9569 = vst [vmem:[#allocation160_spill] sm:$0xff] %v6802_v53  ;;  %v5384_v60 = vld [vmem:[%s9082_s0 + $0x310] sm:$0xff]  }
 0x179   :  { %v6823_v22 = vunpack.c.h.bf16 %v5384_v60 }
 0x17a   :  { %v710_v58 = vadd.f32 %v6763_v10, %v709_v37  ;;  %v1221_v42 = vadd.f32 %v1220_v31, %v966_v15  ;;  %v6815_v31 = vunpack.c.l.bf16 %v5384_v60  ;;  %v975_v10 = vmul.f32 %v6776_v48, %v6776_v48 }
 0x17b   :  { %9572 = vst [vmem:[#allocation163_spill] sm:$0xff] %v6823_v22 }
 0x17c   :  { %v711_v9 = vadd.f32 %v6771_v33, %v710_v58  ;;  %v968_v58 = vmul.f32 %v6732_v28, %v6732_v28  ;;  %v1222_v14 = vadd.f32 %v1221_v42, %v967_v36  ;;  %9571 = vst [vmem:[#allocation162_spill] sm:$0xff] %v6815_v31  ;;  %v5385_v28 = vld [vmem:[%s9082_s0 + $0x318] sm:$0xff]  }
 0x17d   :  { %v6836_v60 = vunpack.c.h.bf16 %v5385_v28 }
 0x17e   :  { %v712_v37 = vadd.f32 %v6776_v48, %v711_v9  ;;  %v1223_v15 = vadd.f32 %v1222_v14, %v968_v58  ;;  %v6828_v14 = vunpack.c.l.bf16 %v5385_v28  ;;  %v977_v48 = vmul.f32 %v6789_v29, %v6789_v29 }
 0x17f   :  { %9574 = vst [vmem:[#allocation165_spill] sm:$0xff] %v6836_v60 }
 0x180   :  { %v713_v40 = vadd.f32 %v6784_v59, %v712_v37  ;;  %v970_v37 = vmul.f32 %v6745_v46, %v6745_v46  ;;  %v1224_v36 = vadd.f32 %v1223_v15, %v969_v54  ;;  %9573 = vst [vmem:[#allocation164_spill] sm:$0xff] %v6828_v14  ;;  %v5386_v46 = vld [vmem:[%s9082_s0 + $0x320] sm:$0xff]  }
 0x181   :  { %v6849_v28 = vunpack.c.h.bf16 %v5386_v46 }
 0x182   :  { %v714_v9 = vadd.f32 %v6789_v29, %v713_v40  ;;  %v1225_v58 = vadd.f32 %v1224_v36, %v970_v37  ;;  %v6841_v36 = vunpack.c.l.bf16 %v5386_v46  ;;  %v979_v29 = vmul.f32 %v6802_v53, %v6802_v53 }
 0x183   :  { %9576 = vst [vmem:[#allocation167_spill] sm:$0xff] %v6849_v28 }
 0x184   :  { %v715_v63 = vadd.f32 %v6797_v24, %v714_v9  ;;  %v972_v9 = vmul.f32 %v6758_v5, %v6758_v5  ;;  %v1226_v54 = vadd.f32 %v1225_v58, %v971_v20  ;;  %9575 = vst [vmem:[#allocation166_spill] sm:$0xff] %v6841_v36  ;;  %v5387_v5 = vld [vmem:[%s9082_s0 + $0x328] sm:$0xff]  }
 0x185   :  { %v6862_v46 = vunpack.c.h.bf16 %v5387_v5 }
 0x186   :  { %v716_v40 = vadd.f32 %v6802_v53, %v715_v63  ;;  %v1227_v37 = vadd.f32 %v1226_v54, %v972_v9  ;;  %v6854_v54 = vunpack.c.l.bf16 %v5387_v5  ;;  %v981_v53 = vmul.f32 %v6815_v31, %v6815_v31 }
 0x187   :  { %9578 = vst [vmem:[#allocation169_spill] sm:$0xff] %v6862_v46 }
 0x188   :  { %v717_v42 = vadd.f32 %v6810_v51, %v716_v40  ;;  %v974_v40 = vmul.f32 %v6771_v33, %v6771_v33  ;;  %v1228_v20 = vadd.f32 %v1227_v37, %v973_v45  ;;  %9577 = vst [vmem:[#allocation168_spill] sm:$0xff] %v6854_v54  ;;  %v5388_v33 = vld [vmem:[%s9082_s0 + $0x330] sm:$0xff]  }
 0x189   :  { %v6875_v5 = vunpack.c.h.bf16 %v5388_v33 }
 0x18a   :  { %v718_v63 = vadd.f32 %v6815_v31, %v717_v42  ;;  %v1229_v9 = vadd.f32 %v1228_v20, %v974_v40  ;;  %v6867_v20 = vunpack.c.l.bf16 %v5388_v33  ;;  %v983_v31 = vmul.f32 %v6828_v14, %v6828_v14 }
 0x18b   :  { %9580 = vst [vmem:[#allocation171_spill] sm:$0xff] %v6875_v5 }
 0x18c   :  { %v719_v15 = vadd.f32 %v6823_v22, %v718_v63  ;;  %v976_v63 = vmul.f32 %v6784_v59, %v6784_v59  ;;  %v1230_v45 = vadd.f32 %v1229_v9, %v975_v10  ;;  %9579 = vst [vmem:[#allocation170_spill] sm:$0xff] %v6867_v20  ;;  %v5389_v59 = vld [vmem:[%s9082_s0 + $0x338] sm:$0xff]  }
 0x18d   :  { %v6888_v33 = vunpack.c.h.bf16 %v5389_v59 }
 0x18e   :  { %v720_v42 = vadd.f32 %v6828_v14, %v719_v15  ;;  %v1231_v40 = vadd.f32 %v1230_v45, %v976_v63  ;;  %v6880_v45 = vunpack.c.l.bf16 %v5389_v59  ;;  %v985_v14 = vmul.f32 %v6841_v36, %v6841_v36 }
 0x18f   :  { %9582 = vst [vmem:[#allocation173_spill] sm:$0xff] %v6888_v33 }
 0x190   :  { %v721_v58 = vadd.f32 %v6836_v60, %v720_v42  ;;  %v978_v42 = vmul.f32 %v6797_v24, %v6797_v24  ;;  %v1232_v10 = vadd.f32 %v1231_v40, %v977_v48  ;;  %9581 = vst [vmem:[#allocation172_spill] sm:$0xff] %v6880_v45  ;;  %v5390_v24 = vld [vmem:[%s9082_s0 + $0x340] sm:$0xff]  }
 0x191   :  { %v6901_v59 = vunpack.c.h.bf16 %v5390_v24 }
 0x192   :  { %v722_v15 = vadd.f32 %v6841_v36, %v721_v58  ;;  %v1233_v63 = vadd.f32 %v1232_v10, %v978_v42  ;;  %v6893_v10 = vunpack.c.l.bf16 %v5390_v24  ;;  %v987_v36 = vmul.f32 %v6854_v54, %v6854_v54 }
 0x193   :  { %9584 = vst [vmem:[#allocation175_spill] sm:$0xff] %v6901_v59 }
 0x194   :  { %v723_v37 = vadd.f32 %v6849_v28, %v722_v15  ;;  %v980_v15 = vmul.f32 %v6810_v51, %v6810_v51  ;;  %v1234_v48 = vadd.f32 %v1233_v63, %v979_v29  ;;  %9583 = vst [vmem:[#allocation174_spill] sm:$0xff] %v6893_v10  ;;  %v5391_v51 = vld [vmem:[%s9082_s0 + $0x348] sm:$0xff]  }
 0x195   :  { %v6914_v24 = vunpack.c.h.bf16 %v5391_v51 }
 0x196   :  { %v724_v58 = vadd.f32 %v6854_v54, %v723_v37  ;;  %v1235_v42 = vadd.f32 %v1234_v48, %v980_v15  ;;  %v6906_v48 = vunpack.c.l.bf16 %v5391_v51  ;;  %v989_v54 = vmul.f32 %v6867_v20, %v6867_v20 }
 0x197   :  { %9586 = vst [vmem:[#allocation177_spill] sm:$0xff] %v6914_v24 }
 0x198   :  { %v725_v9 = vadd.f32 %v6862_v46, %v724_v58  ;;  %v982_v58 = vmul.f32 %v6823_v22, %v6823_v22  ;;  %v1236_v29 = vadd.f32 %v1235_v42, %v981_v53  ;;  %9585 = vst [vmem:[#allocation176_spill] sm:$0xff] %v6906_v48  ;;  %v5392_v22 = vld [vmem:[%s9082_s0 + $0x350] sm:$0xff]  }
 0x199   :  { %v6927_v51 = vunpack.c.h.bf16 %v5392_v22 }
 0x19a   :  { %v726_v37 = vadd.f32 %v6867_v20, %v725_v9  ;;  %v1237_v15 = vadd.f32 %v1236_v29, %v982_v58  ;;  %v6919_v29 = vunpack.c.l.bf16 %v5392_v22  ;;  %v991_v20 = vmul.f32 %v6880_v45, %v6880_v45 }
 0x19b   :  { %9588 = vst [vmem:[#allocation179_spill] sm:$0xff] %v6927_v51 }
 0x19c   :  { %v727_v40 = vadd.f32 %v6875_v5, %v726_v37  ;;  %v984_v37 = vmul.f32 %v6836_v60, %v6836_v60  ;;  %v1238_v53 = vadd.f32 %v1237_v15, %v983_v31  ;;  %9587 = vst [vmem:[#allocation178_spill] sm:$0xff] %v6919_v29  ;;  %v5393_v60 = vld [vmem:[%s9082_s0 + $0x358] sm:$0xff]  }
 0x19d   :  { %v6940_v22 = vunpack.c.h.bf16 %v5393_v60 }
 0x19e   :  { %v728_v9 = vadd.f32 %v6880_v45, %v727_v40  ;;  %v1239_v58 = vadd.f32 %v1238_v53, %v984_v37  ;;  %v6932_v53 = vunpack.c.l.bf16 %v5393_v60  ;;  %v993_v45 = vmul.f32 %v6893_v10, %v6893_v10 }
 0x19f   :  { %9590 = vst [vmem:[#allocation181_spill] sm:$0xff] %v6940_v22 }
 0x1a0   :  { %v729_v63 = vadd.f32 %v6888_v33, %v728_v9  ;;  %v986_v9 = vmul.f32 %v6849_v28, %v6849_v28  ;;  %v1240_v31 = vadd.f32 %v1239_v58, %v985_v14  ;;  %9589 = vst [vmem:[#allocation180_spill] sm:$0xff] %v6932_v53  ;;  %v5394_v28 = vld [vmem:[%s9082_s0 + $0x360] sm:$0xff]  }
 0x1a1   :  { %v6953_v60 = vunpack.c.h.bf16 %v5394_v28 }
 0x1a2   :  { %v730_v40 = vadd.f32 %v6893_v10, %v729_v63  ;;  %v1241_v37 = vadd.f32 %v1240_v31, %v986_v9  ;;  %v6945_v31 = vunpack.c.l.bf16 %v5394_v28  ;;  %v995_v10 = vmul.f32 %v6906_v48, %v6906_v48 }
 0x1a3   :  { %9592 = vst [vmem:[#allocation183_spill] sm:$0xff] %v6953_v60 }
 0x1a4   :  { %v731_v42 = vadd.f32 %v6901_v59, %v730_v40  ;;  %v988_v40 = vmul.f32 %v6862_v46, %v6862_v46  ;;  %v1242_v14 = vadd.f32 %v1241_v37, %v987_v36  ;;  %9591 = vst [vmem:[#allocation182_spill] sm:$0xff] %v6945_v31  ;;  %v5395_v46 = vld [vmem:[%s9082_s0 + $0x368] sm:$0xff]  }
 0x1a5   :  { %v6966_v28 = vunpack.c.h.bf16 %v5395_v46 }
 0x1a6   :  { %v732_v63 = vadd.f32 %v6906_v48, %v731_v42  ;;  %v1243_v9 = vadd.f32 %v1242_v14, %v988_v40  ;;  %v6958_v14 = vunpack.c.l.bf16 %v5395_v46  ;;  %v997_v48 = vmul.f32 %v6919_v29, %v6919_v29 }
 0x1a7   :  { %9594 = vst [vmem:[#allocation185_spill] sm:$0xff] %v6966_v28 }
 0x1a8   :  { %v733_v15 = vadd.f32 %v6914_v24, %v732_v63  ;;  %v990_v63 = vmul.f32 %v6875_v5, %v6875_v5  ;;  %v1244_v36 = vadd.f32 %v1243_v9, %v989_v54  ;;  %9593 = vst [vmem:[#allocation184_spill] sm:$0xff] %v6958_v14  ;;  %v5396_v5 = vld [vmem:[%s9082_s0 + $0x370] sm:$0xff]  }
 0x1a9   :  { %v6979_v46 = vunpack.c.h.bf16 %v5396_v5 }
 0x1aa   :  { %v734_v42 = vadd.f32 %v6919_v29, %v733_v15  ;;  %v1245_v40 = vadd.f32 %v1244_v36, %v990_v63  ;;  %v6971_v36 = vunpack.c.l.bf16 %v5396_v5  ;;  %v999_v29 = vmul.f32 %v6932_v53, %v6932_v53 }
 0x1ab   :  { %9596 = vst [vmem:[#allocation187_spill] sm:$0xff] %v6979_v46 }
 0x1ac   :  { %v735_v58 = vadd.f32 %v6927_v51, %v734_v42  ;;  %v992_v42 = vmul.f32 %v6888_v33, %v6888_v33  ;;  %v1246_v54 = vadd.f32 %v1245_v40, %v991_v20  ;;  %9595 = vst [vmem:[#allocation186_spill] sm:$0xff] %v6971_v36  ;;  %v5397_v33 = vld [vmem:[%s9082_s0 + $0x378] sm:$0xff]  }
 0x1ad   :  { %v6992_v5 = vunpack.c.h.bf16 %v5397_v33 }
 0x1ae   :  { %v736_v15 = vadd.f32 %v6932_v53, %v735_v58  ;;  %v1247_v63 = vadd.f32 %v1246_v54, %v992_v42  ;;  %v6984_v54 = vunpack.c.l.bf16 %v5397_v33  ;;  %v1001_v53 = vmul.f32 %v6945_v31, %v6945_v31 }
 0x1af   :  { %9598 = vst [vmem:[#allocation189_spill] sm:$0xff] %v6992_v5 }
 0x1b0   :  { %v737_v37 = vadd.f32 %v6940_v22, %v736_v15  ;;  %v994_v15 = vmul.f32 %v6901_v59, %v6901_v59  ;;  %v1248_v20 = vadd.f32 %v1247_v63, %v993_v45  ;;  %9597 = vst [vmem:[#allocation188_spill] sm:$0xff] %v6984_v54  ;;  %v5398_v59 = vld [vmem:[%s9082_s0 + $0x380] sm:$0xff]  }
 0x1b1   :  { %v7005_v33 = vunpack.c.h.bf16 %v5398_v59 }
 0x1b2   :  { %v738_v58 = vadd.f32 %v6945_v31, %v737_v37  ;;  %v1249_v42 = vadd.f32 %v1248_v20, %v994_v15  ;;  %v6997_v20 = vunpack.c.l.bf16 %v5398_v59  ;;  %v1003_v31 = vmul.f32 %v6958_v14, %v6958_v14 }
 0x1b3   :  { %9600 = vst [vmem:[#allocation191_spill] sm:$0xff] %v7005_v33 }
 0x1b4   :  { %v739_v9 = vadd.f32 %v6953_v60, %v738_v58  ;;  %v996_v58 = vmul.f32 %v6914_v24, %v6914_v24  ;;  %v1250_v45 = vadd.f32 %v1249_v42, %v995_v10  ;;  %9599 = vst [vmem:[#allocation190_spill] sm:$0xff] %v6997_v20  ;;  %v5399_v24 = vld [vmem:[%s9082_s0 + $0x388] sm:$0xff]  }
 0x1b5   :  { %v7018_v59 = vunpack.c.h.bf16 %v5399_v24 }
 0x1b6   :  { %v740_v37 = vadd.f32 %v6958_v14, %v739_v9  ;;  %v1251_v15 = vadd.f32 %v1250_v45, %v996_v58  ;;  %v7010_v45 = vunpack.c.l.bf16 %v5399_v24  ;;  %v1005_v14 = vmul.f32 %v6971_v36, %v6971_v36 }
 0x1b7   :  { %9602 = vst [vmem:[#allocation193_spill] sm:$0xff] %v7018_v59 }
 0x1b8   :  { %v741_v40 = vadd.f32 %v6966_v28, %v740_v37  ;;  %v998_v37 = vmul.f32 %v6927_v51, %v6927_v51  ;;  %v1252_v10 = vadd.f32 %v1251_v15, %v997_v48  ;;  %9601 = vst [vmem:[#allocation192_spill] sm:$0xff] %v7010_v45  ;;  %v5400_v51 = vld [vmem:[%s9082_s0 + $0x390] sm:$0xff]  }
 0x1b9   :  { %v7031_v24 = vunpack.c.h.bf16 %v5400_v51 }
 0x1ba   :  { %v742_v9 = vadd.f32 %v6971_v36, %v741_v40  ;;  %v1253_v58 = vadd.f32 %v1252_v10, %v998_v37  ;;  %v7023_v10 = vunpack.c.l.bf16 %v5400_v51  ;;  %v1007_v36 = vmul.f32 %v6984_v54, %v6984_v54 }
 0x1bb   :  { %9604 = vst [vmem:[#allocation195_spill] sm:$0xff] %v7031_v24 }
 0x1bc   :  { %v743_v63 = vadd.f32 %v6979_v46, %v742_v9  ;;  %v1000_v9 = vmul.f32 %v6940_v22, %v6940_v22  ;;  %v1254_v48 = vadd.f32 %v1253_v58, %v999_v29  ;;  %9603 = vst [vmem:[#allocation194_spill] sm:$0xff] %v7023_v10  ;;  %v5401_v22 = vld [vmem:[%s9082_s0 + $0x398] sm:$0xff]  }
 0x1bd   :  { %v7044_v51 = vunpack.c.h.bf16 %v5401_v22 }
 0x1be   :  { %v744_v40 = vadd.f32 %v6984_v54, %v743_v63  ;;  %v1255_v37 = vadd.f32 %v1254_v48, %v1000_v9  ;;  %v7036_v48 = vunpack.c.l.bf16 %v5401_v22  ;;  %v1009_v54 = vmul.f32 %v6997_v20, %v6997_v20 }
 0x1bf   :  { %9606 = vst [vmem:[#allocation197_spill] sm:$0xff] %v7044_v51 }
 0x1c0   :  { %v745_v42 = vadd.f32 %v6992_v5, %v744_v40  ;;  %v1002_v40 = vmul.f32 %v6953_v60, %v6953_v60  ;;  %v1256_v29 = vadd.f32 %v1255_v37, %v1001_v53  ;;  %9605 = vst [vmem:[#allocation196_spill] sm:$0xff] %v7036_v48  ;;  %v5402_v60 = vld [vmem:[%s9082_s0 + $0x3a0] sm:$0xff]  }
 0x1c1   :  { %v7057_v22 = vunpack.c.h.bf16 %v5402_v60 }
 0x1c2   :  { %v746_v63 = vadd.f32 %v6997_v20, %v745_v42  ;;  %v1257_v9 = vadd.f32 %v1256_v29, %v1002_v40  ;;  %v7049_v29 = vunpack.c.l.bf16 %v5402_v60  ;;  %v1011_v20 = vmul.f32 %v7010_v45, %v7010_v45 }
 0x1c3   :  { %9608 = vst [vmem:[#allocation199_spill] sm:$0xff] %v7057_v22 }
 0x1c4   :  { %v747_v15 = vadd.f32 %v7005_v33, %v746_v63  ;;  %v1004_v63 = vmul.f32 %v6966_v28, %v6966_v28  ;;  %v1258_v53 = vadd.f32 %v1257_v9, %v1003_v31  ;;  %9607 = vst [vmem:[#allocation198_spill] sm:$0xff] %v7049_v29  ;;  %v5403_v28 = vld [vmem:[%s9082_s0 + $0x3a8] sm:$0xff]  }
 0x1c5   :  { %v7070_v60 = vunpack.c.h.bf16 %v5403_v28 }
 0x1c6   :  { %v748_v42 = vadd.f32 %v7010_v45, %v747_v15  ;;  %v1259_v40 = vadd.f32 %v1258_v53, %v1004_v63  ;;  %v7062_v53 = vunpack.c.l.bf16 %v5403_v28  ;;  %v1013_v45 = vmul.f32 %v7023_v10, %v7023_v10 }
 0x1c7   :  { %9610 = vst [vmem:[#allocation201_spill] sm:$0xff] %v7070_v60 }
 0x1c8   :  { %v749_v58 = vadd.f32 %v7018_v59, %v748_v42  ;;  %v1006_v42 = vmul.f32 %v6979_v46, %v6979_v46  ;;  %v1260_v31 = vadd.f32 %v1259_v40, %v1005_v14  ;;  %9609 = vst [vmem:[#allocation200_spill] sm:$0xff] %v7062_v53  ;;  %v5404_v46 = vld [vmem:[%s9082_s0 + $0x3b0] sm:$0xff]  }
 0x1c9   :  { %v7083_v28 = vunpack.c.h.bf16 %v5404_v46 }
 0x1ca   :  { %v750_v15 = vadd.f32 %v7023_v10, %v749_v58  ;;  %v1261_v63 = vadd.f32 %v1260_v31, %v1006_v42  ;;  %v7075_v31 = vunpack.c.l.bf16 %v5404_v46  ;;  %v1015_v10 = vmul.f32 %v7036_v48, %v7036_v48 }
 0x1cb   :  { %9612 = vst [vmem:[#allocation203_spill] sm:$0xff] %v7083_v28 }
 0x1cc   :  { %v751_v37 = vadd.f32 %v7031_v24, %v750_v15  ;;  %v1008_v15 = vmul.f32 %v6992_v5, %v6992_v5  ;;  %v1262_v14 = vadd.f32 %v1261_v63, %v1007_v36  ;;  %9611 = vst [vmem:[#allocation202_spill] sm:$0xff] %v7075_v31  ;;  %v5405_v5 = vld [vmem:[%s9082_s0 + $0x3b8] sm:$0xff]  }
 0x1cd   :  { %v7096_v46 = vunpack.c.h.bf16 %v5405_v5 }
 0x1ce   :  { %v752_v58 = vadd.f32 %v7036_v48, %v751_v37  ;;  %v1263_v42 = vadd.f32 %v1262_v14, %v1008_v15  ;;  %v7088_v14 = vunpack.c.l.bf16 %v5405_v5  ;;  %v1017_v48 = vmul.f32 %v7049_v29, %v7049_v29 }
 0x1cf   :  { %9614 = vst [vmem:[#allocation205_spill] sm:$0xff] %v7096_v46 }
 0x1d0   :  { %v753_v9 = vadd.f32 %v7044_v51, %v752_v58  ;;  %v1010_v58 = vmul.f32 %v7005_v33, %v7005_v33  ;;  %v1264_v36 = vadd.f32 %v1263_v42, %v1009_v54  ;;  %9613 = vst [vmem:[#allocation204_spill] sm:$0xff] %v7088_v14  ;;  %v5406_v33 = vld [vmem:[%s9082_s0 + $0x3c0] sm:$0xff]  }
 0x1d1   :  { %v7109_v5 = vunpack.c.h.bf16 %v5406_v33 }
 0x1d2   :  { %v754_v37 = vadd.f32 %v7049_v29, %v753_v9  ;;  %v1265_v15 = vadd.f32 %v1264_v36, %v1010_v58  ;;  %v7101_v36 = vunpack.c.l.bf16 %v5406_v33  ;;  %v1019_v29 = vmul.f32 %v7062_v53, %v7062_v53 }
 0x1d3   :  { %9616 = vst [vmem:[#allocation207_spill] sm:$0xff] %v7109_v5 }
 0x1d4   :  { %v755_v40 = vadd.f32 %v7057_v22, %v754_v37  ;;  %v1012_v37 = vmul.f32 %v7018_v59, %v7018_v59  ;;  %v1266_v54 = vadd.f32 %v1265_v15, %v1011_v20  ;;  %9615 = vst [vmem:[#allocation206_spill] sm:$0xff] %v7101_v36  ;;  %v5407_v59 = vld [vmem:[%s9082_s0 + $0x3c8] sm:$0xff]  }
 0x1d5   :  { %v7122_v33 = vunpack.c.h.bf16 %v5407_v59 }
 0x1d6   :  { %v756_v9 = vadd.f32 %v7062_v53, %v755_v40  ;;  %v1267_v58 = vadd.f32 %v1266_v54, %v1012_v37  ;;  %v7114_v54 = vunpack.c.l.bf16 %v5407_v59  ;;  %v1021_v53 = vmul.f32 %v7075_v31, %v7075_v31 }
 0x1d7   :  { %9618 = vst [vmem:[#allocation209_spill] sm:$0xff] %v7122_v33 }
 0x1d8   :  { %v757_v63 = vadd.f32 %v7070_v60, %v756_v9  ;;  %v1014_v9 = vmul.f32 %v7031_v24, %v7031_v24  ;;  %v1268_v20 = vadd.f32 %v1267_v58, %v1013_v45  ;;  %9617 = vst [vmem:[#allocation208_spill] sm:$0xff] %v7114_v54  ;;  %v5408_v24 = vld [vmem:[%s9082_s0 + $0x3d0] sm:$0xff]  }
 0x1d9   :  { %v7135_v59 = vunpack.c.h.bf16 %v5408_v24 }
 0x1da   :  { %v758_v40 = vadd.f32 %v7075_v31, %v757_v63  ;;  %v1269_v37 = vadd.f32 %v1268_v20, %v1014_v9  ;;  %v7127_v20 = vunpack.c.l.bf16 %v5408_v24  ;;  %v1023_v31 = vmul.f32 %v7088_v14, %v7088_v14 }
 0x1db   :  { %9620 = vst [vmem:[#allocation211_spill] sm:$0xff] %v7135_v59 }
 0x1dc   :  { %v759_v42 = vadd.f32 %v7083_v28, %v758_v40  ;;  %v1016_v40 = vmul.f32 %v7044_v51, %v7044_v51  ;;  %v1270_v45 = vadd.f32 %v1269_v37, %v1015_v10  ;;  %9619 = vst [vmem:[#allocation210_spill] sm:$0xff] %v7127_v20  ;;  %v5409_v51 = vld [vmem:[%s9082_s0 + $0x3d8] sm:$0xff]  }
 0x1dd   :  { %v7148_v24 = vunpack.c.h.bf16 %v5409_v51 }
 0x1de   :  { %v760_v63 = vadd.f32 %v7088_v14, %v759_v42  ;;  %v1271_v9 = vadd.f32 %v1270_v45, %v1016_v40  ;;  %v7140_v45 = vunpack.c.l.bf16 %v5409_v51  ;;  %v1025_v14 = vmul.f32 %v7101_v36, %v7101_v36 }
 0x1df   :  { %9622 = vst [vmem:[#allocation213_spill] sm:$0xff] %v7148_v24 }
 0x1e0   :  { %v761_v15 = vadd.f32 %v7096_v46, %v760_v63  ;;  %v1018_v63 = vmul.f32 %v7057_v22, %v7057_v22  ;;  %v1272_v10 = vadd.f32 %v1271_v9, %v1017_v48  ;;  %9621 = vst [vmem:[#allocation212_spill] sm:$0xff] %v7140_v45  ;;  %v5410_v22 = vld [vmem:[%s9082_s0 + $0x3e0] sm:$0xff]  }
 0x1e1   :  { %v7161_v51 = vunpack.c.h.bf16 %v5410_v22 }
 0x1e2   :  { %v762_v42 = vadd.f32 %v7101_v36, %v761_v15  ;;  %v1273_v40 = vadd.f32 %v1272_v10, %v1018_v63  ;;  %v7153_v10 = vunpack.c.l.bf16 %v5410_v22  ;;  %v1027_v36 = vmul.f32 %v7114_v54, %v7114_v54 }
 0x1e3   :  { %9624 = vst [vmem:[#allocation215_spill] sm:$0xff] %v7161_v51 }
 0x1e4   :  { %v763_v58 = vadd.f32 %v7109_v5, %v762_v42  ;;  %v1020_v42 = vmul.f32 %v7070_v60, %v7070_v60  ;;  %v1274_v48 = vadd.f32 %v1273_v40, %v1019_v29  ;;  %9623 = vst [vmem:[#allocation214_spill] sm:$0xff] %v7153_v10  ;;  %v5411_v60 = vld [vmem:[%s9082_s0 + $0x3e8] sm:$0xff]  }
 0x1e5   :  { %v7174_v22 = vunpack.c.h.bf16 %v5411_v60 }
 0x1e6   :  { %v764_v15 = vadd.f32 %v7114_v54, %v763_v58  ;;  %v1275_v63 = vadd.f32 %v1274_v48, %v1020_v42  ;;  %v7166_v48 = vunpack.c.l.bf16 %v5411_v60 }
 0x1e7   :  { %9626 = vst [vmem:[#allocation217_spill] sm:$0xff] %v7174_v22 }
 0x1e8   :  { %v765_v37 = vadd.f32 %v7122_v33, %v764_v15  ;;  %v1022_v15 = vmul.f32 %v7083_v28, %v7083_v28  ;;  %v1276_v29 = vadd.f32 %v1275_v63, %v1021_v53  ;;  %9625 = vst [vmem:[#allocation216_spill] sm:$0xff] %v7166_v48  ;;  %v5412_v28 = vld [vmem:[%s9082_s0 + $0x3f0] sm:$0xff]  }
 0x1e9   :  { %v7187_v60 = vunpack.c.h.bf16 %v5412_v28 }
 0x1ea   :  { %v766_v58 = vadd.f32 %v7127_v20, %v765_v37  ;;  %v1277_v42 = vadd.f32 %v1276_v29, %v1022_v15  ;;  %v7179_v29 = vunpack.c.l.bf16 %v5412_v28  ;;  %v1030_v28 = vmul.f32 %v7135_v59, %v7135_v59 }
 0x1eb   :  { %9628 = vst [vmem:[#allocation219_spill] sm:$0xff] %v7187_v60 }
 0x1ec   :  { %v767_v9 = vadd.f32 %v7135_v59, %v766_v58  ;;  %v1024_v58 = vmul.f32 %v7096_v46, %v7096_v46  ;;  %v1278_v53 = vadd.f32 %v1277_v42, %v1023_v31  ;;  %9627 = vst [vmem:[#allocation218_spill] sm:$0xff] %v7179_v29  ;;  %v5413_v46 = vld [vmem:[%s9082_s0 + $0x3f8] sm:$0xff]  }
 0x1ed   :  { %v7197_v57 = vunpack.c.h.bf16 %v5413_v46 }
 0x1ee   :  { %v768_v37 = vadd.f32 %v7140_v45, %v767_v9  ;;  %v1279_v15 = vadd.f32 %v1278_v53, %v1024_v58  ;;  %v7192_v53 = vunpack.c.l.bf16 %v5413_v46 }
 0x1ef   :  { %9630 = vst [vmem:[#allocation221_spill] sm:$0xff] %v7197_v57 }
 0x1f0   :  { %v769_v40 = vadd.f32 %v7148_v24, %v768_v37  ;;  %v1026_v37 = vmul.f32 %v7109_v5, %v7109_v5  ;;  %v1280_v31 = vadd.f32 %v1279_v15, %v1025_v14  ;;  %9629 = vst [vmem:[#allocation220_spill] sm:$0xff] %v7192_v53  ;;  %v1029_v5 = vmul.f32 %v7127_v20, %v7127_v20 }
 0x1f1   :  { %v1032_v20 = vmul.f32 %v7148_v24, %v7148_v24  ;;  %v1036_v24 = vmul.f32 %v7174_v22, %v7174_v22 }
 0x1f2   :  { %v770_v9 = vadd.f32 %v7153_v10, %v769_v40  ;;  %v1281_v58 = vadd.f32 %v1280_v31, %v1026_v37  ;;  %v1031_v37 = vmul.f32 %v7140_v45, %v7140_v45 }
 0x1f4   :  { %v771_v63 = vadd.f32 %v7161_v51, %v770_v9  ;;  %v1028_v9 = vmul.f32 %v7122_v33, %v7122_v33  ;;  %v1282_v0 = vadd.f32 %v1281_v58, %v1027_v36  ;;  %v1033_v58 = vmul.f32 %v7153_v10, %v7153_v10 }
 0x1f5   :  { %v1037_v10 = vmul.f32 %v7179_v29, %v7179_v29 }
 0x1f6   :  { %v772_v40 = vadd.f32 %v7166_v48, %v771_v63  ;;  %v1283_v15 = vadd.f32 %v1282_v0, %v1028_v9  ;;  %v1034_v0 = vmul.f32 %v7161_v51, %v7161_v51 }
 0x1f8   :  { %v773_v42 = vadd.f32 %v7174_v22, %v772_v40  ;;  %v1284_v31 = vadd.f32 %v1283_v15, %v1029_v5  ;;  %v1035_v5 = vmul.f32 %v7166_v48, %v7166_v48 }
 0x1fa   :  { %v774_v63 = vadd.f32 %v7179_v29, %v773_v42  ;;  %v1285_v36 = vadd.f32 %v1284_v31, %v1030_v28 }
 0x1fc   :  { %v775_v14 = vadd.f32 %v7187_v60, %v774_v63  ;;  %v1286_v63 = vadd.f32 %v1285_v36, %v1031_v37  ;;  %v1038_v36 = vmul.f32 %v7187_v60, %v7187_v60 }
 0x1fe   :  { %v776_v40 = vadd.f32 %v7192_v53, %v775_v14  ;;  %v1287_v9 = vadd.f32 %v1286_v63, %v1032_v20 }
 0x200   :  { %v777_v42 = vadd.f32 %v7197_v57, %v776_v40  ;;  %v1288_v15 = vadd.f32 %v1287_v9, %v1033_v58  ;;  %v1039_v58 = vmul.f32 %v7192_v53, %v7192_v53  ;;  %v7512_v9 = vld [vmem:[%s9083_s1] ss:$0 sm:$0xff] }
 0x202   :  { %v778_v46 = vrot.slane %v777_v42, 4  ;;  %v1289_v28 = vadd.f32 %v1288_v15, %v1034_v0 }
 0x204   :  { %v779_v33 = vadd.f32 %v778_v46, %v777_v42  ;;  %v1290_v37 = vadd.f32 %v1289_v28, %v1035_v5  ;;  %v9636_v28 = vld [vmem:[#allocation7_spill] sm:$0xff] }
 0x206   :  { %v780_v14 = vrot.slane %v779_v33, 2  ;;  %v1291_v20 = vadd.f32 %v1290_v37, %v1036_v24  ;;  %v9631_v37 = vld [vmem:[#allocation2_spill] sm:$0xff] }
 0x208   :  { %v781_v40 = vadd.f32 %v780_v14, %v779_v33  ;;  %v1040_v33 = vmul.f32 %v7197_v57, %v7197_v57  ;;  %v1292_v63 = vadd.f32 %v1291_v20, %v1037_v10  ;;  %v9633_v20 = vld [vmem:[#allocation4_spill] sm:$0xff] }
 0x20a   :  { %v782_v31 = vrot.slane %v781_v40, 1  ;;  %v1293_v5 = vadd.f32 %v1292_v63, %v1038_v36  ;;  %v9634_v63 = vld [vmem:[#allocation5_spill] sm:$0xff] }
 0x20c   :  { %v783_v42 = vadd.f32 %v782_v31, %v781_v40  ;;  %v1294_v36 = vadd.f32 %v1293_v5, %v1039_v58  ;;  %v9635_v40 = vld [vmem:[#allocation6_spill] sm:$0xff]  ;;  %v9637_v31 = vld [vmem:[#allocation8_spill] sm:$0xff] }
 0x20e   :  { %v7220_v46 = vmul.f32 0.00048828125, %v783_v42  ;;  %v1295_v5 = vadd.f32 %v1294_v36, %v1040_v33  ;;  %v9638_v42 = vld [vmem:[#allocation9_spill] sm:$0xff] }
 0x210   :  { %v7228_v0 = vmul.f32 %v7220_v46, %v7220_v46  ;;  %v1296_v36 = vrot.slane %v1295_v5, 4  ;;  %v9737_v22 = vsub.f32 %v5566_v2, %v7220_v46  ;;  %v9738_v45 = vsub.f32 %v5568_v3, %v7220_v46 }
 0x211   :  { %v9739_v14 = vsub.f32 %v5570_v4, %v7220_v46  ;;  %v9741_v2 = vsub.f32 %v5579_v8, %v7220_v46  ;;  %v9742_v3 = vsub.f32 %v5585_v11, %v7220_v46  ;;  %v9743_v4 = vsub.f32 %v5588_v13, %v7220_v46 }
 0x212   :  { %v1297_v58 = vadd.f32 %v1296_v36, %v1295_v5  ;;  %v9632_v5 = vld [vmem:[#allocation3_spill] sm:$0xff]  ;;  %v9639_v36 = vld [vmem:[#allocation10_spill] sm:$0xff] }
 0x214   :  { %v1298_v33 = vrot.slane %v1297_v58, 2 }
 0x216   :  { %v1299_v60 = vadd.f32 %v1298_v33, %v1297_v58  ;;  %v9653_v33 = vld [vmem:[#allocation24_spill] sm:$0xff] }
 0x218   :  { %v1300_v53 = vrot.slane %v1299_v60, 1 }
 0x21a   :  { %v1301_v10 = vadd.f32 %v1300_v53, %v1299_v60 }
 0x21c   :  { %v1302_v58 = vmul.f32 0.00048828125, %v1301_v10 }
 0x21e   :  { %v1304_v54 = vsub.f32 %v1302_v58, %v7228_v0 }
 0x220   :  { %v1561_v10 = vadd.f32 1e-05, %v1304_v54 }
 0x222   :  { %5541 = vrsqrt.f32 %v1561_v10  ;;  %v9740_v10 = vsub.f32 %v5575_v6, %v7220_v46  ;;  %v9744_v6 = vsub.f32 %v5594_v16, %v7220_v46 }
 0x22f   :  { %v7507_v54 = vpop.eup %5541 }
 0x230   :  { %v1563_v24 = vmul.f32 %v7507_v54, %v9737_v22  ;;  %v1564_v51 = vmul.f32 %v7507_v54, %v9738_v45  ;;  %v1565_v59 = vmul.f32 %v7507_v54, %v9739_v14  ;;  %v1566_v15 = vmul.f32 %v7507_v54, %v9740_v10 }
 0x231   :  { %v1567_v22 = vmul.f32 %v7507_v54, %v9741_v2  ;;  %v1568_v45 = vmul.f32 %v7507_v54, %v9742_v3  ;;  %v1569_v14 = vmul.f32 %v7507_v54, %v9743_v4  ;;  %v1570_v10 = vmul.f32 %v7507_v54, %v9744_v6 }
 0x232   :  { %v1826_v29 = vmul.f32 %v7512_v9, %v1563_v24  ;;  %v1827_v8 = vmul.f32 %v7512_v9, %v1564_v51  ;;  %v1828_v2 = vmul.f32 %v7512_v9, %v1565_v59  ;;  %v1829_v11 = vmul.f32 %v7512_v9, %v1566_v15 }
 0x233   :  { %v1830_v3 = vmul.f32 %v7512_v9, %v1567_v22  ;;  %v1831_v58 = vmul.f32 %v7512_v9, %v1568_v45  ;;  %v1832_v13 = vmul.f32 %v7512_v9, %v1569_v14  ;;  %v1833_v4 = vmul.f32 %v7512_v9, %v1570_v10 }
 0x234   :  { %v2082_v53 = vmax.f32 %v1826_v29, 0.0  ;;  %v2083_v16 = vmax.f32 %v1827_v8, 0.0  ;;  %v2084_v57 = vmax.f32 %v1828_v2, 0.0  ;;  %v2085_v6 = vmax.f32 %v1829_v11, 0.0 }
 0x235   :  { %v2086_v48 = vmax.f32 %v1830_v3, 0.0  ;;  %v2087_v24 = vmax.f32 %v1831_v58, 0.0  ;;  %v2088_v0 = vmax.f32 %v1832_v13, 0.0  ;;  %v2089_v51 = vmax.f32 %v1833_v4, 0.0 }
 0x236   :  { %v4650_v60 = vpack.c.bf16 %v2083_v16, %v2082_v53  ;;  %v4655_v59 = vpack.c.bf16 %v2085_v6, %v2084_v57  ;;  %v9745_v15 = vsub.f32 %v5597_v18, %v7220_v46  ;;  %v9746_v45 = vsub.f32 %v5603_v21, %v7220_v46 }
 0x237   :  { %v4660_v29 = vpack.c.bf16 %v2087_v24, %v2086_v48  ;;  %v4665_v10 = vpack.c.bf16 %v2089_v51, %v2088_v0  ;;  %v9747_v8 = vsub.f32 %v5606_v23, %v7220_v46  ;;  %v9748_v57 = vsub.f32 %v5612_v26, %v7220_v46 }
 0x238   :  { %v1571_v22 = vmul.f32 %v7507_v54, %v9745_v15  ;;  %v1572_v14 = vmul.f32 %v7507_v54, %v9746_v45  ;;  %4651 = vst [vmem:[%s9084_s2] sm:$0xff] %v4650_v60   ;;  %5414 = vst [vmem:[%s9084_s2 + $0x8] sm:$0xff] %v4655_v59   ;;  %v9749_v23 = vsub.f32 %v5619_v30, %v7220_v46 }
 0x239   :  { %v1573_v58 = vmul.f32 %v7507_v54, %v9747_v8  ;;  %v1574_v53 = vmul.f32 %v7507_v54, %v9748_v57  ;;  %v9750_v26 = vsub.f32 %v5627_v34, %v7220_v46  ;;  %5415 = vst [vmem:[%s9084_s2 + $0x10] sm:$0xff] %v4660_v29   ;;  %5416 = vst [vmem:[%s9084_s2 + $0x18] sm:$0xff] %v4665_v10  }
 0x23a   :  { %v1834_v18 = vmul.f32 %v7512_v9, %v1571_v22  ;;  %v1835_v21 = vmul.f32 %v7512_v9, %v1572_v14  ;;  %v1575_v48 = vmul.f32 %v7507_v54, %v9749_v23  ;;  %v9751_v30 = vsub.f32 %v5632_v38, %v7220_v46 }
 0x23b   :  { %v1576_v0 = vmul.f32 %v7507_v54, %v9750_v26  ;;  %v1836_v60 = vmul.f32 %v7512_v9, %v1573_v58  ;;  %v1837_v2 = vmul.f32 %v7512_v9, %v1574_v53  ;;  %v9752_v34 = vsub.f32 %v5640_v43, %v7220_v46 }
 0x23c   :  { %v1577_v11 = vmul.f32 %v7507_v54, %v9751_v30  ;;  %v2090_v13 = vmax.f32 %v1834_v18, 0.0  ;;  %v2091_v4 = vmax.f32 %v1835_v21, 0.0  ;;  %v1838_v16 = vmul.f32 %v7512_v9, %v1575_v48 }
 0x23d   :  { %v1578_v3 = vmul.f32 %v7507_v54, %v9752_v34  ;;  %v1839_v6 = vmul.f32 %v7512_v9, %v1576_v0  ;;  %v2092_v24 = vmax.f32 %v1836_v60, 0.0  ;;  %v2093_v51 = vmax.f32 %v1837_v2, 0.0 }
 0x23e   :  { %v1840_v59 = vmul.f32 %v7512_v9, %v1577_v11  ;;  %v4670_v38 = vpack.c.bf16 %v2091_v4, %v2090_v13  ;;  %v2094_v22 = vmax.f32 %v1838_v16, 0.0  ;;  %v9753_v43 = vsub.f32 %v5645_v47, %v7220_v46 }
 0x23f   :  { %v1841_v15 = vmul.f32 %v7512_v9, %v1578_v3  ;;  %v2095_v45 = vmax.f32 %v1839_v6, 0.0  ;;  %v4675_v29 = vpack.c.bf16 %v2093_v51, %v2092_v24  ;;  %v9754_v58 = vsub.f32 %v5653_v52, %v7220_v46 }
 0x240   :  { %v1579_v14 = vmul.f32 %v7507_v54, %v9753_v43  ;;  %v2096_v10 = vmax.f32 %v1840_v59, 0.0  ;;  %5417 = vst [vmem:[%s9084_s2 + $0x20] sm:$0xff] %v4670_v38   ;;  %v9755_v47 = vsub.f32 %v5658_v56, %v7220_v46  ;;  %v9756_v23 = vsub.f32 %v5666_v61, %v7220_v46 }
 0x241   :  { %v2097_v8 = vmax.f32 %v1841_v15, 0.0  ;;  %v1580_v57 = vmul.f32 %v7507_v54, %v9754_v58  ;;  %v4680_v53 = vpack.c.bf16 %v2095_v45, %v2094_v22  ;;  %5418 = vst [vmem:[%s9084_s2 + $0x28] sm:$0xff] %v4675_v29   ;;  %v9757_v0 = vsub.f32 %v5671_v1, %v7220_v46 }
 0x242   :  { %v1842_v18 = vmul.f32 %v7512_v9, %v1579_v14  ;;  %v1581_v21 = vmul.f32 %v7507_v54, %v9755_v47  ;;  %v1582_v48 = vmul.f32 %v7507_v54, %v9756_v23  ;;  %v9758_v56 = vsub.f32 %v5679_v12, %v7220_v46 }
 0x243   :  { %v4685_v52 = vpack.c.bf16 %v2097_v8, %v2096_v10  ;;  %v1843_v26 = vmul.f32 %v7512_v9, %v1580_v57  ;;  %v1583_v60 = vmul.f32 %v7507_v54, %v9757_v0  ;;  %5419 = vst [vmem:[%s9084_s2 + $0x30] sm:$0xff] %v4680_v53   ;;  %v9759_v34 = vsub.f32 %v5684_v19, %v7220_v46 }
 0x244   :  { %v1584_v2 = vmul.f32 %v7507_v54, %v9758_v56  ;;  %v2098_v61 = vmax.f32 %v1842_v18, 0.0  ;;  %v1844_v30 = vmul.f32 %v7512_v9, %v1581_v21  ;;  %v1845_v11 = vmul.f32 %v7512_v9, %v1582_v48 }
 0x245   :  { %v1585_v1 = vmul.f32 %v7507_v54, %v9759_v34  ;;  %5420 = vst [vmem:[%s9084_s2 + $0x38] sm:$0xff] %v4685_v52   ;;  %v2099_v12 = vmax.f32 %v1843_v26, 0.0  ;;  %v1846_v3 = vmul.f32 %v7512_v9, %v1583_v60  ;;  %v9760_v4 = vsub.f32 %v5692_v27, %v7220_v46 }
 0x246   :  { %v1847_v13 = vmul.f32 %v7512_v9, %v1584_v2  ;;  %v2100_v6 = vmax.f32 %v1844_v30, 0.0  ;;  %v2101_v24 = vmax.f32 %v1845_v11, 0.0  ;;  %v9761_v51 = vsub.f32 %v5697_v32, %v7220_v46 }
 0x247   :  { %v1586_v16 = vmul.f32 %v7507_v54, %v9760_v4  ;;  %v1848_v19 = vmul.f32 %v7512_v9, %v1585_v1  ;;  %v4690_v15 = vpack.c.bf16 %v2099_v12, %v2098_v61  ;;  %v2102_v38 = vmax.f32 %v1846_v3, 0.0 }
 0x248   :  { %v1587_v59 = vmul.f32 %v7507_v54, %v9761_v51  ;;  %v2103_v22 = vmax.f32 %v1847_v13, 0.0  ;;  %v4695_v43 = vpack.c.bf16 %v2101_v24, %v2100_v6  ;;  %v9762_v27 = vsub.f32 %v5705_v39, %v7220_v46 }
 0x249   :  { %v1849_v45 = vmul.f32 %v7512_v9, %v1586_v16  ;;  %v2104_v14 = vmax.f32 %v1848_v19, 0.0  ;;  %5421 = vst [vmem:[%s9084_s2 + $0x40] sm:$0xff] %v4690_v15   ;;  %v9763_v58 = vsub.f32 %v5710_v44, %v7220_v46  ;;  %v9764_v53 = vsub.f32 %v5718_v50, %v7220_v46 }
 0x24a   :  { %v1588_v29 = vmul.f32 %v7507_v54, %v9762_v27  ;;  %v1850_v10 = vmul.f32 %v7512_v9, %v1587_v59  ;;  %v4700_v32 = vpack.c.bf16 %v2103_v22, %v2102_v38  ;;  %5422 = vst [vmem:[%s9084_s2 + $0x48] sm:$0xff] %v4695_v43   ;;  %v9765_v21 = vsub.f32 %v5723_v55, %v7220_v46 }
 0x24b   :  { %v2105_v8 = vmax.f32 %v1849_v45, 0.0  ;;  %v1589_v57 = vmul.f32 %v7507_v54, %v9763_v58  ;;  %v1590_v39 = vmul.f32 %v7507_v54, %v9764_v53  ;;  %v9766_v44 = vsub.f32 %v5731_v62, %v7220_v46 }
 0x24c   :  { %v1851_v18 = vmul.f32 %v7512_v9, %v1588_v29  ;;  %v2106_v47 = vmax.f32 %v1850_v10, 0.0  ;;  %v1591_v23 = vmul.f32 %v7507_v54, %v9765_v21  ;;  %5423 = vst [vmem:[%s9084_s2 + $0x50] sm:$0xff] %v4700_v32   ;;  %v9767_v0 = vsub.f32 %v5736_v7, %v7220_v46 }
 0x24d   :  { %v1592_v48 = vmul.f32 %v7507_v54, %v9766_v44  ;;  %v4705_v50 = vpack.c.bf16 %v2105_v8, %v2104_v14  ;;  %v1852_v52 = vmul.f32 %v7512_v9, %v1589_v57  ;;  %v1853_v26 = vmul.f32 %v7512_v9, %v1590_v39 }
 0x24e   :  { %v1593_v55 = vmul.f32 %v7507_v54, %v9767_v0  ;;  %v2107_v60 = vmax.f32 %v1851_v18, 0.0  ;;  %v1854_v56 = vmul.f32 %v7512_v9, %v1591_v23  ;;  %v9768_v2 = vsub.f32 %v5744_v17, %v7220_v46 }
 0x24f   :  { %v1855_v62 = vmul.f32 %v7512_v9, %v1592_v48  ;;  %5424 = vst [vmem:[%s9084_s2 + $0x58] sm:$0xff] %v4705_v50   ;;  %v2108_v30 = vmax.f32 %v1852_v52, 0.0  ;;  %v2109_v11 = vmax.f32 %v1853_v26, 0.0  ;;  %v9769_v34 = vsub.f32 %v5749_v25, %v7220_v46 }
 0x250   :  { %v1594_v61 = vmul.f32 %v7507_v54, %v9768_v2  ;;  %v1856_v7 = vmul.f32 %v7512_v9, %v1593_v55  ;;  %v4710_v12 = vpack.c.bf16 %v2107_v60, %v2106_v47  ;;  %v2110_v3 = vmax.f32 %v1854_v56, 0.0 }
 0x251   :  { %v1595_v1 = vmul.f32 %v7507_v54, %v9769_v34  ;;  %v2111_v13 = vmax.f32 %v1855_v62, 0.0  ;;  %v4715_v4 = vpack.c.bf16 %v2109_v11, %v2108_v30  ;;  %v9770_v6 = vsub.f32 %v5757_v35, %v7220_v46 }
 0x252   :  { %v1857_v17 = vmul.f32 %v7512_v9, %v1594_v61  ;;  %v2112_v16 = vmax.f32 %v1856_v7, 0.0  ;;  %5425 = vst [vmem:[%s9084_s2 + $0x60] sm:$0xff] %v4710_v12   ;;  %v9771_v59 = vsub.f32 %v5762_v41, %v7220_v46  ;;  %v9772_v38 = vsub.f32 %v5770_v49, %v7220_v46 }
 0x253   :  { %v1596_v24 = vmul.f32 %v7507_v54, %v9770_v6  ;;  %v1858_v19 = vmul.f32 %v7512_v9, %v1595_v1  ;;  %v4720_v25 = vpack.c.bf16 %v2111_v13, %v2110_v3  ;;  %5426 = vst [vmem:[%s9084_s2 + $0x68] sm:$0xff] %v4715_v4   ;;  %v9773_v43 = vsub.f32 %v9631_v37, %v7220_v46  ;;  %v9784_v13 = vld [vmem:[#allocation12_spill] sm:$0xff] }
 0x254   :  { %v2113_v51 = vmax.f32 %v1857_v17, 0.0  ;;  %v1597_v15 = vmul.f32 %v7507_v54, %v9771_v59  ;;  %v1598_v35 = vmul.f32 %v7507_v54, %v9772_v38  ;;  %v9774_v41 = vsub.f32 %v9632_v5, %v7220_v46  ;;  %v9788_v38 = vld [vmem:[#allocation14_spill] sm:$0xff] }
 0x255   :  { %v1859_v22 = vmul.f32 %v7512_v9, %v1596_v24  ;;  %v2114_v45 = vmax.f32 %v1858_v19, 0.0  ;;  %v1599_v14 = vmul.f32 %v7507_v54, %v9773_v43  ;;  %5427 = vst [vmem:[%s9084_s2 + $0x70] sm:$0xff] %v4720_v25   ;;  %v9775_v32 = vsub.f32 %v9633_v20, %v7220_v46  ;;  %v9786_v24 = vld [vmem:[#allocation13_spill] sm:$0xff] }
 0x256   :  { %v1600_v27 = vmul.f32 %v7507_v54, %v9774_v41  ;;  %v4725_v49 = vpack.c.bf16 %v2113_v51, %v2112_v16  ;;  %v1860_v29 = vmul.f32 %v7512_v9, %v1597_v15  ;;  %v1861_v10 = vmul.f32 %v7512_v9, %v1598_v35 }
 0x257   :  { %v1601_v37 = vmul.f32 %v7507_v54, %v9775_v32  ;;  %v2115_v8 = vmax.f32 %v1859_v22, 0.0  ;;  %v1862_v58 = vmul.f32 %v7512_v9, %v1599_v14  ;;  %v9776_v57 = vsub.f32 %v9634_v63, %v7220_v46 }
 0x258   :  { %v1863_v5 = vmul.f32 %v7512_v9, %v1600_v27  ;;  %5428 = vst [vmem:[%s9084_s2 + $0x78] sm:$0xff] %v4725_v49   ;;  %v2116_v39 = vmax.f32 %v1860_v29, 0.0  ;;  %v2117_v18 = vmax.f32 %v1861_v10, 0.0  ;;  %v9777_v47 = vsub.f32 %v9635_v40, %v7220_v46  ;;  %v9790_v29 = vld [vmem:[#allocation15_spill] sm:$0xff] }
 0x259   :  { %v1602_v53 = vmul.f32 %v7507_v54, %v9776_v57  ;;  %v1864_v20 = vmul.f32 %v7512_v9, %v1601_v37  ;;  %v4730_v23 = vpack.c.bf16 %v2115_v8, %v2114_v45  ;;  %v2118_v44 = vmax.f32 %v1862_v58, 0.0 }
 0x25a   :  { %v1603_v21 = vmul.f32 %v7507_v54, %v9777_v47  ;;  %v2119_v48 = vmax.f32 %v1863_v5, 0.0  ;;  %v4735_v50 = vpack.c.bf16 %v2117_v18, %v2116_v39  ;;  %v9778_v26 = vsub.f32 %v9636_v28, %v7220_v46  ;;  %v9792_v5 = vld [vmem:[#allocation16_spill] sm:$0xff]  ;;  %v9794_v39 = vld [vmem:[#allocation17_spill] sm:$0xff] }
 0x25b   :  { %v1865_v63 = vmul.f32 %v7512_v9, %v1602_v53  ;;  %v2120_v52 = vmax.f32 %v1864_v20, 0.0  ;;  %5429 = vst [vmem:[%s9084_s2 + $0x80] sm:$0xff] %v4730_v23   ;;  %v9779_v56 = vsub.f32 %v9637_v31, %v7220_v46  ;;  %v9780_v2 = vsub.f32 %v9638_v42, %v7220_v46  ;;  %v9782_v31 = vld [vmem:[#allocation11_spill] sm:$0xff]  ;;  %v9796_v23 = vld [vmem:[#allocation18_spill] sm:$0xff] }
 0x25c   :  { %v1604_v0 = vmul.f32 %v7507_v54, %v9778_v26  ;;  %v1866_v55 = vmul.f32 %v7512_v9, %v1603_v21  ;;  %v4740_v40 = vpack.c.bf16 %v2119_v48, %v2118_v44  ;;  %5430 = vst [vmem:[%s9084_s2 + $0x88] sm:$0xff] %v4735_v50   ;;  %v9781_v11 = vsub.f32 %v9639_v36, %v7220_v46 }
 0x25d   :  { %v2121_v60 = vmax.f32 %v1865_v63, 0.0  ;;  %v1605_v62 = vmul.f32 %v7507_v54, %v9779_v56  ;;  %v1606_v28 = vmul.f32 %v7507_v54, %v9780_v2  ;;  %v9783_v34 = vsub.f32 %v9782_v31, %v7220_v46  ;;  %v9798_v63 = vld [vmem:[#allocation19_spill] sm:$0xff] }
 0x25e   :  { %v1867_v61 = vmul.f32 %v7512_v9, %v1604_v0  ;;  %v2122_v30 = vmax.f32 %v1866_v55, 0.0  ;;  %v1607_v7 = vmul.f32 %v7507_v54, %v9781_v11  ;;  %5431 = vst [vmem:[%s9084_s2 + $0x90] sm:$0xff] %v4740_v40   ;;  %v9785_v17 = vsub.f32 %v9784_v13, %v7220_v46  ;;  %v9800_v40 = vld [vmem:[#allocation20_spill] sm:$0xff] }
 0x25f   :  { %v1608_v1 = vmul.f32 %v7507_v54, %v9783_v34  ;;  %v4745_v42 = vpack.c.bf16 %v2121_v60, %v2120_v52  ;;  %v1868_v12 = vmul.f32 %v7512_v9, %v1605_v62  ;;  %v1869_v3 = vmul.f32 %v7512_v9, %v1606_v28 }
 0x260   :  { %v1609_v36 = vmul.f32 %v7507_v54, %v9785_v17  ;;  %v2123_v4 = vmax.f32 %v1867_v61, 0.0  ;;  %v1870_v16 = vmul.f32 %v7512_v9, %v1607_v7  ;;  %v9787_v19 = vsub.f32 %v9786_v24, %v7220_v46  ;;  %v9802_v61 = vld [vmem:[#allocation21_spill] sm:$0xff] }
 0x261   :  { %v1871_v6 = vmul.f32 %v7512_v9, %v1608_v1  ;;  %5432 = vst [vmem:[%s9084_s2 + $0x98] sm:$0xff] %v4745_v42   ;;  %v2124_v51 = vmax.f32 %v1868_v12, 0.0  ;;  %v2125_v59 = vmax.f32 %v1869_v3, 0.0  ;;  %v9789_v35 = vsub.f32 %v9788_v38, %v7220_v46  ;;  %v9804_v1 = vld [vmem:[#allocation22_spill] sm:$0xff] }
 0x262   :  { %v1610_v25 = vmul.f32 %v7507_v54, %v9787_v19  ;;  %v1872_v15 = vmul.f32 %v7512_v9, %v1609_v36  ;;  %v4750_v45 = vpack.c.bf16 %v2123_v4, %v2122_v30  ;;  %v2126_v43 = vmax.f32 %v1870_v16, 0.0 }
 0x263   :  { %v1611_v22 = vmul.f32 %v7507_v54, %v9789_v35  ;;  %v2127_v14 = vmax.f32 %v1871_v6, 0.0  ;;  %v4755_v27 = vpack.c.bf16 %v2125_v59, %v2124_v51  ;;  %v9791_v10 = vsub.f32 %v9790_v29, %v7220_v46  ;;  %v9806_v6 = vld [vmem:[#allocation23_spill] sm:$0xff]  ;;  %v9809_v35 = vld [vmem:[#allocation25_spill] sm:$0xff] }
 0x264   :  { %v1873_v41 = vmul.f32 %v7512_v9, %v1610_v25  ;;  %v2128_v49 = vmax.f32 %v1872_v15, 0.0  ;;  %5433 = vst [vmem:[%s9084_s2 + $0xa0] sm:$0xff] %v4750_v45   ;;  %v9793_v57 = vsub.f32 %v9792_v5, %v7220_v46  ;;  %v9795_v18 = vsub.f32 %v9794_v39, %v7220_v46 }
 0x265   :  { %v1612_v32 = vmul.f32 %v7507_v54, %v9791_v10  ;;  %v1874_v37 = vmul.f32 %v7512_v9, %v1611_v22  ;;  %v4760_v8 = vpack.c.bf16 %v2127_v14, %v2126_v43  ;;  %5434 = vst [vmem:[%s9084_s2 + $0xa8] sm:$0xff] %v4755_v27   ;;  %v9797_v44 = vsub.f32 %v9796_v23, %v7220_v46 }
 0x266   :  { %v2129_v58 = vmax.f32 %v1873_v41, 0.0  ;;  %v1613_v53 = vmul.f32 %v7507_v54, %v9793_v57  ;;  %v1614_v20 = vmul.f32 %v7507_v54, %v9795_v18  ;;  %v9799_v50 = vsub.f32 %v9798_v63, %v7220_v46  ;;  %v9811_v41 = vld [vmem:[#allocation26_spill] sm:$0xff] }
 0x267   :  { %v1875_v47 = vmul.f32 %v7512_v9, %v1612_v32  ;;  %v2130_v21 = vmax.f32 %v1874_v37, 0.0  ;;  %v1615_v48 = vmul.f32 %v7507_v54, %v9797_v44  ;;  %5435 = vst [vmem:[%s9084_s2 + $0xb0] sm:$0xff] %v4760_v8   ;;  %v9801_v60 = vsub.f32 %v9800_v40, %v7220_v46  ;;  %v9819_v63 = vld [vmem:[#allocation30_spill] sm:$0xff] }
 0x268   :  { %v1616_v52 = vmul.f32 %v7507_v54, %v9799_v50  ;;  %v4765_v26 = vpack.c.bf16 %v2129_v58, %v2128_v49  ;;  %v1876_v0 = vmul.f32 %v7512_v9, %v1613_v53  ;;  %v1877_v55 = vmul.f32 %v7512_v9, %v1614_v20  ;;  %v9815_v58 = vld [vmem:[#allocation28_spill] sm:$0xff]  ;;  %v9817_v20 = vld [vmem:[#allocation29_spill] sm:$0xff] }
 0x269   :  { %v1617_v56 = vmul.f32 %v7507_v54, %v9801_v60  ;;  %v2131_v62 = vmax.f32 %v1875_v47, 0.0  ;;  %v1878_v2 = vmul.f32 %v7512_v9, %v1615_v48  ;;  %v9803_v30 = vsub.f32 %v9802_v61, %v7220_v46 }
 0x26a   :  { %v1879_v28 = vmul.f32 %v7512_v9, %v1616_v52  ;;  %5436 = vst [vmem:[%s9084_s2 + $0xb8] sm:$0xff] %v4765_v26   ;;  %v2132_v7 = vmax.f32 %v1876_v0, 0.0  ;;  %v2133_v31 = vmax.f32 %v1877_v55, 0.0  ;;  %v9805_v42 = vsub.f32 %v9804_v1, %v7220_v46  ;;  %v9825_v1 = vld [vmem:[#allocation33_spill] sm:$0xff] }
 0x26b   :  { %v1618_v11 = vmul.f32 %v7507_v54, %v9803_v30  ;;  %v1880_v34 = vmul.f32 %v7512_v9, %v1617_v56  ;;  %v4770_v3 = vpack.c.bf16 %v2131_v62, %v2130_v21  ;;  %v2134_v13 = vmax.f32 %v1878_v2, 0.0  ;;  %v9821_v62 = vld [vmem:[#allocation31_spill] sm:$0xff] }
 0x26c   :  { %v1619_v12 = vmul.f32 %v7507_v54, %v9805_v42  ;;  %v2135_v17 = vmax.f32 %v1879_v28, 0.0  ;;  %v4775_v4 = vpack.c.bf16 %v2133_v31, %v2132_v7  ;;  %v9807_v24 = vsub.f32 %v9806_v6, %v7220_v46  ;;  %v9823_v7 = vld [vmem:[#allocation32_spill] sm:$0xff] }
 0x26d   :  { %v1881_v36 = vmul.f32 %v7512_v9, %v1618_v11  ;;  %v2136_v16 = vmax.f32 %v1880_v34, 0.0  ;;  %5437 = vst [vmem:[%s9084_s2 + $0xc0] sm:$0xff] %v4770_v3   ;;  %v9808_v15 = vsub.f32 %v9653_v33, %v7220_v46  ;;  %v9810_v22 = vsub.f32 %v9809_v35, %v7220_v46  ;;  %v9813_v33 = vld [vmem:[#allocation27_spill] sm:$0xff] }
 0x26e   :  { %v1620_v19 = vmul.f32 %v7507_v54, %v9807_v24  ;;  %v1882_v25 = vmul.f32 %v7512_v9, %v1619_v12  ;;  %v4780_v51 = vpack.c.bf16 %v2135_v17, %v2134_v13  ;;  %5438 = vst [vmem:[%s9084_s2 + $0xc8] sm:$0xff] %v4775_v4   ;;  %v9812_v27 = vsub.f32 %v9811_v41, %v7220_v46  ;;  %v9827_v17 = vld [vmem:[#allocation34_spill] sm:$0xff] }
 0x26f   :  { %v2137_v59 = vmax.f32 %v1881_v36, 0.0  ;;  %v1621_v38 = vmul.f32 %v7507_v54, %v9808_v15  ;;  %v1622_v45 = vmul.f32 %v7507_v54, %v9810_v22  ;;  %v9814_v29 = vsub.f32 %v9813_v33, %v7220_v46 }
 0x270   :  { %v1883_v43 = vmul.f32 %v7512_v9, %v1620_v19  ;;  %v2138_v14 = vmax.f32 %v1882_v25, 0.0  ;;  %v1623_v49 = vmul.f32 %v7507_v54, %v9812_v27  ;;  %5439 = vst [vmem:[%s9084_s2 + $0xd0] sm:$0xff] %v4780_v51   ;;  %v9816_v5 = vsub.f32 %v9815_v58, %v7220_v46 }
 0x271   :  { %v1624_v10 = vmul.f32 %v7507_v54, %v9814_v29  ;;  %v4785_v32 = vpack.c.bf16 %v2137_v59, %v2136_v16  ;;  %v1884_v37 = vmul.f32 %v7512_v9, %v1621_v38  ;;  %v1885_v8 = vmul.f32 %v7512_v9, %v1622_v45  ;;  %v9829_v16 = vld [vmem:[#allocation35_spill] sm:$0xff]  ;;  %v9831_v59 = vld [vmem:[#allocation36_spill] sm:$0xff]  ;;  %v9835_v29 = vld [vmem:[#allocation38_spill] sm:$0xff] }
 0x272   :  { %v1625_v57 = vmul.f32 %v7507_v54, %v9816_v5  ;;  %v2139_v53 = vmax.f32 %v1883_v43, 0.0  ;;  %v1886_v39 = vmul.f32 %v7512_v9, %v1623_v49  ;;  %v9818_v47 = vsub.f32 %v9817_v20, %v7220_v46  ;;  %v9833_v43 = vld [vmem:[#allocation37_spill] sm:$0xff] }
 0x273   :  { %v1887_v18 = vmul.f32 %v7512_v9, %v1624_v10  ;;  %5440 = vst [vmem:[%s9084_s2 + $0xd8] sm:$0xff] %v4785_v32   ;;  %v2140_v23 = vmax.f32 %v1884_v37, 0.0  ;;  %v2141_v44 = vmax.f32 %v1885_v8, 0.0  ;;  %v9820_v50 = vsub.f32 %v9819_v63, %v7220_v46 }
 0x274   :  { %v1626_v21 = vmul.f32 %v7507_v54, %v9818_v47  ;;  %v1888_v48 = vmul.f32 %v7512_v9, %v1625_v57  ;;  %v4790_v26 = vpack.c.bf16 %v2139_v53, %v2138_v14  ;;  %v2142_v0 = vmax.f32 %v1886_v39, 0.0  ;;  %v9837_v39 = vld [vmem:[#allocation39_spill] sm:$0xff] }
 0x275   :  { %v1627_v52 = vmul.f32 %v7507_v54, %v9820_v50  ;;  %v2143_v55 = vmax.f32 %v1887_v18, 0.0  ;;  %v4795_v60 = vpack.c.bf16 %v2141_v44, %v2140_v23  ;;  %v9822_v2 = vsub.f32 %v9821_v62, %v7220_v46  ;;  %v9839_v44 = vld [vmem:[#allocation40_spill] sm:$0xff]  ;;  %v9841_v50 = vld [vmem:[#allocation41_spill] sm:$0xff]  ;;  %v9845_v62 = vld [vmem:[#allocation43_spill] sm:$0xff] }
 0x276   :  { %v1889_v40 = vmul.f32 %v7512_v9, %v1626_v21  ;;  %v2144_v56 = vmax.f32 %v1888_v48, 0.0  ;;  %5441 = vst [vmem:[%s9084_s2 + $0xe0] sm:$0xff] %v4790_v26   ;;  %v9824_v31 = vsub.f32 %v9823_v7, %v7220_v46  ;;  %v9826_v42 = vsub.f32 %v9825_v1, %v7220_v46  ;;  %v9847_v7 = vld [vmem:[#allocation44_spill] sm:$0xff] }
 0x277   :  { %v1628_v28 = vmul.f32 %v7507_v54, %v9822_v2  ;;  %v1890_v61 = vmul.f32 %v7512_v9, %v1627_v52  ;;  %v4800_v30 = vpack.c.bf16 %v2143_v55, %v2142_v0  ;;  %5442 = vst [vmem:[%s9084_s2 + $0xe8] sm:$0xff] %v4795_v60   ;;  %v9828_v36 = vsub.f32 %v9827_v17, %v7220_v46 }
 0x278   :  { %v2145_v11 = vmax.f32 %v1889_v40, 0.0  ;;  %v1629_v34 = vmul.f32 %v7507_v54, %v9824_v31  ;;  %v1630_v12 = vmul.f32 %v7507_v54, %v9826_v42  ;;  %v9830_v6 = vsub.f32 %v9829_v16, %v7220_v46  ;;  %v9843_v40 = vld [vmem:[#allocation42_spill] sm:$0xff] }
 0x279   :  { %v1891_v3 = vmul.f32 %v7512_v9, %v1628_v28  ;;  %v2146_v13 = vmax.f32 %v1890_v61, 0.0  ;;  %v1631_v4 = vmul.f32 %v7507_v54, %v9828_v36  ;;  %5443 = vst [vmem:[%s9084_s2 + $0xf0] sm:$0xff] %v4800_v30   ;;  %v9832_v15 = vsub.f32 %v9831_v59, %v7220_v46 }
 0x27a   :  { %v1632_v24 = vmul.f32 %v7507_v54, %v9830_v6  ;;  %v4805_v19 = vpack.c.bf16 %v2145_v11, %v2144_v56  ;;  %v1892_v25 = vmul.f32 %v7512_v9, %v1629_v34  ;;  %v1893_v51 = vmul.f32 %v7512_v9, %v1630_v12  ;;  %v9851_v6 = vld [vmem:[#allocation46_spill] sm:$0xff] }
 0x27b   :  { %v1633_v38 = vmul.f32 %v7507_v54, %v9832_v15  ;;  %v2147_v35 = vmax.f32 %v1891_v3, 0.0  ;;  %v1894_v22 = vmul.f32 %v7512_v9, %v1631_v4  ;;  %v9834_v14 = vsub.f32 %v9833_v43, %v7220_v46  ;;  %v9849_v3 = vld [vmem:[#allocation45_spill] sm:$0xff] }
 0x27c   :  { %v1895_v45 = vmul.f32 %v7512_v9, %v1632_v24  ;;  %5444 = vst [vmem:[%s9084_s2 + $0xf8] sm:$0xff] %v4805_v19   ;;  %v2148_v27 = vmax.f32 %v1892_v25, 0.0  ;;  %v2149_v49 = vmax.f32 %v1893_v51, 0.0  ;;  %v9836_v10 = vsub.f32 %v9835_v29, %v7220_v46 }
 0x27d   :  { %v1634_v41 = vmul.f32 %v7507_v54, %v9834_v14  ;;  %v1896_v33 = vmul.f32 %v7512_v9, %v1633_v38  ;;  %v4810_v37 = vpack.c.bf16 %v2147_v35, %v2146_v13  ;;  %v2150_v8 = vmax.f32 %v1894_v22, 0.0  ;;  %v9853_v22 = vld [vmem:[#allocation47_spill] sm:$0xff] }
 0x27e   :  { %v1635_v32 = vmul.f32 %v7507_v54, %v9836_v10  ;;  %v2151_v58 = vmax.f32 %v1895_v45, 0.0  ;;  %v4815_v57 = vpack.c.bf16 %v2149_v49, %v2148_v27  ;;  %v9838_v18 = vsub.f32 %v9837_v39, %v7220_v46  ;;  %v9855_v49 = vld [vmem:[#allocation48_spill] sm:$0xff]  ;;  %v9857_v10 = vld [vmem:[#allocation49_spill] sm:$0xff]  ;;  %v9861_v39 = vld [vmem:[#allocation51_spill] sm:$0xff] }
 0x27f   :  { %v1897_v5 = vmul.f32 %v7512_v9, %v1634_v41  ;;  %v2152_v53 = vmax.f32 %v1896_v33, 0.0  ;;  %5445 = vst [vmem:[%s9084_s2 + $0x100] sm:$0xff] %v4810_v37   ;;  %v9840_v48 = vsub.f32 %v9839_v44, %v7220_v46  ;;  %v9842_v52 = vsub.f32 %v9841_v50, %v7220_v46  ;;  %v9863_v44 = vld [vmem:[#allocation52_spill] sm:$0xff] }
 0x280   :  { %v1636_v20 = vmul.f32 %v7507_v54, %v9838_v18  ;;  %v1898_v47 = vmul.f32 %v7512_v9, %v1635_v32  ;;  %v4820_v21 = vpack.c.bf16 %v2151_v58, %v2150_v8  ;;  %5446 = vst [vmem:[%s9084_s2 + $0x108] sm:$0xff] %v4815_v57   ;;  %v9844_v60 = vsub.f32 %v9843_v40, %v7220_v46 }
 0x281   :  { %v2153_v23 = vmax.f32 %v1897_v5, 0.0  ;;  %v1637_v63 = vmul.f32 %v7507_v54, %v9840_v48  ;;  %v1638_v26 = vmul.f32 %v7507_v54, %v9842_v52  ;;  %v9846_v2 = vsub.f32 %v9845_v62, %v7220_v46  ;;  %v9859_v5 = vld [vmem:[#allocation50_spill] sm:$0xff] }
 0x282   :  { %v1899_v0 = vmul.f32 %v7512_v9, %v1636_v20  ;;  %v2154_v55 = vmax.f32 %v1898_v47, 0.0  ;;  %v1639_v56 = vmul.f32 %v7507_v54, %v9844_v60  ;;  %5447 = vst [vmem:[%s9084_s2 + $0x110] sm:$0xff] %v4820_v21   ;;  %v9848_v31 = vsub.f32 %v9847_v7, %v7220_v46 }
 0x283   :  { %v1640_v28 = vmul.f32 %v7507_v54, %v9846_v2  ;;  %v4825_v61 = vpack.c.bf16 %v2153_v23, %v2152_v53  ;;  %v1900_v30 = vmul.f32 %v7512_v9, %v1637_v63  ;;  %v1901_v11 = vmul.f32 %v7512_v9, %v1638_v26  ;;  %v9867_v2 = vld [vmem:[#allocation54_spill] sm:$0xff] }
 0x284   :  { %v1641_v34 = vmul.f32 %v7507_v54, %v9848_v31  ;;  %v2155_v1 = vmax.f32 %v1899_v0, 0.0  ;;  %v1902_v42 = vmul.f32 %v7512_v9, %v1639_v56  ;;  %v9850_v13 = vsub.f32 %v9849_v3, %v7220_v46  ;;  %v9865_v0 = vld [vmem:[#allocation53_spill] sm:$0xff] }
 0x285   :  { %v1903_v12 = vmul.f32 %v7512_v9, %v1640_v28  ;;  %5448 = vst [vmem:[%s9084_s2 + $0x118] sm:$0xff] %v4825_v61   ;;  %v2156_v36 = vmax.f32 %v1900_v30, 0.0  ;;  %v2157_v4 = vmax.f32 %v1901_v11, 0.0  ;;  %v9852_v24 = vsub.f32 %v9851_v6, %v7220_v46 }
 0x286   :  { %v1642_v17 = vmul.f32 %v7507_v54, %v9850_v13  ;;  %v1904_v16 = vmul.f32 %v7512_v9, %v1641_v34  ;;  %v4830_v25 = vpack.c.bf16 %v2155_v1, %v2154_v55  ;;  %v2158_v51 = vmax.f32 %v1902_v42, 0.0  ;;  %v9869_v42 = vld [vmem:[#allocation55_spill] sm:$0xff] }
 0x287   :  { %v1643_v19 = vmul.f32 %v7507_v54, %v9852_v24  ;;  %v2159_v59 = vmax.f32 %v1903_v12, 0.0  ;;  %v4835_v38 = vpack.c.bf16 %v2157_v4, %v2156_v36  ;;  %v9854_v45 = vsub.f32 %v9853_v22, %v7220_v46  ;;  %v9871_v4 = vld [vmem:[#allocation56_spill] sm:$0xff]  ;;  %v9873_v24 = vld [vmem:[#allocation57_spill] sm:$0xff]  ;;  %v9877_v22 = vld [vmem:[#allocation59_spill] sm:$0xff] }
 0x288   :  { %v1905_v15 = vmul.f32 %v7512_v9, %v1642_v17  ;;  %v2160_v35 = vmax.f32 %v1904_v16, 0.0  ;;  %5449 = vst [vmem:[%s9084_s2 + $0x120] sm:$0xff] %v4830_v25   ;;  %v9856_v33 = vsub.f32 %v9855_v49, %v7220_v46  ;;  %v9858_v32 = vsub.f32 %v9857_v10, %v7220_v46  ;;  %v9879_v49 = vld [vmem:[#allocation60_spill] sm:$0xff] }
 0x289   :  { %v1644_v43 = vmul.f32 %v7507_v54, %v9854_v45  ;;  %v1906_v14 = vmul.f32 %v7512_v9, %v1643_v19  ;;  %v4840_v41 = vpack.c.bf16 %v2159_v59, %v2158_v51  ;;  %5450 = vst [vmem:[%s9084_s2 + $0x128] sm:$0xff] %v4835_v38   ;;  %v9860_v57 = vsub.f32 %v9859_v5, %v7220_v46 }
 0x28a   :  { %v2161_v27 = vmax.f32 %v1905_v15, 0.0  ;;  %v1645_v29 = vmul.f32 %v7507_v54, %v9856_v33  ;;  %v1646_v37 = vmul.f32 %v7507_v54, %v9858_v32  ;;  %v9862_v18 = vsub.f32 %v9861_v39, %v7220_v46  ;;  %v9875_v15 = vld [vmem:[#allocation58_spill] sm:$0xff] }
 0x28b   :  { %v1907_v8 = vmul.f32 %v7512_v9, %v1644_v43  ;;  %v2162_v58 = vmax.f32 %v1906_v14, 0.0  ;;  %v1647_v53 = vmul.f32 %v7507_v54, %v9860_v57  ;;  %5451 = vst [vmem:[%s9084_s2 + $0x130] sm:$0xff] %v4840_v41   ;;  %v9864_v48 = vsub.f32 %v9863_v44, %v7220_v46 }
 0x28c   :  { %v1648_v20 = vmul.f32 %v7507_v54, %v9862_v18  ;;  %v4845_v47 = vpack.c.bf16 %v2161_v27, %v2160_v35  ;;  %v1908_v21 = vmul.f32 %v7512_v9, %v1645_v29  ;;  %v1909_v23 = vmul.f32 %v7512_v9, %v1646_v37  ;;  %v9883_v18 = vld [vmem:[#allocation62_spill] sm:$0xff] }
 0x28d   :  { %v1649_v63 = vmul.f32 %v7507_v54, %v9864_v48  ;;  %v2163_v50 = vmax.f32 %v1907_v8, 0.0  ;;  %v1910_v52 = vmul.f32 %v7512_v9, %v1647_v53  ;;  %v9866_v55 = vsub.f32 %v9865_v0, %v7220_v46  ;;  %v9881_v8 = vld [vmem:[#allocation61_spill] sm:$0xff] }
 0x28e   :  { %v1911_v26 = vmul.f32 %v7512_v9, %v1648_v20  ;;  %5452 = vst [vmem:[%s9084_s2 + $0x138] sm:$0xff] %v4845_v47   ;;  %v2164_v60 = vmax.f32 %v1908_v21, 0.0  ;;  %v2165_v56 = vmax.f32 %v1909_v23, 0.0  ;;  %v9868_v28 = vsub.f32 %v9867_v2, %v7220_v46 }
 0x28f   :  { %v1650_v40 = vmul.f32 %v7507_v54, %v9866_v55  ;;  %v1912_v62 = vmul.f32 %v7512_v9, %v1649_v63  ;;  %v4850_v30 = vpack.c.bf16 %v2163_v50, %v2162_v58  ;;  %v2166_v11 = vmax.f32 %v1910_v52, 0.0  ;;  %v9885_v52 = vld [vmem:[#allocation63_spill] sm:$0xff] }
 0x290   :  { %v1651_v61 = vmul.f32 %v7507_v54, %v9868_v28  ;;  %v2167_v7 = vmax.f32 %v1911_v26, 0.0  ;;  %v4855_v34 = vpack.c.bf16 %v2165_v56, %v2164_v60  ;;  %v9870_v12 = vsub.f32 %v9869_v42, %v7220_v46  ;;  %v9887_v56 = vld [vmem:[#allocation64_spill] sm:$0xff]  ;;  %v9889_v28 = vld [vmem:[#allocation65_spill] sm:$0xff]  ;;  %v9893_v42 = vld [vmem:[#allocation67_spill] sm:$0xff] }
 0x291   :  { %v1913_v31 = vmul.f32 %v7512_v9, %v1650_v40  ;;  %v2168_v1 = vmax.f32 %v1912_v62, 0.0  ;;  %5453 = vst [vmem:[%s9084_s2 + $0x140] sm:$0xff] %v4850_v30   ;;  %v9872_v16 = vsub.f32 %v9871_v4, %v7220_v46  ;;  %v9874_v19 = vsub.f32 %v9873_v24, %v7220_v46  ;;  %v9895_v4 = vld [vmem:[#allocation68_spill] sm:$0xff] }
 0x292   :  { %v1652_v3 = vmul.f32 %v7507_v54, %v9870_v12  ;;  %v1914_v13 = vmul.f32 %v7512_v9, %v1651_v61  ;;  %v4860_v17 = vpack.c.bf16 %v2167_v7, %v2166_v11  ;;  %5454 = vst [vmem:[%s9084_s2 + $0x148] sm:$0xff] %v4855_v34   ;;  %v9876_v38 = vsub.f32 %v9875_v15, %v7220_v46 }
 0x293   :  { %v2169_v36 = vmax.f32 %v1913_v31, 0.0  ;;  %v1653_v6 = vmul.f32 %v7507_v54, %v9872_v16  ;;  %v1654_v25 = vmul.f32 %v7507_v54, %v9874_v19  ;;  %v9878_v45 = vsub.f32 %v9877_v22, %v7220_v46  ;;  %v9891_v31 = vld [vmem:[#allocation66_spill] sm:$0xff] }
 0x294   :  { %v1915_v51 = vmul.f32 %v7512_v9, %v1652_v3  ;;  %v2170_v59 = vmax.f32 %v1914_v13, 0.0  ;;  %v1655_v35 = vmul.f32 %v7507_v54, %v9876_v38  ;;  %5455 = vst [vmem:[%s9084_s2 + $0x150] sm:$0xff] %v4860_v17   ;;  %v9880_v33 = vsub.f32 %v9879_v49, %v7220_v46 }
 0x295   :  { %v1656_v43 = vmul.f32 %v7507_v54, %v9878_v45  ;;  %v4865_v14 = vpack.c.bf16 %v2169_v36, %v2168_v1  ;;  %v1916_v41 = vmul.f32 %v7512_v9, %v1653_v6  ;;  %v1917_v27 = vmul.f32 %v7512_v9, %v1654_v25  ;;  %v9899_v45 = vld [vmem:[#allocation70_spill] sm:$0xff] }
 0x296   :  { %v1657_v29 = vmul.f32 %v7507_v54, %v9880_v33  ;;  %v2171_v10 = vmax.f32 %v1915_v51, 0.0  ;;  %v1918_v32 = vmul.f32 %v7512_v9, %v1655_v35  ;;  %v9882_v58 = vsub.f32 %v9881_v8, %v7220_v46  ;;  %v9897_v51 = vld [vmem:[#allocation69_spill] sm:$0xff] }
 0x297   :  { %v1919_v37 = vmul.f32 %v7512_v9, %v1656_v43  ;;  %5456 = vst [vmem:[%s9084_s2 + $0x158] sm:$0xff] %v4865_v14   ;;  %v2172_v57 = vmax.f32 %v1916_v41, 0.0  ;;  %v2173_v53 = vmax.f32 %v1917_v27, 0.0  ;;  %v9884_v20 = vsub.f32 %v9883_v18, %v7220_v46 }
 0x298   :  { %v1658_v5 = vmul.f32 %v7507_v54, %v9882_v58  ;;  %v1920_v39 = vmul.f32 %v7512_v9, %v1657_v29  ;;  %v4870_v21 = vpack.c.bf16 %v2171_v10, %v2170_v59  ;;  %v2174_v23 = vmax.f32 %v1918_v32, 0.0  ;;  %v9901_v32 = vld [vmem:[#allocation71_spill] sm:$0xff] }
 0x299   :  { %v1659_v47 = vmul.f32 %v7507_v54, %v9884_v20  ;;  %v2175_v44 = vmax.f32 %v1919_v37, 0.0  ;;  %v4875_v63 = vpack.c.bf16 %v2173_v53, %v2172_v57  ;;  %v9886_v26 = vsub.f32 %v9885_v52, %v7220_v46  ;;  %v9903_v53 = vld [vmem:[#allocation72_spill] sm:$0xff]  ;;  %v9905_v20 = vld [vmem:[#allocation73_spill] sm:$0xff]  ;;  %v9909_v52 = vld [vmem:[#allocation75_spill] sm:$0xff] }
 0x29a   :  { %v1921_v48 = vmul.f32 %v7512_v9, %v1658_v5  ;;  %v2176_v50 = vmax.f32 %v1920_v39, 0.0  ;;  %5457 = vst [vmem:[%s9084_s2 + $0x160] sm:$0xff] %v4870_v21   ;;  %v9888_v62 = vsub.f32 %v9887_v56, %v7220_v46  ;;  %v9890_v61 = vsub.f32 %v9889_v28, %v7220_v46  ;;  %v9911_v56 = vld [vmem:[#allocation76_spill] sm:$0xff] }
 0x29b   :  { %v1660_v0 = vmul.f32 %v7507_v54, %v9886_v26  ;;  %v1922_v55 = vmul.f32 %v7512_v9, %v1659_v47  ;;  %v4880_v40 = vpack.c.bf16 %v2175_v44, %v2174_v23  ;;  %5458 = vst [vmem:[%s9084_s2 + $0x168] sm:$0xff] %v4875_v63   ;;  %v9892_v34 = vsub.f32 %v9891_v31, %v7220_v46 }
 0x29c   :  { %v2177_v60 = vmax.f32 %v1921_v48, 0.0  ;;  %v1661_v2 = vmul.f32 %v7507_v54, %v9888_v62  ;;  %v1662_v30 = vmul.f32 %v7507_v54, %v9890_v61  ;;  %v9894_v12 = vsub.f32 %v9893_v42, %v7220_v46  ;;  %v9907_v48 = vld [vmem:[#allocation74_spill] sm:$0xff] }
 0x29d   :  { %v1923_v11 = vmul.f32 %v7512_v9, %v1660_v0  ;;  %v2178_v7 = vmax.f32 %v1922_v55, 0.0  ;;  %v1663_v1 = vmul.f32 %v7507_v54, %v9892_v34  ;;  %5459 = vst [vmem:[%s9084_s2 + $0x170] sm:$0xff] %v4880_v40   ;;  %v9896_v16 = vsub.f32 %v9895_v4, %v7220_v46 }
 0x29e   :  { %v1664_v3 = vmul.f32 %v7507_v54, %v9894_v12  ;;  %v4885_v13 = vpack.c.bf16 %v2177_v60, %v2176_v50  ;;  %v1924_v17 = vmul.f32 %v7512_v9, %v1661_v2  ;;  %v1925_v36 = vmul.f32 %v7512_v9, %v1662_v30  ;;  %v9915_v12 = vld [vmem:[#allocation78_spill] sm:$0xff] }
 0x29f   :  { %v1665_v6 = vmul.f32 %v7507_v54, %v9896_v16  ;;  %v2179_v24 = vmax.f32 %v1923_v11, 0.0  ;;  %v1926_v19 = vmul.f32 %v7512_v9, %v1663_v1  ;;  %v9898_v59 = vsub.f32 %v9897_v51, %v7220_v46  ;;  %v9913_v11 = vld [vmem:[#allocation77_spill] sm:$0xff] }
 0x2a0   :  { %v1927_v25 = vmul.f32 %v7512_v9, %v1664_v3  ;;  %5460 = vst [vmem:[%s9084_s2 + $0x178] sm:$0xff] %v4885_v13   ;;  %v2180_v38 = vmax.f32 %v1924_v17, 0.0  ;;  %v2181_v35 = vmax.f32 %v1925_v36, 0.0  ;;  %v9900_v43 = vsub.f32 %v9899_v45, %v7220_v46 }
 0x2a1   :  { %v1666_v15 = vmul.f32 %v7507_v54, %v9898_v59  ;;  %v1928_v22 = vmul.f32 %v7512_v9, %v1665_v6  ;;  %v4890_v41 = vpack.c.bf16 %v2179_v24, %v2178_v7  ;;  %v2182_v27 = vmax.f32 %v1926_v19, 0.0  ;;  %v9917_v19 = vld [vmem:[#allocation79_spill] sm:$0xff] }
 0x2a2   :  { %v1667_v14 = vmul.f32 %v7507_v54, %v9900_v43  ;;  %v2183_v49 = vmax.f32 %v1927_v25, 0.0  ;;  %v4895_v29 = vpack.c.bf16 %v2181_v35, %v2180_v38  ;;  %v9902_v37 = vsub.f32 %v9901_v32, %v7220_v46  ;;  %v9919_v35 = vld [vmem:[#allocation80_spill] sm:$0xff]  ;;  %v9921_v43 = vld [vmem:[#allocation81_spill] sm:$0xff]  ;;  %v9925_v32 = vld [vmem:[#allocation83_spill] sm:$0xff] }
 0x2a3   :  { %v1929_v33 = vmul.f32 %v7512_v9, %v1666_v15  ;;  %v2184_v10 = vmax.f32 %v1928_v22, 0.0  ;;  %5461 = vst [vmem:[%s9084_s2 + $0x180] sm:$0xff] %v4890_v41   ;;  %v9904_v39 = vsub.f32 %v9903_v53, %v7220_v46  ;;  %v9906_v47 = vsub.f32 %v9905_v20, %v7220_v46  ;;  %v9927_v53 = vld [vmem:[#allocation84_spill] sm:$0xff] }
 0x2a4   :  { %v1668_v8 = vmul.f32 %v7507_v54, %v9902_v37  ;;  %v1930_v58 = vmul.f32 %v7512_v9, %v1667_v14  ;;  %v4900_v5 = vpack.c.bf16 %v2183_v49, %v2182_v27  ;;  %5462 = vst [vmem:[%s9084_s2 + $0x188] sm:$0xff] %v4895_v29   ;;  %v9908_v63 = vsub.f32 %v9907_v48, %v7220_v46 }
 0x2a5   :  { %v2185_v57 = vmax.f32 %v1929_v33, 0.0  ;;  %v1669_v18 = vmul.f32 %v7507_v54, %v9904_v39  ;;  %v1670_v21 = vmul.f32 %v7507_v54, %v9906_v47  ;;  %v9910_v26 = vsub.f32 %v9909_v52, %v7220_v46  ;;  %v9923_v33 = vld [vmem:[#allocation82_spill] sm:$0xff] }
 0x2a6   :  { %v1931_v23 = vmul.f32 %v7512_v9, %v1668_v8  ;;  %v2186_v44 = vmax.f32 %v1930_v58, 0.0  ;;  %v1671_v50 = vmul.f32 %v7507_v54, %v9908_v63  ;;  %5463 = vst [vmem:[%s9084_s2 + $0x190] sm:$0xff] %v4900_v5   ;;  %v9912_v62 = vsub.f32 %v9911_v56, %v7220_v46 }
 0x2a7   :  { %v1672_v0 = vmul.f32 %v7507_v54, %v9910_v26  ;;  %v4905_v55 = vpack.c.bf16 %v2185_v57, %v2184_v10  ;;  %v1932_v40 = vmul.f32 %v7512_v9, %v1669_v18  ;;  %v1933_v60 = vmul.f32 %v7512_v9, %v1670_v21  ;;  %v9931_v26 = vld [vmem:[#allocation86_spill] sm:$0xff] }
 0x2a8   :  { %v1673_v2 = vmul.f32 %v7507_v54, %v9912_v62  ;;  %v2187_v28 = vmax.f32 %v1931_v23, 0.0  ;;  %v1934_v61 = vmul.f32 %v7512_v9, %v1671_v50  ;;  %v9914_v7 = vsub.f32 %v9913_v11, %v7220_v46  ;;  %v9929_v23 = vld [vmem:[#allocation85_spill] sm:$0xff] }
 0x2a9   :  { %v1935_v30 = vmul.f32 %v7512_v9, %v1672_v0  ;;  %5464 = vst [vmem:[%s9084_s2 + $0x198] sm:$0xff] %v4905_v55   ;;  %v2188_v34 = vmax.f32 %v1932_v40, 0.0  ;;  %v2189_v1 = vmax.f32 %v1933_v60, 0.0  ;;  %v9916_v3 = vsub.f32 %v9915_v12, %v7220_v46 }
 0x2aa   :  { %v1674_v31 = vmul.f32 %v7507_v54, %v9914_v7  ;;  %v1936_v42 = vmul.f32 %v7512_v9, %v1673_v2  ;;  %v4910_v17 = vpack.c.bf16 %v2187_v28, %v2186_v44  ;;  %v2190_v36 = vmax.f32 %v1934_v61, 0.0  ;;  %v9933_v61 = vld [vmem:[#allocation87_spill] sm:$0xff] }
 0x2ab   :  { %v1675_v13 = vmul.f32 %v7507_v54, %v9916_v3  ;;  %v2191_v4 = vmax.f32 %v1935_v30, 0.0  ;;  %v4915_v6 = vpack.c.bf16 %v2189_v1, %v2188_v34  ;;  %v9918_v25 = vsub.f32 %v9917_v19, %v7220_v46  ;;  %v9935_v1 = vld [vmem:[#allocation88_spill] sm:$0xff]  ;;  %v9937_v3 = vld [vmem:[#allocation89_spill] sm:$0xff]  ;;  %v9941_v19 = vld [vmem:[#allocation91_spill] sm:$0xff] }
 0x2ac   :  { %v1937_v16 = vmul.f32 %v7512_v9, %v1674_v31  ;;  %v2192_v24 = vmax.f32 %v1936_v42, 0.0  ;;  %5465 = vst [vmem:[%s9084_s2 + $0x1a0] sm:$0xff] %v4910_v17   ;;  %v9920_v22 = vsub.f32 %v9919_v35, %v7220_v46  ;;  %v9922_v14 = vsub.f32 %v9921_v43, %v7220_v46  ;;  %v9943_v35 = vld [vmem:[#allocation92_spill] sm:$0xff] }
 0x2ad   :  { %v1676_v51 = vmul.f32 %v7507_v54, %v9918_v25  ;;  %v1938_v59 = vmul.f32 %v7512_v9, %v1675_v13  ;;  %v4920_v15 = vpack.c.bf16 %v2191_v4, %v2190_v36  ;;  %5466 = vst [vmem:[%s9084_s2 + $0x1a8] sm:$0xff] %v4915_v6   ;;  %v9924_v29 = vsub.f32 %v9923_v33, %v7220_v46 }
 0x2ae   :  { %v2193_v38 = vmax.f32 %v1937_v16, 0.0  ;;  %v1677_v45 = vmul.f32 %v7507_v54, %v9920_v22  ;;  %v1678_v41 = vmul.f32 %v7507_v54, %v9922_v14  ;;  %v9926_v37 = vsub.f32 %v9925_v32, %v7220_v46  ;;  %v9939_v16 = vld [vmem:[#allocation90_spill] sm:$0xff] }
 0x2af   :  { %v1939_v27 = vmul.f32 %v7512_v9, %v1676_v51  ;;  %v2194_v49 = vmax.f32 %v1938_v59, 0.0  ;;  %v1679_v10 = vmul.f32 %v7507_v54, %v9924_v29  ;;  %5467 = vst [vmem:[%s9084_s2 + $0x1b0] sm:$0xff] %v4920_v15   ;;  %v9928_v39 = vsub.f32 %v9927_v53, %v7220_v46 }
 0x2b0   :  { %v1680_v8 = vmul.f32 %v7507_v54, %v9926_v37  ;;  %v4925_v58 = vpack.c.bf16 %v2193_v38, %v2192_v24  ;;  %v1940_v5 = vmul.f32 %v7512_v9, %v1677_v45  ;;  %v1941_v57 = vmul.f32 %v7512_v9, %v1678_v41  ;;  %v9947_v37 = vld [vmem:[#allocation94_spill] sm:$0xff] }
 0x2b1   :  { %v1681_v18 = vmul.f32 %v7507_v54, %v9928_v39  ;;  %v2195_v20 = vmax.f32 %v1939_v27, 0.0  ;;  %v1942_v47 = vmul.f32 %v7512_v9, %v1679_v10  ;;  %v9930_v44 = vsub.f32 %v9929_v23, %v7220_v46  ;;  %v9945_v27 = vld [vmem:[#allocation93_spill] sm:$0xff] }
 0x2b2   :  { %v1943_v21 = vmul.f32 %v7512_v9, %v1680_v8  ;;  %5468 = vst [vmem:[%s9084_s2 + $0x1b8] sm:$0xff] %v4925_v58   ;;  %v2196_v63 = vmax.f32 %v1940_v5, 0.0  ;;  %v2197_v50 = vmax.f32 %v1941_v57, 0.0  ;;  %v9932_v0 = vsub.f32 %v9931_v26, %v7220_v46 }
 0x2b3   :  { %v1682_v48 = vmul.f32 %v7507_v54, %v9930_v44  ;;  %v1944_v52 = vmul.f32 %v7512_v9, %v1681_v18  ;;  %v4930_v40 = vpack.c.bf16 %v2195_v20, %v2194_v49  ;;  %v2198_v60 = vmax.f32 %v1942_v47, 0.0  ;;  %v9949_v47 = vld [vmem:[#allocation95_spill] sm:$0xff]  ;;  %v8353_v44 = vld [vmem:[%s9083_s1] ss:$0 sm:$0xff] }
 0x2b4   :  { %v1683_v55 = vmul.f32 %v7507_v54, %v9932_v0  ;;  %v2199_v56 = vmax.f32 %v1943_v21, 0.0  ;;  %v4935_v2 = vpack.c.bf16 %v2197_v50, %v2196_v63  ;;  %v9934_v30 = vsub.f32 %v9933_v61, %v7220_v46  ;;  %v9951_v50 = vld [vmem:[#allocation96_spill] sm:$0xff]  ;;  %v9953_v0 = vld [vmem:[#allocation97_spill] sm:$0xff]  ;;  %v9957_v61 = vld [vmem:[#allocation99_spill] sm:$0xff] }
 0x2b5   :  { %v1945_v62 = vmul.f32 %v7512_v9, %v1682_v48  ;;  %v2200_v28 = vmax.f32 %v1944_v52, 0.0  ;;  %5469 = vst [vmem:[%s9084_s2 + $0x1c0] sm:$0xff] %v4930_v40   ;;  %v9936_v42 = vsub.f32 %v9935_v1, %v7220_v46  ;;  %v9938_v13 = vsub.f32 %v9937_v3, %v7220_v46  ;;  %v9959_v1 = vld [vmem:[#allocation100_spill] sm:$0xff] }
 0x2b6   :  { %v1684_v11 = vmul.f32 %v7507_v54, %v9934_v30  ;;  %v1946_v7 = vmul.f32 %v7512_v9, %v1683_v55  ;;  %v4940_v31 = vpack.c.bf16 %v2199_v56, %v2198_v60  ;;  %5470 = vst [vmem:[%s9084_s2 + $0x1c8] sm:$0xff] %v4935_v2   ;;  %v9940_v6 = vsub.f32 %v9939_v16, %v7220_v46 }
 0x2b7   :  { %v2201_v34 = vmax.f32 %v1945_v62, 0.0  ;;  %v1685_v12 = vmul.f32 %v7507_v54, %v9936_v42  ;;  %v1686_v17 = vmul.f32 %v7507_v54, %v9938_v13  ;;  %v9942_v25 = vsub.f32 %v9941_v19, %v7220_v46  ;;  %v9955_v62 = vld [vmem:[#allocation98_spill] sm:$0xff] }
 0x2b8   :  { %v1947_v36 = vmul.f32 %v7512_v9, %v1684_v11  ;;  %v2202_v4 = vmax.f32 %v1946_v7, 0.0  ;;  %v1687_v24 = vmul.f32 %v7507_v54, %v9940_v6  ;;  %5471 = vst [vmem:[%s9084_s2 + $0x1d0] sm:$0xff] %v4940_v31   ;;  %v9944_v22 = vsub.f32 %v9943_v35, %v7220_v46 }
 0x2b9   :  { %v1688_v51 = vmul.f32 %v7507_v54, %v9942_v25  ;;  %v4945_v59 = vpack.c.bf16 %v2201_v34, %v2200_v28  ;;  %v1948_v15 = vmul.f32 %v7512_v9, %v1685_v12  ;;  %v1949_v38 = vmul.f32 %v7512_v9, %v1686_v17  ;;  %v9963_v25 = vld [vmem:[#allocation102_spill] sm:$0xff] }
 0x2ba   :  { %v1689_v45 = vmul.f32 %v7507_v54, %v9944_v22  ;;  %v2203_v43 = vmax.f32 %v1947_v36, 0.0  ;;  %v1950_v14 = vmul.f32 %v7512_v9, %v1687_v24  ;;  %v9946_v49 = vsub.f32 %v9945_v27, %v7220_v46  ;;  %v9961_v36 = vld [vmem:[#allocation101_spill] sm:$0xff] }
 0x2bb   :  { %v1951_v41 = vmul.f32 %v7512_v9, %v1688_v51  ;;  %5472 = vst [vmem:[%s9084_s2 + $0x1d8] sm:$0xff] %v4945_v59   ;;  %v2204_v29 = vmax.f32 %v1948_v15, 0.0  ;;  %v2205_v10 = vmax.f32 %v1949_v38, 0.0  ;;  %v9948_v8 = vsub.f32 %v9947_v37, %v7220_v46 }
 0x2bc   :  { %v1690_v33 = vmul.f32 %v7507_v54, %v9946_v49  ;;  %v1952_v32 = vmul.f32 %v7512_v9, %v1689_v45  ;;  %v4950_v5 = vpack.c.bf16 %v2203_v43, %v2202_v4  ;;  %v2206_v57 = vmax.f32 %v1950_v14, 0.0  ;;  %v9965_v14 = vld [vmem:[#allocation103_spill] sm:$0xff] }
 0x2bd   :  { %v1691_v58 = vmul.f32 %v7507_v54, %v9948_v8  ;;  %v2207_v53 = vmax.f32 %v1951_v41, 0.0  ;;  %v4955_v18 = vpack.c.bf16 %v2205_v10, %v2204_v29  ;;  %v9950_v21 = vsub.f32 %v9949_v47, %v7220_v46  ;;  %v9967_v10 = vld [vmem:[#allocation104_spill] sm:$0xff]  ;;  %v9969_v8 = vld [vmem:[#allocation105_spill] sm:$0xff]  ;;  %v9973_v47 = vld [vmem:[#allocation107_spill] sm:$0xff] }
 0x2be   :  { %v1953_v39 = vmul.f32 %v7512_v9, %v1690_v33  ;;  %v2208_v20 = vmax.f32 %v1952_v32, 0.0  ;;  %5473 = vst [vmem:[%s9084_s2 + $0x1e0] sm:$0xff] %v4950_v5   ;;  %v9952_v52 = vsub.f32 %v9951_v50, %v7220_v46  ;;  %v9954_v55 = vsub.f32 %v9953_v0, %v7220_v46  ;;  %v9975_v50 = vld [vmem:[#allocation108_spill] sm:$0xff] }
 0x2bf   :  { %v1692_v23 = vmul.f32 %v7507_v54, %v9950_v21  ;;  %v1954_v48 = vmul.f32 %v8353_v44, %v1691_v58  ;;  %v4960_v63 = vpack.c.bf16 %v2207_v53, %v2206_v57  ;;  %5474 = vst [vmem:[%s9084_s2 + $0x1e8] sm:$0xff] %v4955_v18   ;;  %v9956_v2 = vsub.f32 %v9955_v62, %v7220_v46 }
 0x2c0   :  { %v2209_v9 = vmax.f32 %v1953_v39, 0.0  ;;  %v1693_v26 = vmul.f32 %v7507_v54, %v9952_v52  ;;  %v1694_v40 = vmul.f32 %v7507_v54, %v9954_v55  ;;  %v9958_v30 = vsub.f32 %v9957_v61, %v7220_v46  ;;  %v9971_v39 = vld [vmem:[#allocation106_spill] sm:$0xff] }
 0x2c1   :  { %v1955_v60 = vmul.f32 %v8353_v44, %v1692_v23  ;;  %v2210_v56 = vmax.f32 %v1954_v48, 0.0  ;;  %v1695_v28 = vmul.f32 %v7507_v54, %v9956_v2  ;;  %5475 = vst [vmem:[%s9084_s2 + $0x1f0] sm:$0xff] %v4960_v63   ;;  %v9960_v42 = vsub.f32 %v9959_v1, %v7220_v46 }
 0x2c2   :  { %v1696_v11 = vmul.f32 %v7507_v54, %v9958_v30  ;;  %v4965_v7 = vpack.c.bf16 %v2209_v9, %v2208_v20  ;;  %v1956_v31 = vmul.f32 %v8353_v44, %v1693_v26  ;;  %v1957_v34 = vmul.f32 %v8353_v44, %v1694_v40  ;;  %v9976_v40 = vld [vmem:[#allocation109_spill] sm:$0xff] }
 0x2c3   :  { %v1697_v12 = vmul.f32 %v7507_v54, %v9960_v42  ;;  %v2211_v3 = vmax.f32 %v1955_v60, 0.0  ;;  %v1958_v13 = vmul.f32 %v8353_v44, %v1695_v28  ;;  %v9962_v4 = vsub.f32 %v9961_v36, %v7220_v46  ;;  %v9977_v28 = vld [vmem:[#allocation110_spill] sm:$0xff]  ;;  %v9978_v42 = vld [vmem:[#allocation111_spill] sm:$0xff]  ;;  %v9979_v36 = vld [vmem:[#allocation112_spill] sm:$0xff] }
 0x2c4   :  { %v1959_v17 = vmul.f32 %v8353_v44, %v1696_v11  ;;  %5476 = vst [vmem:[%s9084_s2 + $0x1f8] sm:$0xff] %v4965_v7   ;;  %v2212_v6 = vmax.f32 %v1956_v31, 0.0  ;;  %v2213_v24 = vmax.f32 %v1957_v34, 0.0  ;;  %v9964_v51 = vsub.f32 %v9963_v25, %v7220_v46 }
 0x2c5   :  { %v1698_v16 = vmul.f32 %v7507_v54, %v9962_v4  ;;  %v1960_v19 = vmul.f32 %v8353_v44, %v1697_v12  ;;  %v4970_v15 = vpack.c.bf16 %v2211_v3, %v2210_v56  ;;  %v2214_v38 = vmax.f32 %v1958_v13, 0.0 }
 0x2c6   :  { %v1699_v59 = vmul.f32 %v7507_v54, %v9964_v51  ;;  %v2215_v35 = vmax.f32 %v1959_v17, 0.0  ;;  %v4975_v45 = vpack.c.bf16 %v2213_v24, %v2212_v6  ;;  %v9966_v41 = vsub.f32 %v9965_v14, %v7220_v46  ;;  %v9981_v51 = vld [vmem:[#allocation114_spill] sm:$0xff] }
 0x2c7   :  { %v1961_v22 = vmul.f32 %v8353_v44, %v1698_v16  ;;  %v2216_v43 = vmax.f32 %v1960_v19, 0.0  ;;  %5477 = vst [vmem:[%s9084_s2 + $0x200] sm:$0xff] %v4970_v15   ;;  %v9968_v32 = vsub.f32 %v9967_v10, %v7220_v46  ;;  %v9970_v58 = vsub.f32 %v9969_v8, %v7220_v46  ;;  %v9980_v16 = vld [vmem:[#allocation113_spill] sm:$0xff] }
 0x2c8   :  { %v1700_v27 = vmul.f32 %v7507_v54, %v9966_v41  ;;  %v1962_v49 = vmul.f32 %v8353_v44, %v1699_v59  ;;  %v4980_v33 = vpack.c.bf16 %v2215_v35, %v2214_v38  ;;  %5478 = vst [vmem:[%s9084_s2 + $0x208] sm:$0xff] %v4975_v45   ;;  %v9972_v18 = vsub.f32 %v9971_v39, %v7220_v46 }
 0x2c9   :  { %v2217_v29 = vmax.f32 %v1961_v22, 0.0  ;;  %v1701_v37 = vmul.f32 %v7507_v54, %v9968_v32  ;;  %v1702_v5 = vmul.f32 %v7507_v54, %v9970_v58  ;;  %v9974_v21 = vsub.f32 %v9973_v47, %v7220_v46  ;;  %v9982_v22 = vld [vmem:[#allocation115_spill] sm:$0xff]  ;;  %v9984_v58 = vld [vmem:[#allocation117_spill] sm:$0xff] }
 0x2ca   :  { %v1963_v57 = vmul.f32 %v8353_v44, %v1700_v27  ;;  %v2218_v53 = vmax.f32 %v1962_v49, 0.0  ;;  %v1703_v20 = vmul.f32 %v7507_v54, %v9972_v18  ;;  %5479 = vst [vmem:[%s9084_s2 + $0x210] sm:$0xff] %v4980_v33   ;;  %v1447_v52 = vsub.f32 %v9975_v50, %v7220_v46  ;;  %v9983_v27 = vld [vmem:[#allocation116_spill] sm:$0xff] }
 0x2cb   :  { %v1704_v23 = vmul.f32 %v7507_v54, %v9974_v21  ;;  %v4985_v48 = vpack.c.bf16 %v2217_v29, %v2216_v43  ;;  %v1964_v63 = vmul.f32 %v8353_v44, %v1701_v37  ;;  %v1965_v9 = vmul.f32 %v8353_v44, %v1702_v5 }
 0x2cc   :  { %v2219_v26 = vmax.f32 %v1963_v57, 0.0  ;;  %v1966_v0 = vmul.f32 %v8353_v44, %v1703_v20  ;;  %v1448_v60 = vsub.f32 %v9976_v40, %v7220_v46  ;;  %v1705_v2 = vmul.f32 %v7507_v54, %v1447_v52  ;;  %v9985_v20 = vld [vmem:[#allocation118_spill] sm:$0xff]  ;;  %v9986_v52 = vld [vmem:[#allocation119_spill] sm:$0xff] }
 0x2cd   :  { %v1967_v55 = vmul.f32 %v8353_v44, %v1704_v23  ;;  %5480 = vst [vmem:[%s9084_s2 + $0x218] sm:$0xff] %v4985_v48   ;;  %v2220_v56 = vmax.f32 %v1964_v63, 0.0  ;;  %v2221_v62 = vmax.f32 %v1965_v9, 0.0  ;;  %v1449_v61 = vsub.f32 %v9977_v28, %v7220_v46 }
 0x2ce   :  { %v4990_v30 = vpack.c.bf16 %v2219_v26, %v2218_v53  ;;  %v2222_v11 = vmax.f32 %v1966_v0, 0.0  ;;  %v1706_v31 = vmul.f32 %v7507_v54, %v1448_v60  ;;  %v1968_v1 = vmul.f32 %v8353_v44, %v1705_v2  ;;  %v9987_v60 = vld [vmem:[#allocation120_spill] sm:$0xff] }
 0x2cf   :  { %v2223_v7 = vmax.f32 %v1967_v55, 0.0  ;;  %v4995_v34 = vpack.c.bf16 %v2221_v62, %v2220_v56  ;;  %v1450_v12 = vsub.f32 %v9978_v42, %v7220_v46  ;;  %v1707_v3 = vmul.f32 %v7507_v54, %v1449_v61  ;;  %v9988_v62 = vld [vmem:[#allocation121_spill] sm:$0xff]  ;;  %v9990_v42 = vld [vmem:[#allocation123_spill] sm:$0xff] }
 0x2d0   :  { %5481 = vst [vmem:[%s9084_s2 + $0x220] sm:$0xff] %v4990_v30   ;;  %v1969_v17 = vmul.f32 %v8353_v44, %v1706_v31  ;;  %v1451_v4 = vsub.f32 %v9979_v36, %v7220_v46  ;;  %v1452_v6 = vsub.f32 %v9980_v16, %v7220_v46  ;;  %v2224_v24 = vmax.f32 %v1968_v1, 0.0  ;;  %v9991_v36 = vld [vmem:[#allocation124_spill] sm:$0xff] }
 0x2d1   :  { %v5000_v13 = vpack.c.bf16 %v2223_v7, %v2222_v11  ;;  %5482 = vst [vmem:[%s9084_s2 + $0x228] sm:$0xff] %v4995_v34   ;;  %v1708_v19 = vmul.f32 %v7507_v54, %v1450_v12  ;;  %v1970_v25 = vmul.f32 %v8353_v44, %v1707_v3  ;;  %v1453_v59 = vsub.f32 %v9981_v51, %v7220_v46  ;;  %v9989_v11 = vld [vmem:[#allocation122_spill] sm:$0xff] }
 0x2d2   :  { %v2225_v15 = vmax.f32 %v1969_v17, 0.0  ;;  %v1709_v38 = vmul.f32 %v7507_v54, %v1451_v4  ;;  %v1710_v35 = vmul.f32 %v7507_v54, %v1452_v6  ;;  %v1454_v45 = vsub.f32 %v9982_v22, %v7220_v46 }
 0x2d3   :  { %5483 = vst [vmem:[%s9084_s2 + $0x230] sm:$0xff] %v5000_v13   ;;  %v1971_v43 = vmul.f32 %v8353_v44, %v1708_v19  ;;  %v2226_v14 = vmax.f32 %v1970_v25, 0.0  ;;  %v1711_v41 = vmul.f32 %v7507_v54, %v1453_v59  ;;  %v1455_v49 = vsub.f32 %v9983_v27, %v7220_v46  ;;  %v9992_v59 = vld [vmem:[#allocation125_spill] sm:$0xff] }
 0x2d4   :  { %v5005_v33 = vpack.c.bf16 %v2225_v15, %v2224_v24  ;;  %v1972_v29 = vmul.f32 %v8353_v44, %v1709_v38  ;;  %v1973_v10 = vmul.f32 %v8353_v44, %v1710_v35  ;;  %v1712_v32 = vmul.f32 %v7507_v54, %v1454_v45 }
 0x2d5   :  { %v2227_v37 = vmax.f32 %v1971_v43, 0.0  ;;  %v1974_v8 = vmul.f32 %v8353_v44, %v1711_v41  ;;  %v1456_v5 = vsub.f32 %v9984_v58, %v7220_v46  ;;  %v1713_v57 = vmul.f32 %v7507_v54, %v1455_v49  ;;  %v9993_v43 = vld [vmem:[#allocation126_spill] sm:$0xff] }
 0x2d6   :  { %5484 = vst [vmem:[%s9084_s2 + $0x238] sm:$0xff] %v5005_v33   ;;  %v2228_v53 = vmax.f32 %v1972_v29, 0.0  ;;  %v2229_v39 = vmax.f32 %v1973_v10, 0.0  ;;  %v1975_v18 = vmul.f32 %v8353_v44, %v1712_v32  ;;  %v1457_v47 = vsub.f32 %v9985_v20, %v7220_v46  ;;  %v9994_v32 = vld [vmem:[#allocation127_spill] sm:$0xff] }
 0x2d7   :  { %v5010_v21 = vpack.c.bf16 %v2227_v37, %v2226_v14  ;;  %v2230_v23 = vmax.f32 %v1974_v8, 0.0  ;;  %v1714_v48 = vmul.f32 %v7507_v54, %v1456_v5  ;;  %v1976_v63 = vmul.f32 %v8353_v44, %v1713_v57  ;;  %v9995_v57 = vld [vmem:[#allocation128_spill] sm:$0xff] }
 0x2d8   :  { %v5015_v9 = vpack.c.bf16 %v2229_v39, %v2228_v53  ;;  %v2231_v50 = vmax.f32 %v1975_v18, 0.0  ;;  %v1458_v26 = vsub.f32 %v9986_v52, %v7220_v46  ;;  %v1715_v0 = vmul.f32 %v7507_v54, %v1457_v47  ;;  %v9996_v39 = vld [vmem:[#allocation129_spill] sm:$0xff]  ;;  %v9998_v52 = vld [vmem:[#allocation131_spill] sm:$0xff] }
 0x2d9   :  { %5485 = vst [vmem:[%s9084_s2 + $0x240] sm:$0xff] %v5010_v21   ;;  %v1977_v55 = vmul.f32 %v8353_v44, %v1714_v48  ;;  %v2232_v40 = vmax.f32 %v1976_v63, 0.0  ;;  %v1459_v56 = vsub.f32 %v9987_v60, %v7220_v46  ;;  %v1460_v2 = vsub.f32 %v9988_v62, %v7220_v46  ;;  %v9999_v60 = vld [vmem:[#allocation132_spill] sm:$0xff] }
 0x2da   :  { %5486 = vst [vmem:[%s9084_s2 + $0x248] sm:$0xff] %v5015_v9   ;;  %v5020_v28 = vpack.c.bf16 %v2231_v50, %v2230_v23  ;;  %v1716_v61 = vmul.f32 %v7507_v54, %v1458_v26  ;;  %v1978_v30 = vmul.f32 %v8353_v44, %v1715_v0  ;;  %v1461_v7 = vsub.f32 %v9989_v11, %v7220_v46  ;;  %v9997_v23 = vld [vmem:[#allocation130_spill] sm:$0xff] }
 0x2db   :  { %v2233_v31 = vmax.f32 %v1977_v55, 0.0  ;;  %v1717_v34 = vmul.f32 %v7507_v54, %v1459_v56  ;;  %v1718_v1 = vmul.f32 %v7507_v54, %v1460_v2  ;;  %v1462_v12 = vsub.f32 %v9990_v42, %v7220_v46 }
 0x2dc   :  { %5487 = vst [vmem:[%s9084_s2 + $0x250] sm:$0xff] %v5020_v28   ;;  %v1979_v3 = vmul.f32 %v8353_v44, %v1716_v61  ;;  %v2234_v13 = vmax.f32 %v1978_v30, 0.0  ;;  %v1719_v17 = vmul.f32 %v7507_v54, %v1461_v7  ;;  %v1463_v4 = vsub.f32 %v9991_v36, %v7220_v46  ;;  %v10000_v7 = vld [vmem:[#allocation133_spill] sm:$0xff] }
 0x2dd   :  { %v5025_v16 = vpack.c.bf16 %v2233_v31, %v2232_v40  ;;  %v1980_v6 = vmul.f32 %v8353_v44, %v1717_v34  ;;  %v1981_v24 = vmul.f32 %v8353_v44, %v1718_v1  ;;  %v1720_v19 = vmul.f32 %v7507_v54, %v1462_v12 }
 0x2de   :  { %v2235_v25 = vmax.f32 %v1979_v3, 0.0  ;;  %v1982_v51 = vmul.f32 %v8353_v44, %v1719_v17  ;;  %v1464_v15 = vsub.f32 %v9992_v59, %v7220_v46  ;;  %v1721_v38 = vmul.f32 %v7507_v54, %v1463_v4  ;;  %v10001_v3 = vld [vmem:[#allocation134_spill] sm:$0xff] }
 0x2df   :  { %5488 = vst [vmem:[%s9084_s2 + $0x258] sm:$0xff] %v5025_v16   ;;  %v2236_v35 = vmax.f32 %v1980_v6, 0.0  ;;  %v2237_v22 = vmax.f32 %v1981_v24, 0.0  ;;  %v1983_v45 = vmul.f32 %v8353_v44, %v1720_v19  ;;  %v1465_v14 = vsub.f32 %v9993_v43, %v7220_v46  ;;  %v10002_v19 = vld [vmem:[#allocation135_spill] sm:$0xff] }
 0x2e0   :  { %v5030_v41 = vpack.c.bf16 %v2235_v25, %v2234_v13  ;;  %v2238_v27 = vmax.f32 %v1982_v51, 0.0  ;;  %v1722_v49 = vmul.f32 %v7507_v54, %v1464_v15  ;;  %v1984_v33 = vmul.f32 %v8353_v44, %v1721_v38  ;;  %v10003_v38 = vld [vmem:[#allocation136_spill] sm:$0xff] }
 0x2e1   :  { %v5035_v29 = vpack.c.bf16 %v2237_v22, %v2236_v35  ;;  %v2239_v10 = vmax.f32 %v1983_v45, 0.0  ;;  %v1466_v37 = vsub.f32 %v9994_v32, %v7220_v46  ;;  %v1723_v8 = vmul.f32 %v7507_v54, %v1465_v14  ;;  %v10004_v22 = vld [vmem:[#allocation137_spill] sm:$0xff]  ;;  %v10006_v32 = vld [vmem:[#allocation139_spill] sm:$0xff] }
 0x2e2   :  { %5489 = vst [vmem:[%s9084_s2 + $0x260] sm:$0xff] %v5030_v41   ;;  %v1985_v58 = vmul.f32 %v8353_v44, %v1722_v49  ;;  %v2240_v5 = vmax.f32 %v1984_v33, 0.0  ;;  %v1467_v53 = vsub.f32 %v9995_v57, %v7220_v46  ;;  %v1468_v18 = vsub.f32 %v9996_v39, %v7220_v46  ;;  %v10007_v57 = vld [vmem:[#allocation140_spill] sm:$0xff] }
 0x2e3   :  { %5490 = vst [vmem:[%s9084_s2 + $0x268] sm:$0xff] %v5035_v29   ;;  %v5040_v20 = vpack.c.bf16 %v2239_v10, %v2238_v27  ;;  %v1724_v47 = vmul.f32 %v7507_v54, %v1466_v37  ;;  %v1986_v21 = vmul.f32 %v8353_v44, %v1723_v8  ;;  %v1469_v48 = vsub.f32 %v9997_v23, %v7220_v46  ;;  %v10005_v27 = vld [vmem:[#allocation138_spill] sm:$0xff] }
 0x2e4   :  { %v2241_v63 = vmax.f32 %v1985_v58, 0.0  ;;  %v1725_v9 = vmul.f32 %v7507_v54, %v1467_v53  ;;  %v1726_v50 = vmul.f32 %v7507_v54, %v1468_v18  ;;  %v1470_v26 = vsub.f32 %v9998_v52, %v7220_v46 }
 0x2e5   :  { %5491 = vst [vmem:[%s9084_s2 + $0x270] sm:$0xff] %v5040_v20   ;;  %v1987_v0 = vmul.f32 %v8353_v44, %v1724_v47  ;;  %v2242_v55 = vmax.f32 %v1986_v21, 0.0  ;;  %v1727_v40 = vmul.f32 %v7507_v54, %v1469_v48  ;;  %v1471_v56 = vsub.f32 %v9999_v60, %v7220_v46  ;;  %v10008_v48 = vld [vmem:[#allocation141_spill] sm:$0xff] }
 0x2e6   :  { %v5045_v62 = vpack.c.bf16 %v2241_v63, %v2240_v5  ;;  %v1988_v2 = vmul.f32 %v8353_v44, %v1725_v9  ;;  %v1989_v28 = vmul.f32 %v8353_v44, %v1726_v50  ;;  %v1728_v61 = vmul.f32 %v7507_v54, %v1470_v26 }
 0x2e7   :  { %v2243_v30 = vmax.f32 %v1987_v0, 0.0  ;;  %v1990_v11 = vmul.f32 %v8353_v44, %v1727_v40  ;;  %v1472_v31 = vsub.f32 %v10000_v7, %v7220_v46  ;;  %v1729_v34 = vmul.f32 %v7507_v54, %v1471_v56  ;;  %v10009_v0 = vld [vmem:[#allocation142_spill] sm:$0xff] }
 0x2e8   :  { %5492 = vst [vmem:[%s9084_s2 + $0x278] sm:$0xff] %v5045_v62   ;;  %v2244_v1 = vmax.f32 %v1988_v2, 0.0  ;;  %v2245_v42 = vmax.f32 %v1989_v28, 0.0  ;;  %v1991_v12 = vmul.f32 %v8353_v44, %v1728_v61  ;;  %v1473_v13 = vsub.f32 %v10001_v3, %v7220_v46  ;;  %v10010_v61 = vld [vmem:[#allocation143_spill] sm:$0xff] }
 0x2e9   :  { %v5050_v17 = vpack.c.bf16 %v2243_v30, %v2242_v55  ;;  %v2246_v36 = vmax.f32 %v1990_v11, 0.0  ;;  %v1730_v4 = vmul.f32 %v7507_v54, %v1472_v31  ;;  %v1992_v16 = vmul.f32 %v8353_v44, %v1729_v34  ;;  %v10011_v34 = vld [vmem:[#allocation144_spill] sm:$0xff] }
 0x2ea   :  { %v5055_v6 = vpack.c.bf16 %v2245_v42, %v2244_v1  ;;  %v2247_v24 = vmax.f32 %v1991_v12, 0.0  ;;  %v1474_v25 = vsub.f32 %v10002_v19, %v7220_v46  ;;  %v1731_v51 = vmul.f32 %v7507_v54, %v1473_v13  ;;  %v10012_v42 = vld [vmem:[#allocation145_spill] sm:$0xff]  ;;  %v10014_v19 = vld [vmem:[#allocation147_spill] sm:$0xff] }
 0x2eb   :  { %5493 = vst [vmem:[%s9084_s2 + $0x280] sm:$0xff] %v5050_v17   ;;  %v1993_v59 = vmul.f32 %v8353_v44, %v1730_v4  ;;  %v2248_v15 = vmax.f32 %v1992_v16, 0.0  ;;  %v1475_v35 = vsub.f32 %v10003_v38, %v7220_v46  ;;  %v1476_v45 = vsub.f32 %v10004_v22, %v7220_v46  ;;  %v10015_v38 = vld [vmem:[#allocation148_spill] sm:$0xff] }
 0x2ec   :  { %5494 = vst [vmem:[%s9084_s2 + $0x288] sm:$0xff] %v5055_v6   ;;  %v5060_v43 = vpack.c.bf16 %v2247_v24, %v2246_v36  ;;  %v1732_v14 = vmul.f32 %v7507_v54, %v1474_v25  ;;  %v1994_v41 = vmul.f32 %v8353_v44, %v1731_v51  ;;  %v1477_v49 = vsub.f32 %v10005_v27, %v7220_v46  ;;  %v10013_v36 = vld [vmem:[#allocation146_spill] sm:$0xff] }
 0x2ed   :  { %v2249_v33 = vmax.f32 %v1993_v59, 0.0  ;;  %v1733_v29 = vmul.f32 %v7507_v54, %v1475_v35  ;;  %v1734_v10 = vmul.f32 %v7507_v54, %v1476_v45  ;;  %v1478_v37 = vsub.f32 %v10006_v32, %v7220_v46 }
 0x2ee   :  { %5495 = vst [vmem:[%s9084_s2 + $0x290] sm:$0xff] %v5060_v43   ;;  %v1995_v8 = vmul.f32 %v8353_v44, %v1732_v14  ;;  %v2250_v58 = vmax.f32 %v1994_v41, 0.0  ;;  %v1735_v5 = vmul.f32 %v7507_v54, %v1477_v49  ;;  %v1479_v53 = vsub.f32 %v10007_v57, %v7220_v46  ;;  %v10016_v49 = vld [vmem:[#allocation149_spill] sm:$0xff] }
 0x2ef   :  { %v5065_v39 = vpack.c.bf16 %v2249_v33, %v2248_v15  ;;  %v1996_v18 = vmul.f32 %v8353_v44, %v1733_v29  ;;  %v1997_v20 = vmul.f32 %v8353_v44, %v1734_v10  ;;  %v1736_v47 = vmul.f32 %v7507_v54, %v1478_v37 }
 0x2f0   :  { %v2251_v21 = vmax.f32 %v1995_v8, 0.0  ;;  %v1998_v23 = vmul.f32 %v8353_v44, %v1735_v5  ;;  %v1480_v63 = vsub.f32 %v10008_v48, %v7220_v46  ;;  %v1737_v9 = vmul.f32 %v7507_v54, %v1479_v53  ;;  %v10017_v8 = vld [vmem:[#allocation150_spill] sm:$0xff] }
 0x2f1   :  { %5496 = vst [vmem:[%s9084_s2 + $0x298] sm:$0xff] %v5065_v39   ;;  %v2252_v50 = vmax.f32 %v1996_v18, 0.0  ;;  %v2253_v52 = vmax.f32 %v1997_v20, 0.0  ;;  %v1999_v26 = vmul.f32 %v8353_v44, %v1736_v47  ;;  %v1481_v55 = vsub.f32 %v10009_v0, %v7220_v46  ;;  %v10018_v47 = vld [vmem:[#allocation151_spill] sm:$0xff] }
 0x2f2   :  { %v5070_v40 = vpack.c.bf16 %v2251_v21, %v2250_v58  ;;  %v2254_v60 = vmax.f32 %v1998_v23, 0.0  ;;  %v1738_v56 = vmul.f32 %v7507_v54, %v1480_v63  ;;  %v2000_v62 = vmul.f32 %v8353_v44, %v1737_v9  ;;  %v10019_v9 = vld [vmem:[#allocation152_spill] sm:$0xff] }
 0x2f3   :  { %v5075_v2 = vpack.c.bf16 %v2253_v52, %v2252_v50  ;;  %v2255_v28 = vmax.f32 %v1999_v26, 0.0  ;;  %v1482_v30 = vsub.f32 %v10010_v61, %v7220_v46  ;;  %v1739_v11 = vmul.f32 %v7507_v54, %v1481_v55  ;;  %v10020_v52 = vld [vmem:[#allocation153_spill] sm:$0xff]  ;;  %v10022_v61 = vld [vmem:[#allocation155_spill] sm:$0xff] }
 0x2f4   :  { %5497 = vst [vmem:[%s9084_s2 + $0x2a0] sm:$0xff] %v5070_v40   ;;  %v2001_v7 = vmul.f32 %v8353_v44, %v1738_v56  ;;  %v2256_v31 = vmax.f32 %v2000_v62, 0.0  ;;  %v1483_v1 = vsub.f32 %v10011_v34, %v7220_v46  ;;  %v1484_v12 = vsub.f32 %v10012_v42, %v7220_v46  ;;  %v10023_v34 = vld [vmem:[#allocation156_spill] sm:$0xff] }
 0x2f5   :  { %5498 = vst [vmem:[%s9084_s2 + $0x2a8] sm:$0xff] %v5075_v2   ;;  %v5080_v3 = vpack.c.bf16 %v2255_v28, %v2254_v60  ;;  %v1740_v13 = vmul.f32 %v7507_v54, %v1482_v30  ;;  %v2002_v17 = vmul.f32 %v8353_v44, %v1739_v11  ;;  %v1485_v4 = vsub.f32 %v10013_v36, %v7220_v46  ;;  %v10021_v60 = vld [vmem:[#allocation154_spill] sm:$0xff] }
 0x2f6   :  { %v2257_v16 = vmax.f32 %v2001_v7, 0.0  ;;  %v1741_v6 = vmul.f32 %v7507_v54, %v1483_v1  ;;  %v1742_v24 = vmul.f32 %v7507_v54, %v1484_v12  ;;  %v1486_v25 = vsub.f32 %v10014_v19, %v7220_v46 }
 0x2f7   :  { %5499 = vst [vmem:[%s9084_s2 + $0x2b0] sm:$0xff] %v5080_v3   ;;  %v2003_v51 = vmul.f32 %v8353_v44, %v1740_v13  ;;  %v2258_v59 = vmax.f32 %v2002_v17, 0.0  ;;  %v1743_v15 = vmul.f32 %v7507_v54, %v1485_v4  ;;  %v1487_v35 = vsub.f32 %v10015_v38, %v7220_v46  ;;  %v10024_v4 = vld [vmem:[#allocation157_spill] sm:$0xff] }
 0x2f8   :  { %v5085_v22 = vpack.c.bf16 %v2257_v16, %v2256_v31  ;;  %v2004_v45 = vmul.f32 %v8353_v44, %v1741_v6  ;;  %v2005_v43 = vmul.f32 %v8353_v44, %v1742_v24  ;;  %v1744_v14 = vmul.f32 %v7507_v54, %v1486_v25 }
 0x2f9   :  { %v2259_v41 = vmax.f32 %v2003_v51, 0.0  ;;  %v2006_v27 = vmul.f32 %v8353_v44, %v1743_v15  ;;  %v1488_v33 = vsub.f32 %v10016_v49, %v7220_v46  ;;  %v1745_v29 = vmul.f32 %v7507_v54, %v1487_v35  ;;  %v10025_v51 = vld [vmem:[#allocation158_spill] sm:$0xff] }
 0x2fa   :  { %5500 = vst [vmem:[%s9084_s2 + $0x2b8] sm:$0xff] %v5085_v22   ;;  %v2260_v10 = vmax.f32 %v2004_v45, 0.0  ;;  %v2261_v32 = vmax.f32 %v2005_v43, 0.0  ;;  %v2007_v37 = vmul.f32 %v8353_v44, %v1744_v14  ;;  %v1489_v58 = vsub.f32 %v10017_v8, %v7220_v46  ;;  %v10026_v14 = vld [vmem:[#allocation159_spill] sm:$0xff] }
 0x2fb   :  { %v5090_v5 = vpack.c.bf16 %v2259_v41, %v2258_v59  ;;  %v2262_v57 = vmax.f32 %v2006_v27, 0.0  ;;  %v1746_v53 = vmul.f32 %v7507_v54, %v1488_v33  ;;  %v2008_v39 = vmul.f32 %v8353_v44, %v1745_v29  ;;  %v10027_v29 = vld [vmem:[#allocation160_spill] sm:$0xff] }
 0x2fc   :  { %v5095_v18 = vpack.c.bf16 %v2261_v32, %v2260_v10  ;;  %v2263_v20 = vmax.f32 %v2007_v37, 0.0  ;;  %v1490_v21 = vsub.f32 %v10018_v47, %v7220_v46  ;;  %v1747_v23 = vmul.f32 %v7507_v54, %v1489_v58  ;;  %v10028_v32 = vld [vmem:[#allocation161_spill] sm:$0xff]  ;;  %v10030_v47 = vld [vmem:[#allocation163_spill] sm:$0xff] }
 0x2fd   :  { %5501 = vst [vmem:[%s9084_s2 + $0x2c0] sm:$0xff] %v5090_v5   ;;  %v2009_v48 = vmul.f32 %v8353_v44, %v1746_v53  ;;  %v2264_v63 = vmax.f32 %v2008_v39, 0.0  ;;  %v1491_v50 = vsub.f32 %v10019_v9, %v7220_v46  ;;  %v1492_v26 = vsub.f32 %v10020_v52, %v7220_v46  ;;  %v10031_v9 = vld [vmem:[#allocation164_spill] sm:$0xff] }
 0x2fe   :  { %5502 = vst [vmem:[%s9084_s2 + $0x2c8] sm:$0xff] %v5095_v18   ;;  %v5100_v0 = vpack.c.bf16 %v2263_v20, %v2262_v57  ;;  %v1748_v55 = vmul.f32 %v7507_v54, %v1490_v21  ;;  %v2010_v40 = vmul.f32 %v8353_v44, %v1747_v23  ;;  %v1493_v56 = vsub.f32 %v10021_v60, %v7220_v46  ;;  %v10029_v57 = vld [vmem:[#allocation162_spill] sm:$0xff] }
 0x2ff   :  { %v2265_v62 = vmax.f32 %v2009_v48, 0.0  ;;  %v1749_v2 = vmul.f32 %v7507_v54, %v1491_v50  ;;  %v1750_v28 = vmul.f32 %v7507_v54, %v1492_v26  ;;  %v1494_v30 = vsub.f32 %v10022_v61, %v7220_v46 }
 0x300   :  { %5503 = vst [vmem:[%s9084_s2 + $0x2d0] sm:$0xff] %v5100_v0   ;;  %v2011_v11 = vmul.f32 %v8353_v44, %v1748_v55  ;;  %v2266_v7 = vmax.f32 %v2010_v40, 0.0  ;;  %v1751_v31 = vmul.f32 %v7507_v54, %v1493_v56  ;;  %v1495_v1 = vsub.f32 %v10023_v34, %v7220_v46  ;;  %v10032_v56 = vld [vmem:[#allocation165_spill] sm:$0xff] }
 0x301   :  { %v5105_v42 = vpack.c.bf16 %v2265_v62, %v2264_v63  ;;  %v2012_v12 = vmul.f32 %v8353_v44, %v1749_v2  ;;  %v2013_v3 = vmul.f32 %v8353_v44, %v1750_v28  ;;  %v1752_v13 = vmul.f32 %v7507_v54, %v1494_v30 }
 0x302   :  { %v2267_v17 = vmax.f32 %v2011_v11, 0.0  ;;  %v2014_v36 = vmul.f32 %v8353_v44, %v1751_v31  ;;  %v1496_v16 = vsub.f32 %v10024_v4, %v7220_v46  ;;  %v1753_v6 = vmul.f32 %v7507_v54, %v1495_v1  ;;  %v10033_v11 = vld [vmem:[#allocation166_spill] sm:$0xff] }
 0x303   :  { %5504 = vst [vmem:[%s9084_s2 + $0x2d8] sm:$0xff] %v5105_v42   ;;  %v2268_v24 = vmax.f32 %v2012_v12, 0.0  ;;  %v2269_v19 = vmax.f32 %v2013_v3, 0.0  ;;  %v2015_v25 = vmul.f32 %v8353_v44, %v1752_v13  ;;  %v1497_v59 = vsub.f32 %v10025_v51, %v7220_v46  ;;  %v10034_v13 = vld [vmem:[#allocation167_spill] sm:$0xff] }
 0x304   :  { %v5110_v15 = vpack.c.bf16 %v2267_v17, %v2266_v7  ;;  %v2270_v38 = vmax.f32 %v2014_v36, 0.0  ;;  %v1754_v35 = vmul.f32 %v7507_v54, %v1496_v16  ;;  %v2016_v22 = vmul.f32 %v8353_v44, %v1753_v6  ;;  %v10035_v6 = vld [vmem:[#allocation168_spill] sm:$0xff] }
 0x305   :  { %v5115_v45 = vpack.c.bf16 %v2269_v19, %v2268_v24  ;;  %v2271_v43 = vmax.f32 %v2015_v25, 0.0  ;;  %v1498_v41 = vsub.f32 %v10026_v14, %v7220_v46  ;;  %v1755_v27 = vmul.f32 %v7507_v54, %v1497_v59  ;;  %v10036_v19 = vld [vmem:[#allocation169_spill] sm:$0xff]  ;;  %v10038_v14 = vld [vmem:[#allocation171_spill] sm:$0xff] }
 0x306   :  { %5505 = vst [vmem:[%s9084_s2 + $0x2e0] sm:$0xff] %v5110_v15   ;;  %v2017_v49 = vmul.f32 %v8353_v44, %v1754_v35  ;;  %v2272_v33 = vmax.f32 %v2016_v22, 0.0  ;;  %v1499_v10 = vsub.f32 %v10027_v29, %v7220_v46  ;;  %v1500_v37 = vsub.f32 %v10028_v32, %v7220_v46  ;;  %v10039_v29 = vld [vmem:[#allocation172_spill] sm:$0xff] }
 0x307   :  { %5506 = vst [vmem:[%s9084_s2 + $0x2e8] sm:$0xff] %v5115_v45   ;;  %v5120_v8 = vpack.c.bf16 %v2271_v43, %v2270_v38  ;;  %v1756_v58 = vmul.f32 %v7507_v54, %v1498_v41  ;;  %v2018_v5 = vmul.f32 %v8353_v44, %v1755_v27  ;;  %v1501_v53 = vsub.f32 %v10029_v57, %v7220_v46  ;;  %v10037_v38 = vld [vmem:[#allocation170_spill] sm:$0xff] }
 0x308   :  { %v2273_v39 = vmax.f32 %v2017_v49, 0.0  ;;  %v1757_v18 = vmul.f32 %v7507_v54, %v1499_v10  ;;  %v1758_v20 = vmul.f32 %v7507_v54, %v1500_v37  ;;  %v1502_v21 = vsub.f32 %v10030_v47, %v7220_v46 }
 0x309   :  { %5507 = vst [vmem:[%s9084_s2 + $0x2f0] sm:$0xff] %v5120_v8   ;;  %v2019_v23 = vmul.f32 %v8353_v44, %v1756_v58  ;;  %v2274_v48 = vmax.f32 %v2018_v5, 0.0  ;;  %v1759_v63 = vmul.f32 %v7507_v54, %v1501_v53  ;;  %v1503_v50 = vsub.f32 %v10031_v9, %v7220_v46  ;;  %v10040_v53 = vld [vmem:[#allocation173_spill] sm:$0xff] }
 0x30a   :  { %v5125_v52 = vpack.c.bf16 %v2273_v39, %v2272_v33  ;;  %v2020_v26 = vmul.f32 %v8353_v44, %v1757_v18  ;;  %v2021_v0 = vmul.f32 %v8353_v44, %v1758_v20  ;;  %v1760_v55 = vmul.f32 %v7507_v54, %v1502_v21 }
 0x30b   :  { %v2275_v40 = vmax.f32 %v2019_v23, 0.0  ;;  %v2022_v60 = vmul.f32 %v8353_v44, %v1759_v63  ;;  %v1504_v62 = vsub.f32 %v10032_v56, %v7220_v46  ;;  %v1761_v2 = vmul.f32 %v7507_v54, %v1503_v50  ;;  %v10041_v23 = vld [vmem:[#allocation174_spill] sm:$0xff] }
 0x30c   :  { %5508 = vst [vmem:[%s9084_s2 + $0x2f8] sm:$0xff] %v5125_v52   ;;  %v2276_v28 = vmax.f32 %v2020_v26, 0.0  ;;  %v2277_v61 = vmax.f32 %v2021_v0, 0.0  ;;  %v2023_v30 = vmul.f32 %v8353_v44, %v1760_v55  ;;  %v1505_v7 = vsub.f32 %v10033_v11, %v7220_v46  ;;  %v10042_v55 = vld [vmem:[#allocation175_spill] sm:$0xff] }
 0x30d   :  { %v5130_v31 = vpack.c.bf16 %v2275_v40, %v2274_v48  ;;  %v2278_v34 = vmax.f32 %v2022_v60, 0.0  ;;  %v1762_v1 = vmul.f32 %v7507_v54, %v1504_v62  ;;  %v2024_v42 = vmul.f32 %v8353_v44, %v1761_v2  ;;  %v10043_v2 = vld [vmem:[#allocation176_spill] sm:$0xff] }
 0x30e   :  { %v5135_v12 = vpack.c.bf16 %v2277_v61, %v2276_v28  ;;  %v2279_v3 = vmax.f32 %v2023_v30, 0.0  ;;  %v1506_v17 = vsub.f32 %v10034_v13, %v7220_v46  ;;  %v1763_v36 = vmul.f32 %v7507_v54, %v1505_v7  ;;  %v10044_v61 = vld [vmem:[#allocation177_spill] sm:$0xff]  ;;  %v10046_v13 = vld [vmem:[#allocation179_spill] sm:$0xff] }
 0x30f   :  { %5509 = vst [vmem:[%s9084_s2 + $0x300] sm:$0xff] %v5130_v31   ;;  %v2025_v4 = vmul.f32 %v8353_v44, %v1762_v1  ;;  %v2280_v16 = vmax.f32 %v2024_v42, 0.0  ;;  %v1507_v24 = vsub.f32 %v10035_v6, %v7220_v46  ;;  %v1508_v25 = vsub.f32 %v10036_v19, %v7220_v46  ;;  %v10047_v6 = vld [vmem:[#allocation180_spill] sm:$0xff] }
 0x310   :  { %5510 = vst [vmem:[%s9084_s2 + $0x308] sm:$0xff] %v5135_v12   ;;  %v5140_v51 = vpack.c.bf16 %v2279_v3, %v2278_v34  ;;  %v1764_v59 = vmul.f32 %v7507_v54, %v1506_v17  ;;  %v2026_v15 = vmul.f32 %v8353_v44, %v1763_v36  ;;  %v1509_v35 = vsub.f32 %v10037_v38, %v7220_v46  ;;  %v10045_v34 = vld [vmem:[#allocation178_spill] sm:$0xff] }
 0x311   :  { %v2281_v22 = vmax.f32 %v2025_v4, 0.0  ;;  %v1765_v45 = vmul.f32 %v7507_v54, %v1507_v24  ;;  %v1766_v43 = vmul.f32 %v7507_v54, %v1508_v25  ;;  %v1510_v41 = vsub.f32 %v10038_v14, %v7220_v46 }
 0x312   :  { %5511 = vst [vmem:[%s9084_s2 + $0x310] sm:$0xff] %v5140_v51   ;;  %v2027_v27 = vmul.f32 %v8353_v44, %v1764_v59  ;;  %v2282_v49 = vmax.f32 %v2026_v15, 0.0  ;;  %v1767_v33 = vmul.f32 %v7507_v54, %v1509_v35  ;;  %v1511_v10 = vsub.f32 %v10039_v29, %v7220_v46  ;;  %v10048_v35 = vld [vmem:[#allocation181_spill] sm:$0xff] }
 0x313   :  { %v5145_v32 = vpack.c.bf16 %v2281_v22, %v2280_v16  ;;  %v2028_v37 = vmul.f32 %v8353_v44, %v1765_v45  ;;  %v2029_v8 = vmul.f32 %v8353_v44, %v1766_v43  ;;  %v1768_v58 = vmul.f32 %v7507_v54, %v1510_v41 }
 0x314   :  { %v2283_v5 = vmax.f32 %v2027_v27, 0.0  ;;  %v2030_v57 = vmul.f32 %v8353_v44, %v1767_v33  ;;  %v1512_v39 = vsub.f32 %v10040_v53, %v7220_v46  ;;  %v1769_v18 = vmul.f32 %v7507_v54, %v1511_v10  ;;  %v10049_v27 = vld [vmem:[#allocation182_spill] sm:$0xff] }
 0x315   :  { %5512 = vst [vmem:[%s9084_s2 + $0x318] sm:$0xff] %v5145_v32   ;;  %v2284_v20 = vmax.f32 %v2028_v37, 0.0  ;;  %v2285_v47 = vmax.f32 %v2029_v8, 0.0  ;;  %v2031_v21 = vmul.f32 %v8353_v44, %v1768_v58  ;;  %v1513_v48 = vsub.f32 %v10041_v23, %v7220_v46  ;;  %v10050_v58 = vld [vmem:[#allocation183_spill] sm:$0xff] }
 0x316   :  { %v5150_v63 = vpack.c.bf16 %v2283_v5, %v2282_v49  ;;  %v2286_v9 = vmax.f32 %v2030_v57, 0.0  ;;  %v1770_v50 = vmul.f32 %v7507_v54, %v1512_v39  ;;  %v2032_v52 = vmul.f32 %v8353_v44, %v1769_v18  ;;  %v10051_v18 = vld [vmem:[#allocation184_spill] sm:$0xff] }
 0x317   :  { %v5155_v26 = vpack.c.bf16 %v2285_v47, %v2284_v20  ;;  %v2287_v0 = vmax.f32 %v2031_v21, 0.0  ;;  %v1514_v40 = vsub.f32 %v10042_v55, %v7220_v46  ;;  %v1771_v60 = vmul.f32 %v7507_v54, %v1513_v48  ;;  %v10052_v47 = vld [vmem:[#allocation185_spill] sm:$0xff]  ;;  %v10054_v55 = vld [vmem:[#allocation187_spill] sm:$0xff] }
 0x318   :  { %5513 = vst [vmem:[%s9084_s2 + $0x320] sm:$0xff] %v5150_v63   ;;  %v2033_v56 = vmul.f32 %v8353_v44, %v1770_v50  ;;  %v2288_v62 = vmax.f32 %v2032_v52, 0.0  ;;  %v1515_v28 = vsub.f32 %v10043_v2, %v7220_v46  ;;  %v1516_v30 = vsub.f32 %v10044_v61, %v7220_v46  ;;  %v10055_v2 = vld [vmem:[#allocation188_spill] sm:$0xff] }
 0x319   :  { %5514 = vst [vmem:[%s9084_s2 + $0x328] sm:$0xff] %v5155_v26   ;;  %v5160_v11 = vpack.c.bf16 %v2287_v0, %v2286_v9  ;;  %v1772_v7 = vmul.f32 %v7507_v54, %v1514_v40  ;;  %v2034_v31 = vmul.f32 %v8353_v44, %v1771_v60  ;;  %v1517_v1 = vsub.f32 %v10045_v34, %v7220_v46  ;;  %v10053_v9 = vld [vmem:[#allocation186_spill] sm:$0xff] }
 0x31a   :  { %v2289_v42 = vmax.f32 %v2033_v56, 0.0  ;;  %v1773_v12 = vmul.f32 %v7507_v54, %v1515_v28  ;;  %v1774_v3 = vmul.f32 %v7507_v54, %v1516_v30  ;;  %v1518_v17 = vsub.f32 %v10046_v13, %v7220_v46 }
 0x31b   :  { %5515 = vst [vmem:[%s9084_s2 + $0x330] sm:$0xff] %v5160_v11   ;;  %v2035_v36 = vmul.f32 %v8353_v44, %v1772_v7  ;;  %v2290_v4 = vmax.f32 %v2034_v31, 0.0  ;;  %v1775_v16 = vmul.f32 %v7507_v54, %v1517_v1  ;;  %v1519_v24 = vsub.f32 %v10047_v6, %v7220_v46  ;;  %v10056_v1 = vld [vmem:[#allocation189_spill] sm:$0xff] }
 0x31c   :  { %v5165_v19 = vpack.c.bf16 %v2289_v42, %v2288_v62  ;;  %v2036_v25 = vmul.f32 %v8353_v44, %v1773_v12  ;;  %v2037_v51 = vmul.f32 %v8353_v44, %v1774_v3  ;;  %v1776_v59 = vmul.f32 %v7507_v54, %v1518_v17 }
 0x31d   :  { %v2291_v15 = vmax.f32 %v2035_v36, 0.0  ;;  %v2038_v38 = vmul.f32 %v8353_v44, %v1775_v16  ;;  %v1520_v22 = vsub.f32 %v10048_v35, %v7220_v46  ;;  %v1777_v45 = vmul.f32 %v7507_v54, %v1519_v24  ;;  %v10057_v36 = vld [vmem:[#allocation190_spill] sm:$0xff] }
 0x31e   :  { %5516 = vst [vmem:[%s9084_s2 + $0x338] sm:$0xff] %v5165_v19   ;;  %v2292_v43 = vmax.f32 %v2036_v25, 0.0  ;;  %v2293_v14 = vmax.f32 %v2037_v51, 0.0  ;;  %v2039_v41 = vmul.f32 %v8353_v44, %v1776_v59  ;;  %v1521_v49 = vsub.f32 %v10049_v27, %v7220_v46  ;;  %v10058_v59 = vld [vmem:[#allocation191_spill] sm:$0xff] }
 0x31f   :  { %v5170_v33 = vpack.c.bf16 %v2291_v15, %v2290_v4  ;;  %v2294_v29 = vmax.f32 %v2038_v38, 0.0  ;;  %v1778_v10 = vmul.f32 %v7507_v54, %v1520_v22  ;;  %v2040_v32 = vmul.f32 %v8353_v44, %v1777_v45  ;;  %v10059_v45 = vld [vmem:[#allocation192_spill] sm:$0xff] }
 0x320   :  { %v5175_v37 = vpack.c.bf16 %v2293_v14, %v2292_v43  ;;  %v2295_v8 = vmax.f32 %v2039_v41, 0.0  ;;  %v1522_v5 = vsub.f32 %v10050_v58, %v7220_v46  ;;  %v1779_v57 = vmul.f32 %v7507_v54, %v1521_v49  ;;  %v10060_v14 = vld [vmem:[#allocation193_spill] sm:$0xff]  ;;  %v10062_v58 = vld [vmem:[#allocation195_spill] sm:$0xff] }
 0x321   :  { %5517 = vst [vmem:[%s9084_s2 + $0x340] sm:$0xff] %v5170_v33   ;;  %v2041_v53 = vmul.f32 %v8353_v44, %v1778_v10  ;;  %v2296_v39 = vmax.f32 %v2040_v32, 0.0  ;;  %v1523_v20 = vsub.f32 %v10051_v18, %v7220_v46  ;;  %v1524_v21 = vsub.f32 %v10052_v47, %v7220_v46  ;;  %v10063_v18 = vld [vmem:[#allocation196_spill] sm:$0xff] }
 0x322   :  { %5518 = vst [vmem:[%s9084_s2 + $0x348] sm:$0xff] %v5175_v37   ;;  %v5180_v23 = vpack.c.bf16 %v2295_v8, %v2294_v29  ;;  %v1780_v48 = vmul.f32 %v7507_v54, %v1522_v5  ;;  %v2042_v63 = vmul.f32 %v8353_v44, %v1779_v57  ;;  %v1525_v50 = vsub.f32 %v10053_v9, %v7220_v46  ;;  %v10061_v29 = vld [vmem:[#allocation194_spill] sm:$0xff] }
 0x323   :  { %v2297_v52 = vmax.f32 %v2041_v53, 0.0  ;;  %v1781_v26 = vmul.f32 %v7507_v54, %v1523_v20  ;;  %v1782_v0 = vmul.f32 %v7507_v54, %v1524_v21  ;;  %v1526_v40 = vsub.f32 %v10054_v55, %v7220_v46 }
 0x324   :  { %5519 = vst [vmem:[%s9084_s2 + $0x350] sm:$0xff] %v5180_v23   ;;  %v2043_v60 = vmul.f32 %v8353_v44, %v1780_v48  ;;  %v2298_v56 = vmax.f32 %v2042_v63, 0.0  ;;  %v1783_v62 = vmul.f32 %v7507_v54, %v1525_v50  ;;  %v1527_v28 = vsub.f32 %v10055_v2, %v7220_v46  ;;  %v10064_v50 = vld [vmem:[#allocation197_spill] sm:$0xff] }
 0x325   :  { %v5185_v61 = vpack.c.bf16 %v2297_v52, %v2296_v39  ;;  %v2044_v30 = vmul.f32 %v8353_v44, %v1781_v26  ;;  %v2045_v11 = vmul.f32 %v8353_v44, %v1782_v0  ;;  %v1784_v7 = vmul.f32 %v7507_v54, %v1526_v40 }
 0x326   :  { %v2299_v31 = vmax.f32 %v2043_v60, 0.0  ;;  %v2046_v34 = vmul.f32 %v8353_v44, %v1783_v62  ;;  %v1528_v42 = vsub.f32 %v10056_v1, %v7220_v46  ;;  %v1785_v12 = vmul.f32 %v7507_v54, %v1527_v28  ;;  %v10065_v60 = vld [vmem:[#allocation198_spill] sm:$0xff] }
 0x327   :  { %5520 = vst [vmem:[%s9084_s2 + $0x358] sm:$0xff] %v5185_v61   ;;  %v2300_v3 = vmax.f32 %v2044_v30, 0.0  ;;  %v2301_v13 = vmax.f32 %v2045_v11, 0.0  ;;  %v2047_v17 = vmul.f32 %v8353_v44, %v1784_v7  ;;  %v1529_v4 = vsub.f32 %v10057_v36, %v7220_v46  ;;  %v10066_v7 = vld [vmem:[#allocation199_spill] sm:$0xff] }
 0x328   :  { %v5190_v16 = vpack.c.bf16 %v2299_v31, %v2298_v56  ;;  %v2302_v6 = vmax.f32 %v2046_v34, 0.0  ;;  %v1786_v24 = vmul.f32 %v7507_v54, %v1528_v42  ;;  %v2048_v19 = vmul.f32 %v8353_v44, %v1785_v12  ;;  %v10067_v12 = vld [vmem:[#allocation200_spill] sm:$0xff] }
 0x329   :  { %v5195_v25 = vpack.c.bf16 %v2301_v13, %v2300_v3  ;;  %v2303_v51 = vmax.f32 %v2047_v17, 0.0  ;;  %v1530_v15 = vsub.f32 %v10058_v59, %v7220_v46  ;;  %v1787_v38 = vmul.f32 %v7507_v54, %v1529_v4  ;;  %v10068_v13 = vld [vmem:[#allocation201_spill] sm:$0xff]  ;;  %v10070_v59 = vld [vmem:[#allocation203_spill] sm:$0xff] }
 0x32a   :  { %5521 = vst [vmem:[%s9084_s2 + $0x360] sm:$0xff] %v5190_v16   ;;  %v2049_v35 = vmul.f32 %v8353_v44, %v1786_v24  ;;  %v2304_v22 = vmax.f32 %v2048_v19, 0.0  ;;  %v1531_v43 = vsub.f32 %v10059_v45, %v7220_v46  ;;  %v1532_v41 = vsub.f32 %v10060_v14, %v7220_v46  ;;  %v8952_v16 = vld [vmem:[%s9083_s1] ss:$0 sm:$0xff]  ;;  %v10071_v45 = vld [vmem:[#allocation204_spill] sm:$0xff] }
 0x32b   :  { %5522 = vst [vmem:[%s9084_s2 + $0x368] sm:$0xff] %v5195_v25   ;;  %v5200_v27 = vpack.c.bf16 %v2303_v51, %v2302_v6  ;;  %v1788_v49 = vmul.f32 %v7507_v54, %v1530_v15  ;;  %v2050_v33 = vmul.f32 %v8353_v44, %v1787_v38  ;;  %v1533_v10 = vsub.f32 %v10061_v29, %v7220_v46  ;;  %v10069_v6 = vld [vmem:[#allocation202_spill] sm:$0xff] }
 0x32c   :  { %v2305_v32 = vmax.f32 %v2049_v35, 0.0  ;;  %v1789_v37 = vmul.f32 %v7507_v54, %v1531_v43  ;;  %v1790_v8 = vmul.f32 %v7507_v54, %v1532_v41  ;;  %v1534_v5 = vsub.f32 %v10062_v58, %v7220_v46 }
 0x32d   :  { %5523 = vst [vmem:[%s9084_s2 + $0x370] sm:$0xff] %v5200_v27   ;;  %v2051_v57 = vmul.f32 %v8353_v44, %v1788_v49  ;;  %v2306_v53 = vmax.f32 %v2050_v33, 0.0  ;;  %v1791_v39 = vmul.f32 %v7507_v54, %v1533_v10  ;;  %v1535_v20 = vsub.f32 %v10063_v18, %v7220_v46  ;;  %v10072_v10 = vld [vmem:[#allocation205_spill] sm:$0xff] }
 0x32e   :  { %v5205_v47 = vpack.c.bf16 %v2305_v32, %v2304_v22  ;;  %v2052_v21 = vmul.f32 %v8353_v44, %v1789_v37  ;;  %v2053_v23 = vmul.f32 %v8353_v44, %v1790_v8  ;;  %v1792_v48 = vmul.f32 %v7507_v54, %v1534_v5 }
 0x32f   :  { %v2307_v63 = vmax.f32 %v2051_v57, 0.0  ;;  %v2054_v9 = vmul.f32 %v8353_v44, %v1791_v39  ;;  %v1536_v52 = vsub.f32 %v10064_v50, %v7220_v46  ;;  %v1793_v26 = vmul.f32 %v7507_v54, %v1535_v20  ;;  %v10073_v57 = vld [vmem:[#allocation206_spill] sm:$0xff] }
 0x330   :  { %5524 = vst [vmem:[%s9084_s2 + $0x378] sm:$0xff] %v5205_v47   ;;  %v2308_v0 = vmax.f32 %v2052_v21, 0.0  ;;  %v2309_v55 = vmax.f32 %v2053_v23, 0.0  ;;  %v2055_v40 = vmul.f32 %v8353_v44, %v1792_v48  ;;  %v1537_v56 = vsub.f32 %v10065_v60, %v7220_v46  ;;  %v10074_v48 = vld [vmem:[#allocation207_spill] sm:$0xff] }
 0x331   :  { %v5210_v62 = vpack.c.bf16 %v2307_v63, %v2306_v53  ;;  %v2310_v2 = vmax.f32 %v2054_v9, 0.0  ;;  %v1794_v28 = vmul.f32 %v7507_v54, %v1536_v52  ;;  %v2056_v61 = vmul.f32 %v8353_v44, %v1793_v26  ;;  %v10075_v26 = vld [vmem:[#allocation208_spill] sm:$0xff] }
 0x332   :  { %v5215_v30 = vpack.c.bf16 %v2309_v55, %v2308_v0  ;;  %v2311_v11 = vmax.f32 %v2055_v40, 0.0  ;;  %v1538_v31 = vsub.f32 %v10066_v7, %v7220_v46  ;;  %v1795_v34 = vmul.f32 %v7507_v54, %v1537_v56  ;;  %v10076_v55 = vld [vmem:[#allocation209_spill] sm:$0xff]  ;;  %v10078_v7 = vld [vmem:[#allocation211_spill] sm:$0xff] }
 0x333   :  { %5525 = vst [vmem:[%s9084_s2 + $0x380] sm:$0xff] %v5210_v62   ;;  %v2057_v1 = vmul.f32 %v8353_v44, %v1794_v28  ;;  %v2312_v42 = vmax.f32 %v2056_v61, 0.0  ;;  %v1539_v3 = vsub.f32 %v10067_v12, %v7220_v46  ;;  %v1540_v17 = vsub.f32 %v10068_v13, %v7220_v46  ;;  %v10079_v12 = vld [vmem:[#allocation212_spill] sm:$0xff] }
 0x334   :  { %5526 = vst [vmem:[%s9084_s2 + $0x388] sm:$0xff] %v5215_v30   ;;  %v5220_v36 = vpack.c.bf16 %v2311_v11, %v2310_v2  ;;  %v1796_v4 = vmul.f32 %v7507_v54, %v1538_v31  ;;  %v2058_v44 = vmul.f32 %v8952_v16, %v1795_v34  ;;  %v1541_v24 = vsub.f32 %v10069_v6, %v7220_v46  ;;  %v10077_v2 = vld [vmem:[#allocation210_spill] sm:$0xff] }
 0x335   :  { %v2313_v19 = vmax.f32 %v2057_v1, 0.0  ;;  %v1797_v25 = vmul.f32 %v7507_v54, %v1539_v3  ;;  %v1798_v51 = vmul.f32 %v7507_v54, %v1540_v17  ;;  %v1542_v15 = vsub.f32 %v10070_v59, %v7220_v46 }
 0x336   :  { %5527 = vst [vmem:[%s9084_s2 + $0x390] sm:$0xff] %v5220_v36   ;;  %v2059_v38 = vmul.f32 %v8952_v16, %v1796_v4  ;;  %v2314_v35 = vmax.f32 %v2058_v44, 0.0  ;;  %v1799_v22 = vmul.f32 %v7507_v54, %v1541_v24  ;;  %v1543_v43 = vsub.f32 %v10071_v45, %v7220_v46  ;;  %v10080_v24 = vld [vmem:[#allocation213_spill] sm:$0xff] }
 0x337   :  { %v5225_v14 = vpack.c.bf16 %v2313_v19, %v2312_v42  ;;  %v2060_v41 = vmul.f32 %v8952_v16, %v1797_v25  ;;  %v2061_v27 = vmul.f32 %v8952_v16, %v1798_v51  ;;  %v1800_v49 = vmul.f32 %v7507_v54, %v1542_v15 }
 0x338   :  { %v2315_v33 = vmax.f32 %v2059_v38, 0.0  ;;  %v2062_v29 = vmul.f32 %v8952_v16, %v1799_v22  ;;  %v1544_v32 = vsub.f32 %v10072_v10, %v7220_v46  ;;  %v1801_v37 = vmul.f32 %v7507_v54, %v1543_v43  ;;  %v10081_v38 = vld [vmem:[#allocation214_spill] sm:$0xff] }
 0x339   :  { %5528 = vst [vmem:[%s9084_s2 + $0x398] sm:$0xff] %v5225_v14   ;;  %v2316_v8 = vmax.f32 %v2060_v41, 0.0  ;;  %v2317_v58 = vmax.f32 %v2061_v27, 0.0  ;;  %v2063_v5 = vmul.f32 %v8952_v16, %v1800_v49  ;;  %v1545_v53 = vsub.f32 %v10073_v57, %v7220_v46  ;;  %v10082_v49 = vld [vmem:[#allocation215_spill] sm:$0xff] }
 0x33a   :  { %v5230_v39 = vpack.c.bf16 %v2315_v33, %v2314_v35  ;;  %v2318_v18 = vmax.f32 %v2062_v29, 0.0  ;;  %v1802_v20 = vmul.f32 %v7507_v54, %v1544_v32  ;;  %v2064_v47 = vmul.f32 %v8952_v16, %v1801_v37  ;;  %v10083_v37 = vld [vmem:[#allocation216_spill] sm:$0xff] }
 0x33b   :  { %v5235_v21 = vpack.c.bf16 %v2317_v58, %v2316_v8  ;;  %v2319_v23 = vmax.f32 %v2063_v5, 0.0  ;;  %v1546_v63 = vsub.f32 %v10074_v48, %v7220_v46  ;;  %v1803_v9 = vmul.f32 %v7507_v54, %v1545_v53  ;;  %v10084_v58 = vld [vmem:[#allocation217_spill] sm:$0xff]  ;;  %v10086_v48 = vld [vmem:[#allocation219_spill] sm:$0xff] }
 0x33c   :  { %5529 = vst [vmem:[%s9084_s2 + $0x3a0] sm:$0xff] %v5230_v39   ;;  %v2065_v50 = vmul.f32 %v8952_v16, %v1802_v20  ;;  %v2320_v52 = vmax.f32 %v2064_v47, 0.0  ;;  %v1547_v0 = vsub.f32 %v10075_v26, %v7220_v46  ;;  %v1548_v40 = vsub.f32 %v10076_v55, %v7220_v46  ;;  %v10087_v26 = vld [vmem:[#allocation220_spill] sm:$0xff] }
 0x33d   :  { %5530 = vst [vmem:[%s9084_s2 + $0x3a8] sm:$0xff] %v5235_v21   ;;  %v5240_v60 = vpack.c.bf16 %v2319_v23, %v2318_v18  ;;  %v1804_v56 = vmul.f32 %v7507_v54, %v1546_v63  ;;  %v2066_v62 = vmul.f32 %v8952_v16, %v1803_v9  ;;  %v1549_v28 = vsub.f32 %v10077_v2, %v7220_v46  ;;  %v10085_v18 = vld [vmem:[#allocation218_spill] sm:$0xff] }
 0x33e   :  { %v2321_v61 = vmax.f32 %v2065_v50, 0.0  ;;  %v1805_v30 = vmul.f32 %v7507_v54, %v1547_v0  ;;  %v1806_v11 = vmul.f32 %v7507_v54, %v1548_v40  ;;  %v1550_v31 = vsub.f32 %v10078_v7, %v7220_v46 }
 0x33f   :  { %5531 = vst [vmem:[%s9084_s2 + $0x3b0] sm:$0xff] %v5240_v60   ;;  %v2067_v34 = vmul.f32 %v8952_v16, %v1804_v56  ;;  %v2322_v1 = vmax.f32 %v2066_v62, 0.0  ;;  %v1807_v42 = vmul.f32 %v7507_v54, %v1549_v28  ;;  %v1551_v3 = vsub.f32 %v10079_v12, %v7220_v46  ;;  %v10088_v28 = vld [vmem:[#allocation221_spill] sm:$0xff] }
 0x340   :  { %v5245_v13 = vpack.c.bf16 %v2321_v61, %v2320_v52  ;;  %v2068_v17 = vmul.f32 %v8952_v16, %v1805_v30  ;;  %v2069_v36 = vmul.f32 %v8952_v16, %v1806_v11  ;;  %v1808_v4 = vmul.f32 %v7507_v54, %v1550_v31 }
 0x341   :  { %v2323_v44 = vmax.f32 %v2067_v34, 0.0  ;;  %v2070_v6 = vmul.f32 %v8952_v16, %v1807_v42  ;;  %v1552_v19 = vsub.f32 %v10080_v24, %v7220_v46  ;;  %v1809_v25 = vmul.f32 %v7507_v54, %v1551_v3 }
 0x342   :  { %5532 = vst [vmem:[%s9084_s2 + $0x3b8] sm:$0xff] %v5245_v13   ;;  %v2324_v51 = vmax.f32 %v2068_v17, 0.0  ;;  %v2325_v59 = vmax.f32 %v2069_v36, 0.0  ;;  %v2071_v15 = vmul.f32 %v8952_v16, %v1808_v4  ;;  %v1553_v35 = vsub.f32 %v10081_v38, %v7220_v46 }
 0x343   :  { %v5250_v22 = vpack.c.bf16 %v2323_v44, %v2322_v1  ;;  %v2326_v45 = vmax.f32 %v2070_v6, 0.0  ;;  %v1810_v43 = vmul.f32 %v7507_v54, %v1552_v19  ;;  %v2072_v14 = vmul.f32 %v8952_v16, %v1809_v25 }
 0x344   :  { %v5255_v41 = vpack.c.bf16 %v2325_v59, %v2324_v51  ;;  %v2327_v27 = vmax.f32 %v2071_v15, 0.0  ;;  %v1554_v33 = vsub.f32 %v10082_v49, %v7220_v46  ;;  %v1811_v29 = vmul.f32 %v7507_v54, %v1553_v35 }
 0x345   :  { %5533 = vst [vmem:[%s9084_s2 + $0x3c0] sm:$0xff] %v5250_v22   ;;  %v2073_v10 = vmul.f32 %v8952_v16, %v1810_v43  ;;  %v2328_v32 = vmax.f32 %v2072_v14, 0.0  ;;  %v1555_v8 = vsub.f32 %v10083_v37, %v7220_v46  ;;  %v1556_v5 = vsub.f32 %v10084_v58, %v7220_v46 }
 0x346   :  { %5534 = vst [vmem:[%s9084_s2 + $0x3c8] sm:$0xff] %v5255_v41   ;;  %v5260_v57 = vpack.c.bf16 %v2327_v27, %v2326_v45  ;;  %v1812_v53 = vmul.f32 %v7507_v54, %v1554_v33  ;;  %v2074_v39 = vmul.f32 %v8952_v16, %v1811_v29  ;;  %v1557_v20 = vsub.f32 %v10085_v18, %v7220_v46 }
 0x347   :  { %v2329_v47 = vmax.f32 %v2073_v10, 0.0  ;;  %v1813_v21 = vmul.f32 %v7507_v54, %v1555_v8  ;;  %v1814_v23 = vmul.f32 %v7507_v54, %v1556_v5  ;;  %v1558_v63 = vsub.f32 %v10086_v48, %v7220_v46 }
 0x348   :  { %5535 = vst [vmem:[%s9084_s2 + $0x3d0] sm:$0xff] %v5260_v57   ;;  %v2075_v9 = vmul.f32 %v8952_v16, %v1812_v53  ;;  %v2330_v50 = vmax.f32 %v2074_v39, 0.0  ;;  %v1815_v52 = vmul.f32 %v7507_v54, %v1557_v20  ;;  %v1559_v0 = vsub.f32 %v10087_v26, %v7220_v46 }
 0x349   :  { %v5265_v55 = vpack.c.bf16 %v2329_v47, %v2328_v32  ;;  %v2076_v40 = vmul.f32 %v8952_v16, %v1813_v21  ;;  %v2077_v60 = vmul.f32 %v8952_v16, %v1814_v23  ;;  %v1816_v56 = vmul.f32 %v7507_v54, %v1558_v63 }
 0x34a   :  { %v2331_v62 = vmax.f32 %v2075_v9, 0.0  ;;  %v2078_v2 = vmul.f32 %v8952_v16, %v1815_v52  ;;  %v1560_v61 = vsub.f32 %v10088_v28, %v7220_v46  ;;  %v1817_v30 = vmul.f32 %v7507_v54, %v1559_v0 }
 0x34b   :  { %5536 = vst [vmem:[%s9084_s2 + $0x3d8] sm:$0xff] %v5265_v55   ;;  %v2332_v11 = vmax.f32 %v2076_v40, 0.0  ;;  %v2333_v7 = vmax.f32 %v2077_v60, 0.0  ;;  %v2079_v31 = vmul.f32 %v8952_v16, %v1816_v56 }
 0x34c   :  { %v5270_v34 = vpack.c.bf16 %v2331_v62, %v2330_v50  ;;  %v2334_v1 = vmax.f32 %v2078_v2, 0.0  ;;  %v1818_v42 = vmul.f32 %v7507_v54, %v1560_v61  ;;  %v2080_v12 = vmul.f32 %v8952_v16, %v1817_v30 }
 0x34d   :  { %v5275_v3 = vpack.c.bf16 %v2333_v7, %v2332_v11  ;;  %v2335_v13 = vmax.f32 %v2079_v31, 0.0 }
 0x34e   :  { %5537 = vst [vmem:[%s9084_s2 + $0x3e0] sm:$0xff] %v5270_v34   ;;  %v2081_v46 = vmul.f32 %v8952_v16, %v1818_v42  ;;  %v2336_v17 = vmax.f32 %v2080_v12, 0.0 }
 0x34f   :  { %5538 = vst [vmem:[%s9084_s2 + $0x3e8] sm:$0xff] %v5275_v3   ;;  %v5280_v36 = vpack.c.bf16 %v2335_v13, %v2334_v1 }
 0x350   :  { %v2337_v4 = vmax.f32 %v2081_v46, 0.0 }
 0x351   :  { %5539 = vst [vmem:[%s9084_s2 + $0x3f0] sm:$0xff] %v5280_v36  }
 0x352   :  { %v5285_v54 = vpack.c.bf16 %v2337_v4, %v2336_v17 }
 0x354   :  { %5540 = vst [vmem:[%s9084_s2 + $0x3f8] sm:$0xff] %v5285_v54  }

// kernel: blcd_forward.17
= control target key start
LH: loop header
LB: loop body
LE: loop exit
PB: predicated region body
PF: predicated region fallthrough
CT: control target
= control target key end

     0   :  { %s2551_s9 = smov 0   ;;  %s2553_s10 = smov 0   ;;  %s2919_s0 = inlined_call_operand.vmem [shape: bf16[2048,1152], index: 0, kind: input, shape index: {}]   ;;  %s2920_s1 = inlined_call_operand.vmem [shape: bf16[1152,128], index: 1, kind: input, shape index: {}]   ;;  %s2921_s2 = inlined_call_operand.vmem [shape: bf16[2048,128], index: 2, kind: output, shape index: {}]  }
   0x1   :  { %s2555_s11 = smov 0   ;;  %s2557_s12 = smov 0  }
   0x2   :  { %s2559_s13 = smov 0   ;;  %s2561_s14 = smov 0  }
   0x3   :  { %s2563_s15 = smov 0  }
   0x4 LB: > { %s24_s16 = sadd.s32 1, %s2525_s13  ;;  %s31_s17 = sadd.s32 1, %s2529_s14  ;;  %s2533_s15 = sphi %s2563_s15, %s12_s15   ;;  %s2529_s14 = sphi %s2561_s14, %s2927_s14   ;;  %s2525_s13 = sphi %s2559_s13, %s2926_s13   ;;  %s2521_s12 = sphi %s2557_s12, %s2925_s12   ;;  %s2517_s11 = sphi %s2555_s11, %s2924_s11   ;;  %s2513_s10 = sphi %s2553_s10, %s2923_s10   ;;  %s2509_s9 = sphi %s2551_s9, %s2922_s9  }
   0x5   : > { %p25_p0 = scmp.ge.s32.totalorder %s24_s16, 9  ;;  %p47_p1 = scmp.ne.s32.totalorder %s2513_s10, %s2509_s9 }
   0x6   : > { %p48_p2 = scmp.eq.s32.totalorder %s2533_s15, 0  ;;  %s40_s21 = sadd.s32 1, %s2513_s10 }
   0x7   : > { %s2929_s16 = smov (%p25_p0, %s24_s16), 0  ;;  %s2931_s17 = smov (!%p25_p0, %s31_s17), %s2529_s14 }
   0x8   : > { %p49_p3 = por %p48_p2, %p47_p1  ;;  %p33_p4 = scmp.ge.s32.totalorder %s2931_s17, 4 }
   0x9   : > { %s36_s18 = ssub.s32 %s2525_s13, %s2929_s16  ;;  %p1871_p6 = scmp.ge.s32.totalorder %s2533_s15, 36 }
   0xa   : > { %s2933_s17 = smov (%p33_p4, %s2931_s17), 0 }
   0xb   : > { %s35_s19 = ssub.s32 %s2529_s14, %s2933_s17  ;;  %129 = sbr.rel (%p1871_p6) target bundleno = 65 (0x41), region = 16 }
   0xc   : > { %s37_s20 = sor.u32 %s36_s18, %s35_s19 }
   0xd   : > { %p38_p5 = scmp.eq.s32.totalorder %s37_s20, 0 }
   0xf   : > { %s2602_s22 = scalar_select %p38_p5, %s2513_s10, %s40_s21  }
  0x10   : > { %132 = sbr.rel (!%p49_p3) target bundleno = 65 (0x41), region = 20  ;;  %s134_s23 = sand.u32 (%p49_p3), 1, %s2513_s10  }
  0x11   : > { %s2381_s24 = smul.u32 (%p49_p3), 576, %s2529_s14  ;;  %s1872_s25 = sshll.u32 (%p49_p3), %s134_s23, 8 }
  0x12   : > { %s2616_s3 = scalar_lea.vmem (%p49_p3), [#allocation3], %s1872_s25 }
  0x13   : > { %s139_s26 = sadd.s32 (%p49_p3), %s2525_s13, %s2381_s24 }
  0x14   : > { %s1875_s27 = sshll.u32 (%p49_p3), %s139_s26, 2 }
  0x15   : > { %s2611_s30 = scalar_lea.vmem %s2919_s0, %s1875_s27 }
  0x16   : > { %v158_v0 = vld [vmem:[%s2611_s30] sm:$0xf]  ;;  %v160_v1 = vld [vmem:[%s2611_s30 + $0x24] sm:$0xf]  ;;  %v162_v2 = vld [vmem:[%s2611_s30 + $0x48] sm:$0xf] }
  0x17   : > { %159 = vst [vmem:[%s2616_s3] sm:$0xf] %v158_v0  ;;  %161 = vst [vmem:[%s2616_s3 + $0x4] sm:$0xf] %v160_v1  ;;  %v164_v3 = vld [vmem:[%s2611_s30 + $0x6c] sm:$0xf] }
  0x18   : > { %163 = vst [vmem:[%s2616_s3 + $0x8] sm:$0xf] %v162_v2  ;;  %v166_v4 = vld [vmem:[%s2611_s30 + $0x90] sm:$0xf]  ;;  %v168_v5 = vld [vmem:[%s2611_s30 + $0xb4] sm:$0xf] }
  0x19   : > { %165 = vst [vmem:[%s2616_s3 + $0xc] sm:$0xf] %v164_v3  ;;  %167 = vst [vmem:[%s2616_s3 + $0x10] sm:$0xf] %v166_v4  ;;  %v170_v6 = vld [vmem:[%s2611_s30 + $0xd8] sm:$0xf] }
  0x1a   : > { %169 = vst [vmem:[%s2616_s3 + $0x14] sm:$0xf] %v168_v5  ;;  %v172_v7 = vld [vmem:[%s2611_s30 + $0xfc] sm:$0xf]  ;;  %v174_v8 = vld [vmem:[%s2611_s30 + $0x120] sm:$0xf] }
  0x1b   : > { %171 = vst [vmem:[%s2616_s3 + $0x18] sm:$0xf] %v170_v6  ;;  %173 = vst [vmem:[%s2616_s3 + $0x1c] sm:$0xf] %v172_v7  ;;  %v176_v9 = vld [vmem:[%s2611_s30 + $0x144] sm:$0xf] }
  0x1c   : > { %175 = vst [vmem:[%s2616_s3 + $0x20] sm:$0xf] %v174_v8  ;;  %v178_v10 = vld [vmem:[%s2611_s30 + $0x168] sm:$0xf]  ;;  %v180_v11 = vld [vmem:[%s2611_s30 + $0x18c] sm:$0xf] }
  0x1d   : > { %177 = vst [vmem:[%s2616_s3 + $0x24] sm:$0xf] %v176_v9  ;;  %179 = vst [vmem:[%s2616_s3 + $0x28] sm:$0xf] %v178_v10  ;;  %v182_v12 = vld [vmem:[%s2611_s30 + $0x1b0] sm:$0xf] }
  0x1e   : > { %181 = vst [vmem:[%s2616_s3 + $0x2c] sm:$0xf] %v180_v11  ;;  %v184_v13 = vld [vmem:[%s2611_s30 + $0x1d4] sm:$0xf]  ;;  %v186_v14 = vld [vmem:[%s2611_s30 + $0x1f8] sm:$0xf] }
  0x1f   : > { %183 = vst [vmem:[%s2616_s3 + $0x30] sm:$0xf] %v182_v12  ;;  %185 = vst [vmem:[%s2616_s3 + $0x34] sm:$0xf] %v184_v13  ;;  %v188_v15 = vld [vmem:[%s2611_s30 + $0x21c] sm:$0xf] }
  0x20   : > { %187 = vst [vmem:[%s2616_s3 + $0x38] sm:$0xf] %v186_v14  ;;  %v190_v16 = vld [vmem:[%s2611_s30 + $0x240] sm:$0xf]  ;;  %v192_v17 = vld [vmem:[%s2611_s30 + $0x264] sm:$0xf] }
  0x21   : > { %189 = vst [vmem:[%s2616_s3 + $0x3c] sm:$0xf] %v188_v15  ;;  %191 = vst [vmem:[%s2616_s3 + $0x40] sm:$0xf] %v190_v16  ;;  %v194_v18 = vld [vmem:[%s2611_s30 + $0x288] sm:$0xf] }
  0x22   : > { %193 = vst [vmem:[%s2616_s3 + $0x44] sm:$0xf] %v192_v17  ;;  %v196_v19 = vld [vmem:[%s2611_s30 + $0x2ac] sm:$0xf]  ;;  %v198_v20 = vld [vmem:[%s2611_s30 + $0x2d0] sm:$0xf] }
  0x23   : > { %195 = vst [vmem:[%s2616_s3 + $0x48] sm:$0xf] %v194_v18  ;;  %197 = vst [vmem:[%s2616_s3 + $0x4c] sm:$0xf] %v196_v19  ;;  %v200_v21 = vld [vmem:[%s2611_s30 + $0x2f4] sm:$0xf] }
  0x24   : > { %199 = vst [vmem:[%s2616_s3 + $0x50] sm:$0xf] %v198_v20  ;;  %v202_v22 = vld [vmem:[%s2611_s30 + $0x318] sm:$0xf]  ;;  %v204_v23 = vld [vmem:[%s2611_s30 + $0x33c] sm:$0xf] }
  0x25   : > { %201 = vst [vmem:[%s2616_s3 + $0x54] sm:$0xf] %v200_v21  ;;  %203 = vst [vmem:[%s2616_s3 + $0x58] sm:$0xf] %v202_v22  ;;  %v206_v24 = vld [vmem:[%s2611_s30 + $0x360] sm:$0xf] }
  0x26   : > { %205 = vst [vmem:[%s2616_s3 + $0x5c] sm:$0xf] %v204_v23  ;;  %v208_v25 = vld [vmem:[%s2611_s30 + $0x384] sm:$0xf]  ;;  %v210_v26 = vld [vmem:[%s2611_s30 + $0x3a8] sm:$0xf] }
  0x27   : > { %207 = vst [vmem:[%s2616_s3 + $0x60] sm:$0xf] %v206_v24  ;;  %209 = vst [vmem:[%s2616_s3 + $0x64] sm:$0xf] %v208_v25  ;;  %v212_v27 = vld [vmem:[%s2611_s30 + $0x3cc] sm:$0xf] }
  0x28   : > { %211 = vst [vmem:[%s2616_s3 + $0x68] sm:$0xf] %v210_v26  ;;  %v214_v28 = vld [vmem:[%s2611_s30 + $0x3f0] sm:$0xf]  ;;  %v216_v29 = vld [vmem:[%s2611_s30 + $0x414] sm:$0xf] }
  0x29   : > { %213 = vst [vmem:[%s2616_s3 + $0x6c] sm:$0xf] %v212_v27  ;;  %215 = vst [vmem:[%s2616_s3 + $0x70] sm:$0xf] %v214_v28  ;;  %v218_v30 = vld [vmem:[%s2611_s30 + $0x438] sm:$0xf] }
  0x2a   : > { %217 = vst [vmem:[%s2616_s3 + $0x74] sm:$0xf] %v216_v29  ;;  %v220_v31 = vld [vmem:[%s2611_s30 + $0x45c] sm:$0xf]  ;;  %v222_v32 = vld [vmem:[%s2611_s30 + $0x480] sm:$0xf] }
  0x2b   : > { %219 = vst [vmem:[%s2616_s3 + $0x78] sm:$0xf] %v218_v30  ;;  %221 = vst [vmem:[%s2616_s3 + $0x7c] sm:$0xf] %v220_v31  ;;  %v224_v33 = vld [vmem:[%s2611_s30 + $0x4a4] sm:$0xf] }
  0x2c   : > { %223 = vst [vmem:[%s2616_s3 + $0x80] sm:$0xf] %v222_v32  ;;  %v226_v34 = vld [vmem:[%s2611_s30 + $0x4c8] sm:$0xf]  ;;  %v228_v35 = vld [vmem:[%s2611_s30 + $0x4ec] sm:$0xf] }
  0x2d   : > { %225 = vst [vmem:[%s2616_s3 + $0x84] sm:$0xf] %v224_v33  ;;  %227 = vst [vmem:[%s2616_s3 + $0x88] sm:$0xf] %v226_v34  ;;  %v230_v36 = vld [vmem:[%s2611_s30 + $0x510] sm:$0xf] }
  0x2e   : > { %229 = vst [vmem:[%s2616_s3 + $0x8c] sm:$0xf] %v228_v35  ;;  %v232_v37 = vld [vmem:[%s2611_s30 + $0x534] sm:$0xf]  ;;  %v234_v38 = vld [vmem:[%s2611_s30 + $0x558] sm:$0xf] }
  0x2f   : > { %231 = vst [vmem:[%s2616_s3 + $0x90] sm:$0xf] %v230_v36  ;;  %233 = vst [vmem:[%s2616_s3 + $0x94] sm:$0xf] %v232_v37  ;;  %v236_v39 = vld [vmem:[%s2611_s30 + $0x57c] sm:$0xf] }
  0x30   : > { %235 = vst [vmem:[%s2616_s3 + $0x98] sm:$0xf] %v234_v38  ;;  %v238_v40 = vld [vmem:[%s2611_s30 + $0x5a0] sm:$0xf]  ;;  %v240_v41 = vld [vmem:[%s2611_s30 + $0x5c4] sm:$0xf] }
  0x31   : > { %237 = vst [vmem:[%s2616_s3 + $0x9c] sm:$0xf] %v236_v39  ;;  %239 = vst [vmem:[%s2616_s3 + $0xa0] sm:$0xf] %v238_v40  ;;  %v242_v42 = vld [vmem:[%s2611_s30 + $0x5e8] sm:$0xf] }
  0x32   : > { %241 = vst [vmem:[%s2616_s3 + $0xa4] sm:$0xf] %v240_v41  ;;  %v244_v43 = vld [vmem:[%s2611_s30 + $0x60c] sm:$0xf]  ;;  %v246_v44 = vld [vmem:[%s2611_s30 + $0x630] sm:$0xf] }
  0x33   : > { %243 = vst [vmem:[%s2616_s3 + $0xa8] sm:$0xf] %v242_v42  ;;  %245 = vst [vmem:[%s2616_s3 + $0xac] sm:$0xf] %v244_v43  ;;  %v248_v45 = vld [vmem:[%s2611_s30 + $0x654] sm:$0xf] }
  0x34   : > { %247 = vst [vmem:[%s2616_s3 + $0xb0] sm:$0xf] %v246_v44  ;;  %v250_v46 = vld [vmem:[%s2611_s30 + $0x678] sm:$0xf]  ;;  %v252_v47 = vld [vmem:[%s2611_s30 + $0x69c] sm:$0xf] }
  0x35   : > { %249 = vst [vmem:[%s2616_s3 + $0xb4] sm:$0xf] %v248_v45  ;;  %251 = vst [vmem:[%s2616_s3 + $0xb8] sm:$0xf] %v250_v46  ;;  %v254_v48 = vld [vmem:[%s2611_s30 + $0x6c0] sm:$0xf] }
  0x36   : > { %253 = vst [vmem:[%s2616_s3 + $0xbc] sm:$0xf] %v252_v47  ;;  %v256_v49 = vld [vmem:[%s2611_s30 + $0x6e4] sm:$0xf]  ;;  %v258_v50 = vld [vmem:[%s2611_s30 + $0x708] sm:$0xf] }
  0x37   : > { %255 = vst [vmem:[%s2616_s3 + $0xc0] sm:$0xf] %v254_v48  ;;  %257 = vst [vmem:[%s2616_s3 + $0xc4] sm:$0xf] %v256_v49  ;;  %v260_v51 = vld [vmem:[%s2611_s30 + $0x72c] sm:$0xf] }
  0x38   : > { %259 = vst [vmem:[%s2616_s3 + $0xc8] sm:$0xf] %v258_v50  ;;  %v262_v52 = vld [vmem:[%s2611_s30 + $0x750] sm:$0xf]  ;;  %v264_v53 = vld [vmem:[%s2611_s30 + $0x774] sm:$0xf] }
  0x39   : > { %261 = vst [vmem:[%s2616_s3 + $0xcc] sm:$0xf] %v260_v51  ;;  %263 = vst [vmem:[%s2616_s3 + $0xd0] sm:$0xf] %v262_v52  ;;  %v266_v54 = vld [vmem:[%s2611_s30 + $0x798] sm:$0xf] }
  0x3a   : > { %265 = vst [vmem:[%s2616_s3 + $0xd4] sm:$0xf] %v264_v53  ;;  %v268_v55 = vld [vmem:[%s2611_s30 + $0x7bc] sm:$0xf]  ;;  %v270_v56 = vld [vmem:[%s2611_s30 + $0x7e0] sm:$0xf] }
  0x3b   : > { %267 = vst [vmem:[%s2616_s3 + $0xd8] sm:$0xf] %v266_v54  ;;  %269 = vst [vmem:[%s2616_s3 + $0xdc] sm:$0xf] %v268_v55  ;;  %v272_v57 = vld [vmem:[%s2611_s30 + $0x804] sm:$0xf] }
  0x3c   : > { %271 = vst [vmem:[%s2616_s3 + $0xe0] sm:$0xf] %v270_v56  ;;  %v274_v58 = vld [vmem:[%s2611_s30 + $0x828] sm:$0xf]  ;;  %v276_v59 = vld [vmem:[%s2611_s30 + $0x84c] sm:$0xf] }
  0x3d   : > { %273 = vst [vmem:[%s2616_s3 + $0xe4] sm:$0xf] %v272_v57  ;;  %275 = vst [vmem:[%s2616_s3 + $0xe8] sm:$0xf] %v274_v58  ;;  %v278_v60 = vld [vmem:[%s2611_s30 + $0x870] sm:$0xf] }
  0x3e   : > { %277 = vst [vmem:[%s2616_s3 + $0xec] sm:$0xf] %v276_v59  ;;  %v280_v61 = vld [vmem:[%s2611_s30 + $0x894] sm:$0xf]  ;;  %v282_v62 = vld [vmem:[%s2611_s30 + $0x8b8] sm:$0xf] }
  0x3f   : > { %279 = vst [vmem:[%s2616_s3 + $0xf0] sm:$0xf] %v278_v60  ;;  %281 = vst [vmem:[%s2616_s3 + $0xf4] sm:$0xf] %v280_v61  ;;  %v284_v63 = vld [vmem:[%s2611_s30 + $0x8dc] sm:$0xf] }
  0x40   : > { %283 = vst [vmem:[%s2616_s3 + $0xf8] sm:$0xf] %v282_v62  ;;  %285 = vst [vmem:[%s2616_s3 + $0xfc] sm:$0xf] %v284_v63 }
  0x41 PF: > { %p1876_p7 = scmp.ge.s32.totalorder %s2533_s15, 1  ;;  %p448_p8 = scmp.lt.s32.totalorder %s2533_s15, 37 }
  0x43   : > { %p449_p9 = pnand %p1876_p7, %p448_p8 }
  0x44   : > { %s455_s4 = sand.u32 (!%p449_p9), 1, %s2509_s9   ;;  %s1878_s5 = sshll.u32 (!%p449_p9), %s2517_s11, 4 }
  0x45   : > { %452 = sbr.rel (%p449_p9) target bundleno = 433 (0x1b1), region = 65  ;;  %s1877_s6 = sshll.u32 (!%p449_p9), %s455_s4, 8 }
  0x46   : > { %p489_p10 = scmp.lt.s32.totalorder (!%p449_p9), %s1878_s5, 143  ;;  %s1880_s7 = sshll.u32 (!%p449_p9), %s2521_s12, 6 }
  0x47   : > { %p498_p11 = scmp.lt.s32.totalorder (!%p449_p9), %s1880_s7, 255  ;;  %s2758_s9 = scalar_lea.vmem (!%p449_p9), [#allocation3], %s1877_s6 }
  0x48   : > { %p1882_p12 = scmp.ne.s32.totalorder (!%p449_p9), %s2517_s11, 0 }
  0x4a   : > { %s2935_s5 = smov (!%p489_p10, %s1878_s5), 143  ;;  %s2937_s7 = smov (!%p498_p11, %s1880_s7), 255 }
  0x4b   : > { %s1879_s8 = sshll.u32 %s2935_s5, 2  ;;  %s1881_s21 = sshll.u32 %s2937_s7, 2 }
  0x4c   : > { %s2751_s20 = scalar_lea.vmem %s2920_s1, %s1879_s8  ;;  %s2756_s25 = scalar_lea.vmem %s2921_s2, %s1881_s21 }
  0x4d   : > { %510 = sbr.rel (%p1882_p12) target bundleno = 115 (0x73), region = 73 }
  0x52   : > { %v2535_v0 = vmov 0.0  }
  0x53   : > { %511 = vst [vmem:[#allocation2 + $0xb0] sm:$0xff] %v2535_v0  ;;  %512 = vst [vmem:[#allocation2 + $0x1b0] sm:$0xff] %v2535_v0 }
  0x54   : > { %513 = vst [vmem:[#allocation2 + $0xd8] sm:$0xff] %v2535_v0  ;;  %514 = vst [vmem:[#allocation2 + $0x18] sm:$0xff] %v2535_v0 }
  0x55   : > { %515 = vst [vmem:[#allocation2 + $0x50] sm:$0xff] %v2535_v0  ;;  %516 = vst [vmem:[#allocation2 + $0x168] sm:$0xff] %v2535_v0 }
  0x56   : > { %517 = vst [vmem:[#allocation2 + $0x130] sm:$0xff] %v2535_v0  ;;  %518 = vst [vmem:[#allocation2 + $0x48] sm:$0xff] %v2535_v0 }
  0x57   : > { %519 = vst [vmem:[#allocation2 + $0x180] sm:$0xff] %v2535_v0  ;;  %520 = vst [vmem:[#allocation2 + $0x110] sm:$0xff] %v2535_v0 }
  0x58   : > { %521 = vst [vmem:[#allocation2 + $0x118] sm:$0xff] %v2535_v0  ;;  %522 = vst [vmem:[#allocation2 + $0x98] sm:$0xff] %v2535_v0 }
  0x59   : > { %523 = vst [vmem:[#allocation2 + $0x120] sm:$0xff] %v2535_v0  ;;  %524 = vst [vmem:[#allocation2 + $0x150] sm:$0xff] %v2535_v0 }
  0x5a   : > { %525 = vst [vmem:[#allocation2 + $0x108] sm:$0xff] %v2535_v0  ;;  %526 = vst [vmem:[#allocation2 + $0x60] sm:$0xff] %v2535_v0 }
  0x5b   : > { %527 = vst [vmem:[#allocation2 + $0xe0] sm:$0xff] %v2535_v0  ;;  %528 = vst [vmem:[#allocation2 + $0x188] sm:$0xff] %v2535_v0 }
  0x5c   : > { %529 = vst [vmem:[#allocation2 + $0x138] sm:$0xff] %v2535_v0  ;;  %530 = vst [vmem:[#allocation2 + $0x140] sm:$0xff] %v2535_v0 }
  0x5d   : > { %531 = vst [vmem:[#allocation2 + $0x80] sm:$0xff] %v2535_v0  ;;  %532 = vst [vmem:[#allocation2 + $0x1a8] sm:$0xff] %v2535_v0 }
  0x5e   : > { %533 = vst [vmem:[#allocation2 + $0x1b8] sm:$0xff] %v2535_v0  ;;  %534 = vst [vmem:[#allocation2 + $0x28] sm:$0xff] %v2535_v0 }
  0x5f   : > { %535 = vst [vmem:[#allocation2 + $0x1e8] sm:$0xff] %v2535_v0  ;;  %536 = vst [vmem:[#allocation2 + $0xf8] sm:$0xff] %v2535_v0 }
  0x60   : > { %537 = vst [vmem:[#allocation2 + $0x160] sm:$0xff] %v2535_v0  ;;  %538 = vst [vmem:[#allocation2 + $0x30] sm:$0xff] %v2535_v0 }
  0x61   : > { %539 = vst [vmem:[#allocation2 + $0x1e0] sm:$0xff] %v2535_v0  ;;  %540 = vst [vmem:[#allocation2] sm:$0xff] %v2535_v0 }
  0x62   : > { %541 = vst [vmem:[#allocation2 + $0xf0] sm:$0xff] %v2535_v0  ;;  %542 = vst [vmem:[#allocation2 + $0x8] sm:$0xff] %v2535_v0 }
  0x63   : > { %543 = vst [vmem:[#allocation2 + $0x148] sm:$0xff] %v2535_v0  ;;  %544 = vst [vmem:[#allocation2 + $0x1d0] sm:$0xff] %v2535_v0 }
  0x64   : > { %545 = vst [vmem:[#allocation2 + $0x100] sm:$0xff] %v2535_v0  ;;  %546 = vst [vmem:[#allocation2 + $0xc8] sm:$0xff] %v2535_v0 }
  0x65   : > { %547 = vst [vmem:[#allocation2 + $0x40] sm:$0xff] %v2535_v0  ;;  %548 = vst [vmem:[#allocation2 + $0x1f8] sm:$0xff] %v2535_v0 }
  0x66   : > { %549 = vst [vmem:[#allocation2 + $0x20] sm:$0xff] %v2535_v0  ;;  %550 = vst [vmem:[#allocation2 + $0x128] sm:$0xff] %v2535_v0 }
  0x67   : > { %551 = vst [vmem:[#allocation2 + $0x1a0] sm:$0xff] %v2535_v0  ;;  %552 = vst [vmem:[#allocation2 + $0x1f0] sm:$0xff] %v2535_v0 }
  0x68   : > { %553 = vst [vmem:[#allocation2 + $0xe8] sm:$0xff] %v2535_v0  ;;  %554 = vst [vmem:[#allocation2 + $0x78] sm:$0xff] %v2535_v0 }
  0x69   : > { %555 = vst [vmem:[#allocation2 + $0x70] sm:$0xff] %v2535_v0  ;;  %556 = vst [vmem:[#allocation2 + $0x90] sm:$0xff] %v2535_v0 }
  0x6a   : > { %557 = vst [vmem:[#allocation2 + $0x1d8] sm:$0xff] %v2535_v0  ;;  %558 = vst [vmem:[#allocation2 + $0xd0] sm:$0xff] %v2535_v0 }
  0x6b   : > { %559 = vst [vmem:[#allocation2 + $0xb8] sm:$0xff] %v2535_v0  ;;  %560 = vst [vmem:[#allocation2 + $0x88] sm:$0xff] %v2535_v0 }
  0x6c   : > { %561 = vst [vmem:[#allocation2 + $0xa8] sm:$0xff] %v2535_v0  ;;  %562 = vst [vmem:[#allocation2 + $0x1c8] sm:$0xff] %v2535_v0 }
  0x6d   : > { %563 = vst [vmem:[#allocation2 + $0x170] sm:$0xff] %v2535_v0  ;;  %564 = vst [vmem:[#allocation2 + $0x178] sm:$0xff] %v2535_v0 }
  0x6e   : > { %565 = vst [vmem:[#allocation2 + $0x68] sm:$0xff] %v2535_v0  ;;  %566 = vst [vmem:[#allocation2 + $0x190] sm:$0xff] %v2535_v0 }
  0x6f   : > { %567 = vst [vmem:[#allocation2 + $0x198] sm:$0xff] %v2535_v0  ;;  %568 = vst [vmem:[#allocation2 + $0x38] sm:$0xff] %v2535_v0 }
  0x70   : > { %569 = vst [vmem:[#allocation2 + $0xc0] sm:$0xff] %v2535_v0  ;;  %570 = vst [vmem:[#allocation2 + $0x1c0] sm:$0xff] %v2535_v0 }
  0x71   : > { %571 = vst [vmem:[#allocation2 + $0x158] sm:$0xff] %v2535_v0  ;;  %572 = vst [vmem:[#allocation2 + $0x10] sm:$0xff] %v2535_v0 }
  0x72   : > { %573 = vst [vmem:[#allocation2 + $0x58] sm:$0xff] %v2535_v0  ;;  %574 = vst [vmem:[#allocation2 + $0xa0] sm:$0xff] %v2535_v0 }
  0x73 PF: > { %v2439_v1 = vld [vmem:[%s2751_s20 + $0x38] sm:$0xff]   ;;  %v2440_v2 = vld [vmem:[%s2751_s20 + $0x30] sm:$0xff]   ;;  %v2441_v3 = vld [vmem:[%s2751_s20 + $0x28] sm:$0xff]   ;;  %p1923_p13 = scmp.ne.s32.totalorder %s2517_s11, 8 }
  0x74   : > { %2285 = vmatprep.subr.bf16.mxu0 %v2439_v1  ;;  %2365 = vmatprep.subr.bf16.mxu1 %v2439_v1  ;;  %v2442_v4 = vld [vmem:[%s2751_s20 + $0x20] sm:$0xff]   ;;  %v2443_v7 = vld [vmem:[%s2751_s20 + $0x18] sm:$0xff]   ;;  %v2444_v8 = vld [vmem:[%s2751_s20 + $0x10] sm:$0xff]  }
  0x75   : > { %2286 = vmatpush3.bf16.msra.mxu0 %v2439_v1  ;;  %2373 = vmatpush3.bf16.msra.mxu1 %v2439_v1  ;;  %v2447_v5 = vld [vmem:[%s2758_s9] sm:$0xff]   ;;  %v2445_v9 = vld [vmem:[%s2751_s20 + $0x8] sm:$0xff]   ;;  %v2451_v13 = vld [vmem:[%s2758_s9 + $0x10] sm:$0xff]  }
  0x76   : > { %2287 = vmatprep.subr.bf16.mxu0 %v2440_v2  ;;  %2366 = vmatprep.subr.bf16.mxu1 %v2440_v2  ;;  %v2448_v6 = vld [vmem:[%s2758_s9 + $0x80] sm:$0xff]   ;;  %v2449_v11 = vld [vmem:[%s2758_s9 + $0x8] sm:$0xff]   ;;  %v2452_v14 = vld [vmem:[%s2758_s9 + $0x90] sm:$0xff]  }
  0x77   : > { %2301 = vmatprep.mubr.bf16.mxu0 %v2447_v5  ;;  %2333 = vmatprep.mubr.bf16.mxu1 %v2448_v6  ;;  %v2446_v10 = vld [vmem:[%s2751_s20] sm:$0xff]   ;;  %v2450_v12 = vld [vmem:[%s2758_s9 + $0x88] sm:$0xff]   ;;  %v2453_v15 = vld [vmem:[%s2758_s9 + $0x18] sm:$0xff]  }
  0x78   : > { %v2454_v16 = vld [vmem:[%s2758_s9 + $0x98] sm:$0xff]   ;;  %v2455_v17 = vld [vmem:[%s2758_s9 + $0x20] sm:$0xff]   ;;  %v2457_v19 = vld [vmem:[%s2758_s9 + $0x28] sm:$0xff]  }
  0x79   : > { %2288 = vmatpush3.bf16.msra.mxu0 %v2440_v2  ;;  %2374 = vmatpush3.bf16.msra.mxu1 %v2440_v2  ;;  %v2456_v18 = vld [vmem:[%s2758_s9 + $0xa0] sm:$0xff]   ;;  %v2458_v20 = vld [vmem:[%s2758_s9 + $0xa8] sm:$0xff]   ;;  %v2459_v21 = vld [vmem:[%s2758_s9 + $0x30] sm:$0xff]  }
  0x7a   : > { %2289 = vmatprep.subr.bf16.mxu0 %v2441_v3  ;;  %2367 = vmatprep.subr.bf16.mxu1 %v2441_v3  ;;  %v2460_v22 = vld [vmem:[%s2758_s9 + $0xb0] sm:$0xff]   ;;  %v2461_v23 = vld [vmem:[%s2758_s9 + $0x38] sm:$0xff]   ;;  %v2463_v25 = vld [vmem:[%s2758_s9 + $0x40] sm:$0xff]  }
  0x7b   : > { %v2462_v24 = vld [vmem:[%s2758_s9 + $0xb8] sm:$0xff]   ;;  %v2464_v26 = vld [vmem:[%s2758_s9 + $0xc0] sm:$0xff]   ;;  %v2465_v27 = vld [vmem:[%s2758_s9 + $0x48] sm:$0xff]  }
  0x7c   : > { %v2466_v28 = vld [vmem:[%s2758_s9 + $0xc8] sm:$0xff]   ;;  %v2467_v29 = vld [vmem:[%s2758_s9 + $0x50] sm:$0xff]   ;;  %v2469_v31 = vld [vmem:[%s2758_s9 + $0x58] sm:$0xff]  }
  0x7d   : > { %2290 = vmatpush3.bf16.msra.mxu0 %v2441_v3  ;;  %2375 = vmatpush3.bf16.msra.mxu1 %v2441_v3  ;;  %v2468_v30 = vld [vmem:[%s2758_s9 + $0xd0] sm:$0xff]   ;;  %v2470_v32 = vld [vmem:[%s2758_s9 + $0xd8] sm:$0xff]   ;;  %v2471_v33 = vld [vmem:[%s2758_s9 + $0x60] sm:$0xff]  }
  0x7e   : > { %2291 = vmatprep.subr.bf16.mxu0 %v2442_v4  ;;  %2368 = vmatprep.subr.bf16.mxu1 %v2442_v4  ;;  %v2472_v34 = vld [vmem:[%s2758_s9 + $0xe0] sm:$0xff]   ;;  %v2473_v35 = vld [vmem:[%s2758_s9 + $0x68] sm:$0xff]   ;;  %v2475_v37 = vld [vmem:[%s2758_s9 + $0x70] sm:$0xff]  }
  0x7f   : > { %v2474_v36 = vld [vmem:[%s2758_s9 + $0xe8] sm:$0xff]   ;;  %v2476_v38 = vld [vmem:[%s2758_s9 + $0xf0] sm:$0xff]   ;;  %v2477_v39 = vld [vmem:[%s2758_s9 + $0x78] sm:$0xff]  }
  0x80   : > { %v2478_v40 = vld [vmem:[%s2758_s9 + $0xf8] sm:$0xff]   ;;  %v609_v42 = vld [vmem:[#allocation2 + $0x100] sm:$0xff]  ;;  %v575_v45 = vld [vmem:[#allocation2 + $0xb0] sm:$0xff] }
  0x81   : > { %2292 = vmatpush3.bf16.msra.mxu0 %v2442_v4  ;;  %2376 = vmatpush3.bf16.msra.mxu1 %v2442_v4  ;;  %v577_v41 = vld [vmem:[#allocation2 + $0xd8] sm:$0xff]  ;;  %v607_v46 = vld [vmem:[#allocation2 + $0x148] sm:$0xff]  ;;  %v576_v57 = vld [vmem:[#allocation2 + $0x1b0] sm:$0xff] }
  0x82   : > { %2293 = vmatprep.subr.bf16.mxu0 %v2443_v7  ;;  %2369 = vmatprep.subr.bf16.mxu1 %v2443_v7  ;;  %v578_v51 = vld [vmem:[#allocation2 + $0x18] sm:$0xff]  ;;  %v610_v52 = vld [vmem:[#allocation2 + $0xc8] sm:$0xff]  ;;  %v608_v58 = vld [vmem:[#allocation2 + $0x1d0] sm:$0xff] }
  0x83   : > { %v581_v63 = vld [vmem:[#allocation2 + $0x130] sm:$0xff]  ;;  %v613_v0 = vld [vmem:[#allocation2 + $0x20] sm:$0xff] }
  0x84   : > { %v579_v5 = vld [vmem:[#allocation2 + $0x50] sm:$0xff]  ;;  %v611_v6 = vld [vmem:[#allocation2 + $0x40] sm:$0xff] }
  0x85   : > { %2294 = vmatpush3.bf16.msra.mxu0 %v2443_v7  ;;  %2377 = vmatpush3.bf16.msra.mxu1 %v2443_v7 }
  0x86   : > { %2295 = vmatprep.subr.bf16.mxu0 %v2444_v8  ;;  %2370 = vmatprep.subr.bf16.mxu1 %v2444_v8 }
  0x89   : > { %2296 = vmatpush3.bf16.msra.mxu0 %v2444_v8  ;;  %2378 = vmatpush3.bf16.msra.mxu1 %v2444_v8 }
  0x8a   : > { %2297 = vmatprep.subr.bf16.mxu0 %v2445_v9  ;;  %2371 = vmatprep.subr.bf16.mxu1 %v2445_v9 }
  0x8d   : > { %2298 = vmatpush3.bf16.msra.mxu0 %v2445_v9  ;;  %2379 = vmatpush3.bf16.msra.mxu1 %v2445_v9 }
  0x8e   : > { %2299 = vmatprep.subr.bf16.mxu0 %v2446_v10  ;;  %2372 = vmatprep.subr.bf16.mxu1 %v2446_v10 }
  0x91   : > { %2300 = vmatpush3.bf16.msra.mxu0 %v2446_v10  ;;  %2380 = vmatpush3.bf16.msra.mxu1 %v2446_v10 }
  0x94   : > { %2302 = vmatmul.mubr.bf16.vlgmr.msra.gmra.mxu0 %v2449_v11  ;;  %2334 = vmatmul.mubr.bf16.vlgmr.msra.gmra.mxu1 %v2450_v12  ;;  %v582_v11 = vld [vmem:[#allocation2 + $0x48] sm:$0xff] }
  0x95   : > { %2305 = vmatprep.mubr.bf16.mxu0 %v2451_v13  ;;  %2337 = vmatprep.mubr.bf16.mxu1 %v2452_v14  ;;  %v614_v12 = vld [vmem:[#allocation2 + $0x128] sm:$0xff] }
  0x9c   : > { %2306 = vmatmul.mubr.bf16.gmra.mxu0 %v2453_v15  ;;  %2338 = vmatmul.mubr.bf16.gmra.mxu1 %v2454_v16 }
  0x9d   : > { %2309 = vmatprep.mubr.bf16.mxu0 %v2455_v17  ;;  %2341 = vmatprep.mubr.bf16.mxu1 %v2456_v18  ;;  %v580_v17 = vld [vmem:[#allocation2 + $0x168] sm:$0xff]  ;;  %v612_v18 = vld [vmem:[#allocation2 + $0x1f8] sm:$0xff] }
  0xa4   : > { %2310 = vmatmul.mubr.bf16.gmra.mxu0 %v2457_v19  ;;  %2342 = vmatmul.mubr.bf16.gmra.mxu1 %v2458_v20 }
  0xa5   : > { %2313 = vmatprep.mubr.bf16.mxu0 %v2459_v21  ;;  %2345 = vmatprep.mubr.bf16.mxu1 %v2460_v22 }
  0xac   : > { %2314 = vmatmul.mubr.bf16.gmra.mxu0 %v2461_v23  ;;  %2346 = vmatmul.mubr.bf16.gmra.mxu1 %v2462_v24  ;;  %v585_v23 = vld [vmem:[#allocation2 + $0x118] sm:$0xff]  ;;  %v617_v24 = vld [vmem:[#allocation2 + $0xe8] sm:$0xff] }
  0xad   : > { %2317 = vmatprep.mubr.bf16.mxu0 %v2463_v25  ;;  %2349 = vmatprep.mubr.bf16.mxu1 %v2464_v26 }
  0xb4   : > { %2318 = vmatmul.mubr.bf16.gmra.mxu0 %v2465_v27  ;;  %2350 = vmatmul.mubr.bf16.gmra.mxu1 %v2466_v28 }
  0xb5   : > { %2321 = vmatprep.mubr.bf16.mxu0 %v2467_v29  ;;  %2353 = vmatprep.mubr.bf16.mxu1 %v2468_v30  ;;  %v583_v29 = vld [vmem:[#allocation2 + $0x180] sm:$0xff] }
  0xb6   : > { %v615_v30 = vld [vmem:[#allocation2 + $0x1a0] sm:$0xff] }
  0xbc   : > { %2322 = vmatmul.mubr.bf16.gmra.mxu0 %v2469_v31  ;;  %2354 = vmatmul.mubr.bf16.gmra.mxu1 %v2470_v32 }
  0xbd   : > { %2325 = vmatprep.mubr.bf16.mxu0 %v2471_v33  ;;  %2357 = vmatprep.mubr.bf16.mxu1 %v2472_v34 }
  0xc4   : > { %2326 = vmatmul.mubr.bf16.gmra.mxu0 %v2473_v35  ;;  %2358 = vmatmul.mubr.bf16.gmra.mxu1 %v2474_v36  ;;  %v586_v35 = vld [vmem:[#allocation2 + $0x98] sm:$0xff] }
  0xc5   : > { %2329 = vmatprep.mubr.bf16.mxu0 %v2475_v37  ;;  %2361 = vmatprep.mubr.bf16.mxu1 %v2476_v38  ;;  %v618_v36 = vld [vmem:[#allocation2 + $0x78] sm:$0xff] }
  0xcc   : > { %2330 = vmatmul.mubr.bf16.gmra.mxu0 %v2477_v39  ;;  %2362 = vmatmul.mubr.bf16.gmra.mxu1 %v2478_v40 }
 0x154   : > { %v2303_v43 = vpop.f32.mrf.mxu0  ;;  %v2335_v44 = vpop.f32.mrf.mxu1 }
 0x155   : > { %v1250_v47 = vadd.f32 %v2303_v43, %v577_v41  ;;  %v1282_v48 = vadd.f32 %v2335_v44, %v609_v42  ;;  %v584_v41 = vld [vmem:[#allocation2 + $0x110] sm:$0xff] }
 0x156   : > { %v993_v49 = vpop.f32.mrf.mxu0  ;;  %v1121_v50 = vpop.f32.mrf.mxu1  ;;  %v616_v42 = vld [vmem:[#allocation2 + $0x1f0] sm:$0xff] }
 0x157   : > { %1314 = vst [vmem:[#allocation2 + $0xd8] sm:$0xff] %v1250_v47  ;;  %1346 = vst [vmem:[#allocation2 + $0x100] sm:$0xff] %v1282_v48  ;;  %v1248_v53 = vadd.f32 %v993_v49, %v575_v45  ;;  %v1280_v54 = vadd.f32 %v1121_v50, %v607_v46  ;;  %v589_v47 = vld [vmem:[#allocation2 + $0x108] sm:$0xff]  ;;  %v621_v48 = vld [vmem:[#allocation2 + $0x1d8] sm:$0xff] }
 0x158   : > { %v2304_v55 = vpop.f32.mrf.mxu0  ;;  %v2336_v56 = vpop.f32.mrf.mxu1 }
 0x159   : > { %1312 = vst [vmem:[#allocation2 + $0xb0] sm:$0xff] %v1248_v53  ;;  %1344 = vst [vmem:[#allocation2 + $0x148] sm:$0xff] %v1280_v54  ;;  %v1251_v59 = vadd.f32 %v2304_v55, %v578_v51  ;;  %v1283_v60 = vadd.f32 %v2336_v56, %v610_v52  ;;  %v587_v53 = vld [vmem:[#allocation2 + $0x120] sm:$0xff]  ;;  %v619_v54 = vld [vmem:[#allocation2 + $0x70] sm:$0xff] }
 0x15a   : > { %v996_v61 = vpop.f32.mrf.mxu0  ;;  %v1124_v62 = vpop.f32.mrf.mxu1 }
 0x15b   : > { %1315 = vst [vmem:[#allocation2 + $0x18] sm:$0xff] %v1251_v59  ;;  %1347 = vst [vmem:[#allocation2 + $0xc8] sm:$0xff] %v1283_v60  ;;  %v1249_v1 = vadd.f32 %v996_v61, %v576_v57  ;;  %v1281_v2 = vadd.f32 %v1124_v62, %v608_v58  ;;  %v590_v59 = vld [vmem:[#allocation2 + $0x60] sm:$0xff]  ;;  %v622_v60 = vld [vmem:[#allocation2 + $0xd0] sm:$0xff] }
 0x15c   : > { %v2307_v3 = vpop.f32.mrf.mxu0  ;;  %v2339_v4 = vpop.f32.mrf.mxu1 }
 0x15d   : > { %1313 = vst [vmem:[#allocation2 + $0x1b0] sm:$0xff] %v1249_v1  ;;  %1345 = vst [vmem:[#allocation2 + $0x1d0] sm:$0xff] %v1281_v2  ;;  %v1254_v7 = vadd.f32 %v2307_v3, %v581_v63  ;;  %v1286_v8 = vadd.f32 %v2339_v4, %v613_v0  ;;  %v588_v1 = vld [vmem:[#allocation2 + $0x150] sm:$0xff] }
 0x15e   : > { %v1009_v9 = vpop.f32.mrf.mxu0  ;;  %v1137_v10 = vpop.f32.mrf.mxu1  ;;  %v620_v2 = vld [vmem:[#allocation2 + $0x90] sm:$0xff] }
 0x15f   : > { %1318 = vst [vmem:[#allocation2 + $0x130] sm:$0xff] %v1254_v7  ;;  %1350 = vst [vmem:[#allocation2 + $0x20] sm:$0xff] %v1286_v8  ;;  %v1252_v13 = vadd.f32 %v1009_v9, %v579_v5  ;;  %v1284_v14 = vadd.f32 %v1137_v10, %v611_v6  ;;  %v593_v7 = vld [vmem:[#allocation2 + $0x138] sm:$0xff]  ;;  %v625_v8 = vld [vmem:[#allocation2 + $0xa8] sm:$0xff] }
 0x160   : > { %v2308_v15 = vpop.f32.mrf.mxu0  ;;  %v2340_v16 = vpop.f32.mrf.mxu1 }
 0x161   : > { %1316 = vst [vmem:[#allocation2 + $0x50] sm:$0xff] %v1252_v13  ;;  %1348 = vst [vmem:[#allocation2 + $0x40] sm:$0xff] %v1284_v14  ;;  %v1255_v19 = vadd.f32 %v2308_v15, %v582_v11  ;;  %v1287_v20 = vadd.f32 %v2340_v16, %v614_v12  ;;  %v591_v13 = vld [vmem:[#allocation2 + $0xe0] sm:$0xff]  ;;  %v623_v14 = vld [vmem:[#allocation2 + $0xb8] sm:$0xff] }
 0x162   : > { %v1012_v21 = vpop.f32.mrf.mxu0  ;;  %v1140_v22 = vpop.f32.mrf.mxu1 }
 0x163   : > { %1319 = vst [vmem:[#allocation2 + $0x48] sm:$0xff] %v1255_v19  ;;  %1351 = vst [vmem:[#allocation2 + $0x128] sm:$0xff] %v1287_v20  ;;  %v1253_v25 = vadd.f32 %v1012_v21, %v580_v17  ;;  %v1285_v26 = vadd.f32 %v1140_v22, %v612_v18  ;;  %v594_v19 = vld [vmem:[#allocation2 + $0x140] sm:$0xff]  ;;  %v626_v20 = vld [vmem:[#allocation2 + $0x1c8] sm:$0xff] }
 0x164   : > { %v2311_v27 = vpop.f32.mrf.mxu0  ;;  %v2343_v28 = vpop.f32.mrf.mxu1 }
 0x165   : > { %1317 = vst [vmem:[#allocation2 + $0x168] sm:$0xff] %v1253_v25  ;;  %1349 = vst [vmem:[#allocation2 + $0x1f8] sm:$0xff] %v1285_v26  ;;  %v1258_v31 = vadd.f32 %v2311_v27, %v585_v23  ;;  %v1290_v32 = vadd.f32 %v2343_v28, %v617_v24  ;;  %v592_v25 = vld [vmem:[#allocation2 + $0x188] sm:$0xff] }
 0x166   : > { %v1025_v33 = vpop.f32.mrf.mxu0  ;;  %v1153_v34 = vpop.f32.mrf.mxu1  ;;  %v624_v26 = vld [vmem:[#allocation2 + $0x88] sm:$0xff] }
 0x167   : > { %1322 = vst [vmem:[#allocation2 + $0x118] sm:$0xff] %v1258_v31  ;;  %1354 = vst [vmem:[#allocation2 + $0xe8] sm:$0xff] %v1290_v32  ;;  %v1256_v37 = vadd.f32 %v1025_v33, %v583_v29  ;;  %v1288_v38 = vadd.f32 %v1153_v34, %v615_v30  ;;  %v597_v31 = vld [vmem:[#allocation2 + $0x1b8] sm:$0xff]  ;;  %v629_v32 = vld [vmem:[#allocation2 + $0x68] sm:$0xff] }
 0x168   : > { %v2312_v39 = vpop.f32.mrf.mxu0  ;;  %v2344_v40 = vpop.f32.mrf.mxu1 }
 0x169   : > { %1320 = vst [vmem:[#allocation2 + $0x180] sm:$0xff] %v1256_v37  ;;  %1352 = vst [vmem:[#allocation2 + $0x1a0] sm:$0xff] %v1288_v38  ;;  %v1259_v43 = vadd.f32 %v2312_v39, %v586_v35  ;;  %v1291_v44 = vadd.f32 %v2344_v40, %v618_v36  ;;  %v595_v37 = vld [vmem:[#allocation2 + $0x80] sm:$0xff]  ;;  %v627_v38 = vld [vmem:[#allocation2 + $0x170] sm:$0xff] }
 0x16a   : > { %v1028_v45 = vpop.f32.mrf.mxu0  ;;  %v1156_v46 = vpop.f32.mrf.mxu1 }
 0x16b   : > { %1323 = vst [vmem:[#allocation2 + $0x98] sm:$0xff] %v1259_v43  ;;  %1355 = vst [vmem:[#allocation2 + $0x78] sm:$0xff] %v1291_v44  ;;  %v1257_v49 = vadd.f32 %v1028_v45, %v584_v41  ;;  %v1289_v50 = vadd.f32 %v1156_v46, %v616_v42  ;;  %v598_v43 = vld [vmem:[#allocation2 + $0x28] sm:$0xff]  ;;  %v630_v44 = vld [vmem:[#allocation2 + $0x190] sm:$0xff] }
 0x16c   : > { %v2315_v51 = vpop.f32.mrf.mxu0  ;;  %v2347_v52 = vpop.f32.mrf.mxu1 }
 0x16d   : > { %1321 = vst [vmem:[#allocation2 + $0x110] sm:$0xff] %v1257_v49  ;;  %1353 = vst [vmem:[#allocation2 + $0x1f0] sm:$0xff] %v1289_v50  ;;  %v1262_v55 = vadd.f32 %v2315_v51, %v589_v47  ;;  %v1294_v56 = vadd.f32 %v2347_v52, %v621_v48  ;;  %v596_v49 = vld [vmem:[#allocation2 + $0x1a8] sm:$0xff]  ;;  %v628_v50 = vld [vmem:[#allocation2 + $0x178] sm:$0xff] }
 0x16e   : > { %v1041_v57 = vpop.f32.mrf.mxu0  ;;  %v1169_v58 = vpop.f32.mrf.mxu1 }
 0x16f   : > { %1326 = vst [vmem:[#allocation2 + $0x108] sm:$0xff] %v1262_v55  ;;  %1358 = vst [vmem:[#allocation2 + $0x1d8] sm:$0xff] %v1294_v56  ;;  %v1260_v61 = vadd.f32 %v1041_v57, %v587_v53  ;;  %v1292_v62 = vadd.f32 %v1169_v58, %v619_v54  ;;  %v601_v55 = vld [vmem:[#allocation2 + $0x160] sm:$0xff] }
 0x170   : > { %v2316_v63 = vpop.f32.mrf.mxu0  ;;  %v2348_v0 = vpop.f32.mrf.mxu1  ;;  %v633_v56 = vld [vmem:[#allocation2 + $0xc0] sm:$0xff] }
 0x171   : > { %1324 = vst [vmem:[#allocation2 + $0x120] sm:$0xff] %v1260_v61  ;;  %1356 = vst [vmem:[#allocation2 + $0x70] sm:$0xff] %v1292_v62  ;;  %v1263_v3 = vadd.f32 %v2316_v63, %v590_v59  ;;  %v1295_v4 = vadd.f32 %v2348_v0, %v622_v60  ;;  %v599_v61 = vld [vmem:[#allocation2 + $0x1e8] sm:$0xff]  ;;  %v631_v62 = vld [vmem:[#allocation2 + $0x198] sm:$0xff] }
 0x172   : > { %v1044_v5 = vpop.f32.mrf.mxu0  ;;  %v1172_v6 = vpop.f32.mrf.mxu1 }
 0x173   : > { %1327 = vst [vmem:[#allocation2 + $0x60] sm:$0xff] %v1263_v3  ;;  %1359 = vst [vmem:[#allocation2 + $0xd0] sm:$0xff] %v1295_v4  ;;  %v1261_v9 = vadd.f32 %v1044_v5, %v588_v1  ;;  %v1293_v10 = vadd.f32 %v1172_v6, %v620_v2  ;;  %v602_v3 = vld [vmem:[#allocation2 + $0x30] sm:$0xff]  ;;  %v634_v4 = vld [vmem:[#allocation2 + $0x1c0] sm:$0xff] }
 0x174   : > { %v2319_v11 = vpop.f32.mrf.mxu0  ;;  %v2351_v12 = vpop.f32.mrf.mxu1 }
 0x175   : > { %1325 = vst [vmem:[#allocation2 + $0x150] sm:$0xff] %v1261_v9  ;;  %1357 = vst [vmem:[#allocation2 + $0x90] sm:$0xff] %v1293_v10  ;;  %v1266_v15 = vadd.f32 %v2319_v11, %v593_v7  ;;  %v1298_v16 = vadd.f32 %v2351_v12, %v625_v8  ;;  %v600_v9 = vld [vmem:[#allocation2 + $0xf8] sm:$0xff] }
 0x176   : > { %v1057_v17 = vpop.f32.mrf.mxu0  ;;  %v1185_v18 = vpop.f32.mrf.mxu1  ;;  %v632_v10 = vld [vmem:[#allocation2 + $0x38] sm:$0xff] }
 0x177   : > { %1330 = vst [vmem:[#allocation2 + $0x138] sm:$0xff] %v1266_v15  ;;  %1362 = vst [vmem:[#allocation2 + $0xa8] sm:$0xff] %v1298_v16  ;;  %v1264_v21 = vadd.f32 %v1057_v17, %v591_v13  ;;  %v1296_v22 = vadd.f32 %v1185_v18, %v623_v14  ;;  %v605_v15 = vld [vmem:[#allocation2 + $0xf0] sm:$0xff]  ;;  %v637_v16 = vld [vmem:[#allocation2 + $0x58] sm:$0xff] }
 0x178   : > { %v2320_v23 = vpop.f32.mrf.mxu0  ;;  %v2352_v24 = vpop.f32.mrf.mxu1 }
 0x179   : > { %1328 = vst [vmem:[#allocation2 + $0xe0] sm:$0xff] %v1264_v21  ;;  %1360 = vst [vmem:[#allocation2 + $0xb8] sm:$0xff] %v1296_v22  ;;  %v1267_v27 = vadd.f32 %v2320_v23, %v594_v19  ;;  %v1299_v28 = vadd.f32 %v2352_v24, %v626_v20  ;;  %v603_v21 = vld [vmem:[#allocation2 + $0x1e0] sm:$0xff]  ;;  %v635_v22 = vld [vmem:[#allocation2 + $0x158] sm:$0xff] }
 0x17a   : > { %v1060_v29 = vpop.f32.mrf.mxu0  ;;  %v1188_v30 = vpop.f32.mrf.mxu1 }
 0x17b   : > { %1331 = vst [vmem:[#allocation2 + $0x140] sm:$0xff] %v1267_v27  ;;  %1363 = vst [vmem:[#allocation2 + $0x1c8] sm:$0xff] %v1299_v28  ;;  %v1265_v33 = vadd.f32 %v1060_v29, %v592_v25  ;;  %v1297_v34 = vadd.f32 %v1188_v30, %v624_v26  ;;  %v606_v27 = vld [vmem:[#allocation2 + $0x8] sm:$0xff]  ;;  %v638_v28 = vld [vmem:[#allocation2 + $0xa0] sm:$0xff] }
 0x17c   : > { %v2323_v35 = vpop.f32.mrf.mxu0  ;;  %v2355_v36 = vpop.f32.mrf.mxu1 }
 0x17d   : > { %1329 = vst [vmem:[#allocation2 + $0x188] sm:$0xff] %v1265_v33  ;;  %1361 = vst [vmem:[#allocation2 + $0x88] sm:$0xff] %v1297_v34  ;;  %v1270_v39 = vadd.f32 %v2323_v35, %v597_v31  ;;  %v1302_v40 = vadd.f32 %v2355_v36, %v629_v32  ;;  %v604_v33 = vld [vmem:[#allocation2] sm:$0xff]  ;;  %v636_v34 = vld [vmem:[#allocation2 + $0x10] sm:$0xff] }
 0x17e   : > { %v1073_v41 = vpop.f32.mrf.mxu0  ;;  %v1201_v42 = vpop.f32.mrf.mxu1 }
 0x17f   : > { %1334 = vst [vmem:[#allocation2 + $0x1b8] sm:$0xff] %v1270_v39  ;;  %1366 = vst [vmem:[#allocation2 + $0x68] sm:$0xff] %v1302_v40  ;;  %v1268_v45 = vadd.f32 %v1073_v41, %v595_v37  ;;  %v1300_v46 = vadd.f32 %v1201_v42, %v627_v38 }
 0x180   : > { %v2324_v47 = vpop.f32.mrf.mxu0  ;;  %v2356_v48 = vpop.f32.mrf.mxu1 }
 0x181   : > { %1332 = vst [vmem:[#allocation2 + $0x80] sm:$0xff] %v1268_v45  ;;  %1364 = vst [vmem:[#allocation2 + $0x170] sm:$0xff] %v1300_v46  ;;  %v1271_v51 = vadd.f32 %v2324_v47, %v598_v43  ;;  %v1303_v52 = vadd.f32 %v2356_v48, %v630_v44 }
 0x182   : > { %v1076_v53 = vpop.f32.mrf.mxu0  ;;  %v1204_v54 = vpop.f32.mrf.mxu1 }
 0x183   : > { %1335 = vst [vmem:[#allocation2 + $0x28] sm:$0xff] %v1271_v51  ;;  %1367 = vst [vmem:[#allocation2 + $0x190] sm:$0xff] %v1303_v52  ;;  %v1269_v57 = vadd.f32 %v1076_v53, %v596_v49  ;;  %v1301_v58 = vadd.f32 %v1204_v54, %v628_v50 }
 0x184   : > { %v2327_v59 = vpop.f32.mrf.mxu0  ;;  %v2359_v60 = vpop.f32.mrf.mxu1 }
 0x185   : > { %1333 = vst [vmem:[#allocation2 + $0x1a8] sm:$0xff] %v1269_v57  ;;  %1365 = vst [vmem:[#allocation2 + $0x178] sm:$0xff] %v1301_v58  ;;  %v1274_v63 = vadd.f32 %v2327_v59, %v601_v55  ;;  %v1306_v0 = vadd.f32 %v2359_v60, %v633_v56 }
 0x186   : > { %v1089_v1 = vpop.f32.mrf.mxu0  ;;  %v1217_v2 = vpop.f32.mrf.mxu1 }
 0x187   : > { %1338 = vst [vmem:[#allocation2 + $0x160] sm:$0xff] %v1274_v63  ;;  %1370 = vst [vmem:[#allocation2 + $0xc0] sm:$0xff] %v1306_v0  ;;  %v1272_v5 = vadd.f32 %v1089_v1, %v599_v61  ;;  %v1304_v6 = vadd.f32 %v1217_v2, %v631_v62 }
 0x188   : > { %v2328_v7 = vpop.f32.mrf.mxu0  ;;  %v2360_v8 = vpop.f32.mrf.mxu1 }
 0x189   : > { %1336 = vst [vmem:[#allocation2 + $0x1e8] sm:$0xff] %v1272_v5  ;;  %1368 = vst [vmem:[#allocation2 + $0x198] sm:$0xff] %v1304_v6  ;;  %v1275_v11 = vadd.f32 %v2328_v7, %v602_v3  ;;  %v1307_v12 = vadd.f32 %v2360_v8, %v634_v4 }
 0x18a   : > { %v1092_v13 = vpop.f32.mrf.mxu0  ;;  %v1220_v14 = vpop.f32.mrf.mxu1 }
 0x18b   : > { %1339 = vst [vmem:[#allocation2 + $0x30] sm:$0xff] %v1275_v11  ;;  %1371 = vst [vmem:[#allocation2 + $0x1c0] sm:$0xff] %v1307_v12  ;;  %v1273_v17 = vadd.f32 %v1092_v13, %v600_v9  ;;  %v1305_v18 = vadd.f32 %v1220_v14, %v632_v10 }
 0x18c   : > { %v2331_v19 = vpop.f32.mrf.mxu0  ;;  %v2363_v20 = vpop.f32.mrf.mxu1 }
 0x18d   : > { %1337 = vst [vmem:[#allocation2 + $0xf8] sm:$0xff] %v1273_v17  ;;  %1369 = vst [vmem:[#allocation2 + $0x38] sm:$0xff] %v1305_v18  ;;  %v1278_v23 = vadd.f32 %v2331_v19, %v605_v15  ;;  %v1310_v24 = vadd.f32 %v2363_v20, %v637_v16 }
 0x18e   : > { %v1105_v25 = vpop.f32.mrf.mxu0  ;;  %v1233_v26 = vpop.f32.mrf.mxu1 }
 0x18f   : > { %1342 = vst [vmem:[#allocation2 + $0xf0] sm:$0xff] %v1278_v23  ;;  %1374 = vst [vmem:[#allocation2 + $0x58] sm:$0xff] %v1310_v24  ;;  %v1276_v29 = vadd.f32 %v1105_v25, %v603_v21  ;;  %v1308_v30 = vadd.f32 %v1233_v26, %v635_v22 }
 0x190   : > { %v2332_v31 = vpop.f32.mrf.mxu0  ;;  %v2364_v32 = vpop.f32.mrf.mxu1 }
 0x191   : > { %1340 = vst [vmem:[#allocation2 + $0x1e0] sm:$0xff] %v1276_v29  ;;  %1372 = vst [vmem:[#allocation2 + $0x158] sm:$0xff] %v1308_v30  ;;  %v1279_v35 = vadd.f32 %v2332_v31, %v606_v27  ;;  %v1311_v36 = vadd.f32 %v2364_v32, %v638_v28  ;;  %1379 = sbr.rel (%p1923_p13) target bundleno = 433 (0x1b1), region = 77 }
 0x192   : > { %v1108_v37 = vpop.f32.mrf.mxu0  ;;  %v1236_v38 = vpop.f32.mrf.mxu1 }
 0x193   : > { %1343 = vst [vmem:[#allocation2 + $0x8] sm:$0xff] %v1279_v35  ;;  %1375 = vst [vmem:[#allocation2 + $0xa0] sm:$0xff] %v1311_v36  ;;  %v1277_v39 = vadd.f32 %v1108_v37, %v604_v33  ;;  %v1309_v40 = vadd.f32 %v1236_v38, %v636_v34 }
 0x195   : > { %1341 = vst [vmem:[#allocation2] sm:$0xff] %v1277_v39  ;;  %1373 = vst [vmem:[#allocation2 + $0x10] sm:$0xff] %v1309_v40 }
 0x196   : > { %v1380_v41 = vld [vmem:[#allocation2 + $0xb0] sm:$0xff]  ;;  %v1382_v43 = vld [vmem:[#allocation2 + $0xd8] sm:$0xff]  ;;  %v1385_v47 = vld [vmem:[#allocation2 + $0x168] sm:$0xff] }
 0x197   : > { %v1381_v42 = vld [vmem:[#allocation2 + $0x1b0] sm:$0xff]  ;;  %v1383_v45 = vld [vmem:[#allocation2 + $0x18] sm:$0xff]  ;;  %v1387_v51 = vld [vmem:[#allocation2 + $0x48] sm:$0xff] }
 0x198   : > { %v2057_v44 = vpack.c.bf16 %v1381_v42, %v1380_v41  ;;  %v1384_v46 = vld [vmem:[#allocation2 + $0x50] sm:$0xff]  ;;  %v2062_v48 = vpack.c.bf16 %v1383_v45, %v1382_v43  ;;  %v1388_v52 = vld [vmem:[#allocation2 + $0x180] sm:$0xff]  ;;  %v1390_v55 = vld [vmem:[#allocation2 + $0x118] sm:$0xff] }
 0x199   : > { %v2067_v49 = vpack.c.bf16 %v1385_v47, %v1384_v46  ;;  %v1386_v50 = vld [vmem:[#allocation2 + $0x130] sm:$0xff]  ;;  %v1391_v56 = vld [vmem:[#allocation2 + $0x98] sm:$0xff]  ;;  %v1392_v59 = vld [vmem:[#allocation2 + $0x120] sm:$0xff] }
 0x19a   : > { %2058 = vst [vmem:[%s2756_s25] sm:$0xff] %v2057_v44   ;;  %v2072_v53 = vpack.c.bf16 %v1387_v51, %v1386_v50  ;;  %v1389_v54 = vld [vmem:[#allocation2 + $0x110] sm:$0xff]  ;;  %2214 = vst [vmem:[%s2756_s25 + $0x8] sm:$0xff] %v2062_v48   ;;  %v2082_v58 = vpack.c.bf16 %v1391_v56, %v1390_v55  ;;  %v1394_v61 = vld [vmem:[#allocation2 + $0x108] sm:$0xff] }
 0x19b   : > { %2215 = vst [vmem:[%s2756_s25 + $0x10] sm:$0xff] %v2067_v49   ;;  %v2077_v57 = vpack.c.bf16 %v1389_v54, %v1388_v52  ;;  %v1393_v60 = vld [vmem:[#allocation2 + $0x150] sm:$0xff]  ;;  %v1395_v63 = vld [vmem:[#allocation2 + $0x60] sm:$0xff]  ;;  %v1397_v1 = vld [vmem:[#allocation2 + $0x188] sm:$0xff] }
 0x19c   : > { %2216 = vst [vmem:[%s2756_s25 + $0x18] sm:$0xff] %v2072_v53   ;;  %v2087_v62 = vpack.c.bf16 %v1393_v60, %v1392_v59  ;;  %v1396_v0 = vld [vmem:[#allocation2 + $0xe0] sm:$0xff]  ;;  %2218 = vst [vmem:[%s2756_s25 + $0x28] sm:$0xff] %v2082_v58   ;;  %v2092_v2 = vpack.c.bf16 %v1395_v63, %v1394_v61  ;;  %v1398_v4 = vld [vmem:[#allocation2 + $0x138] sm:$0xff] }
 0x19d   : > { %2217 = vst [vmem:[%s2756_s25 + $0x20] sm:$0xff] %v2077_v57   ;;  %v2097_v3 = vpack.c.bf16 %v1397_v1, %v1396_v0  ;;  %v1399_v5 = vld [vmem:[#allocation2 + $0x140] sm:$0xff]  ;;  %v1401_v8 = vld [vmem:[#allocation2 + $0x1a8] sm:$0xff]  ;;  %v1402_v9 = vld [vmem:[#allocation2 + $0x1b8] sm:$0xff] }
 0x19e   : > { %v1400_v6 = vld [vmem:[#allocation2 + $0x80] sm:$0xff]  ;;  %2219 = vst [vmem:[%s2756_s25 + $0x30] sm:$0xff] %v2087_v62   ;;  %v2102_v7 = vpack.c.bf16 %v1399_v5, %v1398_v4  ;;  %v1403_v10 = vld [vmem:[#allocation2 + $0x28] sm:$0xff]  ;;  %2220 = vst [vmem:[%s2756_s25 + $0x38] sm:$0xff] %v2092_v2  }
 0x19f   : > { %2221 = vst [vmem:[%s2756_s25 + $0x40] sm:$0xff] %v2097_v3   ;;  %v2107_v11 = vpack.c.bf16 %v1401_v8, %v1400_v6  ;;  %v2112_v12 = vpack.c.bf16 %v1403_v10, %v1402_v9  ;;  %v1404_v13 = vld [vmem:[#allocation2 + $0x1e8] sm:$0xff]  ;;  %v1405_v14 = vld [vmem:[#allocation2 + $0xf8] sm:$0xff]  ;;  %v1406_v15 = vld [vmem:[#allocation2 + $0x160] sm:$0xff] }
 0x1a0   : > { %2222 = vst [vmem:[%s2756_s25 + $0x48] sm:$0xff] %v2102_v7   ;;  %v2117_v16 = vpack.c.bf16 %v1405_v14, %v1404_v13  ;;  %v1407_v17 = vld [vmem:[#allocation2 + $0x30] sm:$0xff]  ;;  %v1408_v18 = vld [vmem:[#allocation2 + $0x1e0] sm:$0xff]  ;;  %v1411_v23 = vld [vmem:[#allocation2 + $0x8] sm:$0xff] }
 0x1a1   : > { %v1409_v19 = vld [vmem:[#allocation2] sm:$0xff]  ;;  %2223 = vst [vmem:[%s2756_s25 + $0x50] sm:$0xff] %v2107_v11   ;;  %2224 = vst [vmem:[%s2756_s25 + $0x58] sm:$0xff] %v2112_v12   ;;  %v2122_v20 = vpack.c.bf16 %v1407_v17, %v1406_v15  ;;  %v1410_v22 = vld [vmem:[#allocation2 + $0xf0] sm:$0xff] }
 0x1a2   : > { %v2127_v21 = vpack.c.bf16 %v1409_v19, %v1408_v18  ;;  %v1412_v24 = vld [vmem:[#allocation2 + $0x148] sm:$0xff]  ;;  %2225 = vst [vmem:[%s2756_s25 + $0x60] sm:$0xff] %v2117_v16   ;;  %v2132_v25 = vpack.c.bf16 %v1411_v23, %v1410_v22  ;;  %v1413_v26 = vld [vmem:[#allocation2 + $0x1d0] sm:$0xff]  ;;  %v1414_v27 = vld [vmem:[#allocation2 + $0x100] sm:$0xff] }
 0x1a3   : > { %v1415_v28 = vld [vmem:[#allocation2 + $0xc8] sm:$0xff]  ;;  %2226 = vst [vmem:[%s2756_s25 + $0x68] sm:$0xff] %v2122_v20   ;;  %v2137_v29 = vpack.c.bf16 %v1413_v26, %v1412_v24  ;;  %v1416_v31 = vld [vmem:[#allocation2 + $0x40] sm:$0xff]  ;;  %v1417_v32 = vld [vmem:[#allocation2 + $0x1f8] sm:$0xff] }
 0x1a4   : > { %2227 = vst [vmem:[%s2756_s25 + $0x70] sm:$0xff] %v2127_v21   ;;  %v2142_v30 = vpack.c.bf16 %v1415_v28, %v1414_v27  ;;  %v1418_v33 = vld [vmem:[#allocation2 + $0x20] sm:$0xff]  ;;  %2228 = vst [vmem:[%s2756_s25 + $0x78] sm:$0xff] %v2132_v25   ;;  %v2147_v34 = vpack.c.bf16 %v1417_v32, %v1416_v31  ;;  %v1419_v35 = vld [vmem:[#allocation2 + $0x128] sm:$0xff] }
 0x1a5   : > { %v1420_v36 = vld [vmem:[#allocation2 + $0x1a0] sm:$0xff]  ;;  %v1421_v37 = vld [vmem:[#allocation2 + $0x1f0] sm:$0xff]  ;;  %2229 = vst [vmem:[%s2756_s25 + $0x80] sm:$0xff] %v2137_v29   ;;  %v2152_v38 = vpack.c.bf16 %v1419_v35, %v1418_v33  ;;  %v1422_v40 = vld [vmem:[#allocation2 + $0xe8] sm:$0xff] }
 0x1a6   : > { %2230 = vst [vmem:[%s2756_s25 + $0x88] sm:$0xff] %v2142_v30   ;;  %v2157_v39 = vpack.c.bf16 %v1421_v37, %v1420_v36  ;;  %v1423_v41 = vld [vmem:[#allocation2 + $0x78] sm:$0xff]  ;;  %v1424_v42 = vld [vmem:[#allocation2 + $0x70] sm:$0xff]  ;;  %2231 = vst [vmem:[%s2756_s25 + $0x90] sm:$0xff] %v2147_v34  }
 0x1a7   : > { %v2162_v43 = vpack.c.bf16 %v1423_v41, %v1422_v40  ;;  %v1425_v44 = vld [vmem:[#allocation2 + $0x90] sm:$0xff]  ;;  %v1426_v45 = vld [vmem:[#allocation2 + $0x1d8] sm:$0xff]  ;;  %2232 = vst [vmem:[%s2756_s25 + $0x98] sm:$0xff] %v2152_v38   ;;  %v1429_v50 = vld [vmem:[#allocation2 + $0x88] sm:$0xff] }
 0x1a8   : > { %v1427_v46 = vld [vmem:[#allocation2 + $0xd0] sm:$0xff]  ;;  %2233 = vst [vmem:[%s2756_s25 + $0xa0] sm:$0xff] %v2157_v39   ;;  %v2167_v47 = vpack.c.bf16 %v1425_v44, %v1424_v42  ;;  %v1428_v49 = vld [vmem:[#allocation2 + $0xb8] sm:$0xff]  ;;  %v1430_v51 = vld [vmem:[#allocation2 + $0xa8] sm:$0xff] }
 0x1a9   : > { %v2172_v48 = vpack.c.bf16 %v1427_v46, %v1426_v45  ;;  %2234 = vst [vmem:[%s2756_s25 + $0xa8] sm:$0xff] %v2162_v43   ;;  %v2177_v52 = vpack.c.bf16 %v1429_v50, %v1428_v49  ;;  %v1431_v53 = vld [vmem:[#allocation2 + $0x1c8] sm:$0xff]  ;;  %v1432_v54 = vld [vmem:[#allocation2 + $0x170] sm:$0xff]  ;;  %v1433_v55 = vld [vmem:[#allocation2 + $0x178] sm:$0xff] }
 0x1aa   : > { %2235 = vst [vmem:[%s2756_s25 + $0xb0] sm:$0xff] %v2167_v47   ;;  %v2182_v56 = vpack.c.bf16 %v1431_v53, %v1430_v51  ;;  %v2187_v57 = vpack.c.bf16 %v1433_v55, %v1432_v54  ;;  %v1434_v58 = vld [vmem:[#allocation2 + $0x68] sm:$0xff]  ;;  %v1435_v59 = vld [vmem:[#allocation2 + $0x190] sm:$0xff]  ;;  %v1436_v60 = vld [vmem:[#allocation2 + $0x198] sm:$0xff] }
 0x1ab   : > { %2236 = vst [vmem:[%s2756_s25 + $0xb8] sm:$0xff] %v2172_v48   ;;  %2237 = vst [vmem:[%s2756_s25 + $0xc0] sm:$0xff] %v2177_v52   ;;  %v2192_v61 = vpack.c.bf16 %v1435_v59, %v1434_v58  ;;  %v1437_v62 = vld [vmem:[#allocation2 + $0x38] sm:$0xff]  ;;  %v1438_v63 = vld [vmem:[#allocation2 + $0xc0] sm:$0xff] }
 0x1ac   : > { %v1439_v0 = vld [vmem:[#allocation2 + $0x1c0] sm:$0xff]  ;;  %2238 = vst [vmem:[%s2756_s25 + $0xc8] sm:$0xff] %v2182_v56   ;;  %2239 = vst [vmem:[%s2756_s25 + $0xd0] sm:$0xff] %v2187_v57   ;;  %v2197_v1 = vpack.c.bf16 %v1437_v62, %v1436_v60  ;;  %v1440_v3 = vld [vmem:[#allocation2 + $0x158] sm:$0xff] }
 0x1ad   : > { %v2202_v2 = vpack.c.bf16 %v1439_v0, %v1438_v63  ;;  %v1441_v4 = vld [vmem:[#allocation2 + $0x10] sm:$0xff]  ;;  %v1442_v5 = vld [vmem:[#allocation2 + $0x58] sm:$0xff]  ;;  %2240 = vst [vmem:[%s2756_s25 + $0xd8] sm:$0xff] %v2192_v61   ;;  %v1443_v7 = vld [vmem:[#allocation2 + $0xa0] sm:$0xff] }
 0x1ae   : > { %v2207_v6 = vpack.c.bf16 %v1441_v4, %v1440_v3  ;;  %2241 = vst [vmem:[%s2756_s25 + $0xe0] sm:$0xff] %v2197_v1   ;;  %v2212_v8 = vpack.c.bf16 %v1443_v7, %v1442_v5 }
 0x1af   : > { %2242 = vst [vmem:[%s2756_s25 + $0xe8] sm:$0xff] %v2202_v2  }
 0x1b0   : > { %2243 = vst [vmem:[%s2756_s25 + $0xf0] sm:$0xff] %v2207_v6   ;;  %2244 = vst [vmem:[%s2756_s25 + $0xf8] sm:$0xff] %v2212_v8  }
 0x1b1 PF: > { %s12_s15 = sadd.s32 1, %s2533_s15   ;;  %s2922_s9 = smov %s2513_s10 }
 0x1b2   : > { %p9_p0 = scmp.ge.s32.totalorder %s12_s15, 38   ;;  %s2923_s10 = smov %s2602_s22 }
 0x1b3   : > { %s2924_s11 = smov %s2525_s13  ;;  %s2925_s12 = smov %s2529_s14 }
 0x1b4   : > { %s2926_s13 = smov %s2929_s16  ;;  %s2927_s14 = smov %s2933_s17 }
 0x1b5   :  { %11 = sbr.rel (!%p9_p0) target bundleno = 4 (0x4), region = 115 }

// kernel: blcd_forward.19
= control target key start
LH: loop header
LB: loop body
LE: loop exit
PB: predicated region body
PF: predicated region fallthrough
CT: control target
= control target key end

     0   :  { %s1607_s9 = smov 0   ;;  %s1609_s10 = smov 0   ;;  %s1815_s0 = inlined_call_operand.vmem [shape: bf16[512,1152], index: 0, kind: input, shape index: {}]   ;;  %s1816_s1 = inlined_call_operand.vmem [shape: bf16[1152,128], index: 1, kind: input, shape index: {}]   ;;  %s1817_s2 = inlined_call_operand.vmem [shape: bf16[512,128], index: 2, kind: output, shape index: {}]  }
   0x1   :  { %s1611_s11 = smov 0   ;;  %s1613_s12 = smov 0  }
   0x2   :  { %s1615_s13 = smov 0   ;;  %s1617_s14 = smov 0  }
   0x3   :  { %s1619_s15 = smov 0  }
   0x4 LB: > { %s24_s16 = sadd.s32 1, %s1581_s13  ;;  %s31_s17 = sadd.s32 1, %s1585_s14  ;;  %s1589_s15 = sphi %s1619_s15, %s12_s15   ;;  %s1585_s14 = sphi %s1617_s14, %s1823_s14   ;;  %s1581_s13 = sphi %s1615_s13, %s1822_s13   ;;  %s1577_s12 = sphi %s1613_s12, %s1821_s12   ;;  %s1573_s11 = sphi %s1611_s11, %s1820_s11   ;;  %s1569_s10 = sphi %s1609_s10, %s1819_s10   ;;  %s1565_s9 = sphi %s1607_s9, %s1818_s9  }
   0x5   : > { %p25_p0 = scmp.ge.s32.totalorder %s24_s16, 9  ;;  %p47_p1 = scmp.ne.s32.totalorder %s1569_s10, %s1565_s9 }
   0x6   : > { %p48_p2 = scmp.eq.s32.totalorder %s1589_s15, 0  ;;  %s40_s21 = sadd.s32 1, %s1569_s10 }
   0x7   : > { %s1825_s16 = smov (%p25_p0, %s24_s16), 0  ;;  %s1827_s17 = smov (!%p25_p0, %s31_s17), %s1585_s14 }
   0x8   : > { %p49_p3 = por %p48_p2, %p47_p1  ;;  %p33_p4 = scmp.ge.s32.totalorder %s1827_s17, 2 }
   0x9   : > { %s36_s18 = ssub.s32 %s1581_s13, %s1825_s16  ;;  %p1167_p6 = scmp.ge.s32.totalorder %s1589_s15, 18 }
   0xa   : > { %s1829_s17 = smov (%p33_p4, %s1827_s17), 0 }
   0xb   : > { %s35_s19 = ssub.s32 %s1585_s14, %s1829_s17  ;;  %129 = sbr.rel (%p1167_p6) target bundleno = 44 (0x2c), region = 16 }
   0xc   : > { %s37_s20 = sor.u32 %s36_s18, %s35_s19 }
   0xd   : > { %p38_p5 = scmp.eq.s32.totalorder %s37_s20, 0 }
   0xf   : > { %s1658_s22 = scalar_select %p38_p5, %s1569_s10, %s40_s21  }
  0x10   : > { %132 = sbr.rel (!%p49_p3) target bundleno = 44 (0x2c), region = 20  ;;  %s134_s23 = sand.u32 (%p49_p3), 1, %s1569_s10  }
  0x11   : > { %s1453_s24 = smul.u32 (%p49_p3), 288, %s1585_s14  ;;  %s1168_s25 = sshll.u32 (%p49_p3), %s134_s23, 7 }
  0x12   : > { %s1672_s3 = scalar_lea.vmem (%p49_p3), [#allocation3], %s1168_s25 }
  0x13   : > { %s139_s26 = sadd.s32 (%p49_p3), %s1581_s13, %s1453_s24 }
  0x14   : > { %s1171_s27 = sshll.u32 (%p49_p3), %s139_s26, 2 }
  0x15   : > { %s1667_s30 = scalar_lea.vmem %s1815_s0, %s1171_s27 }
  0x16   : > { %v158_v0 = vld [vmem:[%s1667_s30] sm:$0xf]  ;;  %v160_v1 = vld [vmem:[%s1667_s30 + $0x24] sm:$0xf]  ;;  %v162_v2 = vld [vmem:[%s1667_s30 + $0x48] sm:$0xf] }
  0x17   : > { %159 = vst [vmem:[%s1672_s3] sm:$0xf] %v158_v0  ;;  %161 = vst [vmem:[%s1672_s3 + $0x4] sm:$0xf] %v160_v1  ;;  %v164_v3 = vld [vmem:[%s1667_s30 + $0x6c] sm:$0xf] }
  0x18   : > { %163 = vst [vmem:[%s1672_s3 + $0x8] sm:$0xf] %v162_v2  ;;  %v166_v4 = vld [vmem:[%s1667_s30 + $0x90] sm:$0xf]  ;;  %v168_v5 = vld [vmem:[%s1667_s30 + $0xb4] sm:$0xf] }
  0x19   : > { %165 = vst [vmem:[%s1672_s3 + $0xc] sm:$0xf] %v164_v3  ;;  %167 = vst [vmem:[%s1672_s3 + $0x10] sm:$0xf] %v166_v4  ;;  %v170_v6 = vld [vmem:[%s1667_s30 + $0xd8] sm:$0xf] }
  0x1a   : > { %169 = vst [vmem:[%s1672_s3 + $0x14] sm:$0xf] %v168_v5  ;;  %v172_v7 = vld [vmem:[%s1667_s30 + $0xfc] sm:$0xf]  ;;  %v174_v8 = vld [vmem:[%s1667_s30 + $0x120] sm:$0xf] }
  0x1b   : > { %171 = vst [vmem:[%s1672_s3 + $0x18] sm:$0xf] %v170_v6  ;;  %173 = vst [vmem:[%s1672_s3 + $0x1c] sm:$0xf] %v172_v7  ;;  %v176_v9 = vld [vmem:[%s1667_s30 + $0x144] sm:$0xf] }
  0x1c   : > { %175 = vst [vmem:[%s1672_s3 + $0x20] sm:$0xf] %v174_v8  ;;  %v178_v10 = vld [vmem:[%s1667_s30 + $0x168] sm:$0xf]  ;;  %v180_v11 = vld [vmem:[%s1667_s30 + $0x18c] sm:$0xf] }
  0x1d   : > { %177 = vst [vmem:[%s1672_s3 + $0x24] sm:$0xf] %v176_v9  ;;  %179 = vst [vmem:[%s1672_s3 + $0x28] sm:$0xf] %v178_v10  ;;  %v182_v12 = vld [vmem:[%s1667_s30 + $0x1b0] sm:$0xf] }
  0x1e   : > { %181 = vst [vmem:[%s1672_s3 + $0x2c] sm:$0xf] %v180_v11  ;;  %v184_v13 = vld [vmem:[%s1667_s30 + $0x1d4] sm:$0xf]  ;;  %v186_v14 = vld [vmem:[%s1667_s30 + $0x1f8] sm:$0xf] }
  0x1f   : > { %183 = vst [vmem:[%s1672_s3 + $0x30] sm:$0xf] %v182_v12  ;;  %185 = vst [vmem:[%s1672_s3 + $0x34] sm:$0xf] %v184_v13  ;;  %v188_v15 = vld [vmem:[%s1667_s30 + $0x21c] sm:$0xf] }
  0x20   : > { %187 = vst [vmem:[%s1672_s3 + $0x38] sm:$0xf] %v186_v14  ;;  %v190_v16 = vld [vmem:[%s1667_s30 + $0x240] sm:$0xf]  ;;  %v192_v17 = vld [vmem:[%s1667_s30 + $0x264] sm:$0xf] }
  0x21   : > { %189 = vst [vmem:[%s1672_s3 + $0x3c] sm:$0xf] %v188_v15  ;;  %191 = vst [vmem:[%s1672_s3 + $0x40] sm:$0xf] %v190_v16  ;;  %v194_v18 = vld [vmem:[%s1667_s30 + $0x288] sm:$0xf] }
  0x22   : > { %193 = vst [vmem:[%s1672_s3 + $0x44] sm:$0xf] %v192_v17  ;;  %v196_v19 = vld [vmem:[%s1667_s30 + $0x2ac] sm:$0xf]  ;;  %v198_v20 = vld [vmem:[%s1667_s30 + $0x2d0] sm:$0xf] }
  0x23   : > { %195 = vst [vmem:[%s1672_s3 + $0x48] sm:$0xf] %v194_v18  ;;  %197 = vst [vmem:[%s1672_s3 + $0x4c] sm:$0xf] %v196_v19  ;;  %v200_v21 = vld [vmem:[%s1667_s30 + $0x2f4] sm:$0xf] }
  0x24   : > { %199 = vst [vmem:[%s1672_s3 + $0x50] sm:$0xf] %v198_v20  ;;  %v202_v22 = vld [vmem:[%s1667_s30 + $0x318] sm:$0xf]  ;;  %v204_v23 = vld [vmem:[%s1667_s30 + $0x33c] sm:$0xf] }
  0x25   : > { %201 = vst [vmem:[%s1672_s3 + $0x54] sm:$0xf] %v200_v21  ;;  %203 = vst [vmem:[%s1672_s3 + $0x58] sm:$0xf] %v202_v22  ;;  %v206_v24 = vld [vmem:[%s1667_s30 + $0x360] sm:$0xf] }
  0x26   : > { %205 = vst [vmem:[%s1672_s3 + $0x5c] sm:$0xf] %v204_v23  ;;  %v208_v25 = vld [vmem:[%s1667_s30 + $0x384] sm:$0xf]  ;;  %v210_v26 = vld [vmem:[%s1667_s30 + $0x3a8] sm:$0xf] }
  0x27   : > { %207 = vst [vmem:[%s1672_s3 + $0x60] sm:$0xf] %v206_v24  ;;  %209 = vst [vmem:[%s1672_s3 + $0x64] sm:$0xf] %v208_v25  ;;  %v212_v27 = vld [vmem:[%s1667_s30 + $0x3cc] sm:$0xf] }
  0x28   : > { %211 = vst [vmem:[%s1672_s3 + $0x68] sm:$0xf] %v210_v26  ;;  %v214_v28 = vld [vmem:[%s1667_s30 + $0x3f0] sm:$0xf]  ;;  %v216_v29 = vld [vmem:[%s1667_s30 + $0x414] sm:$0xf] }
  0x29   : > { %213 = vst [vmem:[%s1672_s3 + $0x6c] sm:$0xf] %v212_v27  ;;  %215 = vst [vmem:[%s1672_s3 + $0x70] sm:$0xf] %v214_v28  ;;  %v218_v30 = vld [vmem:[%s1667_s30 + $0x438] sm:$0xf] }
  0x2a   : > { %217 = vst [vmem:[%s1672_s3 + $0x74] sm:$0xf] %v216_v29  ;;  %v220_v31 = vld [vmem:[%s1667_s30 + $0x45c] sm:$0xf]  ;;  %219 = vst [vmem:[%s1672_s3 + $0x78] sm:$0xf] %v218_v30 }
  0x2b   : > { %221 = vst [vmem:[%s1672_s3 + $0x7c] sm:$0xf] %v220_v31 }
  0x2c PF: > { %p1172_p7 = scmp.ge.s32.totalorder %s1589_s15, 1  ;;  %p320_p8 = scmp.lt.s32.totalorder %s1589_s15, 19 }
  0x2e   : > { %p321_p9 = pnand %p1172_p7, %p320_p8 }
  0x2f   : > { %s327_s4 = sand.u32 (!%p321_p9), 1, %s1565_s9   ;;  %s1174_s5 = sshll.u32 (!%p321_p9), %s1573_s11, 4 }
  0x30   : > { %324 = sbr.rel (%p321_p9) target bundleno = 352 (0x160), region = 65  ;;  %s1173_s6 = sshll.u32 (!%p321_p9), %s327_s4, 7 }
  0x31   : > { %p361_p10 = scmp.lt.s32.totalorder (!%p321_p9), %s1174_s5, 143  ;;  %s1176_s7 = sshll.u32 (!%p321_p9), %s1577_s12, 5 }
  0x32   : > { %p370_p11 = scmp.lt.s32.totalorder (!%p321_p9), %s1176_s7, 63  ;;  %s1750_s9 = scalar_lea.vmem (!%p321_p9), [#allocation3], %s1173_s6 }
  0x33   : > { %p1178_p12 = scmp.ne.s32.totalorder (!%p321_p9), %s1573_s11, 0 }
  0x35   : > { %s1831_s5 = smov (!%p361_p10, %s1174_s5), 143  ;;  %s1833_s7 = smov (!%p370_p11, %s1176_s7), 63 }
  0x36   : > { %s1175_s8 = sshll.u32 %s1831_s5, 2  ;;  %s1177_s21 = sshll.u32 %s1833_s7, 2 }
  0x37   : > { %s1743_s20 = scalar_lea.vmem %s1816_s1, %s1175_s8  ;;  %s1748_s25 = scalar_lea.vmem %s1817_s2, %s1177_s21 }
  0x38   : > { %382 = sbr.rel (%p1178_p12) target bundleno = 78 (0x4e), region = 73 }
  0x3d   : > { %v1591_v32 = vmov 0.0  }
  0x3e   : > { %383 = vst [vmem:[#allocation2 + $0xb0] sm:$0xff] %v1591_v32  ;;  %384 = vst [vmem:[#allocation2] sm:$0xff] %v1591_v32 }
  0x3f   : > { %385 = vst [vmem:[#allocation2 + $0xd8] sm:$0xff] %v1591_v32  ;;  %386 = vst [vmem:[#allocation2 + $0x18] sm:$0xff] %v1591_v32 }
  0x40   : > { %387 = vst [vmem:[#allocation2 + $0x50] sm:$0xff] %v1591_v32  ;;  %388 = vst [vmem:[#allocation2 + $0x68] sm:$0xff] %v1591_v32 }
  0x41   : > { %389 = vst [vmem:[#allocation2 + $0x30] sm:$0xff] %v1591_v32  ;;  %390 = vst [vmem:[#allocation2 + $0x48] sm:$0xff] %v1591_v32 }
  0x42   : > { %391 = vst [vmem:[#allocation2 + $0x80] sm:$0xff] %v1591_v32  ;;  %392 = vst [vmem:[#allocation2 + $0x88] sm:$0xff] %v1591_v32 }
  0x43   : > { %393 = vst [vmem:[#allocation2 + $0xe8] sm:$0xff] %v1591_v32  ;;  %394 = vst [vmem:[#allocation2 + $0xb8] sm:$0xff] %v1591_v32 }
  0x44   : > { %395 = vst [vmem:[#allocation2 + $0x60] sm:$0xff] %v1591_v32  ;;  %396 = vst [vmem:[#allocation2 + $0xf0] sm:$0xff] %v1591_v32 }
  0x45   : > { %397 = vst [vmem:[#allocation2 + $0x8] sm:$0xff] %v1591_v32  ;;  %398 = vst [vmem:[#allocation2 + $0x78] sm:$0xff] %v1591_v32 }
  0x46   : > { %399 = vst [vmem:[#allocation2 + $0x38] sm:$0xff] %v1591_v32  ;;  %400 = vst [vmem:[#allocation2 + $0x58] sm:$0xff] %v1591_v32 }
  0x47   : > { %401 = vst [vmem:[#allocation2 + $0x40] sm:$0xff] %v1591_v32  ;;  %402 = vst [vmem:[#allocation2 + $0xc8] sm:$0xff] %v1591_v32 }
  0x48   : > { %403 = vst [vmem:[#allocation2 + $0xe0] sm:$0xff] %v1591_v32  ;;  %404 = vst [vmem:[#allocation2 + $0x90] sm:$0xff] %v1591_v32 }
  0x49   : > { %405 = vst [vmem:[#allocation2 + $0x70] sm:$0xff] %v1591_v32  ;;  %406 = vst [vmem:[#allocation2 + $0xc0] sm:$0xff] %v1591_v32 }
  0x4a   : > { %407 = vst [vmem:[#allocation2 + $0xa8] sm:$0xff] %v1591_v32  ;;  %408 = vst [vmem:[#allocation2 + $0xd0] sm:$0xff] %v1591_v32 }
  0x4b   : > { %409 = vst [vmem:[#allocation2 + $0x10] sm:$0xff] %v1591_v32  ;;  %410 = vst [vmem:[#allocation2 + $0x28] sm:$0xff] %v1591_v32 }
  0x4c   : > { %411 = vst [vmem:[#allocation2 + $0xa0] sm:$0xff] %v1591_v32  ;;  %412 = vst [vmem:[#allocation2 + $0xf8] sm:$0xff] %v1591_v32 }
  0x4d   : > { %413 = vst [vmem:[#allocation2 + $0x20] sm:$0xff] %v1591_v32  ;;  %414 = vst [vmem:[#allocation2 + $0x98] sm:$0xff] %v1591_v32 }
  0x4e PF: > { %v1511_v33 = vld [vmem:[%s1743_s20 + $0x38] sm:$0xff]   ;;  %v1512_v34 = vld [vmem:[%s1743_s20 + $0x30] sm:$0xff]   ;;  %v1513_v35 = vld [vmem:[%s1743_s20 + $0x28] sm:$0xff]   ;;  %p1203_p13 = scmp.ne.s32.totalorder %s1573_s11, 8 }
  0x4f   : > { %1389 = vmatprep.subr.bf16.mxu0 %v1511_v33  ;;  %1437 = vmatprep.subr.bf16.mxu1 %v1511_v33  ;;  %v1514_v36 = vld [vmem:[%s1743_s20 + $0x20] sm:$0xff]   ;;  %v1515_v39 = vld [vmem:[%s1743_s20 + $0x18] sm:$0xff]   ;;  %v1516_v40 = vld [vmem:[%s1743_s20 + $0x10] sm:$0xff]  }
  0x50   : > { %1390 = vmatpush3.bf16.msra.mxu0 %v1511_v33  ;;  %1445 = vmatpush3.bf16.msra.mxu1 %v1511_v33  ;;  %v1519_v37 = vld [vmem:[%s1750_s9] sm:$0xff]   ;;  %v1517_v41 = vld [vmem:[%s1743_s20 + $0x8] sm:$0xff]   ;;  %v1523_v45 = vld [vmem:[%s1750_s9 + $0x10] sm:$0xff]  }
  0x51   : > { %1391 = vmatprep.subr.bf16.mxu0 %v1512_v34  ;;  %1438 = vmatprep.subr.bf16.mxu1 %v1512_v34  ;;  %v1520_v38 = vld [vmem:[%s1750_s9 + $0x40] sm:$0xff]   ;;  %v1521_v43 = vld [vmem:[%s1750_s9 + $0x8] sm:$0xff]   ;;  %v1524_v46 = vld [vmem:[%s1750_s9 + $0x50] sm:$0xff]  }
  0x52   : > { %1405 = vmatprep.mubr.bf16.mxu0 %v1519_v37  ;;  %1421 = vmatprep.mubr.bf16.mxu1 %v1520_v38  ;;  %v1518_v42 = vld [vmem:[%s1743_s20] sm:$0xff]   ;;  %v1522_v44 = vld [vmem:[%s1750_s9 + $0x48] sm:$0xff]   ;;  %v1525_v47 = vld [vmem:[%s1750_s9 + $0x18] sm:$0xff]  }
  0x53   : > { %v1526_v48 = vld [vmem:[%s1750_s9 + $0x58] sm:$0xff]   ;;  %v1527_v49 = vld [vmem:[%s1750_s9 + $0x20] sm:$0xff]   ;;  %v1529_v51 = vld [vmem:[%s1750_s9 + $0x28] sm:$0xff]  }
  0x54   : > { %1392 = vmatpush3.bf16.msra.mxu0 %v1512_v34  ;;  %1446 = vmatpush3.bf16.msra.mxu1 %v1512_v34  ;;  %v1528_v50 = vld [vmem:[%s1750_s9 + $0x60] sm:$0xff]   ;;  %v1530_v52 = vld [vmem:[%s1750_s9 + $0x68] sm:$0xff]   ;;  %v1531_v53 = vld [vmem:[%s1750_s9 + $0x30] sm:$0xff]  }
  0x55   : > { %1393 = vmatprep.subr.bf16.mxu0 %v1513_v35  ;;  %1439 = vmatprep.subr.bf16.mxu1 %v1513_v35  ;;  %v1532_v54 = vld [vmem:[%s1750_s9 + $0x70] sm:$0xff]   ;;  %v1533_v55 = vld [vmem:[%s1750_s9 + $0x38] sm:$0xff]   ;;  %v433_v58 = vld [vmem:[#allocation2 + $0x40] sm:$0xff] }
  0x56   : > { %v1534_v56 = vld [vmem:[%s1750_s9 + $0x78] sm:$0xff]   ;;  %v415_v61 = vld [vmem:[#allocation2 + $0xb0] sm:$0xff]  ;;  %v434_v4 = vld [vmem:[#allocation2 + $0xc8] sm:$0xff] }
  0x57   : > { %v417_v57 = vld [vmem:[#allocation2 + $0xd8] sm:$0xff]  ;;  %v416_v9 = vld [vmem:[#allocation2] sm:$0xff]  ;;  %v421_v15 = vld [vmem:[#allocation2 + $0x30] sm:$0xff] }
  0x58   : > { %1394 = vmatpush3.bf16.msra.mxu0 %v1513_v35  ;;  %1447 = vmatpush3.bf16.msra.mxu1 %v1513_v35  ;;  %v431_v62 = vld [vmem:[#allocation2 + $0x38] sm:$0xff]  ;;  %v437_v16 = vld [vmem:[#allocation2 + $0x70] sm:$0xff]  ;;  %v435_v22 = vld [vmem:[#allocation2 + $0xe0] sm:$0xff] }
  0x59   : > { %1395 = vmatprep.subr.bf16.mxu0 %v1514_v36  ;;  %1440 = vmatprep.subr.bf16.mxu1 %v1514_v36  ;;  %v418_v3 = vld [vmem:[#allocation2 + $0x18] sm:$0xff]  ;;  %v419_v21 = vld [vmem:[#allocation2 + $0x50] sm:$0xff]  ;;  %v422_v27 = vld [vmem:[#allocation2 + $0x48] sm:$0xff] }
  0x5a   : > { %v432_v10 = vld [vmem:[#allocation2 + $0x58] sm:$0xff]  ;;  %v438_v28 = vld [vmem:[#allocation2 + $0xc0] sm:$0xff]  ;;  %v420_v33 = vld [vmem:[#allocation2 + $0x68] sm:$0xff] }
  0x5b   : > { %v436_v34 = vld [vmem:[#allocation2 + $0x90] sm:$0xff] }
  0x5c   : > { %1396 = vmatpush3.bf16.msra.mxu0 %v1514_v36  ;;  %1448 = vmatpush3.bf16.msra.mxu1 %v1514_v36 }
  0x5d   : > { %1397 = vmatprep.subr.bf16.mxu0 %v1515_v39  ;;  %1441 = vmatprep.subr.bf16.mxu1 %v1515_v39 }
  0x60   : > { %1398 = vmatpush3.bf16.msra.mxu0 %v1515_v39  ;;  %1449 = vmatpush3.bf16.msra.mxu1 %v1515_v39  ;;  %v425_v39 = vld [vmem:[#allocation2 + $0xe8] sm:$0xff] }
  0x61   : > { %1399 = vmatprep.subr.bf16.mxu0 %v1516_v40  ;;  %1442 = vmatprep.subr.bf16.mxu1 %v1516_v40 }
  0x64   : > { %1400 = vmatpush3.bf16.msra.mxu0 %v1516_v40  ;;  %1450 = vmatpush3.bf16.msra.mxu1 %v1516_v40  ;;  %v441_v40 = vld [vmem:[#allocation2 + $0x10] sm:$0xff] }
  0x65   : > { %1401 = vmatprep.subr.bf16.mxu0 %v1517_v41  ;;  %1443 = vmatprep.subr.bf16.mxu1 %v1517_v41 }
  0x68   : > { %1402 = vmatpush3.bf16.msra.mxu0 %v1517_v41  ;;  %1451 = vmatpush3.bf16.msra.mxu1 %v1517_v41 }
  0x69   : > { %1403 = vmatprep.subr.bf16.mxu0 %v1518_v42  ;;  %1444 = vmatprep.subr.bf16.mxu1 %v1518_v42 }
  0x6c   : > { %1404 = vmatpush3.bf16.msra.mxu0 %v1518_v42  ;;  %1452 = vmatpush3.bf16.msra.mxu1 %v1518_v42 }
  0x6f   : > { %1406 = vmatmul.mubr.bf16.vlgmr.msra.gmra.mxu0 %v1521_v43  ;;  %1422 = vmatmul.mubr.bf16.vlgmr.msra.gmra.mxu1 %v1522_v44 }
  0x70   : > { %1409 = vmatprep.mubr.bf16.mxu0 %v1523_v45  ;;  %1425 = vmatprep.mubr.bf16.mxu1 %v1524_v46  ;;  %v423_v45 = vld [vmem:[#allocation2 + $0x80] sm:$0xff]  ;;  %v439_v46 = vld [vmem:[#allocation2 + $0xa8] sm:$0xff] }
  0x77   : > { %1410 = vmatmul.mubr.bf16.gmra.mxu0 %v1525_v47  ;;  %1426 = vmatmul.mubr.bf16.gmra.mxu1 %v1526_v48 }
  0x78   : > { %1413 = vmatprep.mubr.bf16.mxu0 %v1527_v49  ;;  %1429 = vmatprep.mubr.bf16.mxu1 %v1528_v50 }
  0x7f   : > { %1414 = vmatmul.mubr.bf16.gmra.mxu0 %v1529_v51  ;;  %1430 = vmatmul.mubr.bf16.gmra.mxu1 %v1530_v52  ;;  %v426_v51 = vld [vmem:[#allocation2 + $0xb8] sm:$0xff]  ;;  %v442_v52 = vld [vmem:[#allocation2 + $0x28] sm:$0xff] }
  0x80   : > { %1417 = vmatprep.mubr.bf16.mxu0 %v1531_v53  ;;  %1433 = vmatprep.mubr.bf16.mxu1 %v1532_v54 }
  0x87   : > { %1418 = vmatmul.mubr.bf16.gmra.mxu0 %v1533_v55  ;;  %1434 = vmatmul.mubr.bf16.gmra.mxu1 %v1534_v56 }
 0x12f   : > { %v1407_v59 = vpop.f32.mrf.mxu0  ;;  %v1423_v60 = vpop.f32.mrf.mxu1 }
 0x130   : > { %v802_v63 = vadd.f32 %v1407_v59, %v417_v57  ;;  %v818_v0 = vadd.f32 %v1423_v60, %v433_v58  ;;  %v424_v57 = vld [vmem:[#allocation2 + $0x88] sm:$0xff]  ;;  %v440_v58 = vld [vmem:[#allocation2 + $0xd0] sm:$0xff] }
 0x131   : > { %v673_v1 = vpop.f32.mrf.mxu0  ;;  %v737_v2 = vpop.f32.mrf.mxu1 }
 0x132   : > { %834 = vst [vmem:[#allocation2 + $0xd8] sm:$0xff] %v802_v63  ;;  %850 = vst [vmem:[#allocation2 + $0x40] sm:$0xff] %v818_v0  ;;  %v800_v5 = vadd.f32 %v673_v1, %v415_v61  ;;  %v816_v6 = vadd.f32 %v737_v2, %v431_v62  ;;  %v429_v63 = vld [vmem:[#allocation2 + $0x8] sm:$0xff]  ;;  %v445_v0 = vld [vmem:[#allocation2 + $0x20] sm:$0xff] }
 0x133   : > { %v1408_v7 = vpop.f32.mrf.mxu0  ;;  %v1424_v8 = vpop.f32.mrf.mxu1 }
 0x134   : > { %832 = vst [vmem:[#allocation2 + $0xb0] sm:$0xff] %v800_v5  ;;  %848 = vst [vmem:[#allocation2 + $0x38] sm:$0xff] %v816_v6  ;;  %v803_v11 = vadd.f32 %v1408_v7, %v418_v3  ;;  %v819_v12 = vadd.f32 %v1424_v8, %v434_v4  ;;  %v427_v5 = vld [vmem:[#allocation2 + $0x60] sm:$0xff] }
 0x135   : > { %v676_v13 = vpop.f32.mrf.mxu0  ;;  %v740_v14 = vpop.f32.mrf.mxu1  ;;  %v443_v6 = vld [vmem:[#allocation2 + $0xa0] sm:$0xff] }
 0x136   : > { %835 = vst [vmem:[#allocation2 + $0x18] sm:$0xff] %v803_v11  ;;  %851 = vst [vmem:[#allocation2 + $0xc8] sm:$0xff] %v819_v12  ;;  %v801_v17 = vadd.f32 %v676_v13, %v416_v9  ;;  %v817_v18 = vadd.f32 %v740_v14, %v432_v10  ;;  %v430_v11 = vld [vmem:[#allocation2 + $0x78] sm:$0xff] }
 0x137   : > { %v1411_v19 = vpop.f32.mrf.mxu0  ;;  %v1427_v20 = vpop.f32.mrf.mxu1  ;;  %v446_v12 = vld [vmem:[#allocation2 + $0x98] sm:$0xff] }
 0x138   : > { %833 = vst [vmem:[#allocation2] sm:$0xff] %v801_v17  ;;  %849 = vst [vmem:[#allocation2 + $0x58] sm:$0xff] %v817_v18  ;;  %v806_v23 = vadd.f32 %v1411_v19, %v421_v15  ;;  %v822_v24 = vadd.f32 %v1427_v20, %v437_v16  ;;  %v428_v17 = vld [vmem:[#allocation2 + $0xf0] sm:$0xff]  ;;  %v444_v18 = vld [vmem:[#allocation2 + $0xf8] sm:$0xff] }
 0x139   : > { %v689_v25 = vpop.f32.mrf.mxu0  ;;  %v753_v26 = vpop.f32.mrf.mxu1 }
 0x13a   : > { %838 = vst [vmem:[#allocation2 + $0x30] sm:$0xff] %v806_v23  ;;  %854 = vst [vmem:[#allocation2 + $0x70] sm:$0xff] %v822_v24  ;;  %v804_v29 = vadd.f32 %v689_v25, %v419_v21  ;;  %v820_v30 = vadd.f32 %v753_v26, %v435_v22 }
 0x13b   : > { %v1412_v31 = vpop.f32.mrf.mxu0  ;;  %v1428_v32 = vpop.f32.mrf.mxu1 }
 0x13c   : > { %836 = vst [vmem:[#allocation2 + $0x50] sm:$0xff] %v804_v29  ;;  %852 = vst [vmem:[#allocation2 + $0xe0] sm:$0xff] %v820_v30  ;;  %v807_v35 = vadd.f32 %v1412_v31, %v422_v27  ;;  %v823_v36 = vadd.f32 %v1428_v32, %v438_v28 }
 0x13d   : > { %v692_v37 = vpop.f32.mrf.mxu0  ;;  %v756_v38 = vpop.f32.mrf.mxu1 }
 0x13e   : > { %839 = vst [vmem:[#allocation2 + $0x48] sm:$0xff] %v807_v35  ;;  %855 = vst [vmem:[#allocation2 + $0xc0] sm:$0xff] %v823_v36  ;;  %v805_v41 = vadd.f32 %v692_v37, %v420_v33  ;;  %v821_v42 = vadd.f32 %v756_v38, %v436_v34 }
 0x13f   : > { %v1415_v43 = vpop.f32.mrf.mxu0  ;;  %v1431_v44 = vpop.f32.mrf.mxu1 }
 0x140   : > { %837 = vst [vmem:[#allocation2 + $0x68] sm:$0xff] %v805_v41  ;;  %853 = vst [vmem:[#allocation2 + $0x90] sm:$0xff] %v821_v42  ;;  %v810_v47 = vadd.f32 %v1415_v43, %v425_v39  ;;  %v826_v48 = vadd.f32 %v1431_v44, %v441_v40 }
 0x141   : > { %v705_v49 = vpop.f32.mrf.mxu0  ;;  %v769_v50 = vpop.f32.mrf.mxu1 }
 0x142   : > { %842 = vst [vmem:[#allocation2 + $0xe8] sm:$0xff] %v810_v47  ;;  %858 = vst [vmem:[#allocation2 + $0x10] sm:$0xff] %v826_v48  ;;  %v808_v53 = vadd.f32 %v705_v49, %v423_v45  ;;  %v824_v54 = vadd.f32 %v769_v50, %v439_v46 }
 0x143   : > { %v1416_v55 = vpop.f32.mrf.mxu0  ;;  %v1432_v56 = vpop.f32.mrf.mxu1 }
 0x144   : > { %840 = vst [vmem:[#allocation2 + $0x80] sm:$0xff] %v808_v53  ;;  %856 = vst [vmem:[#allocation2 + $0xa8] sm:$0xff] %v824_v54  ;;  %v811_v59 = vadd.f32 %v1416_v55, %v426_v51  ;;  %v827_v60 = vadd.f32 %v1432_v56, %v442_v52 }
 0x145   : > { %v708_v61 = vpop.f32.mrf.mxu0  ;;  %v772_v62 = vpop.f32.mrf.mxu1 }
 0x146   : > { %843 = vst [vmem:[#allocation2 + $0xb8] sm:$0xff] %v811_v59  ;;  %859 = vst [vmem:[#allocation2 + $0x28] sm:$0xff] %v827_v60  ;;  %v809_v1 = vadd.f32 %v708_v61, %v424_v57  ;;  %v825_v2 = vadd.f32 %v772_v62, %v440_v58 }
 0x147   : > { %v1419_v3 = vpop.f32.mrf.mxu0  ;;  %v1435_v4 = vpop.f32.mrf.mxu1 }
 0x148   : > { %841 = vst [vmem:[#allocation2 + $0x88] sm:$0xff] %v809_v1  ;;  %857 = vst [vmem:[#allocation2 + $0xd0] sm:$0xff] %v825_v2  ;;  %v814_v7 = vadd.f32 %v1419_v3, %v429_v63  ;;  %v830_v8 = vadd.f32 %v1435_v4, %v445_v0 }
 0x149   : > { %v721_v9 = vpop.f32.mrf.mxu0  ;;  %v785_v10 = vpop.f32.mrf.mxu1 }
 0x14a   : > { %846 = vst [vmem:[#allocation2 + $0x8] sm:$0xff] %v814_v7  ;;  %862 = vst [vmem:[#allocation2 + $0x20] sm:$0xff] %v830_v8  ;;  %v812_v13 = vadd.f32 %v721_v9, %v427_v5  ;;  %v828_v14 = vadd.f32 %v785_v10, %v443_v6 }
 0x14b   : > { %v1420_v15 = vpop.f32.mrf.mxu0  ;;  %v1436_v16 = vpop.f32.mrf.mxu1 }
 0x14c   : > { %844 = vst [vmem:[#allocation2 + $0x60] sm:$0xff] %v812_v13  ;;  %860 = vst [vmem:[#allocation2 + $0xa0] sm:$0xff] %v828_v14  ;;  %v815_v19 = vadd.f32 %v1420_v15, %v430_v11  ;;  %v831_v20 = vadd.f32 %v1436_v16, %v446_v12  ;;  %867 = sbr.rel (%p1203_p13) target bundleno = 352 (0x160), region = 77 }
 0x14d   : > { %v724_v21 = vpop.f32.mrf.mxu0  ;;  %v788_v22 = vpop.f32.mrf.mxu1 }
 0x14e   : > { %847 = vst [vmem:[#allocation2 + $0x78] sm:$0xff] %v815_v19  ;;  %863 = vst [vmem:[#allocation2 + $0x98] sm:$0xff] %v831_v20  ;;  %v813_v23 = vadd.f32 %v724_v21, %v428_v17  ;;  %v829_v24 = vadd.f32 %v788_v22, %v444_v18 }
 0x150   : > { %845 = vst [vmem:[#allocation2 + $0xf0] sm:$0xff] %v813_v23  ;;  %861 = vst [vmem:[#allocation2 + $0xf8] sm:$0xff] %v829_v24 }
 0x151   : > { %v868_v25 = vld [vmem:[#allocation2 + $0xb0] sm:$0xff]  ;;  %v869_v26 = vld [vmem:[#allocation2] sm:$0xff]  ;;  %v870_v27 = vld [vmem:[#allocation2 + $0xd8] sm:$0xff] }
 0x152   : > { %v1273_v28 = vpack.c.bf16 %v869_v26, %v868_v25  ;;  %v871_v29 = vld [vmem:[#allocation2 + $0x18] sm:$0xff]  ;;  %v872_v30 = vld [vmem:[#allocation2 + $0x50] sm:$0xff]  ;;  %v873_v31 = vld [vmem:[#allocation2 + $0x68] sm:$0xff] }
 0x153   : > { %v1278_v32 = vpack.c.bf16 %v871_v29, %v870_v27  ;;  %v1283_v33 = vpack.c.bf16 %v873_v31, %v872_v30  ;;  %v874_v34 = vld [vmem:[#allocation2 + $0x30] sm:$0xff]  ;;  %v875_v35 = vld [vmem:[#allocation2 + $0x48] sm:$0xff]  ;;  %v876_v36 = vld [vmem:[#allocation2 + $0x80] sm:$0xff] }
 0x154   : > { %1274 = vst [vmem:[%s1748_s25] sm:$0xff] %v1273_v28   ;;  %v1288_v37 = vpack.c.bf16 %v875_v35, %v874_v34  ;;  %v877_v38 = vld [vmem:[#allocation2 + $0x88] sm:$0xff]  ;;  %v879_v40 = vld [vmem:[#allocation2 + $0xb8] sm:$0xff]  ;;  %v880_v43 = vld [vmem:[#allocation2 + $0x60] sm:$0xff] }
 0x155   : > { %v878_v39 = vld [vmem:[#allocation2 + $0xe8] sm:$0xff]  ;;  %1350 = vst [vmem:[%s1748_s25 + $0x8] sm:$0xff] %v1278_v32   ;;  %1351 = vst [vmem:[%s1748_s25 + $0x10] sm:$0xff] %v1283_v33   ;;  %v1293_v41 = vpack.c.bf16 %v877_v38, %v876_v36  ;;  %v883_v47 = vld [vmem:[#allocation2 + $0x78] sm:$0xff] }
 0x156   : > { %v1298_v42 = vpack.c.bf16 %v879_v40, %v878_v39  ;;  %v882_v45 = vld [vmem:[#allocation2 + $0x8] sm:$0xff]  ;;  %1352 = vst [vmem:[%s1748_s25 + $0x18] sm:$0xff] %v1288_v37   ;;  %v884_v48 = vld [vmem:[#allocation2 + $0x38] sm:$0xff]  ;;  %v886_v52 = vld [vmem:[#allocation2 + $0x40] sm:$0xff] }
 0x157   : > { %v881_v44 = vld [vmem:[#allocation2 + $0xf0] sm:$0xff]  ;;  %v885_v49 = vld [vmem:[#allocation2 + $0x58] sm:$0xff]  ;;  %1353 = vst [vmem:[%s1748_s25 + $0x20] sm:$0xff] %v1293_v41   ;;  %v1308_v50 = vpack.c.bf16 %v883_v47, %v882_v45  ;;  %v887_v53 = vld [vmem:[#allocation2 + $0xc8] sm:$0xff] }
 0x158   : > { %v1303_v46 = vpack.c.bf16 %v881_v44, %v880_v43  ;;  %1354 = vst [vmem:[%s1748_s25 + $0x28] sm:$0xff] %v1298_v42   ;;  %v1313_v51 = vpack.c.bf16 %v885_v49, %v884_v48  ;;  %v888_v54 = vld [vmem:[#allocation2 + $0xe0] sm:$0xff]  ;;  %v1318_v55 = vpack.c.bf16 %v887_v53, %v886_v52  ;;  %v889_v56 = vld [vmem:[#allocation2 + $0x90] sm:$0xff]  ;;  %v892_v61 = vld [vmem:[#allocation2 + $0xa8] sm:$0xff] }
 0x159   : > { %v890_v57 = vld [vmem:[#allocation2 + $0x70] sm:$0xff]  ;;  %v891_v58 = vld [vmem:[#allocation2 + $0xc0] sm:$0xff]  ;;  %1356 = vst [vmem:[%s1748_s25 + $0x38] sm:$0xff] %v1308_v50   ;;  %v1323_v59 = vpack.c.bf16 %v889_v56, %v888_v54  ;;  %v895_v1 = vld [vmem:[#allocation2 + $0x28] sm:$0xff] }
 0x15a   : > { %1355 = vst [vmem:[%s1748_s25 + $0x30] sm:$0xff] %v1303_v46   ;;  %1357 = vst [vmem:[%s1748_s25 + $0x40] sm:$0xff] %v1313_v51   ;;  %v1328_v60 = vpack.c.bf16 %v891_v58, %v890_v57  ;;  %v893_v62 = vld [vmem:[#allocation2 + $0xd0] sm:$0xff]  ;;  %v896_v2 = vld [vmem:[#allocation2 + $0xa0] sm:$0xff] }
 0x15b   : > { %v894_v63 = vld [vmem:[#allocation2 + $0x10] sm:$0xff]  ;;  %1358 = vst [vmem:[%s1748_s25 + $0x48] sm:$0xff] %v1318_v55   ;;  %v1333_v0 = vpack.c.bf16 %v893_v62, %v892_v61  ;;  %v897_v3 = vld [vmem:[#allocation2 + $0xf8] sm:$0xff]  ;;  %1359 = vst [vmem:[%s1748_s25 + $0x50] sm:$0xff] %v1323_v59  }
 0x15c   : > { %1360 = vst [vmem:[%s1748_s25 + $0x58] sm:$0xff] %v1328_v60   ;;  %v1338_v4 = vpack.c.bf16 %v895_v1, %v894_v63  ;;  %v1343_v5 = vpack.c.bf16 %v897_v3, %v896_v2  ;;  %v898_v6 = vld [vmem:[#allocation2 + $0x20] sm:$0xff]  ;;  %v899_v7 = vld [vmem:[#allocation2 + $0x98] sm:$0xff] }
 0x15d   : > { %1361 = vst [vmem:[%s1748_s25 + $0x60] sm:$0xff] %v1333_v0   ;;  %v1348_v8 = vpack.c.bf16 %v899_v7, %v898_v6 }
 0x15e   : > { %1362 = vst [vmem:[%s1748_s25 + $0x68] sm:$0xff] %v1338_v4   ;;  %1363 = vst [vmem:[%s1748_s25 + $0x70] sm:$0xff] %v1343_v5  }
 0x15f   : > { %1364 = vst [vmem:[%s1748_s25 + $0x78] sm:$0xff] %v1348_v8  }
 0x160 PF: > { %s12_s15 = sadd.s32 1, %s1589_s15   ;;  %s1818_s9 = smov %s1569_s10 }
 0x161   : > { %p9_p0 = scmp.ge.s32.totalorder %s12_s15, 20   ;;  %s1819_s10 = smov %s1658_s22 }
 0x162   : > { %s1820_s11 = smov %s1581_s13  ;;  %s1821_s12 = smov %s1585_s14 }
 0x163   : > { %s1822_s13 = smov %s1825_s16  ;;  %s1823_s14 = smov %s1829_s17 }
 0x164   :  { %11 = sbr.rel (!%p9_p0) target bundleno = 4 (0x4), region = 115 }

// kernel: blcd_forward.20
= control target key start
LH: loop header
LB: loop body
LE: loop exit
PB: predicated region body
PF: predicated region fallthrough
CT: control target
= control target key end

     0   :  { %s2401_s0 = inlined_call_operand.vmem [shape: bf16[512,128], index: 0, kind: input, shape index: {}]   ;;  %s2402_s1 = inlined_call_operand.vmem [shape: f32[1,128], index: 1, kind: input, shape index: {}]   ;;  %s2403_s2 = inlined_call_operand.vmem [shape: bf16[512,128], index: 2, kind: output, shape index: {}]  }
   0x1   :  { %v1064_v0 = vld [vmem:[%s2401_s0] sm:$0xff]   ;;  %v1351_v1 = vld [vmem:[%s2401_s0 + $0x8] sm:$0xff]   ;;  %v1352_v5 = vld [vmem:[%s2401_s0 + $0x10] sm:$0xff]  }
   0x2   :  { %v1436_v2 = vunpack.c.l.bf16 %v1064_v0  ;;  %v1438_v3 = vunpack.c.h.bf16 %v1064_v0  ;;  %v1440_v4 = vunpack.c.l.bf16 %v1351_v1  ;;  %v1445_v6 = vunpack.c.h.bf16 %v1351_v1  ;;  %v1353_v10 = vld [vmem:[%s2401_s0 + $0x18] sm:$0xff]   ;;  %v1354_v15 = vld [vmem:[%s2401_s0 + $0x20] sm:$0xff]   ;;  %v1355_v20 = vld [vmem:[%s2401_s0 + $0x28] sm:$0xff]  }
   0x3   :  { %v1449_v8 = vunpack.c.l.bf16 %v1352_v5  ;;  %v1455_v11 = vunpack.c.h.bf16 %v1352_v5  ;;  %v1458_v13 = vunpack.c.l.bf16 %v1353_v10  ;;  %v1464_v16 = vunpack.c.h.bf16 %v1353_v10  ;;  %v1356_v27 = vld [vmem:[%s2401_s0 + $0x30] sm:$0xff]   ;;  %v1357_v35 = vld [vmem:[%s2401_s0 + $0x38] sm:$0xff]   ;;  %v1358_v44 = vld [vmem:[%s2401_s0 + $0x40] sm:$0xff]  }
   0x4   :  { %v139_v7 = vadd.f32 %v1438_v3, %v1436_v2  ;;  %v1467_v18 = vunpack.c.l.bf16 %v1354_v15  ;;  %v1473_v21 = vunpack.c.h.bf16 %v1354_v15  ;;  %v1476_v23 = vunpack.c.l.bf16 %v1355_v20  ;;  %v1359_v53 = vld [vmem:[%s2401_s0 + $0x48] sm:$0xff]   ;;  %v1360_v62 = vld [vmem:[%s2401_s0 + $0x50] sm:$0xff]  }
   0x5   :  { %v209_v25 = vmul.f32 %v1436_v2, %v1436_v2  ;;  %v210_v26 = vmul.f32 %v1438_v3, %v1438_v3  ;;  %v1486_v28 = vunpack.c.h.bf16 %v1355_v20  ;;  %v211_v30 = vmul.f32 %v1440_v4, %v1440_v4 }
   0x6   :  { %v140_v9 = vadd.f32 %v1440_v4, %v139_v7  ;;  %v1491_v31 = vunpack.c.l.bf16 %v1356_v27  ;;  %v212_v33 = vmul.f32 %v1445_v6, %v1445_v6  ;;  %v1499_v36 = vunpack.c.h.bf16 %v1356_v27  ;;  %v1362_v27 = vld [vmem:[%s2401_s0 + $0x60] sm:$0xff]  }
   0x7   :  { %v273_v34 = vadd.f32 %v210_v26, %v209_v25  ;;  %v213_v38 = vmul.f32 %v1449_v8, %v1449_v8  ;;  %v1504_v40 = vunpack.c.l.bf16 %v1357_v35  ;;  %v214_v42 = vmul.f32 %v1455_v11, %v1455_v11 }
   0x8   :  { %v141_v12 = vadd.f32 %v1445_v6, %v140_v9  ;;  %v1512_v45 = vunpack.c.h.bf16 %v1357_v35  ;;  %v215_v47 = vmul.f32 %v1458_v13, %v1458_v13  ;;  %v1517_v49 = vunpack.c.l.bf16 %v1358_v44 }
   0x9   :  { %v274_v39 = vadd.f32 %v273_v34, %v211_v30  ;;  %v216_v51 = vmul.f32 %v1464_v16, %v1464_v16  ;;  %v1525_v54 = vunpack.c.h.bf16 %v1358_v44  ;;  %v217_v56 = vmul.f32 %v1467_v18, %v1467_v18 }
   0xa   :  { %v142_v14 = vadd.f32 %v1449_v8, %v141_v12  ;;  %v1530_v58 = vunpack.c.l.bf16 %v1359_v53  ;;  %v218_v60 = vmul.f32 %v1473_v21, %v1473_v21  ;;  %v1538_v63 = vunpack.c.h.bf16 %v1359_v53 }
   0xb   :  { %v275_v43 = vadd.f32 %v274_v39, %v212_v33  ;;  %v219_v1 = vmul.f32 %v1476_v23, %v1476_v23  ;;  %v1543_v7 = vunpack.c.l.bf16 %v1360_v62  ;;  %v220_v10 = vmul.f32 %v1486_v28, %v1486_v28  ;;  %v1363_v39 = vld [vmem:[%s2401_s0 + $0x68] sm:$0xff]  }
   0xc   :  { %v143_v17 = vadd.f32 %v1455_v11, %v142_v14  ;;  %v1361_v14 = vld [vmem:[%s2401_s0 + $0x58] sm:$0xff]   ;;  %v1551_v15 = vunpack.c.h.bf16 %v1360_v62  ;;  %v222_v25 = vmul.f32 %v1499_v36, %v1499_v36  ;;  %v1569_v34 = vunpack.c.l.bf16 %v1362_v27 }
   0xd   :  { %v276_v48 = vadd.f32 %v275_v43, %v213_v38  ;;  %v225_v43 = vmul.f32 %v1517_v49, %v1517_v49  ;;  %v1365_v62 = vld [vmem:[%s2401_s0 + $0x78] sm:$0xff]  }
   0xe   :  { %v144_v19 = vadd.f32 %v1458_v13, %v143_v17 }
   0xf   :  { %v277_v52 = vadd.f32 %v276_v48, %v214_v42  ;;  %v226_v48 = vmul.f32 %v1525_v54, %v1525_v54 }
  0x10   :  { %v145_v22 = vadd.f32 %v1464_v16, %v144_v19  ;;  %v221_v19 = vmul.f32 %v1491_v31, %v1491_v31 }
  0x11   :  { %v278_v57 = vadd.f32 %v277_v52, %v215_v47  ;;  %v1590_v52 = vunpack.c.h.bf16 %v1363_v39 }
  0x12   :  { %v146_v24 = vadd.f32 %v1467_v18, %v145_v22  ;;  %v1556_v22 = vunpack.c.l.bf16 %v1361_v14 }
  0x13   :  { %v279_v61 = vadd.f32 %v278_v57, %v216_v51  ;;  %v1364_v51 = vld [vmem:[%s2401_s0 + $0x70] sm:$0xff]  }
  0x14   :  { %v147_v29 = vadd.f32 %v1473_v21, %v146_v24  ;;  %v1595_v57 = vunpack.c.l.bf16 %v1364_v51 }
  0x15   :  { %v280_v5 = vadd.f32 %v279_v61, %v217_v56 }
  0x16   :  { %v148_v32 = vadd.f32 %v1476_v23, %v147_v29  ;;  %v1564_v29 = vunpack.c.h.bf16 %v1361_v14  ;;  %v230_v14 = vmul.f32 %v1551_v15, %v1551_v15 }
  0x17   :  { %v281_v12 = vadd.f32 %v280_v5, %v218_v60  ;;  %v228_v60 = vmul.f32 %v1538_v63, %v1538_v63  ;;  %v229_v5 = vmul.f32 %v1543_v7, %v1543_v7 }
  0x18   :  { %v149_v37 = vadd.f32 %v1486_v28, %v148_v32  ;;  %v223_v32 = vmul.f32 %v1504_v40, %v1504_v40 }
  0x19   :  { %v282_v20 = vadd.f32 %v281_v12, %v219_v1 }
  0x1a   :  { %v150_v41 = vadd.f32 %v1491_v31, %v149_v37  ;;  %v224_v37 = vmul.f32 %v1512_v45, %v1512_v45 }
  0x1b   :  { %v283_v26 = vadd.f32 %v282_v20, %v220_v10  ;;  %v1608_v10 = vunpack.c.l.bf16 %v1365_v62  ;;  %v1616_v20 = vunpack.c.h.bf16 %v1365_v62 }
  0x1c   :  { %v151_v46 = vadd.f32 %v1499_v36, %v150_v41  ;;  %v1577_v41 = vunpack.c.h.bf16 %v1362_v27 }
  0x1d   :  { %v284_v33 = vadd.f32 %v283_v26, %v221_v19  ;;  %v1366_v19 = vld [vmem:[%s2401_s0 + $0x80] sm:$0xff]  }
  0x1e   :  { %v152_v50 = vadd.f32 %v1504_v40, %v151_v46  ;;  %v1582_v46 = vunpack.c.l.bf16 %v1363_v39  ;;  %v1621_v27 = vunpack.c.l.bf16 %v1366_v19  ;;  %v233_v39 = vmul.f32 %v1569_v34, %v1569_v34 }
  0x1f   :  { %v285_v38 = vadd.f32 %v284_v33, %v222_v25  ;;  %v231_v25 = vmul.f32 %v1556_v22, %v1556_v22 }
  0x20   :  { %v153_v55 = vadd.f32 %v1512_v45, %v152_v50 }
  0x21   :  { %v286_v44 = vadd.f32 %v285_v38, %v223_v32  ;;  %v232_v32 = vmul.f32 %v1564_v29, %v1564_v29 }
  0x22   :  { %v154_v59 = vadd.f32 %v1517_v49, %v153_v55  ;;  %v227_v55 = vmul.f32 %v1530_v58, %v1530_v58 }
  0x23   :  { %v287_v50 = vadd.f32 %v286_v44, %v224_v37  ;;  %v1629_v37 = vunpack.c.h.bf16 %v1366_v19 }
  0x24   :  { %v155_v0 = vadd.f32 %v1525_v54, %v154_v59 }
  0x25   :  { %v288_v56 = vadd.f32 %v287_v50, %v225_v43  ;;  %v1368_v50 = vld [vmem:[%s2401_s0 + $0x90] sm:$0xff]  }
  0x26   :  { %v156_v9 = vadd.f32 %v1530_v58, %v155_v0  ;;  %v1603_v0 = vunpack.c.h.bf16 %v1364_v51 }
  0x27   :  { %v289_v61 = vadd.f32 %v288_v56, %v226_v48 }
  0x28   :  { %v157_v17 = vadd.f32 %v1538_v63, %v156_v9 }
  0x29   :  { %v290_v9 = vadd.f32 %v289_v61, %v227_v55  ;;  %v235_v55 = vmul.f32 %v1582_v46, %v1582_v46  ;;  %v236_v61 = vmul.f32 %v1590_v52, %v1590_v52 }
  0x2a   :  { %v158_v24 = vadd.f32 %v1543_v7, %v157_v17 }
  0x2b   :  { %v291_v17 = vadd.f32 %v290_v9, %v228_v60 }
  0x2c   :  { %v159_v30 = vadd.f32 %v1551_v15, %v158_v24 }
  0x2d   :  { %v292_v26 = vadd.f32 %v291_v17, %v229_v5  ;;  %v1655_v5 = vunpack.c.h.bf16 %v1368_v50 }
  0x2e   :  { %v160_v35 = vadd.f32 %v1556_v22, %v159_v30 }
  0x2f   :  { %v293_v33 = vadd.f32 %v292_v26, %v230_v14  ;;  %v1370_v26 = vld [vmem:[%s2401_s0 + $0xa0] sm:$0xff]  }
  0x30   :  { %v161_v42 = vadd.f32 %v1564_v29, %v160_v35  ;;  %v1367_v35 = vld [vmem:[%s2401_s0 + $0x88] sm:$0xff]  }
  0x31   :  { %v1634_v43 = vunpack.c.l.bf16 %v1367_v35  ;;  %v1642_v51 = vunpack.c.h.bf16 %v1367_v35 }
  0x32   :  { %v162_v47 = vadd.f32 %v1569_v34, %v161_v42  ;;  %v294_v42 = vadd.f32 %v293_v33, %v231_v25  ;;  %v239_v33 = vmul.f32 %v1608_v10, %v1608_v10 }
  0x34   :  { %v163_v53 = vadd.f32 %v1577_v41, %v162_v47  ;;  %v234_v47 = vmul.f32 %v1577_v41, %v1577_v41  ;;  %v295_v48 = vadd.f32 %v294_v42, %v232_v32  ;;  %v240_v42 = vmul.f32 %v1616_v20, %v1616_v20 }
  0x36   :  { %v164_v59 = vadd.f32 %v1582_v46, %v163_v53  ;;  %v296_v56 = vadd.f32 %v295_v48, %v233_v39  ;;  %v1681_v48 = vunpack.c.h.bf16 %v1370_v26 }
  0x38   :  { %v165_v1 = vadd.f32 %v1590_v52, %v164_v59  ;;  %v1647_v59 = vunpack.c.l.bf16 %v1368_v50  ;;  %v297_v62 = vadd.f32 %v296_v56, %v234_v47  ;;  %v1371_v47 = vld [vmem:[%s2401_s0 + $0xa8] sm:$0xff]   ;;  %2454 = vst [vmem:[#allocation5_spill] sm:$0xff] %v1681_v48 }
  0x39   :  { %v1686_v56 = vunpack.c.l.bf16 %v1371_v47 }
  0x3a   :  { %v166_v12 = vadd.f32 %v1595_v57, %v165_v1  ;;  %v1369_v1 = vld [vmem:[%s2401_s0 + $0x98] sm:$0xff]   ;;  %v298_v14 = vadd.f32 %v297_v62, %v235_v55 }
  0x3b   :  { %v1660_v17 = vunpack.c.l.bf16 %v1369_v1  ;;  %2455 = vst [vmem:[#allocation6_spill] sm:$0xff] %v1686_v56 }
  0x3c   :  { %v167_v24 = vadd.f32 %v1603_v0, %v166_v12  ;;  %v237_v12 = vmul.f32 %v1595_v57, %v1595_v57  ;;  %v299_v25 = vadd.f32 %v298_v14, %v236_v61  ;;  %v242_v61 = vmul.f32 %v1629_v37, %v1629_v37 }
  0x3d   :  { %2451 = vst [vmem:[#allocation2_spill] sm:$0xff] %v1660_v17  ;;  %v243_v14 = vmul.f32 %v1634_v43, %v1634_v43 }
  0x3e   :  { %v168_v30 = vadd.f32 %v1608_v10, %v167_v24  ;;  %v238_v24 = vmul.f32 %v1603_v0, %v1603_v0  ;;  %v300_v35 = vadd.f32 %v299_v25, %v237_v12 }
  0x40   :  { %v169_v38 = vadd.f32 %v1616_v20, %v168_v30  ;;  %v1668_v30 = vunpack.c.h.bf16 %v1369_v1  ;;  %v1372_v1 = vld [vmem:[%s2401_s0 + $0xb0] sm:$0xff]  }
  0x42   :  { %v170_v44 = vadd.f32 %v1621_v27, %v169_v38  ;;  %2452 = vst [vmem:[#allocation3_spill] sm:$0xff] %v1668_v30  ;;  %v1673_v38 = vunpack.c.l.bf16 %v1370_v26  ;;  %v244_v26 = vmul.f32 %v1642_v51, %v1642_v51 }
  0x44   :  { %v171_v53 = vadd.f32 %v1629_v37, %v170_v44  ;;  %2453 = vst [vmem:[#allocation4_spill] sm:$0xff] %v1673_v38  ;;  %v301_v44 = vadd.f32 %v300_v35, %v238_v24  ;;  %v1699_v24 = vunpack.c.l.bf16 %v1372_v1  ;;  %v1707_v35 = vunpack.c.h.bf16 %v1372_v1 }
  0x45   :  { %v247_v1 = vmul.f32 %v1660_v17, %v1660_v17 }
  0x46   :  { %v172_v60 = vadd.f32 %v1634_v43, %v171_v53  ;;  %v241_v53 = vmul.f32 %v1621_v27, %v1621_v27  ;;  %v302_v55 = vadd.f32 %v301_v44, %v239_v33  ;;  %2457 = vst [vmem:[#allocation8_spill] sm:$0xff] %v1699_v24  ;;  %v1373_v33 = vld [vmem:[%s2401_s0 + $0xb8] sm:$0xff]   ;;  %2458 = vst [vmem:[#allocation9_spill] sm:$0xff] %v1707_v35 }
  0x48   :  { %v173_v9 = vadd.f32 %v1642_v51, %v172_v60  ;;  %v303_v62 = vadd.f32 %v302_v55, %v240_v42  ;;  %v245_v42 = vmul.f32 %v1647_v59, %v1647_v59 }
  0x4a   :  { %v174_v19 = vadd.f32 %v1647_v59, %v173_v9  ;;  %v1694_v9 = vunpack.c.h.bf16 %v1371_v47  ;;  %v1712_v47 = vunpack.c.l.bf16 %v1373_v33 }
  0x4c   :  { %v175_v32 = vadd.f32 %v1655_v5, %v174_v19  ;;  %2456 = vst [vmem:[#allocation7_spill] sm:$0xff] %v1694_v9  ;;  %v304_v19 = vadd.f32 %v303_v62, %v241_v53  ;;  %2459 = vst [vmem:[#allocation10_spill] sm:$0xff] %v1712_v47  ;;  %v246_v53 = vmul.f32 %v1655_v5, %v1655_v5 }
  0x4e   :  { %v176_v39 = vadd.f32 %v1660_v17, %v175_v32  ;;  %v305_v32 = vadd.f32 %v304_v19, %v242_v61  ;;  %v1720_v61 = vunpack.c.h.bf16 %v1373_v33 }
  0x50   :  { %v177_v50 = vadd.f32 %v1668_v30, %v176_v39  ;;  %v306_v44 = vadd.f32 %v305_v32, %v243_v14  ;;  %2460 = vst [vmem:[#allocation11_spill] sm:$0xff] %v1720_v61  ;;  %v1375_v32 = vld [vmem:[%s2401_s0 + $0xc8] sm:$0xff]  }
  0x52   :  { %v178_v60 = vadd.f32 %v1673_v38, %v177_v50  ;;  %v307_v55 = vadd.f32 %v306_v44, %v244_v26  ;;  %v249_v44 = vmul.f32 %v1673_v38, %v1673_v38  ;;  %v251_v38 = vmul.f32 %v1686_v56, %v1686_v56 }
  0x54   :  { %v179_v12 = vadd.f32 %v1681_v48, %v178_v60  ;;  %v1374_v60 = vld [vmem:[%s2401_s0 + $0xc0] sm:$0xff]  }
  0x55   :  { %v1725_v14 = vunpack.c.l.bf16 %v1374_v60  ;;  %v1733_v33 = vunpack.c.h.bf16 %v1374_v60  ;;  %v1746_v60 = vunpack.c.h.bf16 %v1375_v32 }
  0x56   :  { %v180_v25 = vadd.f32 %v1686_v56, %v179_v12  ;;  %v308_v12 = vadd.f32 %v307_v55, %v245_v42  ;;  %v253_v56 = vmul.f32 %v1699_v24, %v1699_v24 }
  0x57   :  { %2461 = vst [vmem:[#allocation12_spill] sm:$0xff] %v1725_v14  ;;  %2462 = vst [vmem:[#allocation13_spill] sm:$0xff] %v1733_v33 }
  0x58   :  { %v181_v39 = vadd.f32 %v1694_v9, %v180_v25  ;;  %v248_v25 = vmul.f32 %v1668_v30, %v1668_v30  ;;  %v309_v26 = vadd.f32 %v308_v12, %v246_v53  ;;  %v1376_v12 = vld [vmem:[%s2401_s0 + $0xd0] sm:$0xff]   ;;  %2464 = vst [vmem:[#allocation15_spill] sm:$0xff] %v1746_v60 }
  0x5a   :  { %v182_v50 = vadd.f32 %v1699_v24, %v181_v39  ;;  %v310_v42 = vadd.f32 %v309_v26, %v247_v1  ;;  %v1751_v26 = vunpack.c.l.bf16 %v1376_v12  ;;  %v255_v24 = vmul.f32 %v1712_v47, %v1712_v47 }
  0x5c   :  { %v183_v62 = vadd.f32 %v1707_v35, %v182_v50  ;;  %v1738_v50 = vunpack.c.l.bf16 %v1375_v32  ;;  %v311_v53 = vadd.f32 %v310_v42, %v248_v25  ;;  %2465 = vst [vmem:[#allocation16_spill] sm:$0xff] %v1751_v26  ;;  %v1377_v42 = vld [vmem:[%s2401_s0 + $0xd8] sm:$0xff]   ;;  %v1759_v32 = vunpack.c.h.bf16 %v1376_v12 }
  0x5d   :  { %v1772_v12 = vunpack.c.h.bf16 %v1377_v42 }
  0x5e   :  { %v184_v19 = vadd.f32 %v1712_v47, %v183_v62  ;;  %2463 = vst [vmem:[#allocation14_spill] sm:$0xff] %v1738_v50  ;;  %v250_v62 = vmul.f32 %v1681_v48, %v1681_v48  ;;  %v312_v1 = vadd.f32 %v311_v53, %v249_v44  ;;  %v252_v48 = vmul.f32 %v1694_v9, %v1694_v9 }
  0x5f   :  { %2466 = vst [vmem:[#allocation17_spill] sm:$0xff] %v1759_v32  ;;  %v1764_v53 = vunpack.c.l.bf16 %v1377_v42  ;;  %v254_v9 = vmul.f32 %v1707_v35, %v1707_v35  ;;  %2468 = vst [vmem:[#allocation19_spill] sm:$0xff] %v1772_v12  ;;  %v256_v35 = vmul.f32 %v1720_v61, %v1720_v61  ;;  %v257_v47 = vmul.f32 %v1725_v14, %v1725_v14 }
  0x60   :  { %v185_v39 = vadd.f32 %v1720_v61, %v184_v19  ;;  %v313_v25 = vadd.f32 %v312_v1, %v250_v62  ;;  %v1378_v1 = vld [vmem:[%s2401_s0 + $0xe0] sm:$0xff]   ;;  %v258_v61 = vmul.f32 %v1733_v33, %v1733_v33 }
  0x61   :  { %2467 = vst [vmem:[#allocation18_spill] sm:$0xff] %v1764_v53  ;;  %v1785_v42 = vunpack.c.h.bf16 %v1378_v1 }
  0x62   :  { %v186_v55 = vadd.f32 %v1725_v14, %v185_v39  ;;  %v314_v44 = vadd.f32 %v313_v25, %v251_v38  ;;  %v1777_v25 = vunpack.c.l.bf16 %v1378_v1  ;;  %v259_v14 = vmul.f32 %v1738_v50, %v1738_v50 }
  0x63   :  { %2470 = vst [vmem:[#allocation21_spill] sm:$0xff] %v1785_v42 }
  0x64   :  { %v187_v19 = vadd.f32 %v1733_v33, %v186_v55  ;;  %v315_v62 = vadd.f32 %v314_v44, %v252_v48  ;;  %2469 = vst [vmem:[#allocation20_spill] sm:$0xff] %v1777_v25  ;;  %v1379_v44 = vld [vmem:[%s2401_s0 + $0xe8] sm:$0xff]   ;;  %v260_v33 = vmul.f32 %v1746_v60, %v1746_v60 }
  0x65   :  { %v1798_v1 = vunpack.c.h.bf16 %v1379_v44 }
  0x66   :  { %v188_v39 = vadd.f32 %v1738_v50, %v187_v19  ;;  %v316_v38 = vadd.f32 %v315_v62, %v253_v56  ;;  %v1790_v62 = vunpack.c.l.bf16 %v1379_v44  ;;  %v261_v50 = vmul.f32 %v1751_v26, %v1751_v26 }
  0x67   :  { %2472 = vst [vmem:[#allocation23_spill] sm:$0xff] %v1798_v1 }
  0x68   :  { %v189_v55 = vadd.f32 %v1746_v60, %v188_v39  ;;  %v317_v48 = vadd.f32 %v316_v38, %v254_v9  ;;  %2471 = vst [vmem:[#allocation22_spill] sm:$0xff] %v1790_v62  ;;  %v1380_v38 = vld [vmem:[%s2401_s0 + $0xf0] sm:$0xff]   ;;  %v262_v60 = vmul.f32 %v1759_v32, %v1759_v32 }
  0x69   :  { %v1811_v44 = vunpack.c.h.bf16 %v1380_v38 }
  0x6a   :  { %v190_v19 = vadd.f32 %v1751_v26, %v189_v55  ;;  %v318_v56 = vadd.f32 %v317_v48, %v255_v24  ;;  %v1803_v48 = vunpack.c.l.bf16 %v1380_v38  ;;  %v263_v38 = vmul.f32 %v1764_v53, %v1764_v53 }
  0x6b   :  { %2474 = vst [vmem:[#allocation25_spill] sm:$0xff] %v1811_v44 }
  0x6c   :  { %v191_v39 = vadd.f32 %v1759_v32, %v190_v19  ;;  %v319_v9 = vadd.f32 %v318_v56, %v256_v35  ;;  %2473 = vst [vmem:[#allocation24_spill] sm:$0xff] %v1803_v48  ;;  %v1381_v56 = vld [vmem:[%s2401_s0 + $0xf8] sm:$0xff]   ;;  %v265_v32 = vmul.f32 %v1777_v25, %v1777_v25 }
  0x6e   :  { %v192_v55 = vadd.f32 %v1764_v53, %v191_v39  ;;  %v320_v24 = vadd.f32 %v319_v9, %v257_v47  ;;  %v1816_v9 = vunpack.c.l.bf16 %v1381_v56 }
  0x70   :  { %v193_v19 = vadd.f32 %v1772_v12, %v192_v55  ;;  %v321_v35 = vadd.f32 %v320_v24, %v258_v61  ;;  %2475 = vst [vmem:[#allocation26_spill] sm:$0xff] %v1816_v9  ;;  %v1821_v24 = vunpack.c.h.bf16 %v1381_v56 }
  0x72   :  { %v194_v39 = vadd.f32 %v1777_v25, %v193_v19  ;;  %v322_v47 = vadd.f32 %v321_v35, %v259_v14  ;;  %2476 = vst [vmem:[#allocation27_spill] sm:$0xff] %v1821_v24  ;;  %v264_v14 = vmul.f32 %v1772_v12, %v1772_v12  ;;  %v268_v12 = vmul.f32 %v1798_v1, %v1798_v1 }
  0x74   :  { %v195_v55 = vadd.f32 %v1785_v42, %v194_v39  ;;  %v323_v61 = vadd.f32 %v322_v47, %v260_v33  ;;  %v266_v47 = vmul.f32 %v1785_v42, %v1785_v42 }
  0x76   :  { %v196_v19 = vadd.f32 %v1790_v62, %v195_v55 }
  0x78   :  { %v197_v39 = vadd.f32 %v1798_v1, %v196_v19  ;;  %v324_v19 = vadd.f32 %v323_v61, %v261_v50  ;;  %v267_v50 = vmul.f32 %v1790_v62, %v1790_v62 }
  0x7a   :  { %v198_v55 = vadd.f32 %v1803_v48, %v197_v39  ;;  %v325_v35 = vadd.f32 %v324_v19, %v262_v60 }
  0x7c   :  { %v199_v30 = vadd.f32 %v1811_v44, %v198_v55  ;;  %v326_v33 = vadd.f32 %v325_v35, %v263_v38  ;;  %v270_v38 = vmul.f32 %v1811_v44, %v1811_v44 }
  0x7e   :  { %v200_v17 = vadd.f32 %v1816_v9, %v199_v30  ;;  %v327_v55 = vadd.f32 %v326_v33, %v264_v14  ;;  %v271_v14 = vmul.f32 %v1816_v9, %v1816_v9 }
  0x80   :  { %v201_v39 = vadd.f32 %v1821_v24, %v200_v17  ;;  %v328_v61 = vadd.f32 %v327_v55, %v265_v32  ;;  %v269_v17 = vmul.f32 %v1803_v48, %v1803_v48  ;;  %v272_v32 = vmul.f32 %v1821_v24, %v1821_v24 }
  0x82   :  { %v202_v56 = vrot.slane %v201_v39, 4  ;;  %v329_v60 = vadd.f32 %v328_v61, %v266_v47 }
  0x84   :  { %v203_v30 = vadd.f32 %v202_v56, %v201_v39  ;;  %v330_v19 = vadd.f32 %v329_v60, %v267_v50 }
  0x86   :  { %v204_v25 = vrot.slane %v203_v30, 2  ;;  %v331_v35 = vadd.f32 %v330_v19, %v268_v12 }
  0x88   :  { %v332_v33 = vadd.f32 %v331_v35, %v269_v17  ;;  %v205_v62 = vadd.f32 %v204_v25, %v203_v30 }
  0x8a   :  { %v333_v39 = vadd.f32 %v332_v33, %v270_v38  ;;  %v206_v47 = vrot.slane %v205_v62, 1 }
  0x8c   :  { %v334_v56 = vadd.f32 %v333_v39, %v271_v14  ;;  %v207_v48 = vadd.f32 %v206_v47, %v205_v62 }
  0x8e   :  { %v335_v55 = vadd.f32 %v334_v56, %v272_v32  ;;  %v1846_v1 = vmul.f32 0.001953125, %v207_v48  ;;  %v1975_v48 = vld [vmem:[%s2402_s1] ss:$0 sm:$0xff] }
  0x90   :  { %v336_v61 = vrot.slane %v335_v55, 4  ;;  %v343_v17 = vmul.f32 %v1846_v1, %v1846_v1  ;;  %v2498_v26 = vsub.f32 %v1436_v2, %v1846_v1  ;;  %v2501_v38 = vsub.f32 %v1445_v6, %v1846_v1 }
  0x91   :  { %v2502_v2 = vsub.f32 %v1449_v8, %v1846_v1  ;;  %v2505_v6 = vsub.f32 %v1464_v16, %v1846_v1 }
  0x92   :  { %v337_v50 = vadd.f32 %v336_v61, %v335_v55  ;;  %v2486_v55 = vld [vmem:[#allocation11_spill] sm:$0xff]  ;;  %v2500_v61 = vsub.f32 %v1440_v4, %v1846_v1  ;;  %v2504_v4 = vsub.f32 %v1458_v13, %v1846_v1 }
  0x94   :  { %v338_v60 = vrot.slane %v337_v50, 2 }
  0x96   :  { %v339_v44 = vadd.f32 %v338_v60, %v337_v50  ;;  %v2480_v60 = vld [vmem:[#allocation5_spill] sm:$0xff] }
  0x97   :  { %v2484_v50 = vld [vmem:[#allocation9_spill] sm:$0xff] }
  0x98   :  { %v340_v12 = vrot.slane %v339_v44, 1 }
  0x9a   :  { %v341_v19 = vadd.f32 %v340_v12, %v339_v44  ;;  %v2481_v12 = vld [vmem:[#allocation6_spill] sm:$0xff] }
  0x9c   :  { %v342_v25 = vmul.f32 0.001953125, %v341_v19  ;;  %v2482_v19 = vld [vmem:[#allocation7_spill] sm:$0xff] }
  0x9e   :  { %v344_v30 = vsub.f32 %v342_v25, %v343_v17  ;;  %v2477_v25 = vld [vmem:[#allocation2_spill] sm:$0xff]  ;;  %v2499_v17 = vsub.f32 %v1438_v3, %v1846_v1  ;;  %v2503_v3 = vsub.f32 %v1455_v11, %v1846_v1 }
  0xa0   :  { %v409_v14 = vadd.f32 1e-05, %v344_v30  ;;  %v2478_v30 = vld [vmem:[#allocation3_spill] sm:$0xff] }
  0xa2   :  { %1413 = vrsqrt.f32 %v409_v14  ;;  %v2479_v14 = vld [vmem:[#allocation4_spill] sm:$0xff] }
  0xaf   :  { %v1970_v39 = vpop.eup %1413 }
  0xb0   :  { %v411_v33 = vmul.f32 %v1970_v39, %v2498_v26  ;;  %v412_v42 = vmul.f32 %v1970_v39, %v2499_v17  ;;  %v413_v35 = vmul.f32 %v1970_v39, %v2500_v61  ;;  %v414_v32 = vmul.f32 %v1970_v39, %v2501_v38 }
  0xb1   :  { %v415_v26 = vmul.f32 %v1970_v39, %v2502_v2  ;;  %v416_v17 = vmul.f32 %v1970_v39, %v2503_v3  ;;  %v417_v61 = vmul.f32 %v1970_v39, %v2504_v4  ;;  %v418_v38 = vmul.f32 %v1970_v39, %v2505_v6 }
  0xb2   :  { %v482_v24 = vmul.f32 %v1975_v48, %v411_v33  ;;  %v483_v8 = vmul.f32 %v1975_v48, %v412_v42  ;;  %v484_v2 = vmul.f32 %v1975_v48, %v413_v35  ;;  %v485_v11 = vmul.f32 %v1975_v48, %v414_v32 }
  0xb3   :  { %v486_v3 = vmul.f32 %v1975_v48, %v415_v26  ;;  %v487_v9 = vmul.f32 %v1975_v48, %v416_v17  ;;  %v488_v13 = vmul.f32 %v1975_v48, %v417_v61  ;;  %v489_v4 = vmul.f32 %v1975_v48, %v418_v38 }
  0xb4   :  { %v546_v56 = vmax.f32 %v482_v24, 0.0  ;;  %v547_v16 = vmax.f32 %v483_v8, 0.0  ;;  %v548_v47 = vmax.f32 %v484_v2, 0.0  ;;  %v549_v6 = vmax.f32 %v485_v11, 0.0 }
  0xb5   :  { %v550_v62 = vmax.f32 %v486_v3, 0.0  ;;  %v551_v33 = vmax.f32 %v487_v9, 0.0  ;;  %v552_v53 = vmax.f32 %v488_v13, 0.0  ;;  %v553_v42 = vmax.f32 %v489_v4, 0.0 }
  0xb6   :  { %v1194_v44 = vpack.c.bf16 %v547_v16, %v546_v56  ;;  %v1199_v35 = vpack.c.bf16 %v549_v6, %v548_v47  ;;  %v2506_v32 = vsub.f32 %v1467_v18, %v1846_v1  ;;  %v2507_v17 = vsub.f32 %v1473_v21, %v1846_v1 }
  0xb7   :  { %v1204_v24 = vpack.c.bf16 %v551_v33, %v550_v62  ;;  %v1209_v38 = vpack.c.bf16 %v553_v42, %v552_v53  ;;  %v2508_v8 = vsub.f32 %v1476_v23, %v1846_v1  ;;  %v2509_v56 = vsub.f32 %v1486_v28, %v1846_v1 }
  0xb8   :  { %v419_v26 = vmul.f32 %v1970_v39, %v2506_v32  ;;  %v420_v61 = vmul.f32 %v1970_v39, %v2507_v17  ;;  %1195 = vst [vmem:[%s2403_s2] sm:$0xff] %v1194_v44   ;;  %1382 = vst [vmem:[%s2403_s2 + $0x8] sm:$0xff] %v1199_v35   ;;  %v2510_v23 = vsub.f32 %v1491_v31, %v1846_v1 }
  0xb9   :  { %v421_v9 = vmul.f32 %v1970_v39, %v2508_v8  ;;  %v422_v47 = vmul.f32 %v1970_v39, %v2509_v56  ;;  %v2511_v28 = vsub.f32 %v1499_v36, %v1846_v1  ;;  %1383 = vst [vmem:[%s2403_s2 + $0x10] sm:$0xff] %v1204_v24   ;;  %1384 = vst [vmem:[%s2403_s2 + $0x18] sm:$0xff] %v1209_v38  }
  0xba   :  { %v490_v18 = vmul.f32 %v1975_v48, %v419_v26  ;;  %v491_v21 = vmul.f32 %v1975_v48, %v420_v61  ;;  %v423_v53 = vmul.f32 %v1970_v39, %v2510_v23  ;;  %v2512_v31 = vsub.f32 %v1504_v40, %v1846_v1 }
  0xbb   :  { %v424_v62 = vmul.f32 %v1970_v39, %v2511_v28  ;;  %v492_v44 = vmul.f32 %v1975_v48, %v421_v9  ;;  %v493_v2 = vmul.f32 %v1975_v48, %v422_v47  ;;  %v2513_v36 = vsub.f32 %v1512_v45, %v1846_v1 }
  0xbc   :  { %v425_v11 = vmul.f32 %v1970_v39, %v2512_v31  ;;  %v554_v13 = vmax.f32 %v490_v18, 0.0  ;;  %v555_v4 = vmax.f32 %v491_v21, 0.0  ;;  %v494_v16 = vmul.f32 %v1975_v48, %v423_v53 }
  0xbd   :  { %v426_v3 = vmul.f32 %v1970_v39, %v2513_v36  ;;  %v495_v6 = vmul.f32 %v1975_v48, %v424_v62  ;;  %v556_v33 = vmax.f32 %v492_v44, 0.0  ;;  %v557_v42 = vmax.f32 %v493_v2, 0.0 }
  0xbe   :  { %v496_v35 = vmul.f32 %v1975_v48, %v425_v11  ;;  %v1214_v40 = vpack.c.bf16 %v555_v4, %v554_v13  ;;  %v558_v26 = vmax.f32 %v494_v16, 0.0  ;;  %v2514_v45 = vsub.f32 %v1517_v49, %v1846_v1 }
  0xbf   :  { %v497_v32 = vmul.f32 %v1975_v48, %v426_v3  ;;  %v559_v17 = vmax.f32 %v495_v6, 0.0  ;;  %v1219_v24 = vpack.c.bf16 %v557_v42, %v556_v33  ;;  %v2515_v9 = vsub.f32 %v1525_v54, %v1846_v1 }
  0xc0   :  { %v427_v61 = vmul.f32 %v1970_v39, %v2514_v45  ;;  %v560_v38 = vmax.f32 %v496_v35, 0.0  ;;  %1385 = vst [vmem:[%s2403_s2 + $0x20] sm:$0xff] %v1214_v40   ;;  %v2516_v49 = vsub.f32 %v1530_v58, %v1846_v1  ;;  %v2517_v23 = vsub.f32 %v1538_v63, %v1846_v1 }
  0xc1   :  { %v561_v8 = vmax.f32 %v497_v32, 0.0  ;;  %v428_v56 = vmul.f32 %v1970_v39, %v2515_v9  ;;  %v1224_v47 = vpack.c.bf16 %v559_v17, %v558_v26  ;;  %1386 = vst [vmem:[%s2403_s2 + $0x28] sm:$0xff] %v1219_v24   ;;  %v2518_v62 = vsub.f32 %v1543_v7, %v1846_v1 }
  0xc2   :  { %v498_v18 = vmul.f32 %v1975_v48, %v427_v61  ;;  %v429_v21 = vmul.f32 %v1970_v39, %v2516_v49  ;;  %v430_v53 = vmul.f32 %v1970_v39, %v2517_v23  ;;  %v2519_v58 = vsub.f32 %v1551_v15, %v1846_v1 }
  0xc3   :  { %v1229_v54 = vpack.c.bf16 %v561_v8, %v560_v38  ;;  %v499_v28 = vmul.f32 %v1975_v48, %v428_v56  ;;  %v431_v44 = vmul.f32 %v1970_v39, %v2518_v62  ;;  %1387 = vst [vmem:[%s2403_s2 + $0x30] sm:$0xff] %v1224_v47   ;;  %v2520_v36 = vsub.f32 %v1556_v22, %v1846_v1 }
  0xc4   :  { %v432_v2 = vmul.f32 %v1970_v39, %v2519_v58  ;;  %v562_v63 = vmax.f32 %v498_v18, 0.0  ;;  %v500_v31 = vmul.f32 %v1975_v48, %v429_v21  ;;  %v501_v11 = vmul.f32 %v1975_v48, %v430_v53 }
  0xc5   :  { %v433_v7 = vmul.f32 %v1970_v39, %v2520_v36  ;;  %1388 = vst [vmem:[%s2403_s2 + $0x38] sm:$0xff] %v1229_v54   ;;  %v563_v15 = vmax.f32 %v499_v28, 0.0  ;;  %v502_v3 = vmul.f32 %v1975_v48, %v431_v44  ;;  %v2521_v4 = vsub.f32 %v1564_v29, %v1846_v1 }
  0xc6   :  { %v503_v13 = vmul.f32 %v1975_v48, %v432_v2  ;;  %v564_v6 = vmax.f32 %v500_v31, 0.0  ;;  %v565_v33 = vmax.f32 %v501_v11, 0.0  ;;  %v2522_v42 = vsub.f32 %v1569_v34, %v1846_v1 }
  0xc7   :  { %v434_v16 = vmul.f32 %v1970_v39, %v2521_v4  ;;  %v504_v22 = vmul.f32 %v1975_v48, %v433_v7  ;;  %v1234_v32 = vpack.c.bf16 %v563_v15, %v562_v63  ;;  %v566_v40 = vmax.f32 %v502_v3, 0.0 }
  0xc8   :  { %v435_v35 = vmul.f32 %v1970_v39, %v2522_v42  ;;  %v567_v26 = vmax.f32 %v503_v13, 0.0  ;;  %v1239_v45 = vpack.c.bf16 %v565_v33, %v564_v6  ;;  %v2523_v29 = vsub.f32 %v1577_v41, %v1846_v1 }
  0xc9   :  { %v505_v17 = vmul.f32 %v1975_v48, %v434_v16  ;;  %v568_v61 = vmax.f32 %v504_v22, 0.0  ;;  %1389 = vst [vmem:[%s2403_s2 + $0x40] sm:$0xff] %v1234_v32   ;;  %v2524_v9 = vsub.f32 %v1582_v46, %v1846_v1  ;;  %v2525_v47 = vsub.f32 %v1590_v52, %v1846_v1 }
  0xca   :  { %v436_v24 = vmul.f32 %v1970_v39, %v2523_v29  ;;  %v506_v38 = vmul.f32 %v1975_v48, %v435_v35  ;;  %v1244_v34 = vpack.c.bf16 %v567_v26, %v566_v40  ;;  %1390 = vst [vmem:[%s2403_s2 + $0x48] sm:$0xff] %v1239_v45   ;;  %v2526_v21 = vsub.f32 %v1595_v57, %v1846_v1 }
  0xcb   :  { %v569_v8 = vmax.f32 %v505_v17, 0.0  ;;  %v437_v56 = vmul.f32 %v1970_v39, %v2524_v9  ;;  %v438_v41 = vmul.f32 %v1970_v39, %v2525_v47  ;;  %v2527_v46 = vsub.f32 %v1603_v0, %v1846_v1 }
  0xcc   :  { %v507_v18 = vmul.f32 %v1975_v48, %v436_v24  ;;  %v570_v49 = vmax.f32 %v506_v38, 0.0  ;;  %v439_v23 = vmul.f32 %v1970_v39, %v2526_v21  ;;  %1391 = vst [vmem:[%s2403_s2 + $0x50] sm:$0xff] %v1244_v34   ;;  %v2528_v62 = vsub.f32 %v1608_v10, %v1846_v1 }
  0xcd   :  { %v440_v53 = vmul.f32 %v1970_v39, %v2527_v46  ;;  %v1249_v52 = vpack.c.bf16 %v569_v8, %v568_v61  ;;  %v508_v54 = vmul.f32 %v1975_v48, %v437_v56  ;;  %v509_v28 = vmul.f32 %v1975_v48, %v438_v41 }
  0xce   :  { %v441_v57 = vmul.f32 %v1970_v39, %v2528_v62  ;;  %v571_v44 = vmax.f32 %v507_v18, 0.0  ;;  %v510_v58 = vmul.f32 %v1975_v48, %v439_v23  ;;  %v2529_v2 = vsub.f32 %v1616_v20, %v1846_v1 }
  0xcf   :  { %v511_v0 = vmul.f32 %v1975_v48, %v440_v53  ;;  %1392 = vst [vmem:[%s2403_s2 + $0x58] sm:$0xff] %v1249_v52   ;;  %v572_v31 = vmax.f32 %v508_v54, 0.0  ;;  %v573_v11 = vmax.f32 %v509_v28, 0.0  ;;  %v2530_v36 = vsub.f32 %v1621_v27, %v1846_v1 }
  0xd0   :  { %v442_v63 = vmul.f32 %v1970_v39, %v2529_v2  ;;  %v512_v10 = vmul.f32 %v1975_v48, %v441_v57  ;;  %v1254_v15 = vpack.c.bf16 %v571_v44, %v570_v49  ;;  %v574_v3 = vmax.f32 %v510_v58, 0.0 }
  0xd1   :  { %v443_v7 = vmul.f32 %v1970_v39, %v2530_v36  ;;  %v575_v13 = vmax.f32 %v511_v0, 0.0  ;;  %v1259_v4 = vpack.c.bf16 %v573_v11, %v572_v31  ;;  %v2531_v6 = vsub.f32 %v1629_v37, %v1846_v1  ;;  %v2542_v11 = vld [vmem:[#allocation8_spill] sm:$0xff] }
  0xd2   :  { %v513_v20 = vmul.f32 %v1975_v48, %v442_v63  ;;  %v576_v16 = vmax.f32 %v512_v10, 0.0  ;;  %1393 = vst [vmem:[%s2403_s2 + $0x60] sm:$0xff] %v1254_v15   ;;  %v2532_v35 = vsub.f32 %v1634_v43, %v1846_v1  ;;  %v2533_v40 = vsub.f32 %v1642_v51, %v1846_v1 }
  0xd3   :  { %v444_v33 = vmul.f32 %v1970_v39, %v2531_v6  ;;  %v514_v22 = vmul.f32 %v1975_v48, %v443_v7  ;;  %v1264_v27 = vpack.c.bf16 %v575_v13, %v574_v3  ;;  %1394 = vst [vmem:[%s2403_s2 + $0x68] sm:$0xff] %v1259_v4   ;;  %v2534_v45 = vsub.f32 %v1647_v59, %v1846_v1  ;;  %v2545_v13 = vld [vmem:[#allocation10_spill] sm:$0xff] }
  0xd4   :  { %v577_v42 = vmax.f32 %v513_v20, 0.0  ;;  %v445_v32 = vmul.f32 %v1970_v39, %v2532_v35  ;;  %v446_v37 = vmul.f32 %v1970_v39, %v2533_v40  ;;  %v2535_v43 = vsub.f32 %v1655_v5, %v1846_v1 }
  0xd5   :  { %v515_v26 = vmul.f32 %v1975_v48, %v444_v33  ;;  %v578_v17 = vmax.f32 %v514_v22, 0.0  ;;  %v447_v61 = vmul.f32 %v1970_v39, %v2534_v45  ;;  %1395 = vst [vmem:[%s2403_s2 + $0x70] sm:$0xff] %v1264_v27   ;;  %v2536_v34 = vsub.f32 %v2477_v25, %v1846_v1 }
  0xd6   :  { %v448_v29 = vmul.f32 %v1970_v39, %v2535_v43  ;;  %v1269_v51 = vpack.c.bf16 %v577_v42, %v576_v16  ;;  %v516_v24 = vmul.f32 %v1975_v48, %v445_v32  ;;  %v517_v38 = vmul.f32 %v1975_v48, %v446_v37  ;;  %v2548_v32 = vld [vmem:[#allocation12_spill] sm:$0xff] }
  0xd7   :  { %v449_v59 = vmul.f32 %v1970_v39, %v2536_v34  ;;  %v579_v8 = vmax.f32 %v515_v26, 0.0  ;;  %v518_v9 = vmul.f32 %v1975_v48, %v447_v61  ;;  %v2537_v56 = vsub.f32 %v2478_v30, %v1846_v1 }
  0xd8   :  { %v519_v5 = vmul.f32 %v1975_v48, %v448_v29  ;;  %1396 = vst [vmem:[%s2403_s2 + $0x78] sm:$0xff] %v1269_v51   ;;  %v580_v41 = vmax.f32 %v516_v24, 0.0  ;;  %v581_v18 = vmax.f32 %v517_v38, 0.0  ;;  %v2538_v49 = vsub.f32 %v2479_v14, %v1846_v1  ;;  %v2550_v29 = vld [vmem:[#allocation13_spill] sm:$0xff] }
  0xd9   :  { %v450_v47 = vmul.f32 %v1970_v39, %v2537_v56  ;;  %v520_v25 = vmul.f32 %v1975_v48, %v449_v59  ;;  %v1274_v23 = vpack.c.bf16 %v579_v8, %v578_v17  ;;  %v582_v46 = vmax.f32 %v518_v9, 0.0  ;;  %v2552_v8 = vld [vmem:[#allocation14_spill] sm:$0xff]  ;;  %v2554_v56 = vld [vmem:[#allocation15_spill] sm:$0xff] }
  0xda   :  { %v451_v21 = vmul.f32 %v1970_v39, %v2538_v49  ;;  %v583_v53 = vmax.f32 %v519_v5, 0.0  ;;  %v1279_v52 = vpack.c.bf16 %v581_v18, %v580_v41  ;;  %v2539_v28 = vsub.f32 %v2480_v60, %v1846_v1  ;;  %v2556_v49 = vld [vmem:[#allocation16_spill] sm:$0xff] }
  0xdb   :  { %v521_v30 = vmul.f32 %v1975_v48, %v450_v47  ;;  %v584_v54 = vmax.f32 %v520_v25, 0.0  ;;  %1397 = vst [vmem:[%s2403_s2 + $0x80] sm:$0xff] %v1274_v23   ;;  %v2540_v58 = vsub.f32 %v2481_v12, %v1846_v1  ;;  %v2541_v2 = vsub.f32 %v2482_v19, %v1846_v1 }
  0xdc   :  { %v452_v62 = vmul.f32 %v1970_v39, %v2539_v28  ;;  %v522_v57 = vmul.f32 %v1975_v48, %v451_v21  ;;  %v1284_v14 = vpack.c.bf16 %v583_v53, %v582_v46  ;;  %1398 = vst [vmem:[%s2403_s2 + $0x88] sm:$0xff] %v1279_v52   ;;  %v2543_v10 = vsub.f32 %v2542_v11, %v1846_v1  ;;  %v2558_v46 = vld [vmem:[#allocation17_spill] sm:$0xff] }
  0xdd   :  { %v585_v44 = vmax.f32 %v521_v30, 0.0  ;;  %v453_v0 = vmul.f32 %v1970_v39, %v2540_v58  ;;  %v454_v60 = vmul.f32 %v1970_v39, %v2541_v2  ;;  %v2544_v12 = vsub.f32 %v2484_v50, %v1846_v1  ;;  %v2562_v2 = vld [vmem:[#allocation19_spill] sm:$0xff] }
  0xde   :  { %v523_v63 = vmul.f32 %v1975_v48, %v452_v62  ;;  %v586_v31 = vmax.f32 %v522_v57, 0.0  ;;  %v455_v36 = vmul.f32 %v1970_v39, %v2543_v10  ;;  %1399 = vst [vmem:[%s2403_s2 + $0x90] sm:$0xff] %v1284_v14   ;;  %v2546_v20 = vsub.f32 %v2545_v13, %v1846_v1  ;;  %v2560_v62 = vld [vmem:[#allocation18_spill] sm:$0xff] }
  0xdf   :  { %v456_v7 = vmul.f32 %v1970_v39, %v2544_v12  ;;  %v1289_v19 = vpack.c.bf16 %v585_v44, %v584_v54  ;;  %v524_v15 = vmul.f32 %v1975_v48, %v453_v0  ;;  %v525_v3 = vmul.f32 %v1975_v48, %v454_v60 }
  0xe0   :  { %v457_v4 = vmul.f32 %v1970_v39, %v2546_v20  ;;  %v587_v16 = vmax.f32 %v523_v63, 0.0  ;;  %v526_v6 = vmul.f32 %v1975_v48, %v455_v36  ;;  %v2547_v33 = vsub.f32 %v2486_v55, %v1846_v1  ;;  %v2564_v36 = vld [vmem:[#allocation20_spill] sm:$0xff] }
  0xe1   :  { %v527_v50 = vmul.f32 %v1975_v48, %v456_v7  ;;  %1400 = vst [vmem:[%s2403_s2 + $0x98] sm:$0xff] %v1289_v19   ;;  %v588_v27 = vmax.f32 %v524_v15, 0.0  ;;  %v589_v42 = vmax.f32 %v525_v3, 0.0  ;;  %v2549_v40 = vsub.f32 %v2548_v32, %v1846_v1 }
  0xe2   :  { %v458_v22 = vmul.f32 %v1970_v39, %v2547_v33  ;;  %v528_v35 = vmul.f32 %v1975_v48, %v457_v4  ;;  %v1294_v26 = vpack.c.bf16 %v587_v16, %v586_v31  ;;  %v590_v17 = vmax.f32 %v526_v6, 0.0  ;;  %v2566_v16 = vld [vmem:[#allocation21_spill] sm:$0xff] }
  0xe3   :  { %v459_v37 = vmul.f32 %v1970_v39, %v2549_v40  ;;  %v591_v45 = vmax.f32 %v527_v50, 0.0  ;;  %v1299_v61 = vpack.c.bf16 %v589_v42, %v588_v27  ;;  %v2551_v51 = vsub.f32 %v2550_v29, %v1846_v1  ;;  %v2568_v42 = vld [vmem:[#allocation22_spill] sm:$0xff]  ;;  %v2570_v40 = vld [vmem:[#allocation23_spill] sm:$0xff]  ;;  %v2574_v29 = vld [vmem:[#allocation25_spill] sm:$0xff] }
  0xe4   :  { %v529_v55 = vmul.f32 %v1975_v48, %v458_v22  ;;  %v592_v43 = vmax.f32 %v528_v35, 0.0  ;;  %1401 = vst [vmem:[%s2403_s2 + $0xa0] sm:$0xff] %v1294_v26   ;;  %v2553_v9 = vsub.f32 %v2552_v8, %v1846_v1  ;;  %v2555_v47 = vsub.f32 %v2554_v56, %v1846_v1  ;;  %v2576_v8 = vld [vmem:[#allocation26_spill] sm:$0xff] }
  0xe5   :  { %v460_v24 = vmul.f32 %v1970_v39, %v2551_v51  ;;  %v530_v38 = vmul.f32 %v1975_v48, %v459_v37  ;;  %v1304_v34 = vpack.c.bf16 %v591_v45, %v590_v17  ;;  %1402 = vst [vmem:[%s2403_s2 + $0xa8] sm:$0xff] %v1299_v61   ;;  %v2557_v21 = vsub.f32 %v2556_v49, %v1846_v1 }
  0xe6   :  { %v593_v59 = vmax.f32 %v529_v55, 0.0  ;;  %v461_v5 = vmul.f32 %v1970_v39, %v2553_v9  ;;  %v462_v41 = vmul.f32 %v1970_v39, %v2555_v47  ;;  %v2559_v53 = vsub.f32 %v2558_v46, %v1846_v1  ;;  %v2572_v55 = vld [vmem:[#allocation24_spill] sm:$0xff] }
  0xe7   :  { %v531_v18 = vmul.f32 %v1975_v48, %v460_v24  ;;  %v594_v25 = vmax.f32 %v530_v38, 0.0  ;;  %v463_v23 = vmul.f32 %v1970_v39, %v2557_v21  ;;  %1403 = vst [vmem:[%s2403_s2 + $0xb0] sm:$0xff] %v1304_v34   ;;  %v2561_v57 = vsub.f32 %v2560_v62, %v1846_v1 }
  0xe8   :  { %v464_v30 = vmul.f32 %v1970_v39, %v2559_v53  ;;  %v1309_v52 = vpack.c.bf16 %v593_v59, %v592_v43  ;;  %v532_v54 = vmul.f32 %v1975_v48, %v461_v5  ;;  %v533_v28 = vmul.f32 %v1975_v48, %v462_v41 }
  0xe9   :  { %v465_v14 = vmul.f32 %v1970_v39, %v2561_v57  ;;  %v595_v44 = vmax.f32 %v531_v18, 0.0  ;;  %v534_v58 = vmul.f32 %v1975_v48, %v463_v23  ;;  %v2563_v60 = vsub.f32 %v2562_v2, %v1846_v1  ;;  %v2578_v18 = vld [vmem:[#allocation27_spill] sm:$0xff] }
  0xea   :  { %v535_v0 = vmul.f32 %v1975_v48, %v464_v30  ;;  %1404 = vst [vmem:[%s2403_s2 + $0xb8] sm:$0xff] %v1309_v52   ;;  %v596_v31 = vmax.f32 %v532_v54, 0.0  ;;  %v597_v11 = vmax.f32 %v533_v28, 0.0  ;;  %v2565_v12 = vsub.f32 %v2564_v36, %v1846_v1 }
  0xeb   :  { %v466_v63 = vmul.f32 %v1970_v39, %v2563_v60  ;;  %v536_v10 = vmul.f32 %v1975_v48, %v465_v14  ;;  %v1314_v19 = vpack.c.bf16 %v595_v44, %v594_v25  ;;  %v598_v15 = vmax.f32 %v534_v58, 0.0 }
  0xec   :  { %v467_v7 = vmul.f32 %v1970_v39, %v2565_v12  ;;  %v599_v3 = vmax.f32 %v535_v0, 0.0  ;;  %v1319_v20 = vpack.c.bf16 %v597_v11, %v596_v31  ;;  %v2567_v6 = vsub.f32 %v2566_v16, %v1846_v1 }
  0xed   :  { %v537_v13 = vmul.f32 %v1975_v48, %v466_v63  ;;  %v600_v4 = vmax.f32 %v536_v10, 0.0  ;;  %1405 = vst [vmem:[%s2403_s2 + $0xc0] sm:$0xff] %v1314_v19   ;;  %v2569_v35 = vsub.f32 %v2568_v42, %v1846_v1  ;;  %v2571_v37 = vsub.f32 %v2570_v40, %v1846_v1 }
  0xee   :  { %v468_v50 = vmul.f32 %v1970_v39, %v2567_v6  ;;  %v538_v33 = vmul.f32 %v1975_v48, %v467_v7  ;;  %v1324_v22 = vpack.c.bf16 %v599_v3, %v598_v15  ;;  %1406 = vst [vmem:[%s2403_s2 + $0xc8] sm:$0xff] %v1319_v20   ;;  %v2573_v61 = vsub.f32 %v2572_v55, %v1846_v1 }
  0xef   :  { %v601_v27 = vmax.f32 %v537_v13, 0.0  ;;  %v469_v32 = vmul.f32 %v1970_v39, %v2569_v35  ;;  %v470_v26 = vmul.f32 %v1970_v39, %v2571_v37  ;;  %v2575_v51 = vsub.f32 %v2574_v29, %v1846_v1 }
  0xf0   :  { %v539_v17 = vmul.f32 %v1975_v48, %v468_v50  ;;  %v602_v45 = vmax.f32 %v538_v33, 0.0  ;;  %v471_v43 = vmul.f32 %v1970_v39, %v2573_v61  ;;  %1407 = vst [vmem:[%s2403_s2 + $0xd0] sm:$0xff] %v1324_v22   ;;  %v2577_v9 = vsub.f32 %v2576_v8, %v1846_v1 }
  0xf1   :  { %v472_v24 = vmul.f32 %v1970_v39, %v2575_v51  ;;  %v1329_v38 = vpack.c.bf16 %v601_v27, %v600_v4  ;;  %v540_v34 = vmul.f32 %v1975_v48, %v469_v32  ;;  %v541_v59 = vmul.f32 %v1975_v48, %v470_v26 }
  0xf2   :  { %v473_v5 = vmul.f32 %v1970_v39, %v2577_v9  ;;  %v603_v56 = vmax.f32 %v539_v17, 0.0  ;;  %v542_v47 = vmul.f32 %v1975_v48, %v471_v43  ;;  %v2579_v25 = vsub.f32 %v2578_v18, %v1846_v1 }
  0xf3   :  { %v543_v41 = vmul.f32 %v1975_v48, %v472_v24  ;;  %1408 = vst [vmem:[%s2403_s2 + $0xd8] sm:$0xff] %v1329_v38   ;;  %v604_v21 = vmax.f32 %v540_v34, 0.0  ;;  %v605_v23 = vmax.f32 %v541_v59, 0.0 }
  0xf4   :  { %v474_v49 = vmul.f32 %v1970_v39, %v2579_v25  ;;  %v544_v46 = vmul.f32 %v1975_v48, %v473_v5  ;;  %v1334_v53 = vpack.c.bf16 %v603_v56, %v602_v45  ;;  %v606_v30 = vmax.f32 %v542_v47, 0.0 }
  0xf5   :  { %v607_v52 = vmax.f32 %v543_v41, 0.0  ;;  %v1339_v28 = vpack.c.bf16 %v605_v23, %v604_v21 }
  0xf6   :  { %v545_v54 = vmul.f32 %v1975_v48, %v474_v49  ;;  %v608_v62 = vmax.f32 %v544_v46, 0.0  ;;  %1409 = vst [vmem:[%s2403_s2 + $0xe0] sm:$0xff] %v1334_v53  }
  0xf7   :  { %v1344_v1 = vpack.c.bf16 %v607_v52, %v606_v30  ;;  %1410 = vst [vmem:[%s2403_s2 + $0xe8] sm:$0xff] %v1339_v28  }
  0xf8   :  { %v609_v39 = vmax.f32 %v545_v54, 0.0 }
  0xf9   :  { %1411 = vst [vmem:[%s2403_s2 + $0xf0] sm:$0xff] %v1344_v1  }
  0xfa   :  { %v1349_v57 = vpack.c.bf16 %v609_v39, %v608_v62 }
  0xfc   :  { %1412 = vst [vmem:[%s2403_s2 + $0xf8] sm:$0xff] %v1349_v57  }

// kernel: blcd_forward.23
= control target key start
LH: loop header
LB: loop body
LE: loop exit
PB: predicated region body
PF: predicated region fallthrough
CT: control target
= control target key end

     0   :  { %s1093_s9 = smov 0   ;;  %s1095_s10 = smov 0   ;;  %s1222_s0 = inlined_call_operand.vmem [shape: bf16[128,1152], index: 0, kind: input, shape index: {}]   ;;  %s1223_s1 = inlined_call_operand.vmem [shape: bf16[1152,128], index: 1, kind: input, shape index: {}]   ;;  %s1224_s2 = inlined_call_operand.vmem [shape: bf16[128,128], index: 2, kind: output, shape index: {}]  }
   0x1   :  { %s1097_s11 = smov 0   ;;  %s1099_s12 = smov 0  }
   0x2   :  { %s1101_s13 = smov 0  }
   0x3 LB: > { %s24_s14 = sadd.s32 1, %s1071_s12  ;;  %p47_p1 = scmp.ne.s32.totalorder %s1063_s10, %s1059_s9  ;;  %s1075_s13 = sphi %s1101_s13, %s12_s13   ;;  %s1071_s12 = sphi %s1099_s12, %s1228_s12   ;;  %s1067_s11 = sphi %s1097_s11, %s1227_s11   ;;  %s1063_s10 = sphi %s1095_s10, %s1226_s10   ;;  %s1059_s9 = sphi %s1093_s9, %s1225_s9  }
   0x4   : > { %p25_p0 = scmp.ge.s32.totalorder %s24_s14, 9  ;;  %p48_p2 = scmp.eq.s32.totalorder %s1075_s13, 0 }
   0x5   : > { %s40_s16 = sadd.s32 1, %s1063_s10  ;;  %p808_p5 = scmp.ge.s32.totalorder %s1075_s13, 9 }
   0x6   : > { %s1230_s14 = smov (%p25_p0, %s24_s14), 0  ;;  %p49_p3 = por %p48_p2, %p47_p1 }
   0x7   : > { %s36_s15 = ssub.s32 %s1071_s12, %s1230_s14  ;;  %129 = sbr.rel (%p808_p5) target bundleno = 26 (0x1a), region = 16 }
   0x8   : > { %p38_p4 = scmp.eq.s32.totalorder %s36_s15, 0 }
   0xa   : > { %s1128_s17 = scalar_select %p38_p4, %s1063_s10, %s40_s16  }
   0xc   : > { %132 = sbr.rel (!%p49_p3) target bundleno = 26 (0x1a), region = 20  ;;  %s134_s18 = sand.u32 (%p49_p3), 1, %s1063_s10  }
   0xd   : > { %s810_s19 = sshll.u32 (%p49_p3), %s1071_s12, 2  ;;  %s809_s20 = sshll.u32 (%p49_p3), %s134_s18, 6 }
   0xe   : > { %s1136_s23 = scalar_lea.vmem (%p49_p3), %s1222_s0, %s810_s19  ;;  %s136_s24 = scalar_lea.vmem (%p49_p3), [#allocation3], %s809_s20 }
   0xf   : > { %v158_v0 = vld [vmem:[%s1136_s23] sm:$0xf] (%p49_p3)  ;;  %v160_v1 = vld [vmem:[%s1136_s23 + $0x24] sm:$0xf] (%p49_p3)  ;;  %v162_v2 = vld [vmem:[%s1136_s23 + $0x48] sm:$0xf] (%p49_p3) }
  0x10   : > { %159 = vst [vmem:[%s136_s24] sm:$0xf] (%p49_p3), %v158_v0  ;;  %161 = vst [vmem:[%s136_s24 + $0x4] sm:$0xf] (%p49_p3), %v160_v1  ;;  %v164_v3 = vld [vmem:[%s1136_s23 + $0x6c] sm:$0xf] (%p49_p3) }
  0x11   : > { %v166_v4 = vld [vmem:[%s1136_s23 + $0x90] sm:$0xf]  ;;  %163 = vst [vmem:[%s136_s24 + $0x8] sm:$0xf] %v162_v2  ;;  %165 = vst [vmem:[%s136_s24 + $0xc] sm:$0xf] %v164_v3 }
  0x12   : > { %167 = vst [vmem:[%s136_s24 + $0x10] sm:$0xf] %v166_v4  ;;  %v168_v5 = vld [vmem:[%s1136_s23 + $0xb4] sm:$0xf]  ;;  %v170_v6 = vld [vmem:[%s1136_s23 + $0xd8] sm:$0xf] }
  0x13   : > { %v172_v7 = vld [vmem:[%s1136_s23 + $0xfc] sm:$0xf]  ;;  %169 = vst [vmem:[%s136_s24 + $0x14] sm:$0xf] %v168_v5  ;;  %171 = vst [vmem:[%s136_s24 + $0x18] sm:$0xf] %v170_v6 }
  0x14   : > { %173 = vst [vmem:[%s136_s24 + $0x1c] sm:$0xf] %v172_v7  ;;  %v174_v8 = vld [vmem:[%s1136_s23 + $0x120] sm:$0xf]  ;;  %v176_v9 = vld [vmem:[%s1136_s23 + $0x144] sm:$0xf] }
  0x15   : > { %v178_v10 = vld [vmem:[%s1136_s23 + $0x168] sm:$0xf]  ;;  %175 = vst [vmem:[%s136_s24 + $0x20] sm:$0xf] %v174_v8  ;;  %177 = vst [vmem:[%s136_s24 + $0x24] sm:$0xf] %v176_v9 }
  0x16   : > { %179 = vst [vmem:[%s136_s24 + $0x28] sm:$0xf] %v178_v10  ;;  %v180_v11 = vld [vmem:[%s1136_s23 + $0x18c] sm:$0xf]  ;;  %v182_v12 = vld [vmem:[%s1136_s23 + $0x1b0] sm:$0xf] }
  0x17   : > { %v184_v13 = vld [vmem:[%s1136_s23 + $0x1d4] sm:$0xf]  ;;  %181 = vst [vmem:[%s136_s24 + $0x2c] sm:$0xf] %v180_v11  ;;  %183 = vst [vmem:[%s136_s24 + $0x30] sm:$0xf] %v182_v12 }
  0x18   : > { %185 = vst [vmem:[%s136_s24 + $0x34] sm:$0xf] %v184_v13  ;;  %v186_v14 = vld [vmem:[%s1136_s23 + $0x1f8] sm:$0xf]  ;;  %v188_v15 = vld [vmem:[%s1136_s23 + $0x21c] sm:$0xf] }
  0x19   : > { %187 = vst [vmem:[%s136_s24 + $0x38] sm:$0xf] %v186_v14  ;;  %189 = vst [vmem:[%s136_s24 + $0x3c] sm:$0xf] %v188_v15 }
  0x1a PF: > { %p811_p6 = scmp.ge.s32.totalorder %s1075_s13, 1  ;;  %p256_p7 = scmp.lt.s32.totalorder %s1075_s13, 10 }
  0x1c   : > { %p257_p8 = pnand %p811_p6, %p256_p7 }
  0x1d   : > { %s263_s25 = sand.u32 (!%p257_p8), 1, %s1059_s9   ;;  %s813_s26 = sshll.u32 (!%p257_p8), %s1067_s11, 4 }
  0x1e   : > { %260 = sbr.rel (%p257_p8) target bundleno = 302 (0x12e), region = 65  ;;  %s812_s27 = sshll.u32 (!%p257_p8), %s263_s25, 6 }
  0x1f   : > { %p297_p9 = scmp.lt.s32.totalorder (!%p257_p8), %s813_s26, 143  ;;  %s1163_s4 = scalar_lea.vmem (!%p257_p8), [#allocation3], %s812_s27 }
  0x20   : > { %p815_p10 = scmp.ne.s32.totalorder (!%p257_p8), %s1067_s11, 0 }
  0x23   : > { %s1232_s26 = smov (!%p297_p9, %s813_s26), 143  ;;  %318 = sbr.rel (%p815_p10) target bundleno = 49 (0x31), region = 73 }
  0x24   : > { %s814_s28 = sshll.u32 %s1232_s26, 2 }
  0x25   : > { %s1161_s3 = scalar_lea.vmem %s1223_s1, %s814_s28 }
  0x28   : > { %v1077_v16 = vmov 0.0  }
  0x29   : > { %319 = vst [vmem:[#allocation2 + $0x30] sm:$0xff] %v1077_v16  ;;  %320 = vst [vmem:[#allocation2] sm:$0xff] %v1077_v16 }
  0x2a   : > { %321 = vst [vmem:[#allocation2 + $0x58] sm:$0xff] %v1077_v16  ;;  %322 = vst [vmem:[#allocation2 + $0x18] sm:$0xff] %v1077_v16 }
  0x2b   : > { %323 = vst [vmem:[#allocation2 + $0x50] sm:$0xff] %v1077_v16  ;;  %324 = vst [vmem:[#allocation2 + $0x68] sm:$0xff] %v1077_v16 }
  0x2c   : > { %325 = vst [vmem:[#allocation2 + $0x8] sm:$0xff] %v1077_v16  ;;  %326 = vst [vmem:[#allocation2 + $0x48] sm:$0xff] %v1077_v16 }
  0x2d   : > { %327 = vst [vmem:[#allocation2 + $0x40] sm:$0xff] %v1077_v16  ;;  %328 = vst [vmem:[#allocation2 + $0x20] sm:$0xff] %v1077_v16 }
  0x2e   : > { %329 = vst [vmem:[#allocation2 + $0x10] sm:$0xff] %v1077_v16  ;;  %330 = vst [vmem:[#allocation2 + $0x38] sm:$0xff] %v1077_v16 }
  0x2f   : > { %331 = vst [vmem:[#allocation2 + $0x60] sm:$0xff] %v1077_v16  ;;  %332 = vst [vmem:[#allocation2 + $0x70] sm:$0xff] %v1077_v16 }
  0x30   : > { %333 = vst [vmem:[#allocation2 + $0x78] sm:$0xff] %v1077_v16  ;;  %334 = vst [vmem:[#allocation2 + $0x28] sm:$0xff] %v1077_v16 }
  0x31 PF: > { %v1021_v17 = vld [vmem:[%s1161_s3 + $0x38] sm:$0xff]   ;;  %v1022_v18 = vld [vmem:[%s1161_s3 + $0x30] sm:$0xff]   ;;  %v1023_v19 = vld [vmem:[%s1161_s3 + $0x28] sm:$0xff]   ;;  %p832_p11 = scmp.ne.s32.totalorder %s1067_s11, 8 }
  0x32   : > { %932 = vmatprep.subr.bf16.mxu0 %v1021_v17  ;;  %964 = vmatprep.subr.bf16.mxu1 %v1021_v17  ;;  %v1024_v20 = vld [vmem:[%s1161_s3 + $0x20] sm:$0xff]   ;;  %v1025_v23 = vld [vmem:[%s1161_s3 + $0x18] sm:$0xff]   ;;  %v1026_v24 = vld [vmem:[%s1161_s3 + $0x10] sm:$0xff]  }
  0x33   : > { %933 = vmatpush3.bf16.msra.mxu0 %v1021_v17  ;;  %972 = vmatpush3.bf16.msra.mxu1 %v1021_v17  ;;  %v1029_v21 = vld [vmem:[%s1163_s4] sm:$0xff]   ;;  %v1027_v25 = vld [vmem:[%s1161_s3 + $0x8] sm:$0xff]   ;;  %v1033_v29 = vld [vmem:[%s1163_s4 + $0x10] sm:$0xff]  }
  0x34   : > { %934 = vmatprep.subr.bf16.mxu0 %v1022_v18  ;;  %965 = vmatprep.subr.bf16.mxu1 %v1022_v18  ;;  %v1030_v22 = vld [vmem:[%s1163_s4 + $0x20] sm:$0xff]   ;;  %v1031_v27 = vld [vmem:[%s1163_s4 + $0x8] sm:$0xff]   ;;  %v1034_v30 = vld [vmem:[%s1163_s4 + $0x30] sm:$0xff]  }
  0x35   : > { %948 = vmatprep.mubr.bf16.mxu0 %v1029_v21  ;;  %956 = vmatprep.mubr.bf16.mxu1 %v1030_v22  ;;  %v1028_v26 = vld [vmem:[%s1161_s3] sm:$0xff]   ;;  %v1032_v28 = vld [vmem:[%s1163_s4 + $0x28] sm:$0xff]   ;;  %v1035_v31 = vld [vmem:[%s1163_s4 + $0x18] sm:$0xff]  }
  0x36   : > { %v1036_v32 = vld [vmem:[%s1163_s4 + $0x38] sm:$0xff]   ;;  %v345_v34 = vld [vmem:[#allocation2 + $0x10] sm:$0xff]  ;;  %v343_v38 = vld [vmem:[#allocation2 + $0x40] sm:$0xff] }
  0x37   : > { %935 = vmatpush3.bf16.msra.mxu0 %v1022_v18  ;;  %973 = vmatpush3.bf16.msra.mxu1 %v1022_v18  ;;  %v337_v33 = vld [vmem:[#allocation2 + $0x58] sm:$0xff]  ;;  %v335_v37 = vld [vmem:[#allocation2 + $0x30] sm:$0xff]  ;;  %v336_v49 = vld [vmem:[#allocation2] sm:$0xff] }
  0x38   : > { %936 = vmatprep.subr.bf16.mxu0 %v1023_v19  ;;  %966 = vmatprep.subr.bf16.mxu1 %v1023_v19  ;;  %v338_v43 = vld [vmem:[#allocation2 + $0x18] sm:$0xff]  ;;  %v344_v50 = vld [vmem:[#allocation2 + $0x20] sm:$0xff]  ;;  %v341_v55 = vld [vmem:[#allocation2 + $0x8] sm:$0xff] }
  0x39   : > { %v346_v44 = vld [vmem:[#allocation2 + $0x38] sm:$0xff]  ;;  %v339_v61 = vld [vmem:[#allocation2 + $0x50] sm:$0xff]  ;;  %v347_v62 = vld [vmem:[#allocation2 + $0x60] sm:$0xff] }
  0x3a   : > { %v349_v56 = vld [vmem:[#allocation2 + $0x78] sm:$0xff]  ;;  %v342_v3 = vld [vmem:[#allocation2 + $0x48] sm:$0xff]  ;;  %v348_v10 = vld [vmem:[#allocation2 + $0x70] sm:$0xff] }
  0x3b   : > { %937 = vmatpush3.bf16.msra.mxu0 %v1023_v19  ;;  %974 = vmatpush3.bf16.msra.mxu1 %v1023_v19  ;;  %v350_v4 = vld [vmem:[#allocation2 + $0x28] sm:$0xff] }
  0x3c   : > { %938 = vmatprep.subr.bf16.mxu0 %v1024_v20  ;;  %967 = vmatprep.subr.bf16.mxu1 %v1024_v20  ;;  %v340_v9 = vld [vmem:[#allocation2 + $0x68] sm:$0xff] }
  0x3f   : > { %939 = vmatpush3.bf16.msra.mxu0 %v1024_v20  ;;  %975 = vmatpush3.bf16.msra.mxu1 %v1024_v20 }
  0x40   : > { %940 = vmatprep.subr.bf16.mxu0 %v1025_v23  ;;  %968 = vmatprep.subr.bf16.mxu1 %v1025_v23 }
  0x43   : > { %941 = vmatpush3.bf16.msra.mxu0 %v1025_v23  ;;  %976 = vmatpush3.bf16.msra.mxu1 %v1025_v23 }
  0x44   : > { %942 = vmatprep.subr.bf16.mxu0 %v1026_v24  ;;  %969 = vmatprep.subr.bf16.mxu1 %v1026_v24 }
  0x47   : > { %943 = vmatpush3.bf16.msra.mxu0 %v1026_v24  ;;  %977 = vmatpush3.bf16.msra.mxu1 %v1026_v24 }
  0x48   : > { %944 = vmatprep.subr.bf16.mxu0 %v1027_v25  ;;  %970 = vmatprep.subr.bf16.mxu1 %v1027_v25 }
  0x4b   : > { %945 = vmatpush3.bf16.msra.mxu0 %v1027_v25  ;;  %978 = vmatpush3.bf16.msra.mxu1 %v1027_v25 }
  0x4c   : > { %946 = vmatprep.subr.bf16.mxu0 %v1028_v26  ;;  %971 = vmatprep.subr.bf16.mxu1 %v1028_v26 }
  0x4f   : > { %947 = vmatpush3.bf16.msra.mxu0 %v1028_v26  ;;  %979 = vmatpush3.bf16.msra.mxu1 %v1028_v26 }
  0x52   : > { %949 = vmatmul.mubr.bf16.vlgmr.msra.gmra.mxu0 %v1031_v27  ;;  %957 = vmatmul.mubr.bf16.vlgmr.msra.gmra.mxu1 %v1032_v28 }
  0x53   : > { %952 = vmatprep.mubr.bf16.mxu0 %v1033_v29  ;;  %960 = vmatprep.mubr.bf16.mxu1 %v1034_v30 }
  0x5a   : > { %953 = vmatmul.mubr.bf16.gmra.mxu0 %v1035_v31  ;;  %961 = vmatmul.mubr.bf16.gmra.mxu1 %v1036_v32 }
 0x112   : > { %v950_v35 = vpop.f32.mrf.mxu0  ;;  %v958_v36 = vpop.f32.mrf.mxu1 }
 0x113   : > { %v578_v39 = vadd.f32 %v950_v35, %v337_v33  ;;  %v586_v40 = vadd.f32 %v958_v36, %v345_v34 }
 0x114   : > { %v513_v41 = vpop.f32.mrf.mxu0  ;;  %v545_v42 = vpop.f32.mrf.mxu1 }
 0x115   : > { %594 = vst [vmem:[#allocation2 + $0x58] sm:$0xff] %v578_v39  ;;  %602 = vst [vmem:[#allocation2 + $0x10] sm:$0xff] %v586_v40  ;;  %v576_v45 = vadd.f32 %v513_v41, %v335_v37  ;;  %v584_v46 = vadd.f32 %v545_v42, %v343_v38 }
 0x116   : > { %v951_v47 = vpop.f32.mrf.mxu0  ;;  %v959_v48 = vpop.f32.mrf.mxu1 }
 0x117   : > { %592 = vst [vmem:[#allocation2 + $0x30] sm:$0xff] %v576_v45  ;;  %600 = vst [vmem:[#allocation2 + $0x40] sm:$0xff] %v584_v46  ;;  %v579_v51 = vadd.f32 %v951_v47, %v338_v43  ;;  %v587_v52 = vadd.f32 %v959_v48, %v346_v44 }
 0x118   : > { %v516_v53 = vpop.f32.mrf.mxu0  ;;  %v548_v54 = vpop.f32.mrf.mxu1 }
 0x119   : > { %595 = vst [vmem:[#allocation2 + $0x18] sm:$0xff] %v579_v51  ;;  %603 = vst [vmem:[#allocation2 + $0x38] sm:$0xff] %v587_v52  ;;  %v577_v57 = vadd.f32 %v516_v53, %v336_v49  ;;  %v585_v58 = vadd.f32 %v548_v54, %v344_v50 }
 0x11a   : > { %v954_v59 = vpop.f32.mrf.mxu0  ;;  %v962_v60 = vpop.f32.mrf.mxu1 }
 0x11b   : > { %593 = vst [vmem:[#allocation2] sm:$0xff] %v577_v57  ;;  %601 = vst [vmem:[#allocation2 + $0x20] sm:$0xff] %v585_v58  ;;  %v582_v63 = vadd.f32 %v954_v59, %v341_v55  ;;  %v590_v0 = vadd.f32 %v962_v60, %v349_v56 }
 0x11c   : > { %v529_v1 = vpop.f32.mrf.mxu0  ;;  %v561_v2 = vpop.f32.mrf.mxu1 }
 0x11d   : > { %598 = vst [vmem:[#allocation2 + $0x8] sm:$0xff] %v582_v63  ;;  %606 = vst [vmem:[#allocation2 + $0x78] sm:$0xff] %v590_v0  ;;  %v580_v5 = vadd.f32 %v529_v1, %v339_v61  ;;  %v588_v6 = vadd.f32 %v561_v2, %v347_v62 }
 0x11e   : > { %v955_v7 = vpop.f32.mrf.mxu0  ;;  %v963_v8 = vpop.f32.mrf.mxu1 }
 0x11f   : > { %596 = vst [vmem:[#allocation2 + $0x50] sm:$0xff] %v580_v5  ;;  %604 = vst [vmem:[#allocation2 + $0x60] sm:$0xff] %v588_v6  ;;  %v583_v11 = vadd.f32 %v955_v7, %v342_v3  ;;  %v591_v12 = vadd.f32 %v963_v8, %v350_v4  ;;  %611 = sbr.rel (%p832_p11) target bundleno = 302 (0x12e), region = 77 }
 0x120   : > { %v532_v13 = vpop.f32.mrf.mxu0  ;;  %v564_v14 = vpop.f32.mrf.mxu1 }
 0x121   : > { %599 = vst [vmem:[#allocation2 + $0x48] sm:$0xff] %v583_v11  ;;  %607 = vst [vmem:[#allocation2 + $0x28] sm:$0xff] %v591_v12  ;;  %v581_v15 = vadd.f32 %v532_v13, %v340_v9  ;;  %v589_v16 = vadd.f32 %v564_v14, %v348_v10 }
 0x123   : > { %597 = vst [vmem:[#allocation2 + $0x68] sm:$0xff] %v581_v15  ;;  %605 = vst [vmem:[#allocation2 + $0x70] sm:$0xff] %v589_v16 }
 0x124   : > { %v612_v17 = vld [vmem:[#allocation2 + $0x30] sm:$0xff]  ;;  %v613_v18 = vld [vmem:[#allocation2] sm:$0xff]  ;;  %v614_v19 = vld [vmem:[#allocation2 + $0x58] sm:$0xff] }
 0x125   : > { %v872_v20 = vpack.c.bf16 %v613_v18, %v612_v17  ;;  %v615_v21 = vld [vmem:[#allocation2 + $0x18] sm:$0xff]  ;;  %v618_v26 = vld [vmem:[#allocation2 + $0x8] sm:$0xff]  ;;  %v620_v28 = vld [vmem:[#allocation2 + $0x40] sm:$0xff] }
 0x126   : > { %v616_v22 = vld [vmem:[#allocation2 + $0x50] sm:$0xff]  ;;  %v877_v24 = vpack.c.bf16 %v615_v21, %v614_v19  ;;  %v621_v30 = vld [vmem:[#allocation2 + $0x20] sm:$0xff]  ;;  %v623_v32 = vld [vmem:[#allocation2 + $0x38] sm:$0xff] }
 0x127   : > { %873 = vst [vmem:[%s1224_s2] sm:$0xff] %v872_v20   ;;  %v622_v31 = vld [vmem:[#allocation2 + $0x10] sm:$0xff]  ;;  %v892_v33 = vpack.c.bf16 %v621_v30, %v620_v28  ;;  %v624_v35 = vld [vmem:[#allocation2 + $0x60] sm:$0xff]  ;;  %v626_v37 = vld [vmem:[#allocation2 + $0x78] sm:$0xff] }
 0x128   : > { %v619_v27 = vld [vmem:[#allocation2 + $0x48] sm:$0xff]  ;;  %909 = vst [vmem:[%s1224_s2 + $0x8] sm:$0xff] %v877_v24   ;;  %v897_v34 = vpack.c.bf16 %v623_v32, %v622_v31 }
 0x129   : > { %v887_v29 = vpack.c.bf16 %v619_v27, %v618_v26  ;;  %v627_v39 = vld [vmem:[#allocation2 + $0x28] sm:$0xff]  ;;  %912 = vst [vmem:[%s1224_s2 + $0x20] sm:$0xff] %v892_v33  }
 0x12a   : > { %v617_v23 = vld [vmem:[#allocation2 + $0x68] sm:$0xff]  ;;  %v625_v36 = vld [vmem:[#allocation2 + $0x70] sm:$0xff]  ;;  %913 = vst [vmem:[%s1224_s2 + $0x28] sm:$0xff] %v897_v34   ;;  %v907_v40 = vpack.c.bf16 %v627_v39, %v626_v37 }
 0x12b   : > { %v882_v25 = vpack.c.bf16 %v617_v23, %v616_v22  ;;  %911 = vst [vmem:[%s1224_s2 + $0x18] sm:$0xff] %v887_v29   ;;  %v902_v38 = vpack.c.bf16 %v625_v36, %v624_v35 }
 0x12c   : > { %915 = vst [vmem:[%s1224_s2 + $0x38] sm:$0xff] %v907_v40  }
 0x12d   : > { %910 = vst [vmem:[%s1224_s2 + $0x10] sm:$0xff] %v882_v25   ;;  %914 = vst [vmem:[%s1224_s2 + $0x30] sm:$0xff] %v902_v38  }
 0x12e PF: > { %s12_s13 = sadd.s32 1, %s1075_s13   ;;  %s1225_s9 = smov %s1063_s10 }
 0x12f   : > { %p9_p12 = scmp.ge.s32.totalorder %s12_s13, 11   ;;  %s1226_s10 = smov %s1128_s17 }
 0x130   : > { %s1227_s11 = smov %s1071_s12  ;;  %s1228_s12 = smov %s1230_s14 }
 0x131   :  { %11 = sbr.rel (!%p9_p12) target bundleno = 3 (0x3), region = 115 }

// kernel: blcd_forward.24
= control target key start
LH: loop header
LB: loop body
LE: loop exit
PB: predicated region body
PF: predicated region fallthrough
CT: control target
= control target key end

     0   :  { %s565_s0 = inlined_call_operand.vmem [shape: bf16[128,128], index: 0, kind: input, shape index: {}]   ;;  %s566_s1 = inlined_call_operand.vmem [shape: f32[1,128], index: 1, kind: input, shape index: {}]   ;;  %s567_s2 = inlined_call_operand.vmem [shape: bf16[128,128], index: 2, kind: output, shape index: {}]  }
   0x1   :  { %v296_v0 = vld [vmem:[%s565_s0] sm:$0xff]   ;;  %v367_v1 = vld [vmem:[%s565_s0 + $0x8] sm:$0xff]   ;;  %v368_v5 = vld [vmem:[%s565_s0 + $0x10] sm:$0xff]  }
   0x2   :  { %v404_v2 = vunpack.c.l.bf16 %v296_v0  ;;  %v406_v3 = vunpack.c.h.bf16 %v296_v0  ;;  %v408_v4 = vunpack.c.l.bf16 %v367_v1  ;;  %v413_v6 = vunpack.c.h.bf16 %v367_v1  ;;  %v369_v13 = vld [vmem:[%s565_s0 + $0x18] sm:$0xff]   ;;  %v370_v22 = vld [vmem:[%s565_s0 + $0x20] sm:$0xff]   ;;  %v371_v31 = vld [vmem:[%s565_s0 + $0x28] sm:$0xff]  }
   0x3   :  { %v421_v10 = vunpack.c.l.bf16 %v368_v5  ;;  %v429_v14 = vunpack.c.h.bf16 %v368_v5  ;;  %v434_v18 = vunpack.c.l.bf16 %v369_v13  ;;  %v442_v23 = vunpack.c.h.bf16 %v369_v13  ;;  %v372_v40 = vld [vmem:[%s565_s0 + $0x30] sm:$0xff]   ;;  %v373_v49 = vld [vmem:[%s565_s0 + $0x38] sm:$0xff]  }
   0x4   :  { %v43_v7 = vadd.f32 %v406_v3, %v404_v2  ;;  %v65_v8 = vmul.f32 %v404_v2, %v404_v2  ;;  %v66_v9 = vmul.f32 %v406_v3, %v406_v3  ;;  %v67_v12 = vmul.f32 %v408_v4, %v408_v4 }
   0x5   :  { %v68_v16 = vmul.f32 %v413_v6, %v413_v6  ;;  %v69_v20 = vmul.f32 %v421_v10, %v421_v10  ;;  %v70_v25 = vmul.f32 %v429_v14, %v429_v14  ;;  %v447_v27 = vunpack.c.l.bf16 %v370_v22 }
   0x6   :  { %v44_v11 = vadd.f32 %v408_v4, %v43_v7  ;;  %v81_v17 = vadd.f32 %v66_v9, %v65_v8  ;;  %v71_v29 = vmul.f32 %v434_v18, %v434_v18  ;;  %v455_v32 = vunpack.c.h.bf16 %v370_v22 }
   0x7   :  { %v72_v34 = vmul.f32 %v442_v23, %v442_v23  ;;  %v460_v36 = vunpack.c.l.bf16 %v371_v31  ;;  %v73_v38 = vmul.f32 %v447_v27, %v447_v27  ;;  %v468_v41 = vunpack.c.h.bf16 %v371_v31 }
   0x8   :  { %v45_v15 = vadd.f32 %v413_v6, %v44_v11  ;;  %v82_v21 = vadd.f32 %v81_v17, %v67_v12  ;;  %v74_v43 = vmul.f32 %v455_v32, %v455_v32  ;;  %v473_v45 = vunpack.c.l.bf16 %v372_v40 }
   0x9   :  { %v75_v47 = vmul.f32 %v460_v36, %v460_v36  ;;  %v481_v50 = vunpack.c.h.bf16 %v372_v40  ;;  %v76_v52 = vmul.f32 %v468_v41, %v468_v41  ;;  %v486_v54 = vunpack.c.l.bf16 %v373_v49 }
   0xa   :  { %v46_v19 = vadd.f32 %v421_v10, %v45_v15  ;;  %v83_v26 = vadd.f32 %v82_v21, %v68_v16  ;;  %v77_v56 = vmul.f32 %v473_v45, %v473_v45  ;;  %v491_v58 = vunpack.c.h.bf16 %v373_v49 }
   0xb   :  { %v78_v60 = vmul.f32 %v481_v50, %v481_v50  ;;  %v79_v63 = vmul.f32 %v486_v54, %v486_v54 }
   0xc   :  { %v47_v24 = vadd.f32 %v429_v14, %v46_v19  ;;  %v84_v30 = vadd.f32 %v83_v26, %v69_v20  ;;  %v80_v5 = vmul.f32 %v491_v58, %v491_v58 }
   0xe   :  { %v48_v28 = vadd.f32 %v434_v18, %v47_v24  ;;  %v85_v35 = vadd.f32 %v84_v30, %v70_v25 }
  0x10   :  { %v49_v33 = vadd.f32 %v442_v23, %v48_v28  ;;  %v86_v39 = vadd.f32 %v85_v35, %v71_v29 }
  0x12   :  { %v50_v37 = vadd.f32 %v447_v27, %v49_v33  ;;  %v87_v44 = vadd.f32 %v86_v39, %v72_v34 }
  0x14   :  { %v51_v42 = vadd.f32 %v455_v32, %v50_v37  ;;  %v88_v48 = vadd.f32 %v87_v44, %v73_v38 }
  0x16   :  { %v52_v46 = vadd.f32 %v460_v36, %v51_v42  ;;  %v89_v53 = vadd.f32 %v88_v48, %v74_v43 }
  0x18   :  { %v53_v51 = vadd.f32 %v468_v41, %v52_v46  ;;  %v90_v57 = vadd.f32 %v89_v53, %v75_v47 }
  0x1a   :  { %v54_v55 = vadd.f32 %v473_v45, %v53_v51  ;;  %v91_v61 = vadd.f32 %v90_v57, %v76_v52 }
  0x1c   :  { %v55_v59 = vadd.f32 %v481_v50, %v54_v55  ;;  %v92_v0 = vadd.f32 %v91_v61, %v77_v56 }
  0x1e   :  { %v56_v62 = vadd.f32 %v486_v54, %v55_v59  ;;  %v93_v7 = vadd.f32 %v92_v0, %v78_v60 }
  0x20   :  { %v57_v1 = vadd.f32 %v491_v58, %v56_v62  ;;  %v94_v9 = vadd.f32 %v93_v7, %v79_v63 }
  0x22   :  { %v58_v8 = vrot.slane %v57_v1, 4  ;;  %v95_v12 = vadd.f32 %v94_v9, %v80_v5 }
  0x24   :  { %v59_v11 = vadd.f32 %v58_v8, %v57_v1  ;;  %v96_v15 = vrot.slane %v95_v12, 4 }
  0x26   :  { %v60_v13 = vrot.slane %v59_v11, 2  ;;  %v97_v17 = vadd.f32 %v96_v15, %v95_v12 }
  0x28   :  { %v61_v16 = vadd.f32 %v60_v13, %v59_v11  ;;  %v98_v20 = vrot.slane %v97_v17, 2 }
  0x2a   :  { %v62_v19 = vrot.slane %v61_v16, 1  ;;  %v99_v22 = vadd.f32 %v98_v20, %v97_v17 }
  0x2c   :  { %v63_v21 = vadd.f32 %v62_v19, %v61_v16  ;;  %v100_v25 = vrot.slane %v99_v22, 1 }
  0x2e   :  { %v502_v24 = vmul.f32 0.0078125, %v63_v21  ;;  %v101_v26 = vadd.f32 %v100_v25, %v99_v22 }
  0x30   :  { %v103_v28 = vmul.f32 %v502_v24, %v502_v24  ;;  %v102_v29 = vmul.f32 0.0078125, %v101_v26  ;;  %v105_v33 = vsub.f32 %v404_v2, %v502_v24  ;;  %v106_v34 = vsub.f32 %v406_v3, %v502_v24 }
  0x31   :  { %v107_v35 = vsub.f32 %v408_v4, %v502_v24  ;;  %v108_v37 = vsub.f32 %v413_v6, %v502_v24  ;;  %v109_v38 = vsub.f32 %v421_v10, %v502_v24  ;;  %v110_v39 = vsub.f32 %v429_v14, %v502_v24  ;;  %v262_v14 = vld [vmem:[%s566_s1] ss:$0 sm:$0xff] }
  0x32   :  { %v104_v30 = vsub.f32 %v102_v29, %v103_v28  ;;  %v111_v40 = vsub.f32 %v434_v18, %v502_v24  ;;  %v112_v2 = vsub.f32 %v442_v23, %v502_v24  ;;  %v113_v3 = vsub.f32 %v447_v27, %v502_v24 }
  0x33   :  { %v114_v4 = vsub.f32 %v455_v32, %v502_v24  ;;  %v115_v6 = vsub.f32 %v460_v36, %v502_v24  ;;  %v116_v10 = vsub.f32 %v468_v41, %v502_v24  ;;  %v117_v18 = vsub.f32 %v473_v45, %v502_v24 }
  0x34   :  { %v121_v31 = vadd.f32 1e-05, %v104_v30  ;;  %v118_v23 = vsub.f32 %v481_v50, %v502_v24  ;;  %v119_v27 = vsub.f32 %v486_v54, %v502_v24  ;;  %v120_v32 = vsub.f32 %v491_v58, %v502_v24 }
  0x36   :  { %381 = vrsqrt.f32 %v121_v31 }
  0x43   :  { %v382_v42 = vpop.eup %381 }
  0x44   :  { %v123_v36 = vmul.f32 %v382_v42, %v105_v33  ;;  %v124_v43 = vmul.f32 %v382_v42, %v106_v34  ;;  %v125_v41 = vmul.f32 %v382_v42, %v107_v35  ;;  %v126_v44 = vmul.f32 %v382_v42, %v108_v37 }
  0x45   :  { %v127_v46 = vmul.f32 %v382_v42, %v109_v38  ;;  %v128_v47 = vmul.f32 %v382_v42, %v110_v39  ;;  %v129_v48 = vmul.f32 %v382_v42, %v111_v40  ;;  %v130_v49 = vmul.f32 %v382_v42, %v112_v2 }
  0x46   :  { %v146_v51 = vmul.f32 %v262_v14, %v123_v36  ;;  %v147_v52 = vmul.f32 %v262_v14, %v124_v43  ;;  %v148_v45 = vmul.f32 %v262_v14, %v125_v41  ;;  %v149_v53 = vmul.f32 %v262_v14, %v126_v44 }
  0x47   :  { %v150_v55 = vmul.f32 %v262_v14, %v127_v46  ;;  %v151_v50 = vmul.f32 %v262_v14, %v128_v47  ;;  %v152_v56 = vmul.f32 %v262_v14, %v129_v48  ;;  %v153_v57 = vmul.f32 %v262_v14, %v130_v49 }
  0x48   :  { %v162_v54 = vmax.f32 %v146_v51, 0.0  ;;  %v163_v59 = vmax.f32 %v147_v52, 0.0  ;;  %v164_v60 = vmax.f32 %v148_v45, 0.0  ;;  %v165_v58 = vmax.f32 %v149_v53, 0.0 }
  0x49   :  { %v166_v61 = vmax.f32 %v150_v55, 0.0  ;;  %v167_v62 = vmax.f32 %v151_v50, 0.0  ;;  %v168_v63 = vmax.f32 %v152_v56, 0.0  ;;  %v169_v0 = vmax.f32 %v153_v57, 0.0 }
  0x4a   :  { %v330_v1 = vpack.c.bf16 %v163_v59, %v162_v54  ;;  %v335_v5 = vpack.c.bf16 %v165_v58, %v164_v60  ;;  %v131_v7 = vmul.f32 %v382_v42, %v113_v3  ;;  %v132_v8 = vmul.f32 %v382_v42, %v114_v4 }
  0x4b   :  { %v340_v9 = vpack.c.bf16 %v167_v62, %v166_v61  ;;  %v345_v11 = vpack.c.bf16 %v169_v0, %v168_v63  ;;  %v133_v12 = vmul.f32 %v382_v42, %v115_v6  ;;  %v134_v13 = vmul.f32 %v382_v42, %v116_v10 }
  0x4c   :  { %331 = vst [vmem:[%s567_s2] sm:$0xff] %v330_v1   ;;  %374 = vst [vmem:[%s567_s2 + $0x8] sm:$0xff] %v335_v5   ;;  %v154_v15 = vmul.f32 %v262_v14, %v131_v7  ;;  %v155_v16 = vmul.f32 %v262_v14, %v132_v8  ;;  %v135_v17 = vmul.f32 %v382_v42, %v117_v18 }
  0x4d   :  { %v136_v19 = vmul.f32 %v382_v42, %v118_v23  ;;  %375 = vst [vmem:[%s567_s2 + $0x10] sm:$0xff] %v340_v9   ;;  %376 = vst [vmem:[%s567_s2 + $0x18] sm:$0xff] %v345_v11   ;;  %v156_v20 = vmul.f32 %v262_v14, %v133_v12  ;;  %v157_v21 = vmul.f32 %v262_v14, %v134_v13 }
  0x4e   :  { %v137_v22 = vmul.f32 %v382_v42, %v119_v27  ;;  %v138_v24 = vmul.f32 %v382_v42, %v120_v32  ;;  %v170_v25 = vmax.f32 %v154_v15, 0.0  ;;  %v171_v26 = vmax.f32 %v155_v16, 0.0 }
  0x4f   :  { %v158_v28 = vmul.f32 %v262_v14, %v135_v17  ;;  %v159_v29 = vmul.f32 %v262_v14, %v136_v19  ;;  %v172_v30 = vmax.f32 %v156_v20, 0.0  ;;  %v173_v31 = vmax.f32 %v157_v21, 0.0 }
  0x50   :  { %v160_v33 = vmul.f32 %v262_v14, %v137_v22  ;;  %v161_v34 = vmul.f32 %v262_v14, %v138_v24  ;;  %v350_v35 = vpack.c.bf16 %v171_v26, %v170_v25 }
  0x51   :  { %v174_v37 = vmax.f32 %v158_v28, 0.0  ;;  %v175_v38 = vmax.f32 %v159_v29, 0.0  ;;  %v355_v39 = vpack.c.bf16 %v173_v31, %v172_v30 }
  0x52   :  { %v176_v40 = vmax.f32 %v160_v33, 0.0  ;;  %v177_v2 = vmax.f32 %v161_v34, 0.0  ;;  %377 = vst [vmem:[%s567_s2 + $0x20] sm:$0xff] %v350_v35  }
  0x53   :  { %v360_v3 = vpack.c.bf16 %v175_v38, %v174_v37  ;;  %378 = vst [vmem:[%s567_s2 + $0x28] sm:$0xff] %v355_v39  }
  0x54   :  { %v365_v4 = vpack.c.bf16 %v177_v2, %v176_v40 }
  0x55   :  { %379 = vst [vmem:[%s567_s2 + $0x30] sm:$0xff] %v360_v3  }
  0x56   :  { %380 = vst [vmem:[%s567_s2 + $0x38] sm:$0xff] %v365_v4  }

// kernel: blcd_forward.28
= control target key start
LH: loop header
LB: loop body
LE: loop exit
PB: predicated region body
PF: predicated region fallthrough
CT: control target
= control target key end

     0   :  { %s278_s9 = smov 0   ;;  %s303_s0 = inlined_call_operand.vmem [shape: bf16[2,256], index: 0, kind: input, shape index: {}]   ;;  %s304_s1 = inlined_call_operand.vmem [shape: f32[1,256], index: 1, kind: input, shape index: {}]   ;;  %s305_s2 = inlined_call_operand.vmem [shape: bf16[2,256], index: 2, kind: output, shape index: {}]  }
   0x1 LB: > { %s237_s10 = sadd.s32 4294967295, %s261_s9   ;;  %p241_p0 = scmp.ge.s32.totalorder %s261_s9, 1  ;;  %s261_s9 = sphi %s278_s9, %s12_s9  }
   0x2   : > { %p118_p1 = scmp.lt.s32.totalorder %s261_s9, 3 }
   0x4   : > { %p119_p2 = pnand %p241_p0, %p118_p1 }
   0x5   : > { %p139_p3 = scmp.lt.s32.totalorder (!%p119_p2), %s237_s10, 1 }
   0x6   : > { %122 = sbr.rel (%p119_p2) target bundleno = 58 (0x3a), region = 28 }
   0xb   : > { %s307_s10 = smov (!%p139_p3, %s237_s10), 1  ;;  %vm150_vm0 = vcmask 1041408  }
   0xc   : > { %s141_s13 = scalar_lea.vmem %s303_s0, %s307_s10  ;;  %s144_s16 = scalar_lea.vmem %s304_s1, %s307_s10 }
   0xd   : > { %v148_v0 = vld [vmem:[%s141_s13] sm:$0x1]  ;;  %s147_s19 = scalar_lea.vmem %s305_s2, %s307_s10 }
   0xe   : > { %v149_v1 = vunpack.c.l.bf16 %v148_v0  ;;  %v242_v24 = vld [vmem:[%s144_s16] ss:$0 sm:$0xff] }
  0x10   : > { %v151_v2 = vsel %vm150_vm0, %v149_v1, 0.0  ;;  %v159_v3 = vmul.f32 %v149_v1, %v149_v1 }
  0x11   : > { %v152_v4 = vrot.slane %v151_v2, 4 }
  0x12   : > { %v160_v5 = vsel %vm150_vm0, %v159_v3, 0.0 }
  0x13   : > { %v153_v6 = vadd.f32 %v152_v4, %v151_v2  ;;  %v161_v7 = vrot.slane %v160_v5, 4 }
  0x15   : > { %v154_v8 = vrot.slane %v153_v6, 2  ;;  %v162_v9 = vadd.f32 %v161_v7, %v160_v5 }
  0x17   : > { %v155_v10 = vadd.f32 %v154_v8, %v153_v6  ;;  %v163_v11 = vrot.slane %v162_v9, 2 }
  0x19   : > { %v156_v12 = vrot.slane %v155_v10, 1  ;;  %v164_v13 = vadd.f32 %v163_v11, %v162_v9 }
  0x1b   : > { %v157_v14 = vadd.f32 %v156_v12, %v155_v10  ;;  %v165_v15 = vrot.slane %v164_v13, 1 }
  0x1d   : > { %v158_v16 = vmul.f32 0.5, %v157_v14  ;;  %v166_v17 = vadd.f32 %v165_v15, %v164_v13 }
  0x1f   : > { %v167_v18 = vmul.f32 0.5, %v166_v17  ;;  %v168_v19 = vmul.f32 %v158_v16, %v158_v16  ;;  %v170_v22 = vsub.f32 %v149_v1, %v158_v16 }
  0x21   : > { %v169_v20 = vsub.f32 %v167_v18, %v168_v19 }
  0x23   : > { %v171_v21 = vadd.f32 1e-05, %v169_v20 }
  0x25   : > { %253 = vrsqrt.f32 %v171_v21 }
  0x32   : > { %v254_v23 = vpop.eup %253 }
  0x33   : > { %v173_v25 = vmul.f32 %v254_v23, %v170_v22 }
  0x35   : > { %v181_v26 = vmul.f32 %v242_v24, %v173_v25 }
  0x37   : > { %v182_v27 = vpack.c.bf16 %v181_v26, %v181_v26 }
  0x39   : > { %183 = vst [vmem:[%s147_s19] sm:$0x1] %v182_v27 }
  0x3a PF: > { %s12_s9 = sadd.s32 1, %s261_s9  }
  0x3b   : > { %p9_p4 = scmp.ge.s32.totalorder %s12_s9, 4  }
  0x3d   :  { %11 = sbr.rel (!%p9_p4) target bundleno = 1 (0x1), region = 61 }

// kernel: blcd_forward.27
= control target key start
LH: loop header
LB: loop body
LE: loop exit
PB: predicated region body
PF: predicated region fallthrough
CT: control target
= control target key end

     0   :  { %s886_s9 = smov 0   ;;  %s888_s10 = smov 0   ;;  %s1070_s0 = inlined_call_operand.vmem [shape: bf16[8,8192], index: 0, kind: input, shape index: {}]   ;;  %s1071_s1 = inlined_call_operand.vmem [shape: bf16[8192,256], index: 1, kind: input, shape index: {}]   ;;  %s1072_s2 = inlined_call_operand.vmem [shape: bf16[8,256], index: 2, kind: output, shape index: {}]  }
   0x1   :  { %s890_s11 = smov 0   ;;  %s892_s12 = smov 0  }
   0x2   :  { %s894_s13 = smov 0   ;;  %s896_s14 = smov 0  }
   0x3   :  { %s898_s15 = smov 0  }
   0x4 LB: > { %s24_s16 = sadd.s32 1, %s860_s13  ;;  %s27_s17 = sadd.s32 1, %s864_s14  ;;  %s868_s15 = sphi %s898_s15, %s12_s15   ;;  %s864_s14 = sphi %s896_s14, %s1078_s14   ;;  %s860_s13 = sphi %s894_s13, %s1077_s13   ;;  %s856_s12 = sphi %s892_s12, %s1076_s12   ;;  %s852_s11 = sphi %s890_s11, %s1075_s11   ;;  %s848_s10 = sphi %s888_s10, %s1074_s10   ;;  %s844_s9 = sphi %s886_s9, %s1073_s9  }
   0x5   : > { %p25_p0 = scmp.ge.s32.totalorder %s24_s16, 32  ;;  %p75_p1 = scmp.ne.s32.totalorder %s848_s10, %s844_s9 }
   0x6   : > { %p76_p2 = scmp.eq.s32.totalorder %s868_s15, 0  ;;  %s68_s21 = sadd.s32 1, %s848_s10 }
   0x7   : > { %s1080_s16 = smov (%p25_p0, %s24_s16), 0  ;;  %s1082_s17 = smov (!%p25_p0, %s27_s17), %s864_s14 }
   0x8   : > { %p77_p3 = por %p76_p2, %p75_p1  ;;  %p29_p4 = scmp.ge.s32.totalorder %s1082_s17, 2 }
   0x9   : > { %s63_s18 = ssub.s32 %s860_s13, %s1080_s16  ;;  %p684_p6 = scmp.ge.s32.totalorder %s868_s15, 64 }
   0xa   : > { %s1084_s17 = smov (%p29_p4, %s1082_s17), 0 }
   0xb   : > { %s64_s19 = ssub.s32 %s864_s14, %s1084_s17  ;;  %129 = sbr.rel (%p684_p6) target bundleno = 43 (0x2b), region = 16 }
   0xc   : > { %s65_s20 = sor.u32 %s64_s19, %s63_s18 }
   0xd   : > { %p66_p5 = scmp.eq.s32.totalorder %s65_s20, 0 }
   0xf   : > { %s937_s22 = scalar_select %p66_p5, %s848_s10, %s68_s21  }
  0x10   : > { %145 = sbr.rel (!%p77_p3) target bundleno = 43 (0x2b), region = 24  ;;  %s147_s23 = sand.u32 (%p77_p3), 1, %s848_s10  }
  0x11   : > { %s716_s24 = sshll.u32 (%p77_p3), %s860_s13, 6  ;;  %s685_s25 = sshll.u32 (%p77_p3), %s147_s23, 7 }
  0x12   : > { %s152_s26 = sadd.s32 (%p77_p3), %s864_s14, %s716_s24  ;;  %s951_s3 = scalar_lea.vmem (%p77_p3), [#allocation3], %s685_s25 }
  0x13   : > { %s688_s27 = sshll.u32 (%p77_p3), %s152_s26, 2 }
  0x14   : > { %s946_s30 = scalar_lea.vmem (%p77_p3), %s1071_s1, %s688_s27 }
  0x15   : > { %v171_v0 = vld [vmem:[%s946_s30] sm:$0xf]  ;;  %v173_v1 = vld [vmem:[%s946_s30 + $0x8] sm:$0xf]  ;;  %v175_v2 = vld [vmem:[%s946_s30 + $0x10] sm:$0xf] }
  0x16   : > { %172 = vst [vmem:[%s951_s3] sm:$0xf] %v171_v0  ;;  %174 = vst [vmem:[%s951_s3 + $0x4] sm:$0xf] %v173_v1  ;;  %v177_v3 = vld [vmem:[%s946_s30 + $0x18] sm:$0xf] }
  0x17   : > { %176 = vst [vmem:[%s951_s3 + $0x8] sm:$0xf] %v175_v2  ;;  %v179_v4 = vld [vmem:[%s946_s30 + $0x20] sm:$0xf]  ;;  %v181_v5 = vld [vmem:[%s946_s30 + $0x28] sm:$0xf] }
  0x18   : > { %178 = vst [vmem:[%s951_s3 + $0xc] sm:$0xf] %v177_v3  ;;  %180 = vst [vmem:[%s951_s3 + $0x10] sm:$0xf] %v179_v4  ;;  %v183_v6 = vld [vmem:[%s946_s30 + $0x30] sm:$0xf] }
  0x19   : > { %182 = vst [vmem:[%s951_s3 + $0x14] sm:$0xf] %v181_v5  ;;  %v185_v7 = vld [vmem:[%s946_s30 + $0x38] sm:$0xf]  ;;  %v187_v8 = vld [vmem:[%s946_s30 + $0x40] sm:$0xf] }
  0x1a   : > { %184 = vst [vmem:[%s951_s3 + $0x18] sm:$0xf] %v183_v6  ;;  %186 = vst [vmem:[%s951_s3 + $0x1c] sm:$0xf] %v185_v7  ;;  %v189_v9 = vld [vmem:[%s946_s30 + $0x48] sm:$0xf] }
  0x1b   : > { %188 = vst [vmem:[%s951_s3 + $0x20] sm:$0xf] %v187_v8  ;;  %v191_v10 = vld [vmem:[%s946_s30 + $0x50] sm:$0xf]  ;;  %v193_v11 = vld [vmem:[%s946_s30 + $0x58] sm:$0xf] }
  0x1c   : > { %190 = vst [vmem:[%s951_s3 + $0x24] sm:$0xf] %v189_v9  ;;  %192 = vst [vmem:[%s951_s3 + $0x28] sm:$0xf] %v191_v10  ;;  %v195_v12 = vld [vmem:[%s946_s30 + $0x60] sm:$0xf] }
  0x1d   : > { %194 = vst [vmem:[%s951_s3 + $0x2c] sm:$0xf] %v193_v11  ;;  %v197_v13 = vld [vmem:[%s946_s30 + $0x68] sm:$0xf]  ;;  %v199_v14 = vld [vmem:[%s946_s30 + $0x70] sm:$0xf] }
  0x1e   : > { %196 = vst [vmem:[%s951_s3 + $0x30] sm:$0xf] %v195_v12  ;;  %198 = vst [vmem:[%s951_s3 + $0x34] sm:$0xf] %v197_v13  ;;  %v201_v15 = vld [vmem:[%s946_s30 + $0x78] sm:$0xf] }
  0x1f   : > { %200 = vst [vmem:[%s951_s3 + $0x38] sm:$0xf] %v199_v14  ;;  %v203_v16 = vld [vmem:[%s946_s30 + $0x80] sm:$0xf]  ;;  %v205_v17 = vld [vmem:[%s946_s30 + $0x88] sm:$0xf] }
  0x20   : > { %202 = vst [vmem:[%s951_s3 + $0x3c] sm:$0xf] %v201_v15  ;;  %204 = vst [vmem:[%s951_s3 + $0x40] sm:$0xf] %v203_v16  ;;  %v207_v18 = vld [vmem:[%s946_s30 + $0x90] sm:$0xf] }
  0x21   : > { %206 = vst [vmem:[%s951_s3 + $0x44] sm:$0xf] %v205_v17  ;;  %v209_v19 = vld [vmem:[%s946_s30 + $0x98] sm:$0xf]  ;;  %v211_v20 = vld [vmem:[%s946_s30 + $0xa0] sm:$0xf] }
  0x22   : > { %208 = vst [vmem:[%s951_s3 + $0x48] sm:$0xf] %v207_v18  ;;  %210 = vst [vmem:[%s951_s3 + $0x4c] sm:$0xf] %v209_v19  ;;  %v213_v21 = vld [vmem:[%s946_s30 + $0xa8] sm:$0xf] }
  0x23   : > { %212 = vst [vmem:[%s951_s3 + $0x50] sm:$0xf] %v211_v20  ;;  %v215_v22 = vld [vmem:[%s946_s30 + $0xb0] sm:$0xf]  ;;  %v217_v23 = vld [vmem:[%s946_s30 + $0xb8] sm:$0xf] }
  0x24   : > { %214 = vst [vmem:[%s951_s3 + $0x54] sm:$0xf] %v213_v21  ;;  %216 = vst [vmem:[%s951_s3 + $0x58] sm:$0xf] %v215_v22  ;;  %v219_v24 = vld [vmem:[%s946_s30 + $0xc0] sm:$0xf] }
  0x25   : > { %218 = vst [vmem:[%s951_s3 + $0x5c] sm:$0xf] %v217_v23  ;;  %v221_v25 = vld [vmem:[%s946_s30 + $0xc8] sm:$0xf]  ;;  %v223_v26 = vld [vmem:[%s946_s30 + $0xd0] sm:$0xf] }
  0x26   : > { %220 = vst [vmem:[%s951_s3 + $0x60] sm:$0xf] %v219_v24  ;;  %222 = vst [vmem:[%s951_s3 + $0x64] sm:$0xf] %v221_v25  ;;  %v225_v27 = vld [vmem:[%s946_s30 + $0xd8] sm:$0xf] }
  0x27   : > { %224 = vst [vmem:[%s951_s3 + $0x68] sm:$0xf] %v223_v26  ;;  %v227_v28 = vld [vmem:[%s946_s30 + $0xe0] sm:$0xf]  ;;  %v229_v29 = vld [vmem:[%s946_s30 + $0xe8] sm:$0xf] }
  0x28   : > { %226 = vst [vmem:[%s951_s3 + $0x6c] sm:$0xf] %v225_v27  ;;  %228 = vst [vmem:[%s951_s3 + $0x70] sm:$0xf] %v227_v28  ;;  %v231_v30 = vld [vmem:[%s946_s30 + $0xf0] sm:$0xf] }
  0x29   : > { %230 = vst [vmem:[%s951_s3 + $0x74] sm:$0xf] %v229_v29  ;;  %v233_v31 = vld [vmem:[%s946_s30 + $0xf8] sm:$0xf]  ;;  %232 = vst [vmem:[%s951_s3 + $0x78] sm:$0xf] %v231_v30 }
  0x2a   : > { %234 = vst [vmem:[%s951_s3 + $0x7c] sm:$0xf] %v233_v31 }
  0x2b PF: > { %p689_p7 = scmp.ge.s32.totalorder %s868_s15, 1  ;;  %p321_p8 = scmp.lt.s32.totalorder %s868_s15, 65 }
  0x2d   : > { %p322_p9 = pnand %p689_p7, %p321_p8 }
  0x2e   : > { %s328_s4 = sand.u32 (!%p322_p9), 1, %s844_s9   ;;  %s691_s5 = sshll.u32 (!%p322_p9), %s852_s11, 1 }
  0x2f   : > { %325 = sbr.rel (%p322_p9) target bundleno = 305 (0x131), region = 65  ;;  %s690_s6 = sshll.u32 (!%p322_p9), %s328_s4, 7 }
  0x30   : > { %p364_p10 = scmp.lt.s32.totalorder (!%p322_p9), %s691_s5, 63  ;;  %p374_p11 = scmp.lt.s32.totalorder (!%p322_p9), %s856_s12, 1 }
  0x31   : > { %s1028_s25 = scalar_lea.vmem (!%p322_p9), [#allocation3], %s690_s6  ;;  %p694_p12 = scmp.ne.s32.totalorder (!%p322_p9), %s852_s11, 0 }
  0x34   : > { %s1086_s5 = smov (!%p364_p10, %s691_s5), 63  ;;  %s1088_s12 = smov (!%p374_p11, %s856_s12), 1 }
  0x35   : > { %s692_s7 = sshll.u32 %s1086_s5, 2  ;;  %s693_s20 = sshll.u32 %s1088_s12, 2 }
  0x36   : > { %s369_s19 = scalar_lea.vmem %s1070_s0, %s692_s7  ;;  %s1026_s24 = scalar_lea.vmem %s1072_s2, %s693_s20 }
  0x37   : > { %384 = sbr.rel (%p694_p12) target bundleno = 62 (0x3e), region = 73 }
  0x3c   : > { %v870_v32 = vmov 0.0  }
  0x3d   : > { %385 = vst [vmem:[#allocation2] sm:$0xff] %v870_v32 }
  0x3e PF: > { %v796_v33 = vld [vmem:[%s1028_s25 + $0x78] sm:$0xff]   ;;  %v798_v35 = vld [vmem:[%s1028_s25 + $0x70] sm:$0xff]   ;;  %v800_v37 = vld [vmem:[%s1028_s25 + $0x68] sm:$0xff]   ;;  %p713_p13 = scmp.ne.s32.totalorder %s852_s11, 31 }
  0x3f   : > { %v797_v34 = vld [vmem:[%s1028_s25 + $0x38] sm:$0xff]   ;;  %717 = vmatprep.subr.bf16.mxu0 %v796_v33  ;;  %v799_v36 = vld [vmem:[%s1028_s25 + $0x30] sm:$0xff]   ;;  %v801_v38 = vld [vmem:[%s1028_s25 + $0x28] sm:$0xff]  }
  0x40   : > { %718 = vmatpush3.bf16.msra.mxu0 %v797_v34  ;;  %v802_v39 = vld [vmem:[%s1028_s25 + $0x60] sm:$0xff]   ;;  %v804_v41 = vld [vmem:[%s1028_s25 + $0x58] sm:$0xff]   ;;  %v806_v43 = vld [vmem:[%s1028_s25 + $0x50] sm:$0xff]  }
  0x41   : > { %719 = vmatprep.subr.bf16.mxu0 %v798_v35  ;;  %v803_v40 = vld [vmem:[%s1028_s25 + $0x20] sm:$0xff]   ;;  %v805_v42 = vld [vmem:[%s1028_s25 + $0x18] sm:$0xff]   ;;  %v807_v46 = vld [vmem:[%s1028_s25 + $0x10] sm:$0xff]  }
  0x42   : > { %v387_v44 = vld [vmem:[%s369_s19] sm:$0xff]  ;;  %v808_v47 = vld [vmem:[%s1028_s25 + $0x48] sm:$0xff]   ;;  %v810_v49 = vld [vmem:[%s1028_s25 + $0x40] sm:$0xff]  }
  0x43   : > { %v696_v45 = vcombine.high %v387_v44, %v387_v44  ;;  %v809_v48 = vld [vmem:[%s1028_s25 + $0x8] sm:$0xff]   ;;  %v811_v50 = vld [vmem:[%s1028_s25] sm:$0xff]   ;;  %v695_v51 = vcombine.low %v387_v44, %v387_v44 }
  0x44   : > { %720 = vmatpush3.bf16.msra.mxu0 %v799_v36  ;;  %v386_v53 = vld [vmem:[#allocation2] sm:$0xff] }
  0x45   : > { %721 = vmatprep.subr.bf16.mxu0 %v800_v37  ;;  %555 = vmatprep.mubr.bf16.mxu0 %v696_v45 }
  0x48   : > { %722 = vmatpush3.bf16.msra.mxu0 %v801_v38 }
  0x49   : > { %723 = vmatprep.subr.bf16.mxu0 %v802_v39 }
  0x4c   : > { %724 = vmatpush3.bf16.msra.mxu0 %v803_v40 }
  0x4d   : > { %725 = vmatprep.subr.bf16.mxu0 %v804_v41 }
  0x50   : > { %726 = vmatpush3.bf16.msra.mxu0 %v805_v42 }
  0x51   : > { %727 = vmatprep.subr.bf16.mxu0 %v806_v43 }
  0x54   : > { %728 = vmatpush3.bf16.msra.mxu0 %v807_v46 }
  0x55   : > { %729 = vmatprep.subr.bf16.mxu0 %v808_v47 }
  0x58   : > { %730 = vmatpush3.bf16.msra.mxu0 %v809_v48 }
  0x59   : > { %731 = vmatprep.subr.bf16.mxu0 %v810_v49 }
  0x5c   : > { %732 = vmatpush3.bf16.msra.mxu0 %v811_v50 }
  0x5f   : > { %556 = vmatmul.mubr.bf16.vlgmr.msra.gmra.mxu0 %v695_v51 }
 0x11f   : > { %v733_v52 = vpop.f32.mrf.mxu0 }
 0x121   : > { %v734_v54 = vpop.f32.mrf.mxu0 }
 0x122   : > { %v735_v55 = vadd.f32 %v734_v54, %v733_v52  ;;  %568 = sbr.rel (%p713_p13) target bundleno = 305 (0x131), region = 77 }
 0x123   : > { %v736_v56 = vpop.f32.mrf.mxu0 }
 0x124   : > { %v563_v57 = vadd.f32 %v735_v55, %v386_v53 }
 0x125   : > { %v737_v58 = vpop.f32.mrf.mxu0 }
 0x126   : > { %564 = vst [vmem:[#allocation2] sm:$0xff] %v563_v57 }
 0x12d   : > { %v569_v59 = vld [vmem:[#allocation2] sm:$0xff] }
 0x12e   : > { %v570_v60 = vpack.c.bf16 %v569_v59, %v569_v59 }
 0x130   : > { %571 = vst [vmem:[%s1026_s24] sm:$0xf] %v570_v60 }
 0x131 PF: > { %s12_s15 = sadd.s32 1, %s868_s15   ;;  %s1073_s9 = smov %s848_s10 }
 0x132   : > { %p9_p0 = scmp.ge.s32.totalorder %s12_s15, 66   ;;  %s1074_s10 = smov %s937_s22 }
 0x133   : > { %s1075_s11 = smov %s860_s13  ;;  %s1076_s12 = smov %s864_s14 }
 0x134   : > { %s1077_s13 = smov %s1080_s16  ;;  %s1078_s14 = smov %s1084_s17 }
 0x135   :  { %11 = sbr.rel (!%p9_p0) target bundleno = 4 (0x4), region = 115 }

// kernel: blcd_forward.29
= control target key start
LH: loop header
LB: loop body
LE: loop exit
PB: predicated region body
PF: predicated region fallthrough
CT: control target
= control target key end

     0   :  { %s352_s1 = inlined_call_operand.vmem [shape: bf16[256,128], index: 1, kind: input, shape index: {}]   ;;  %s353_s0 = inlined_call_operand.vmem [shape: bf16[8,256], index: 0, kind: input, shape index: {}]   ;;  %s354_s2 = inlined_call_operand.vmem [shape: f32[1,128], index: 2, kind: input, shape index: {}]   ;;  %s355_s3 = inlined_call_operand.vmem [shape: f32[8,128], index: 3, kind: output, shape index: {}]  }
   0x1   :  { %v257_v0 = vld [vmem:[%s352_s1 + $0x78] sm:$0xff]   ;;  %v259_v2 = vld [vmem:[%s352_s1 + $0x70] sm:$0xff]   ;;  %v261_v4 = vld [vmem:[%s352_s1 + $0x68] sm:$0xff]  }
   0x2   :  { %v258_v1 = vld [vmem:[%s352_s1 + $0x38] sm:$0xff]   ;;  %235 = vmatprep.subr.bf16.mxu0 %v257_v0  ;;  %v260_v3 = vld [vmem:[%s352_s1 + $0x30] sm:$0xff]   ;;  %v262_v5 = vld [vmem:[%s352_s1 + $0x28] sm:$0xff]  }
   0x3   :  { %236 = vmatpush3.bf16.msra.mxu0 %v258_v1  ;;  %v263_v6 = vld [vmem:[%s352_s1 + $0x60] sm:$0xff]   ;;  %v265_v8 = vld [vmem:[%s352_s1 + $0x58] sm:$0xff]   ;;  %v267_v10 = vld [vmem:[%s352_s1 + $0x50] sm:$0xff]  }
   0x4   :  { %237 = vmatprep.subr.bf16.mxu0 %v259_v2  ;;  %v264_v7 = vld [vmem:[%s352_s1 + $0x20] sm:$0xff]   ;;  %v266_v9 = vld [vmem:[%s352_s1 + $0x18] sm:$0xff]   ;;  %v268_v13 = vld [vmem:[%s352_s1 + $0x10] sm:$0xff]  }
   0x5   :  { %v21_v11 = vld [vmem:[%s353_s0] sm:$0xff]  ;;  %v269_v14 = vld [vmem:[%s352_s1 + $0x48] sm:$0xff]  }
   0x6   :  { %v217_v12 = vcombine.high %v21_v11, %v21_v11  ;;  %v270_v15 = vld [vmem:[%s352_s1 + $0x8] sm:$0xff]   ;;  %v271_v16 = vld [vmem:[%s352_s1 + $0x40] sm:$0xff]   ;;  %v216_v18 = vcombine.low %v21_v11, %v21_v11 }
   0x7   :  { %238 = vmatpush3.bf16.msra.mxu0 %v260_v3  ;;  %v272_v17 = vld [vmem:[%s352_s1] sm:$0xff]  }
   0x8   :  { %239 = vmatprep.subr.bf16.mxu0 %v261_v4  ;;  %189 = vmatprep.mubr.bf16.mxu0 %v217_v12  ;;  %v234_v21 = vld [vmem:[%s354_s2] ss:$0 sm:$0xff] }
   0xb   :  { %240 = vmatpush3.bf16.msra.mxu0 %v262_v5 }
   0xc   :  { %241 = vmatprep.subr.bf16.mxu0 %v263_v6 }
   0xf   :  { %242 = vmatpush3.bf16.msra.mxu0 %v264_v7 }
  0x10   :  { %243 = vmatprep.subr.bf16.mxu0 %v265_v8 }
  0x13   :  { %244 = vmatpush3.bf16.msra.mxu0 %v266_v9 }
  0x14   :  { %245 = vmatprep.subr.bf16.mxu0 %v267_v10 }
  0x17   :  { %246 = vmatpush3.bf16.msra.mxu0 %v268_v13 }
  0x18   :  { %247 = vmatprep.subr.bf16.mxu0 %v269_v14 }
  0x1b   :  { %248 = vmatpush3.bf16.msra.mxu0 %v270_v15 }
  0x1c   :  { %249 = vmatprep.subr.bf16.mxu0 %v271_v16 }
  0x1f   :  { %250 = vmatpush3.bf16.msra.mxu0 %v272_v17 }
  0x22   :  { %190 = vmatmul.mubr.bf16.vlgmr.msra.gmra.mxu0 %v216_v18 }
  0xe2   :  { %v251_v19 = vpop.f32.mrf.mxu0 }
  0xe4   :  { %v252_v20 = vpop.f32.mrf.mxu0 }
  0xe5   :  { %v253_v22 = vadd.f32 %v252_v20, %v251_v19 }
  0xe6   :  { %v254_v23 = vpop.f32.mrf.mxu0 }
  0xe7   :  { %v210_v24 = vadd.f32 %v253_v22, %v234_v21 }
  0xe8   :  { %v255_v25 = vpop.f32.mrf.mxu0 }
  0xe9   :  { %211 = vst [vmem:[%s355_s3] sm:$0xff] %v210_v24 }

</bundles_post_ra>
